<compile_context>
chip_gen: v7x
topology: tpu7x:2x2x1
jax: 0.10.0
libtpu: 0.0.40
codegen_flags: <defaults>
</compile_context>

<pallas_src>
import jax
import jax.numpy as jnp
from jax import lax
from jax.experimental import pallas as pl
from jax.experimental.pallas import tpu as pltpu


def common_block_kernel(x_ref, w1_ref, w2_ref, b1_ref, b2_ref, o_ref, xpad_ref):
    # x_ref   : (1, H, W, C)        input block (also the residual), f32, channels un-padded
    # w1/w2   : (3, 3*Cp, Cp)       per-dy stacked HWIO conv weights, bf16, BN scale folded
    # b1/b2   : (1, Cp)             folded BN bias, f32
    # o_ref   : (1, H, W, C)        output block, f32
    # xpad_ref: (H+3, Wp, Cp) bf16  halo scratch: rows 0 / H+1 / H+2, col 0 and cols
    #                               W+1..Wp-1 are zero; interior rows 1..H, cols 1..W data.
    H, W, C = o_ref.shape[1], o_ref.shape[2], o_ref.shape[3]
    Hp, Wp, Cp = xpad_ref.shape
    Lf = H * Wp                                   # flat (width-padded) output rows per conv

    # Zero the halo border each step (interior is fully overwritten below).  Kept
    # unconditional: a program_id == 0 guard is unsafe under megacore 'parallel' sharding.
    xpad_ref[0:1, :, :] = jnp.zeros((1, Wp, Cp), xpad_ref.dtype)
    xpad_ref[H + 1:Hp, :, :] = jnp.zeros((Hp - (H + 1), Wp, Cp), xpad_ref.dtype)
    xpad_ref[:, 0:1, :] = jnp.zeros((Hp, 1, Cp), xpad_ref.dtype)
    xpad_ref[:, W + 1:Wp, :] = jnp.zeros((Hp, Wp - (W + 1), Cp), xpad_ref.dtype)

    # Stage the input into the interior; the channel pad to Cp happens here (VMEM only).
    x_b = x_ref[0].astype(xpad_ref.dtype)                       # (H, W, C) bf16
    if Cp != C:
        x_b = jnp.concatenate(
            [x_b, jnp.zeros((H, W, Cp - C), xpad_ref.dtype)], axis=-1)
    xpad_ref[1:H + 1, 1:W + 1, :] = x_b                         # (H, W, Cp)

    def conv3x3(w_ref):
        # Per dy: flatten the contiguous halo rows (layout-free: Wp is a multiple of the
        # bf16 sublane tile), build the K=3*Cp LHS from three contiguous sublane-shifted
        # slices, and do one MXU matmul.  Columns W..Wp-1 of the flat result are garbage
        # from the width padding and are discarded by the callers.
        acc = None
        for dy in range(3):
            flat = xpad_ref[dy:dy + H + 1].reshape((H + 1) * Wp, Cp)
            lhs = jnp.concatenate(
                [flat[0:Lf], flat[1:Lf + 1], flat[2:Lf + 2]], axis=1)   # (Lf, 3*Cp) bf16
            part = jnp.dot(lhs, w_ref[dy], preferred_element_type=jnp.float32)
            acc = part if acc is None else acc + part       # init from first dot, chained
        return acc                                          # (Lf, Cp) f32

    # conv1 (bn1 scale folded into w1) + bias + ReLU, restaged into the same halo scratch
    # (border is still zero, so conv2's padding is correct).
    y1 = jnp.maximum(conv3x3(w1_ref) + b1_ref[0], 0.0)
    xpad_ref[1:H + 1, 1:W + 1, :] = (
        y1.reshape(H, Wp, Cp)[:, 0:W, :].astype(xpad_ref.dtype))

    # conv2 (bn2 scale folded into w2) + bias + residual add + ReLU.
    y2 = conv3x3(w2_ref) + b2_ref[0]
    res = x_ref[0].astype(jnp.float32)                      # residual read late (liveness)
    out = jnp.maximum(y2.reshape(H, Wp, Cp)[:, 0:W, 0:C] + res, 0.0)
    o_ref[0] = out.astype(o_ref.dtype)


def _single_buffered_spec(block_shape, index_map):
    # Grid-invariant operands (constant index_map) don't need double buffering; Buffered(1)
    # frees VMEM.  Fall back to default pipelining if this jax version lacks pipeline_mode.
    try:
        return pl.BlockSpec(block_shape, index_map, pipeline_mode=pl.Buffered(1))
    except (AttributeError, TypeError):
        return pl.BlockSpec(block_shape, index_map)


def common_block(x_nchw, w1_oihw, w2_oihw, bn1, bn2, eps=1e-5):
    """Forward of CommonBlock (stride=1, in_channel == out_channel), eval-mode BN."""
    g1, be1, m1, v1 = bn1
    g2, be2, m2, v2 = bn2
    s1 = g1 / jnp.sqrt(v1 + eps)
    b1 = be1 - m1 * s1
    s2 = g2 / jnp.sqrt(v2 + eps)
    b2 = be2 - m2 * s2

    N, C, H, W = x_nchw.shape
    assert w1_oihw.shape == (C, C, 3, 3) and w2_oihw.shape == (C, C, 3, 3), (
        "CommonBlock requires stride=1 and in_channels == out_channels")

    LANE = 128
    Cp = ((C + LANE - 1) // LANE) * LANE          # VMEM-only channel pad (lane-dense matmuls)
    pad_c = Cp - C
    SUB = 16                                      # bf16 sublane tile
    Wp = ((W + 2 + SUB - 1) // SUB) * SUB         # halo width padded so the dim-merge reshape
                                                  # of the bf16 scratch stays layout-free

    # NCHW -> NHWC at C channels: no channel padding in HBM.
    # TODO(synk): in a full network keep activations NHWC end-to-end so these transposes
    #             (full HBM passes) are not paid around every block.
    x = jnp.transpose(x_nchw, (0, 2, 3, 1))

    def prep_w(w_oihw, scale):
        # OIHW -> HWIO, fold BN scale into output channels, pad channels to Cp, then stack
        # the 3 dx taps of each dy into one (3*Cp, Cp) matmul operand, bf16.
        w = jnp.transpose(w_oihw, (2, 3, 1, 0)) * scale[None, None, None, :]
        if pad_c:
            w = jnp.pad(w, ((0, 0), (0, 0), (0, pad_c), (0, pad_c)))
        return w.reshape(3, 3 * Cp, Cp).astype(jnp.bfloat16)

    def prep_b(b):
        if pad_c:
            b = jnp.pad(b, (0, pad_c))
        return b.reshape(1, Cp).astype(jnp.float32)

    w1p, w2p = prep_w(w1_oihw, s1), prep_w(w2_oihw, s2)
    b1p, b2p = prep_b(b1), prep_b(b2)

    # VMEM budget: double-buffered activation blocks, single-buffered weights/biases, the
    # halo scratch, plus conservative headroom for in-kernel temporaries (flat rows, im2col
    # LHS, f32 accumulators).  Clamp at 48 MiB: headroom on v7x (64 MiB / TensorCore);
    # v5e / v6e have 128 MiB physical so this stays conservative there.
    act_blk = H * W * C * 4                       # f32 activation block (input / output)
    w_blk = 9 * Cp * Cp * 2                       # bf16 stacked weights per conv
    scratch_b = (H + 3) * Wp * Cp * 2             # bf16 halo scratch
    interm = 8 * H * Wp * Cp * 4                  # in-kernel temporaries (conservative)
    vmem_limit = 2 * 2 * act_blk + 2 * w_blk + scratch_b + interm + (4 << 20)
    vmem_limit = int(min(max(vmem_limit, 16 << 20), 48 << 20))

    out_nhwc = pl.pallas_call(
        common_block_kernel,
        out_shape=jax.ShapeDtypeStruct((N, H, W, C), x_nchw.dtype),
        grid_spec=pltpu.PrefetchScalarGridSpec(
            num_scalar_prefetch=0,
            grid=(N,),
            in_specs=[
                pl.BlockSpec((1, H, W, C), lambda n: (n, 0, 0, 0)),
                _single_buffered_spec((3, 3 * Cp, Cp), lambda n: (0, 0, 0)),
                _single_buffered_spec((3, 3 * Cp, Cp), lambda n: (0, 0, 0)),
                _single_buffered_spec((1, Cp), lambda n: (0, 0)),
                _single_buffered_spec((1, Cp), lambda n: (0, 0)),
            ],
            out_specs=pl.BlockSpec((1, H, W, C), lambda n: (n, 0, 0, 0)),
            scratch_shapes=[pltpu.VMEM((H + 3, Wp, Cp), jnp.bfloat16)],
        ),
        compiler_params=pltpu.CompilerParams(
            dimension_semantics=("parallel",),
            vmem_limit_bytes=vmem_limit),
    )(x, w1p, w2p, b1p, b2p)

    return jnp.transpose(out_nhwc, (0, 3, 1, 2))  # NHWC -> NCHW


def _reference(x_nchw, w1_oihw, w2_oihw, bn1, bn2, eps=1e-5):
    """Pure-JAX f32 reference (eval-mode BN) for validation."""
    g1, be1, m1, v1 = bn1
    g2, be2, m2, v2 = bn2

    def conv(x, w):  # NCHW x OIHW
        return lax.conv_general_dilated(
            x, w, window_strides=(1, 1), padding=((1, 1), (1, 1)),
            dimension_numbers=("NCHW", "OIHW", "NCHW"))

    def bn(x, g, b, m, v):
        return (x - m[None, :, None, None]) / jnp.sqrt(v + eps)[None, :, None, None] \
            * g[None, :, None, None] + b[None, :, None, None]

    y = jax.nn.relu(bn(conv(x_nchw, w1_oihw), g1, be1, m1, v1))
    y = bn(conv(y, w2_oihw), g2, be2, m2, v2)
    return jax.nn.relu(y + x_nchw)


if __name__ == "__main__":
    # CommonBlock with in_channel == out_channel == 4, stride == 1 (required for residual add).
    N, C, H, W = 2, 4, 16, 16
    key = jax.random.PRNGKey(0)
    kx, kw1, kw2, kb1, kb2 = jax.random.split(key, 5)

    x = jax.random.normal(kx, (N, C, H, W), jnp.float32)
    w1 = jax.random.normal(kw1, (C, C, 3, 3), jnp.float32) * 0.2   # conv1 weight (OIHW)
    w2 = jax.random.normal(kw2, (C, C, 3, 3), jnp.float32) * 0.2   # conv2 weight (OIHW)

    # Deterministic BN parameters (gamma, beta, running_mean, running_var).
    bn1 = (jnp.ones((C,)) * 1.1,
           jnp.linspace(-0.1, 0.1, C).astype(jnp.float32),
           jax.random.normal(kb1, (C,), jnp.float32) * 0.1,
           jnp.linspace(0.5, 1.5, C).astype(jnp.float32))
    bn2 = (jnp.ones((C,)) * 0.9,
           jnp.linspace(0.1, -0.1, C).astype(jnp.float32),
           jax.random.normal(kb2, (C,), jnp.float32) * 0.1,
           jnp.linspace(1.5, 0.5, C).astype(jnp.float32))

    out = jax.block_until_ready(common_block(x, w1, w2, bn1, bn2))
    ref = jax.block_until_ready(_reference(x, w1, w2, bn1, bn2))

    assert out.shape == (N, C, H, W)
    # bf16 matmul operands and bf16 intermediate staging (f32 accumulation) -> ~1e-2 relative
    # error vs the f32 reference; tolerance loosened accordingly.
    assert jnp.allclose(out, ref, atol=5e-2, rtol=5e-2), \
        f"max abs err = {jnp.max(jnp.abs(out - ref))}"
    print("KERNEL_OK")
</pallas_src>

<mosaic_0001>
module attributes {stable_mosaic.version = 11 : i64} {
  func.func @common_block_kernel(%arg0: i32, %arg1: memref<1x16x16x4xf32, #tpu.memory_space<vmem>>, %arg2: memref<3x384x128xbf16, #tpu.memory_space<vmem>>, %arg3: memref<3x384x128xbf16, #tpu.memory_space<vmem>>, %arg4: memref<1x128xf32, #tpu.memory_space<vmem>>, %arg5: memref<1x128xf32, #tpu.memory_space<vmem>>, %arg6: memref<1x16x16x4xf32, #tpu.memory_space<vmem>>, %arg7: memref<19x32x128xbf16, #tpu.memory_space<vmem>>) attributes {dimension_semantics = [#tpu.dimension_semantics<parallel>], iteration_bounds = array<i64: 2>, scalar_prefetch = 0 : i64, scratch_operands = 1 : i64, tpu.core_type = #tpu.core_type<tc>, window_params = [{transform_indices = @transform_0, window_bounds = array<i64: 1, 16, 16, 4>}, {pipeline_mode = #tpu.pipeline_mode<synchronous>, transform_indices = @transform_1, window_bounds = array<i64: 3, 384, 128>}, {pipeline_mode = #tpu.pipeline_mode<synchronous>, transform_indices = @transform_2, window_bounds = array<i64: 3, 384, 128>}, {pipeline_mode = #tpu.pipeline_mode<synchronous>, transform_indices = @transform_3, window_bounds = array<i64: 1, 128>}, {pipeline_mode = #tpu.pipeline_mode<synchronous>, transform_indices = @transform_4, window_bounds = array<i64: 1, 128>}, {transform_indices = @transform_5, window_bounds = array<i64: 1, 16, 16, 4>}]} {
    %cst = arith.constant 0.000000e+00 : bf16
    %0 = vector.broadcast %cst : bf16 to vector<1x32x128xbf16>
    %c0 = arith.constant 0 : index
    %c0_0 = arith.constant 0 : index
    %c0_1 = arith.constant 0 : index
    %1 = vector.load %arg7[%c0, %c0_0, %c0_1] : memref<19x32x128xbf16, #tpu.memory_space<vmem>>, vector<1x32x128xbf16>
    tpu.vector_store %arg7[%c0, %c0_0, %c0_1], %0 {strides = array<i32>} : memref<19x32x128xbf16, #tpu.memory_space<vmem>>, vector<1x32x128xbf16>,
    %cst_2 = arith.constant 0.000000e+00 : bf16
    %2 = vector.broadcast %cst_2 : bf16 to vector<2x32x128xbf16>
    %c17 = arith.constant 17 : index
    %c0_3 = arith.constant 0 : index
    %c0_4 = arith.constant 0 : index
    %3 = vector.load %arg7[%c17, %c0_3, %c0_4] : memref<19x32x128xbf16, #tpu.memory_space<vmem>>, vector<2x32x128xbf16>
    tpu.vector_store %arg7[%c17, %c0_3, %c0_4], %2 {strides = array<i32>} : memref<19x32x128xbf16, #tpu.memory_space<vmem>>, vector<2x32x128xbf16>,
    %cst_5 = arith.constant 0.000000e+00 : bf16
    %4 = vector.broadcast %cst_5 : bf16 to vector<19x1x128xbf16>
    %c0_6 = arith.constant 0 : index
    %c0_7 = arith.constant 0 : index
    %c0_8 = arith.constant 0 : index
    %5 = vector.load %arg7[%c0_6, %c0_7, %c0_8] : memref<19x32x128xbf16, #tpu.memory_space<vmem>>, vector<19x1x128xbf16>
    tpu.vector_store %arg7[%c0_6, %c0_7, %c0_8], %4 {strides = array<i32>} : memref<19x32x128xbf16, #tpu.memory_space<vmem>>, vector<19x1x128xbf16>,
    %cst_9 = arith.constant 0.000000e+00 : bf16
    %6 = vector.broadcast %cst_9 : bf16 to vector<19x15x128xbf16>
    %c0_10 = arith.constant 0 : index
    %c17_11 = arith.constant 17 : index
    %c0_12 = arith.constant 0 : index
    %7 = vector.load %arg7[%c0_10, %c17_11, %c0_12] : memref<19x32x128xbf16, #tpu.memory_space<vmem>>, vector<19x15x128xbf16>
    tpu.vector_store %arg7[%c0_10, %c17_11, %c0_12], %6 {strides = array<i32>} : memref<19x32x128xbf16, #tpu.memory_space<vmem>>, vector<19x15x128xbf16>,
    %c0_13 = arith.constant 0 : index
    %c0_14 = arith.constant 0 : index
    %c0_15 = arith.constant 0 : index
    %c0_16 = arith.constant 0 : index
    %8 = vector.load %arg1[%c0_13, %c0_14, %c0_15, %c0_16] : memref<1x16x16x4xf32, #tpu.memory_space<vmem>>, vector<1x16x16x4xf32>
    %9 = vector.shape_cast %8 : vector<1x16x16x4xf32> to vector<16x16x4xf32>
    %10 = arith.truncf %9 : vector<16x16x4xf32> to vector<16x16x4xbf16>
    %cst_17 = arith.constant 0.000000e+00 : bf16
    %11 = vector.broadcast %cst_17 : bf16 to vector<16x16x124xbf16>
    %12 = tpu.concatenate %10, %11 in 2 : vector<16x16x4xbf16>, vector<16x16x124xbf16> -> vector<16x16x128xbf16>
    %c1 = arith.constant 1 : index
    %c1_18 = arith.constant 1 : index
    %c0_19 = arith.constant 0 : index
    %13 = vector.load %arg7[%c1, %c1_18, %c0_19] : memref<19x32x128xbf16, #tpu.memory_space<vmem>>, vector<16x16x128xbf16>
    tpu.vector_store %arg7[%c1, %c1_18, %c0_19], %12 {strides = array<i32>} : memref<19x32x128xbf16, #tpu.memory_space<vmem>>, vector<16x16x128xbf16>,
    %c0_20 = arith.constant 0 : index
    %c0_21 = arith.constant 0 : index
    %c0_22 = arith.constant 0 : index
    %14 = vector.load %arg7[%c0_20, %c0_21, %c0_22] : memref<19x32x128xbf16, #tpu.memory_space<vmem>>, vector<17x32x128xbf16>
    %15 = vector.shape_cast %14 : vector<17x32x128xbf16> to vector<544x128xbf16>
    %16 = vector.extract_strided_slice %15 {offsets = [0, 0], sizes = [512, 128], strides = [1, 1]} : vector<544x128xbf16> to vector<512x128xbf16>
    %17 = vector.extract_strided_slice %15 {offsets = [1, 0], sizes = [512, 128], strides = [1, 1]} : vector<544x128xbf16> to vector<512x128xbf16>
    %18 = vector.extract_strided_slice %15 {offsets = [2, 0], sizes = [512, 128], strides = [1, 1]} : vector<544x128xbf16> to vector<512x128xbf16>
    %19 = tpu.concatenate %16, %17, %18 in 1 : vector<512x128xbf16>, vector<512x128xbf16>, vector<512x128xbf16> -> vector<512x384xbf16>
    %c0_23 = arith.constant 0 : index
    %c0_24 = arith.constant 0 : index
    %c0_25 = arith.constant 0 : index
    %20 = vector.load %arg2[%c0_23, %c0_24, %c0_25] : memref<3x384x128xbf16, #tpu.memory_space<vmem>>, vector<1x384x128xbf16>
    %21 = vector.shape_cast %20 : vector<1x384x128xbf16> to vector<384x128xbf16>
    %cst_26 = arith.constant dense<0.000000e+00> : vector<512x128xf32>
    %22 = tpu.matmul %19, %21, %cst_26 {dimension_numbers = #tpu.dot_dimension_numbers<[1], [0], [0], [1], [0, 0, 1, 1], [], []>} : vector<512x384xbf16>, vector<384x128xbf16>, vector<512x128xf32> -> vector<512x128xf32>
    %c1_27 = arith.constant 1 : index
    %c0_28 = arith.constant 0 : index
    %c0_29 = arith.constant 0 : index
    %23 = vector.load %arg7[%c1_27, %c0_28, %c0_29] : memref<19x32x128xbf16, #tpu.memory_space<vmem>>, vector<17x32x128xbf16>
    %24 = vector.shape_cast %23 : vector<17x32x128xbf16> to vector<544x128xbf16>
    %25 = vector.extract_strided_slice %24 {offsets = [0, 0], sizes = [512, 128], strides = [1, 1]} : vector<544x128xbf16> to vector<512x128xbf16>
    %26 = vector.extract_strided_slice %24 {offsets = [1, 0], sizes = [512, 128], strides = [1, 1]} : vector<544x128xbf16> to vector<512x128xbf16>
    %27 = vector.extract_strided_slice %24 {offsets = [2, 0], sizes = [512, 128], strides = [1, 1]} : vector<544x128xbf16> to vector<512x128xbf16>
    %28 = tpu.concatenate %25, %26, %27 in 1 : vector<512x128xbf16>, vector<512x128xbf16>, vector<512x128xbf16> -> vector<512x384xbf16>
    %c1_30 = arith.constant 1 : index
    %c0_31 = arith.constant 0 : index
    %c0_32 = arith.constant 0 : index
    %29 = vector.load %arg2[%c1_30, %c0_31, %c0_32] : memref<3x384x128xbf16, #tpu.memory_space<vmem>>, vector<1x384x128xbf16>
    %30 = vector.shape_cast %29 : vector<1x384x128xbf16> to vector<384x128xbf16>
    %cst_33 = arith.constant dense<0.000000e+00> : vector<512x128xf32>
    %31 = tpu.matmul %28, %30, %cst_33 {dimension_numbers = #tpu.dot_dimension_numbers<[1], [0], [0], [1], [0, 0, 1, 1], [], []>} : vector<512x384xbf16>, vector<384x128xbf16>, vector<512x128xf32> -> vector<512x128xf32>
    %32 = arith.addf %22, %31 : vector<512x128xf32>
    %c2 = arith.constant 2 : index
    %c0_34 = arith.constant 0 : index
    %c0_35 = arith.constant 0 : index
    %33 = vector.load %arg7[%c2, %c0_34, %c0_35] : memref<19x32x128xbf16, #tpu.memory_space<vmem>>, vector<17x32x128xbf16>
    %34 = vector.shape_cast %33 : vector<17x32x128xbf16> to vector<544x128xbf16>
    %35 = vector.extract_strided_slice %34 {offsets = [0, 0], sizes = [512, 128], strides = [1, 1]} : vector<544x128xbf16> to vector<512x128xbf16>
    %36 = vector.extract_strided_slice %34 {offsets = [1, 0], sizes = [512, 128], strides = [1, 1]} : vector<544x128xbf16> to vector<512x128xbf16>
    %37 = vector.extract_strided_slice %34 {offsets = [2, 0], sizes = [512, 128], strides = [1, 1]} : vector<544x128xbf16> to vector<512x128xbf16>
    %38 = tpu.concatenate %35, %36, %37 in 1 : vector<512x128xbf16>, vector<512x128xbf16>, vector<512x128xbf16> -> vector<512x384xbf16>
    %c2_36 = arith.constant 2 : index
    %c0_37 = arith.constant 0 : index
    %c0_38 = arith.constant 0 : index
    %39 = vector.load %arg2[%c2_36, %c0_37, %c0_38] : memref<3x384x128xbf16, #tpu.memory_space<vmem>>, vector<1x384x128xbf16>
    %40 = vector.shape_cast %39 : vector<1x384x128xbf16> to vector<384x128xbf16>
    %cst_39 = arith.constant dense<0.000000e+00> : vector<512x128xf32>
    %41 = tpu.matmul %38, %40, %cst_39 {dimension_numbers = #tpu.dot_dimension_numbers<[1], [0], [0], [1], [0, 0, 1, 1], [], []>} : vector<512x384xbf16>, vector<384x128xbf16>, vector<512x128xf32> -> vector<512x128xf32>
    %42 = arith.addf %32, %41 : vector<512x128xf32>
    %c0_40 = arith.constant 0 : index
    %c0_41 = arith.constant 0 : index
    %43 = vector.load %arg4[%c0_40, %c0_41] : memref<1x128xf32, #tpu.memory_space<vmem>>, vector<1x128xf32>
    %44 = vector.shape_cast %43 : vector<1x128xf32> to vector<128xf32>
    %45 = vector.shape_cast %44 : vector<128xf32> to vector<1x128xf32>
    %46 = vector.broadcast %45 : vector<1x128xf32> to vector<512x128xf32>
    %47 = arith.addf %42, %46 : vector<512x128xf32>
    %cst_42 = arith.constant 0.000000e+00 : f32
    %48 = vector.broadcast %cst_42 : f32 to vector<512x128xf32>
    %49 = arith.maximumf %47, %48 : vector<512x128xf32>
    %50 = vector.shape_cast %49 : vector<512x128xf32> to vector<16x32x128xf32>
    %51 = vector.extract_strided_slice %50 {offsets = [0, 0, 0], sizes = [16, 16, 128], strides = [1, 1, 1]} : vector<16x32x128xf32> to vector<16x16x128xf32>
    %52 = arith.truncf %51 : vector<16x16x128xf32> to vector<16x16x128xbf16>
    %c1_43 = arith.constant 1 : index
    %c1_44 = arith.constant 1 : index
    %c0_45 = arith.constant 0 : index
    %53 = vector.load %arg7[%c1_43, %c1_44, %c0_45] : memref<19x32x128xbf16, #tpu.memory_space<vmem>>, vector<16x16x128xbf16>
    tpu.vector_store %arg7[%c1_43, %c1_44, %c0_45], %52 {strides = array<i32>} : memref<19x32x128xbf16, #tpu.memory_space<vmem>>, vector<16x16x128xbf16>,
    %c0_46 = arith.constant 0 : index
    %c0_47 = arith.constant 0 : index
    %c0_48 = arith.constant 0 : index
    %54 = vector.load %arg7[%c0_46, %c0_47, %c0_48] : memref<19x32x128xbf16, #tpu.memory_space<vmem>>, vector<17x32x128xbf16>
    %55 = vector.shape_cast %54 : vector<17x32x128xbf16> to vector<544x128xbf16>
    %56 = vector.extract_strided_slice %55 {offsets = [0, 0], sizes = [512, 128], strides = [1, 1]} : vector<544x128xbf16> to vector<512x128xbf16>
    %57 = vector.extract_strided_slice %55 {offsets = [1, 0], sizes = [512, 128], strides = [1, 1]} : vector<544x128xbf16> to vector<512x128xbf16>
    %58 = vector.extract_strided_slice %55 {offsets = [2, 0], sizes = [512, 128], strides = [1, 1]} : vector<544x128xbf16> to vector<512x128xbf16>
    %59 = tpu.concatenate %56, %57, %58 in 1 : vector<512x128xbf16>, vector<512x128xbf16>, vector<512x128xbf16> -> vector<512x384xbf16>
    %c0_49 = arith.constant 0 : index
    %c0_50 = arith.constant 0 : index
    %c0_51 = arith.constant 0 : index
    %60 = vector.load %arg3[%c0_49, %c0_50, %c0_51] : memref<3x384x128xbf16, #tpu.memory_space<vmem>>, vector<1x384x128xbf16>
    %61 = vector.shape_cast %60 : vector<1x384x128xbf16> to vector<384x128xbf16>
    %cst_52 = arith.constant dense<0.000000e+00> : vector<512x128xf32>
    %62 = tpu.matmul %59, %61, %cst_52 {dimension_numbers = #tpu.dot_dimension_numbers<[1], [0], [0], [1], [0, 0, 1, 1], [], []>} : vector<512x384xbf16>, vector<384x128xbf16>, vector<512x128xf32> -> vector<512x128xf32>
    %c1_53 = arith.constant 1 : index
    %c0_54 = arith.constant 0 : index
    %c0_55 = arith.constant 0 : index
    %63 = vector.load %arg7[%c1_53, %c0_54, %c0_55] : memref<19x32x128xbf16, #tpu.memory_space<vmem>>, vector<17x32x128xbf16>
    %64 = vector.shape_cast %63 : vector<17x32x128xbf16> to vector<544x128xbf16>
    %65 = vector.extract_strided_slice %64 {offsets = [0, 0], sizes = [512, 128], strides = [1, 1]} : vector<544x128xbf16> to vector<512x128xbf16>
    %66 = vector.extract_strided_slice %64 {offsets = [1, 0], sizes = [512, 128], strides = [1, 1]} : vector<544x128xbf16> to vector<512x128xbf16>
    %67 = vector.extract_strided_slice %64 {offsets = [2, 0], sizes = [512, 128], strides = [1, 1]} : vector<544x128xbf16> to vector<512x128xbf16>
    %68 = tpu.concatenate %65, %66, %67 in 1 : vector<512x128xbf16>, vector<512x128xbf16>, vector<512x128xbf16> -> vector<512x384xbf16>
    %c1_56 = arith.constant 1 : index
    %c0_57 = arith.constant 0 : index
    %c0_58 = arith.constant 0 : index
    %69 = vector.load %arg3[%c1_56, %c0_57, %c0_58] : memref<3x384x128xbf16, #tpu.memory_space<vmem>>, vector<1x384x128xbf16>
    %70 = vector.shape_cast %69 : vector<1x384x128xbf16> to vector<384x128xbf16>
    %cst_59 = arith.constant dense<0.000000e+00> : vector<512x128xf32>
    %71 = tpu.matmul %68, %70, %cst_59 {dimension_numbers = #tpu.dot_dimension_numbers<[1], [0], [0], [1], [0, 0, 1, 1], [], []>} : vector<512x384xbf16>, vector<384x128xbf16>, vector<512x128xf32> -> vector<512x128xf32>
    %72 = arith.addf %62, %71 : vector<512x128xf32>
    %c2_60 = arith.constant 2 : index
    %c0_61 = arith.constant 0 : index
    %c0_62 = arith.constant 0 : index
    %73 = vector.load %arg7[%c2_60, %c0_61, %c0_62] : memref<19x32x128xbf16, #tpu.memory_space<vmem>>, vector<17x32x128xbf16>
    %74 = vector.shape_cast %73 : vector<17x32x128xbf16> to vector<544x128xbf16>
    %75 = vector.extract_strided_slice %74 {offsets = [0, 0], sizes = [512, 128], strides = [1, 1]} : vector<544x128xbf16> to vector<512x128xbf16>
    %76 = vector.extract_strided_slice %74 {offsets = [1, 0], sizes = [512, 128], strides = [1, 1]} : vector<544x128xbf16> to vector<512x128xbf16>
    %77 = vector.extract_strided_slice %74 {offsets = [2, 0], sizes = [512, 128], strides = [1, 1]} : vector<544x128xbf16> to vector<512x128xbf16>
    %78 = tpu.concatenate %75, %76, %77 in 1 : vector<512x128xbf16>, vector<512x128xbf16>, vector<512x128xbf16> -> vector<512x384xbf16>
    %c2_63 = arith.constant 2 : index
    %c0_64 = arith.constant 0 : index
    %c0_65 = arith.constant 0 : index
    %79 = vector.load %arg3[%c2_63, %c0_64, %c0_65] : memref<3x384x128xbf16, #tpu.memory_space<vmem>>, vector<1x384x128xbf16>
    %80 = vector.shape_cast %79 : vector<1x384x128xbf16> to vector<384x128xbf16>
    %cst_66 = arith.constant dense<0.000000e+00> : vector<512x128xf32>
    %81 = tpu.matmul %78, %80, %cst_66 {dimension_numbers = #tpu.dot_dimension_numbers<[1], [0], [0], [1], [0, 0, 1, 1], [], []>} : vector<512x384xbf16>, vector<384x128xbf16>, vector<512x128xf32> -> vector<512x128xf32>
    %82 = arith.addf %72, %81 : vector<512x128xf32>
    %c0_67 = arith.constant 0 : index
    %c0_68 = arith.constant 0 : index
    %83 = vector.load %arg5[%c0_67, %c0_68] : memref<1x128xf32, #tpu.memory_space<vmem>>, vector<1x128xf32>
    %84 = vector.shape_cast %83 : vector<1x128xf32> to vector<128xf32>
    %85 = vector.shape_cast %84 : vector<128xf32> to vector<1x128xf32>
    %86 = vector.broadcast %85 : vector<1x128xf32> to vector<512x128xf32>
    %87 = arith.addf %82, %86 : vector<512x128xf32>
    %c0_69 = arith.constant 0 : index
    %c0_70 = arith.constant 0 : index
    %c0_71 = arith.constant 0 : index
    %c0_72 = arith.constant 0 : index
    %88 = vector.load %arg1[%c0_69, %c0_70, %c0_71, %c0_72] : memref<1x16x16x4xf32, #tpu.memory_space<vmem>>, vector<1x16x16x4xf32>
    %89 = vector.shape_cast %88 : vector<1x16x16x4xf32> to vector<16x16x4xf32>
    %90 = vector.shape_cast %87 : vector<512x128xf32> to vector<16x32x128xf32>
    %91 = vector.extract_strided_slice %90 {offsets = [0, 0, 0], sizes = [16, 16, 4], strides = [1, 1, 1]} : vector<16x32x128xf32> to vector<16x16x4xf32>
    %92 = arith.addf %91, %89 : vector<16x16x4xf32>
    %cst_73 = arith.constant 0.000000e+00 : f32
    %93 = vector.broadcast %cst_73 : f32 to vector<16x16x4xf32>
    %94 = arith.maximumf %92, %93 : vector<16x16x4xf32>
    %c0_74 = arith.constant 0 : index
    %c0_75 = arith.constant 0 : index
    %c0_76 = arith.constant 0 : index
    %c0_77 = arith.constant 0 : index
    %95 = vector.load %arg6[%c0_74, %c0_75, %c0_76, %c0_77] : memref<1x16x16x4xf32, #tpu.memory_space<vmem>>, vector<1x16x16x4xf32>
    %96 = vector.shape_cast %95 : vector<1x16x16x4xf32> to vector<16x16x4xf32>
    %97 = vector.shape_cast %94 : vector<16x16x4xf32> to vector<1x16x16x4xf32>
    tpu.vector_store %arg6[%c0_74, %c0_75, %c0_76, %c0_77], %97 {strides = array<i32>} : memref<1x16x16x4xf32, #tpu.memory_space<vmem>>, vector<1x16x16x4xf32>,
    return
  }
  func.func @transform_0(%arg0: i32) -> (i32, i32, i32, i32) {
    %c0_i32 = arith.constant 0 : i32
    %c0_i32_0 = arith.constant 0 : i32
    %c0_i32_1 = arith.constant 0 : i32
    %c0_i32_2 = arith.constant 0 : i32
    return %arg0, %c0_i32, %c0_i32_0, %c0_i32_1 : i32, i32, i32, i32
  }
  func.func @transform_1(%arg0: i32) -> (i32, i32, i32) {
    %c0_i32 = arith.constant 0 : i32
    %c0_i32_0 = arith.constant 0 : i32
    %c0_i32_1 = arith.constant 0 : i32
    %c0_i32_2 = arith.constant 0 : i32
    return %c0_i32, %c0_i32_0, %c0_i32_1 : i32, i32, i32
  }
  func.func @transform_2(%arg0: i32) -> (i32, i32, i32) {
    %c0_i32 = arith.constant 0 : i32
    %c0_i32_0 = arith.constant 0 : i32
    %c0_i32_1 = arith.constant 0 : i32
    %c0_i32_2 = arith.constant 0 : i32
    return %c0_i32, %c0_i32_0, %c0_i32_1 : i32, i32, i32
  }
  func.func @transform_3(%arg0: i32) -> (i32, i32) {
    %c0_i32 = arith.constant 0 : i32
    %c0_i32_0 = arith.constant 0 : i32
    %c0_i32_1 = arith.constant 0 : i32
    return %c0_i32, %c0_i32_0 : i32, i32
  }
  func.func @transform_4(%arg0: i32) -> (i32, i32) {
    %c0_i32 = arith.constant 0 : i32
    %c0_i32_0 = arith.constant 0 : i32
    %c0_i32_1 = arith.constant 0 : i32
    return %c0_i32, %c0_i32_0 : i32, i32
  }
  func.func @transform_5(%arg0: i32) -> (i32, i32, i32, i32) {
    %c0_i32 = arith.constant 0 : i32
    %c0_i32_0 = arith.constant 0 : i32
    %c0_i32_1 = arith.constant 0 : i32
    %c0_i32_2 = arith.constant 0 : i32
    return %arg0, %c0_i32, %c0_i32_0, %c0_i32_1 : i32, i32, i32, i32
  }
}

</mosaic_0001>

<bundles_post_ra>
// kernel: tpu_custom_call.1
= control target key start
LH: loop header
LB: loop body
LE: loop exit
PB: predicated region body
PF: predicated region fallthrough
CT: control target
= control target key end

     0   :  { %10 = vsyncpa [#allocation4], 0  ;;  %s9521_s18 = smov 0   ;;  %s12786_s0 = inlined_call_operand.vmem [shape: f32[2,16,16,4], index: 0, kind: input, shape index: {}]   ;;  %s12787_s1 = inlined_call_operand.vmem [shape: bf16[3,384,128], index: 1, kind: input, shape index: {}]   ;;  %s12788_s2 = inlined_call_operand.hbm [shape: bf16[3,384,128], index: 2, kind: input, shape index: {}]   ;;  %s12789_s3 = inlined_call_operand.vmem [shape: f32[1,128], index: 3, kind: input, shape index: {}]   ;;  %s12790_s4 = inlined_call_operand.vmem [shape: f32[1,128], index: 4, kind: input, shape index: {}]   ;;  %s12791_s5 = inlined_call_operand.vmem [shape: f32[2,16,16,4], index: 5, kind: output, shape index: {}]  }
   0x1 LB: > { %s9527_s19 = sadd.s32 4294967295, %s9485_s18   ;;  %p8275_p0 = scmp.ge.s32.totalorder %s9485_s18, 1  ;;  %s9485_s18 = sphi %s9521_s18, %s16_s18  }
   0x2   : > { %p157_p1 = scmp.lt.s32.totalorder %s9485_s18, 3  ;;  %s9487_s20 = smov [#allocation3]  }
   0x3   : > { %s172_s21 = sshll.u32 %s9487_s20, 4  ;;  %p12792_p3 = scmp.eq.s32.totalorder %s9527_s19, 0  ;;  %s173_s21 = int_to_ptr.vmem [resolvable:$true] %s172_s21 }
   0x4   : > { %p9531_p2 = pnand %p8275_p0, %p157_p1  ;;  %s9447_s26 = scalar_lea.hbm %s12788_s2, 9216 }
   0x5   : > { %p9448_p6 = scmp.ne.s32.totalorder %s12788_s2, %s9447_s26  ;;  %p9454_p10 = scmp.lt.u32.totalorder %s9447_s26, %s12788_s2 }
   0x6   : > { %s12802_s22 = scalar_select %p9531_p2, 1, 0 }
   0x7   : > { %p9254_p4 = pneg %p9531_p2 }
   0x9   : > { %p9540_p5 = pnand %p12792_p3, %p9254_p4 }
   0xb   : > { %p9449_p7 = pneg %p9540_p5 }
   0xd   : > { %p9450_p8 = pnand %p9449_p7, %p9448_p6 }
   0xf   : > { %p9451_p9 = pneg %p9450_p8 }
  0x11   : > { %p9456_p11 = pnand %p9454_p10, %p9451_p9 }
  0x13   : > { %9459 = shalt.err (!%p9456_p11)
}
  0x14   : > { %s9460_s6 = scalar_lea.vmem %s173_s21, 9216  ;;  %p9468_p1 = scmp.lt.s32.totalorder %s173_s21, %s173_s21 }
  0x15   : > { %p9461_p12 = scmp.ne.s32.totalorder %s173_s21, %s9460_s6  ;;  %p9469_p4 = scmp.lt.s32.totalorder %s9460_s6, %s9460_s6 }
  0x17   : > { %p9463_p13 = pnand %p9461_p12, %p9449_p7  ;;  %p9470_p3 = por %p9469_p4, %p9468_p1 }
  0x19   : > { %p9464_p0 = pneg %p9463_p13 }
  0x1b   : > { %p9471_p2 = pnand %p9470_p3, %p9464_p0 }
  0x1d   : > { %9474 = shalt.err (!%p9471_p2)
}
  0x1e   : > { %s9488_s7 = smov 64   ;;  %s9489_s8 = smov 4  }
  0x1f   : > { %9257 = dma.hbm_to_vmem [thread:$0]  (!%p9540_p5), %s12788_s2, 9216, %s173_s21, [#allocation4], %s9488_s7, %s9488_s7, %s9489_s8  }
  0x20   : > { %p12804_p6 = scmp.ne.s32.totalorder %s12802_s22, 0 }
  0x22   : > { %202 = sbr.rel (%p12804_p6) target bundleno = 1586 (0x632), region = 40 }
  0x29   : > { %p12805_p8 = scmp.eq.s32.totalorder %s9527_s19, 0 }
  0x2b   : > { %9480 = dma.done.wait (%p12805_p8), [#allocation4], 9216   ;;  %p12806_p7 = pmov %p12805_p8 }
  0x2c   : > { %vm308_vm0 = vcmask 1047552   ;;  %vm309_vm1 = vsmask.f32 7938  ;;  %v12807_v0 = vmov 0  ;;  %v9490_v1 = vmov 0   ;;  %v9272_v2 = vld [vmem:[%s12787_s1 + $0xc0] sm:$0xff]  }
  0x2d   : > { %9482 = vsyncadd (%p12806_p7), [#allocation4], 4294958080  ;;  %241 = vst [vmem:[#allocation2] sm:$0xff] %v9490_v1  ;;  %1828 = vmatprep.subr.bf16.mxu0 %v9490_v1  ;;  %v9273_v3 = vld [vmem:[%s12787_s1 + $0x140] sm:$0xff]   ;;  %v9274_v4 = vld [vmem:[%s12787_s1 + $0xc8] sm:$0xff]   ;;  %p230_p2 = scmp.lt.s32.totalorder %s9527_s19, 1 }
  0x2e   : > { %vm9566_vm2 = vmand %vm308_vm0, %vm309_vm1  ;;  %244 = vst [vmem:[#allocation2 + $0x110] sm:$0xff] %v9490_v1  ;;  %1829 = vmatpush1.bf16.msra.mxu0 %v9272_v2  ;;  %8770 = vmatprep.subr.bf16.mxu1 %v9273_v3  ;;  %v9275_v5 = vld [vmem:[%s12787_s1 + $0x148] sm:$0xff]   ;;  %v9277_v6 = vld [vmem:[%s12787_s1 + $0x150] sm:$0xff]   ;;  %vm249_vm3 = vsmask.f32 256  ;;  %vm248_vm4 = vcmask 1040384  }
  0x2f   : > { %v12808_v0 = vsel %vm9566_vm2, 4294967295, %v12807_v0  ;;  %246 = vst [vmem:[#allocation2 + $0x120] sm:$0xff] %v9490_v1  ;;  %1830 = vmatprep.subr.bf16.mxu0 %v9490_v1  ;;  %8771 = vmatpush3.bf16.msra.mxu1 %v9273_v3  ;;  %v9276_v7 = vld [vmem:[%s12787_s1 + $0xd0] sm:$0xff]   ;;  %s12856_s19 = smov (!%p230_p2, %s9527_s19), 1  ;;  %v9279_v8 = vld [vmem:[%s12787_s1 + $0x158] sm:$0xff]   ;;  %vm9606_vm5 = vmand %vm248_vm4, %vm249_vm3  ;;  %v12810_v10 = vmov 0 }
  0x30   : > { %12809 = vst [vmem:[#allocation6_spill] sm:$0xff] %v12808_v0  ;;  %8772 = vmatprep.subr.bf16.mxu1 %v9275_v5  ;;  %v9278_v9 = vld [vmem:[%s12787_s1 + $0xd8] sm:$0xff]   ;;  %s8528_s29 = sshll.u32 %s12856_s19, 8  ;;  %v12811_v10 = vsel %vm9606_vm5, 4294967295, %v12810_v10  ;;  %v9281_v11 = vld [vmem:[%s12787_s1 + $0x160] sm:$0xff]   ;;  %v9282_v13 = vld [vmem:[%s12787_s1 + $0xe8] sm:$0xff]  }
  0x31   : > { %12812 = vst [vmem:[#allocation7_spill] sm:$0xff] %v12811_v10  ;;  %s9618_s9 = scalar_lea.vmem %s12786_s0, %s8528_s29  ;;  %v9280_v12 = vld [vmem:[%s12787_s1 + $0xe0] sm:$0xff]   ;;  %v254_v14 = vld [vmem:[#allocation2 + $0x10] sm:$0x1]  ;;  %v314_v15 = vld [vmem:[#allocation2 + $0x18] sm:$0xff]  ;;  %vm416_vm6 = vcmask 31744   ;;  %s12603_s20 = scalar_lea.vmem %s12791_s5, %s8528_s29 }
  0x32   : > { %1831 = vmatpush1.bf16.msra.mxu0 %v9274_v4  ;;  %v368_v16 = vld [vmem:[%s9618_s9] sm:$0xff]  ;;  %v9283_v17 = vld [vmem:[%s12787_s1 + $0x168] sm:$0xff]   ;;  %v255_v18 = vsel %vm9606_vm5, 0, %v254_v14  ;;  %v315_v19 = vsel %vm9566_vm2, 0, %v314_v15  ;;  %v370_v23 = vld [vmem:[%s9618_s9 + $0x10] sm:$0xff]  ;;  %vm1034_vm8 = vcmask 1046528  }
  0x33   : > { %1832 = vmatprep.subr.bf16.mxu0 %v9490_v1  ;;  %8773 = vmatpush3.bf16.msra.mxu1 %v9275_v5  ;;  %v369_v20 = vld [vmem:[%s9618_s9 + $0x8] sm:$0xff]  ;;  %256 = vst [vmem:[#allocation2 + $0x10] sm:$0x1] %v255_v18  ;;  %316 = vst [vmem:[#allocation2 + $0x18] sm:$0xff] %v315_v19  ;;  %v257_v22 = vld [vmem:[#allocation2 + $0x20] sm:$0x1] }
  0x34   : > { %8774 = vmatprep.subr.bf16.mxu1 %v9277_v6  ;;  %v400_v21 = vpack.c.bf16 %v369_v20, %v368_v16  ;;  %v258_v24 = vsel %vm9606_vm5, 0, %v257_v22  ;;  %v371_v25 = vld [vmem:[%s9618_s9 + $0x18] sm:$0xff]  ;;  %v9284_v26 = vld [vmem:[%s12787_s1 + $0xf0] sm:$0xff]   ;;  %v317_v29 = vld [vmem:[#allocation2 + $0x28] sm:$0xff]  ;;  %vm708_vm7 = vsmask.f32 7424 }
  0x35   : > { %259 = vst [vmem:[#allocation2 + $0x20] sm:$0x1] %v258_v24  ;;  %v401_v28 = vpack.c.bf16 %v371_v25, %v370_v23  ;;  %v9285_v30 = vld [vmem:[%s12787_s1 + $0x170] sm:$0xff]   ;;  %v318_v33 = vsel %vm9566_vm2, 0, %v317_v29  ;;  %v372_v36 = vld [vmem:[%s9618_s9 + $0x20] sm:$0xff]  ;;  %v373_v37 = vld [vmem:[%s9618_s9 + $0x28] sm:$0xff] }
  0x36   : > { %1833 = vmatpush1.bf16.msra.mxu0 %v9276_v7  ;;  %v419_v27 = vsel %vm416_vm6, %v400_v21, 0  ;;  %319 = vst [vmem:[#allocation2 + $0x28] sm:$0xff] %v318_v33  ;;  %v260_v35 = vld [vmem:[#allocation2 + $0x30] sm:$0x1]  ;;  %v9286_v42 = vld [vmem:[%s12787_s1 + $0xf8] sm:$0xff]   ;;  %v402_v43 = vpack.c.bf16 %v373_v37, %v372_v36  ;;  %v323_v5 = vld [vmem:[#allocation2 + $0x48] sm:$0xff] }
  0x37   : > { %1834 = vmatprep.subr.bf16.mxu0 %v9490_v1  ;;  %8775 = vmatpush3.bf16.msra.mxu1 %v9277_v6  ;;  %v450_v31 = vshrl.u32 %v419_v27, 16  ;;  %v453_v32 = vshll.u32 %v419_v27, 16  ;;  %v421_v34 = vsel %vm416_vm6, %v401_v28, 0  ;;  %v261_v41 = vsel %vm9606_vm5, 0, %v260_v35  ;;  %v320_v44 = vld [vmem:[#allocation2 + $0x38] sm:$0xff]  ;;  %v374_v53 = vld [vmem:[%s9618_s9 + $0x30] sm:$0xff] }
  0x38   : > { %8776 = vmatprep.subr.bf16.mxu1 %v9279_v8  ;;  %v456_v39 = vshrl.u32 %v421_v34, 16  ;;  %v459_v40 = vshll.u32 %v421_v34, 16  ;;  %262 = vst [vmem:[#allocation2 + $0x30] sm:$0x1] %v261_v41  ;;  %v9287_v45 = vld [vmem:[%s12787_s1 + $0x178] sm:$0xff]   ;;  %v321_v50 = vsel %vm9566_vm2, 0, %v320_v44 }
  0x39   : > { %v452_v38 = vrot.slane %v450_v31, 7  ;;  %v423_v52 = vsel %vm416_vm6, %v402_v43, 0  ;;  %322 = vst [vmem:[#allocation2 + $0x38] sm:$0xff] %v321_v50  ;;  %v263_v59 = vld [vmem:[#allocation2 + $0x40] sm:$0x1]  ;;  %v375_v60 = vld [vmem:[%s9618_s9 + $0x38] sm:$0xff] }
  0x3a   : > { %1835 = vmatpush1.bf16.msra.mxu0 %v9278_v9  ;;  %v579_v47 = vld [vmem:[#allocation2 + $0x10] sm:$0xff]  ;;  %v582_v48 = vld [vmem:[#allocation2 + $0x18] sm:$0x1]  ;;  %v458_v49 = vrot.slane %v456_v39, 7  ;;  %v462_v57 = vshrl.u32 %v423_v52, 16  ;;  %v465_v58 = vshll.u32 %v423_v52, 16  ;;  %v403_v62 = vpack.c.bf16 %v375_v60, %v374_v53 }
  0x3b   : > { %1836 = vmatprep.subr.bf16.mxu0 %v9490_v1  ;;  %8777 = vmatpush3.bf16.msra.mxu1 %v9279_v8  ;;  %v455_v46 = vor.u32 %v453_v32, %v452_v38  ;;  %v583_v51 = vsel %vm9606_vm5, %v452_v38, %v582_v48  ;;  %v264_v61 = vsel %vm9606_vm5, 0, %v263_v59  ;;  %v9288_v7 = vld [vmem:[%s12787_s1 + $0x100] sm:$0xff]   ;;  %v266_v18 = vld [vmem:[#allocation2 + $0x50] sm:$0x1]  ;;  %v377_v19 = vld [vmem:[%s9618_s9 + $0x48] sm:$0xff] }
  0x3c   : > { %8778 = vmatprep.subr.bf16.mxu1 %v9281_v11  ;;  %584 = vst [vmem:[#allocation2 + $0x18] sm:$0x1] %v583_v51  ;;  %v461_v55 = vor.u32 %v459_v40, %v458_v49  ;;  %v585_v56 = vld [vmem:[#allocation2 + $0x20] sm:$0xff]  ;;  %v464_v4 = vrot.slane %v462_v57, 7  ;;  %265 = vst [vmem:[#allocation2 + $0x40] sm:$0x1] %v264_v61 }
  0x3d   : > { %v9671_v54 = vsel %vm9566_vm2, %v455_v46, %v579_v47  ;;  %v588_v3 = vld [vmem:[#allocation2 + $0x28] sm:$0x1]  ;;  %v267_v24 = vsel %vm9606_vm5, 0, %v266_v18  ;;  %v9295_v33 = vld [vmem:[%s12787_s1] sm:$0xff]   ;;  %v326_v39 = vld [vmem:[#allocation2 + $0x58] sm:$0xff] }
  0x3e   : > { %1837 = vmatpush1.bf16.msra.mxu0 %v9280_v12  ;;  %581 = vst [vmem:[#allocation2 + $0x10] sm:$0xff] %v9671_v54  ;;  %v1538_v63 = vrot.slane %v9671_v54, 1  ;;  %v9680_v2 = vsel %vm9566_vm2, %v461_v55, %v585_v56  ;;  %v1214_v6 = vshrl.u32 %v9671_v54, 16  ;;  %v589_v9 = vsel %vm9606_vm5, %v458_v49, %v588_v3  ;;  %v9289_v27 = vld [vmem:[%s12787_s1 + $0x108] sm:$0xff]   ;;  %268 = vst [vmem:[#allocation2 + $0x50] sm:$0x1] %v267_v24 }
  0x3f   : > { %1838 = vmatprep.subr.bf16.mxu0 %v9490_v1  ;;  %8779 = vmatpush3.bf16.msra.mxu1 %v9281_v11  ;;  %587 = vst [vmem:[#allocation2 + $0x20] sm:$0xff] %v9680_v2  ;;  %v1541_v8 = vrot.slane %v9680_v2, 1  ;;  %v425_v11 = vsel %vm416_vm6, %v403_v62, 0  ;;  %v324_v12 = vsel %vm9566_vm2, 0, %v323_v5  ;;  %590 = vst [vmem:[#allocation2 + $0x28] sm:$0x1] %v589_v9 }
  0x40   : > { %8780 = vmatprep.subr.bf16.mxu1 %v9283_v17  ;;  %v591_v14 = vld [vmem:[#allocation2 + $0x30] sm:$0xff]  ;;  %v468_v15 = vshrl.u32 %v425_v11, 16  ;;  %v471_v16 = vshll.u32 %v425_v11, 16  ;;  %325 = vst [vmem:[#allocation2 + $0x48] sm:$0xff] %v324_v12  ;;  %v1216_v20 = vshll.u32 %v9671_v54, 16  ;;  %v327_v49 = vsel %vm9566_vm2, 0, %v326_v39 }
  0x41   : > { %v594_v22 = vld [vmem:[#allocation2 + $0x38] sm:$0x1]  ;;  %v269_v44 = vld [vmem:[#allocation2 + $0x60] sm:$0x1]  ;;  %v9290_v46 = vld [vmem:[%s12787_s1 + $0x110] sm:$0xff]   ;;  %328 = vst [vmem:[#allocation2 + $0x58] sm:$0xff] %v327_v49 }
  0x42   : > { %1839 = vmatpush1.bf16.msra.mxu0 %v9282_v13  ;;  %v467_v13 = vor.u32 %v465_v58, %v464_v4  ;;  %v470_v23 = vrot.slane %v468_v15, 7  ;;  %v595_v28 = vsel %vm9606_vm5, %v464_v4, %v594_v22  ;;  %v1218_v29 = vrot.slane %v1216_v20, 1  ;;  %v378_v55 = vld [vmem:[%s9618_s9 + $0x50] sm:$0xff]  ;;  %v379_v56 = vld [vmem:[%s9618_s9 + $0x58] sm:$0xff]  ;;  %v9298_v61 = vld [vmem:[%s12787_s1 + $0x8] sm:$0xff]  }
  0x43   : > { %1840 = vmatprep.subr.bf16.mxu0 %v9490_v1  ;;  %8781 = vmatpush3.bf16.msra.mxu1 %v9283_v17  ;;  %v376_v17 = vld [vmem:[%s9618_s9 + $0x40] sm:$0xff]  ;;  %596 = vst [vmem:[#allocation2 + $0x38] sm:$0x1] %v595_v28  ;;  %v270_v53 = vsel %vm9606_vm5, 0, %v269_v44  ;;  %v9291_v58 = vld [vmem:[%s12787_s1 + $0x118] sm:$0xff]   ;;  %v405_v60 = vpack.c.bf16 %v379_v56, %v378_v55  ;;  %v329_v62 = vld [vmem:[#allocation2 + $0x68] sm:$0xff] }
  0x44   : > { %8782 = vmatprep.subr.bf16.mxu1 %v9285_v30  ;;  %v9699_v21 = vsel %vm9566_vm2, %v467_v13, %v591_v14  ;;  %v404_v25 = vpack.c.bf16 %v377_v19, %v376_v17  ;;  %v473_v31 = vor.u32 %v471_v16, %v470_v23  ;;  %v597_v35 = vld [vmem:[#allocation2 + $0x40] sm:$0xff]  ;;  %v1219_v38 = vor.u32 %v1218_v29, %v1214_v6  ;;  %v272_v5 = vld [vmem:[#allocation2 + $0x70] sm:$0x1]  ;;  %v332_v19 = vld [vmem:[#allocation2 + $0x78] sm:$0xff] }
  0x45   : > { %593 = vst [vmem:[#allocation2 + $0x30] sm:$0xff] %v9699_v21  ;;  %v1545_v57 = vrot.slane %v9699_v21, 1  ;;  %271 = vst [vmem:[#allocation2 + $0x60] sm:$0x1] %v270_v53  ;;  %v603_v3 = vld [vmem:[#allocation2 + $0x50] sm:$0xff]  ;;  %v330_v4 = vsel %vm9566_vm2, 0, %v329_v62 }
  0x46   : > { %1841 = vmatpush1.bf16.msra.mxu0 %v9284_v26  ;;  %v9704_v26 = vld [vmem:[#allocation2 + $0x18] sm:$0xff]  ;;  %v427_v32 = vsel %vm416_vm6, %v404_v25, 0  ;;  %v380_v6 = vld [vmem:[%s9618_s9 + $0x60] sm:$0xff]  ;;  %v429_v11 = vsel %vm416_vm6, %v405_v60, 0  ;;  %331 = vst [vmem:[#allocation2 + $0x68] sm:$0xff] %v330_v4  ;;  %v273_v16 = vsel %vm9606_vm5, 0, %v272_v5 }
  0x47   : > { %1842 = vmatprep.subr.bf16.mxu0 %v9490_v1  ;;  %8783 = vmatpush3.bf16.msra.mxu1 %v9285_v30  ;;  %v1539_v30 = vrot.slane %v9704_v26, 1  ;;  %v1221_v34 = vshll.u32 %v9704_v26, 16  ;;  %v474_v36 = vshrl.u32 %v427_v32, 16  ;;  %v477_v37 = vshll.u32 %v427_v32, 16  ;;  %v600_v47 = vld [vmem:[#allocation2 + $0x48] sm:$0x1] }
  0x48   : > { %8784 = vmatprep.subr.bf16.mxu1 %v9287_v45  ;;  %v601_v51 = vsel %vm9606_vm5, %v470_v23, %v600_v47  ;;  %v480_v13 = vshrl.u32 %v429_v11, 16  ;;  %v483_v14 = vshll.u32 %v429_v11, 16  ;;  %v9299_v18 = vld [vmem:[%s12787_s1 + $0x10] sm:$0xff]   ;;  %v275_v20 = vld [vmem:[#allocation2 + $0x80] sm:$0x1]  ;;  %v383_v25 = vld [vmem:[%s9618_s9 + $0x78] sm:$0xff] }
  0x49   : > { %v1540_v40 = vsel %vm1034_vm8, %v1538_v63, %v1539_v30  ;;  %v1542_v41 = vsel %vm1034_vm8, %v1539_v30, %v1541_v8  ;;  %v9727_v43 = vrot.slane %v1221_v34, 1  ;;  %v9735_v48 = vrot.slane %v474_v36, 7  ;;  %602 = vst [vmem:[#allocation2 + $0x48] sm:$0x1] %v601_v51  ;;  %274 = vst [vmem:[#allocation2 + $0x70] sm:$0x1] %v273_v16 }
  0x4a   : > { %1843 = vmatpush1.bf16.msra.mxu0 %v9286_v42  ;;  %v9725_v42 = vsel %vm9566_vm2, %v473_v31, %v597_v35  ;;  %8786 = vmatprep.mubr.bf16.mxu1 %v1540_v40  ;;  %v482_v23 = vrot.slane %v480_v13, 7  ;;  %v382_v24 = vld [vmem:[%s9618_s9 + $0x70] sm:$0xff]  ;;  %v606_v28 = vld [vmem:[#allocation2 + $0x58] sm:$0x1]  ;;  %v333_v30 = vsel %vm9566_vm2, 0, %v332_v19  ;;  %v276_v31 = vsel %vm9606_vm5, 0, %v275_v20 }
  0x4b   : > { %1844 = vmatprep.subr.bf16.mxu0 %v9490_v1  ;;  %8785 = vmatpush3.bf16.msra.mxu1 %v9287_v45  ;;  %v9729_v45 = vld [vmem:[#allocation2 + $0x28] sm:$0xff]  ;;  %599 = vst [vmem:[#allocation2 + $0x40] sm:$0xff] %v9725_v42  ;;  %v1224_v52 = vsel %vm708_vm7, %v1219_v38, %v9727_v43  ;;  %v479_v59 = vor.u32 %v477_v37, %v9735_v48  ;;  %334 = vst [vmem:[#allocation2 + $0x78] sm:$0xff] %v333_v30  ;;  %v1549_v39 = vrot.slane %v9725_v42, 1  ;;  %v9300_v44 = vld [vmem:[%s12787_s1 + $0x18] sm:$0xff]  }
  0x4c   : > { %2486 = vmatprep.subr.bf16.mxu1 %v9490_v1  ;;  %v1543_v50 = vrot.slane %v9729_v45, 1  ;;  %1860 = vmatprep.mubr.bf16.mxu0 %v1224_v52  ;;  %v407_v32 = vpack.c.bf16 %v383_v25, %v382_v24  ;;  %v607_v34 = vsel %vm9606_vm5, %v9735_v48, %v606_v28  ;;  %v485_v35 = vor.u32 %v483_v14, %v482_v23  ;;  %v609_v36 = vld [vmem:[#allocation2 + $0x60] sm:$0xff]  ;;  %v385_v53 = vld [vmem:[%s9618_s9 + $0x88] sm:$0xff]  ;;  %v338_v13 = vld [vmem:[#allocation2 + $0x98] sm:$0xff] }
  0x4d   : > { %v9768_v9 = vsel %vm9566_vm2, %v479_v59, %v603_v3  ;;  %277 = vst [vmem:[#allocation2 + $0x80] sm:$0x1] %v276_v31  ;;  %608 = vst [vmem:[#allocation2 + $0x58] sm:$0x1] %v607_v34  ;;  %v384_v47 = vld [vmem:[%s9618_s9 + $0x80] sm:$0xff]  ;;  %v9293_v55 = vld [vmem:[%s12787_s1 + $0x128] sm:$0xff]  }
  0x4e   : > { %1845 = vmatpush1.bf16.msra.mxu0 %v9288_v7  ;;  %8787 = vmatmul.mubr.bf16.vlgmr.msra.gmra.mrb[0].mxu1 %v1542_v41  ;;  %v1544_v63 = vsel %vm1034_vm8, %v1541_v8, %v1543_v50  ;;  %v9764_v7 = vld [vmem:[#allocation2 + $0x38] sm:$0xff]  ;;  %v381_v8 = vld [vmem:[%s9618_s9 + $0x68] sm:$0xff]  ;;  %605 = vst [vmem:[#allocation2 + $0x50] sm:$0xff] %v9768_v9  ;;  %v1546_v15 = vsel %vm1034_vm8, %v1543_v50, %v1545_v57  ;;  %v433_v41 = vsel %vm416_vm6, %v407_v32, 0  ;;  %v9301_v4 = vld [vmem:[%s12787_s1 + $0x20] sm:$0xff]   ;;  %v1225_v11 = vshrl.u32 %v9704_v26, 16 }
  0x4f   : > { %1846 = vmatprep.subr.bf16.mxu0 %v9490_v1  ;;  %2487 = vmatpush1.bf16.msra.mxu1 %v9295_v33  ;;  %v1547_v12 = vrot.slane %v9764_v7, 1  ;;  %v406_v17 = vpack.c.bf16 %v381_v8, %v380_v6  ;;  %v9808_v48 = vsel %vm9566_vm2, %v485_v35, %v609_v36  ;;  %v612_v49 = vld [vmem:[#allocation2 + $0x68] sm:$0x1]  ;;  %v492_v51 = vshrl.u32 %v433_v41, 16  ;;  %v9294_v6 = vld [vmem:[%s12787_s1 + $0x130] sm:$0xff]  }
  0x50   : > { %2488 = vmatprep.subr.bf16.mxu1 %v9490_v1  ;;  %8790 = vmatprep.mubr.bf16.mxu1 %v1544_v63  ;;  %v9794_v33 = vld [vmem:[#allocation2 + $0x48] sm:$0xff]  ;;  %v495_v52 = vshll.u32 %v433_v41, 16  ;;  %611 = vst [vmem:[#allocation2 + $0x60] sm:$0xff] %v9808_v48  ;;  %v613_v56 = vsel %vm9606_vm5, %v482_v23, %v612_v49  ;;  %v408_v3 = vpack.c.bf16 %v385_v53, %v384_v47  ;;  %v281_v14 = vld [vmem:[#allocation2 + $0xa0] sm:$0x1]  ;;  %v386_v19 = vld [vmem:[%s9618_s9 + $0x90] sm:$0xff] }
  0x51   : > { %v1548_v22 = vsel %vm1034_vm8, %v1545_v57, %v1547_v12  ;;  %v431_v29 = vsel %vm416_vm6, %v406_v17, 0  ;;  %v1551_v40 = vrot.slane %v9794_v33, 1  ;;  %v278_v57 = vld [vmem:[#allocation2 + $0x90] sm:$0x1]  ;;  %614 = vst [vmem:[#allocation2 + $0x68] sm:$0x1] %v613_v56  ;;  %v1550_v60 = vsel %vm1034_vm8, %v1547_v12, %v1549_v39 }
  0x52   : > { %1847 = vmatpush1.bf16.msra.mxu0 %v9289_v27  ;;  %v9292_v27 = vld [vmem:[%s12787_s1 + $0x120] sm:$0xff]   ;;  %v486_v37 = vshrl.u32 %v431_v29, 16  ;;  %v489_v38 = vshll.u32 %v431_v29, 16  ;;  %v9819_v59 = vrot.slane %v492_v51, 7  ;;  %v279_v63 = vsel %vm9606_vm5, 0, %v278_v57  ;;  %v9303_v30 = vld [vmem:[%s12787_s1 + $0x28] sm:$0xff]  }
  0x53   : > { %1848 = vmatprep.subr.bf16.mxu0 %v9490_v1  ;;  %2489 = vmatpush1.bf16.msra.mxu1 %v9298_v61  ;;  %v615_v61 = vld [vmem:[#allocation2 + $0x70] sm:$0xff]  ;;  %v1552_v5 = vsel %vm1034_vm8, %v1549_v39, %v1551_v40  ;;  %280 = vst [vmem:[#allocation2 + $0x90] sm:$0x1] %v279_v63  ;;  %v618_v16 = vld [vmem:[#allocation2 + $0x78] sm:$0x1]  ;;  %v1553_v28 = vrot.slane %v9768_v9, 1  ;;  %v1227_v39 = vor.u32 %v1225_v11, %v9727_v43 }
  0x54   : > { %2490 = vmatprep.subr.bf16.mxu1 %v9490_v1  ;;  %v488_v50 = vrot.slane %v486_v37, 7  ;;  %v497_v12 = vor.u32 %v495_v52, %v9819_v59  ;;  %v621_v17 = vld [vmem:[#allocation2 + $0x80] sm:$0xff]  ;;  %v9847_v20 = vld [vmem:[#allocation2 + $0x58] sm:$0xff]  ;;  %v339_v32 = vsel %vm9566_vm2, 0, %v338_v13  ;;  %v282_v34 = vsel %vm9606_vm5, 0, %v281_v14  ;;  %v341_v35 = vld [vmem:[#allocation2 + $0xa8] sm:$0xff] }
  0x55   : > { %v1555_v29 = vrot.slane %v9847_v20, 1  ;;  %v284_v36 = vld [vmem:[#allocation2 + $0xb0] sm:$0x1]  ;;  %v9296_v37 = vld [vmem:[%s12787_s1 + $0x138] sm:$0xff]   ;;  %340 = vst [vmem:[#allocation2 + $0x98] sm:$0xff] %v339_v32  ;;  %v1554_v51 = vsel %vm1034_vm8, %v1551_v40, %v1553_v28  ;;  %v1557_v11 = vrot.slane %v9808_v48, 1 }
  0x56   : > { %1849 = vmatpush1.bf16.msra.mxu0 %v9290_v46  ;;  %8791 = vmatmul.mubr.bf16.gmra.mrb[4].mxu1 %v1546_v15  ;;  %v335_v46 = vld [vmem:[#allocation2 + $0x88] sm:$0xff]  ;;  %v1229_v15 = vshll.u32 %v9680_v2, 16  ;;  %v9853_v23 = vsel %vm9566_vm2, %v497_v12, %v621_v17  ;;  %283 = vst [vmem:[#allocation2 + $0xa0] sm:$0x1] %v282_v34  ;;  %v285_v56 = vsel %vm9606_vm5, 0, %v284_v36 }
  0x57   : > { %1850 = vmatprep.subr.bf16.mxu0 %v9490_v1  ;;  %8794 = vmatprep.mubr.bf16.mxu1 %v1548_v22  ;;  %v336_v62 = vsel %vm9566_vm2, 0, %v335_v46  ;;  %v619_v22 = vsel %vm9606_vm5, %v488_v50, %v618_v16  ;;  %623 = vst [vmem:[#allocation2 + $0x80] sm:$0xff] %v9853_v23  ;;  %v388_v46 = vld [vmem:[%s9618_s9 + $0xa0] sm:$0xff]  ;;  %v1556_v57 = vsel %vm1034_vm8, %v1553_v28, %v1555_v29  ;;  %286 = vst [vmem:[#allocation2 + $0xb0] sm:$0x1] %v285_v56  ;;  %v9302_v12 = vld [vmem:[%s12787_s1 + $0x88] sm:$0xff]  }
  0x58   : > { %2491 = vmatpush1.bf16.msra.mxu1 %v9299_v18  ;;  %337 = vst [vmem:[#allocation2 + $0x88] sm:$0xff] %v336_v62  ;;  %v435_v18 = vsel %vm416_vm6, %v408_v3, 0  ;;  %620 = vst [vmem:[#allocation2 + $0x78] sm:$0x1] %v619_v22  ;;  %v9876_v41 = vrot.slane %v1229_v15, 1  ;;  %v9880_v47 = vld [vmem:[#allocation2 + $0x68] sm:$0xff] }
  0x59   : > { %2492 = vmatprep.subr.bf16.mxu1 %v9490_v1  ;;  %v498_v24 = vshrl.u32 %v435_v18, 16  ;;  %v501_v25 = vshll.u32 %v435_v18, 16  ;;  %v287_v62 = vld [vmem:[#allocation2 + $0xc0] sm:$0x1]  ;;  %v1237_v3 = vshll.u32 %v9729_v45, 16  ;;  %v1559_v16 = vrot.slane %v9880_v47, 1 }
  0x5a   : > { %1851 = vmatpush1.bf16.msra.mxu0 %v9291_v58  ;;  %v491_v58 = vor.u32 %v489_v38, %v488_v50  ;;  %v9297_v38 = vld [vmem:[%s12787_s1 + $0x80] sm:$0xff]   ;;  %v389_v50 = vld [vmem:[%s9618_s9 + $0xa8] sm:$0xff]  ;;  %v627_v53 = vld [vmem:[#allocation2 + $0x90] sm:$0xff]  ;;  %v1232_v63 = vsel %vm708_vm7, %v1227_v39, %v9876_v41  ;;  %v288_v18 = vsel %vm9606_vm5, 0, %v287_v62  ;;  %v1245_v62 = vshll.u32 %v9699_v21, 16 }
  0x5b   : > { %1852 = vmatprep.subr.bf16.mxu0 %v9490_v1  ;;  %v9862_v31 = vrot.slane %v498_v24, 7  ;;  %v410_v14 = vpack.c.bf16 %v389_v50, %v388_v46  ;;  %289 = vst [vmem:[#allocation2 + $0xc0] sm:$0x1] %v288_v18  ;;  %v1239_v28 = vrot.slane %v1237_v3, 1  ;;  %v347_v34 = vld [vmem:[#allocation2 + $0xc8] sm:$0xff] }
  0x5c   : > { %2493 = vmatpush1.bf16.msra.mxu1 %v9300_v44  ;;  %v9838_v8 = vsel %vm9566_vm2, %v491_v58, %v615_v61  ;;  %v344_v61 = vld [vmem:[#allocation2 + $0xb8] sm:$0xff]  ;;  %v393_v36 = vld [vmem:[%s9618_s9 + $0xc8] sm:$0xff] }
  0x5d   : > { %2494 = vmatprep.subr.bf16.mxu1 %v9490_v1  ;;  %617 = vst [vmem:[#allocation2 + $0x70] sm:$0xff] %v9838_v8  ;;  %v503_v49 = vor.u32 %v501_v25, %v9862_v31  ;;  %v345_v15 = vsel %vm9566_vm2, 0, %v344_v61  ;;  %v630_v22 = vld [vmem:[#allocation2 + $0x98] sm:$0x1]  ;;  %v633_v24 = vld [vmem:[#allocation2 + $0xa0] sm:$0xff]  ;;  %v439_v25 = vsel %vm416_vm6, %v410_v14, 0 }
  0x5e   : > { %1853 = vmatpush1.bf16.msra.mxu0 %v9292_v27  ;;  %8795 = vmatmul.mubr.bf16.gmra.mrb[8].mxu1 %v1550_v60  ;;  %v387_v27 = vld [vmem:[%s9618_s9 + $0x98] sm:$0xff]  ;;  %v9304_v60 = vld [vmem:[%s12787_s1 + $0x30] sm:$0xff]   ;;  %346 = vst [vmem:[#allocation2 + $0xb8] sm:$0xff] %v345_v15  ;;  %v510_v32 = vshrl.u32 %v439_v25, 16  ;;  %v513_v39 = vshll.u32 %v439_v25, 16  ;;  %v9308_v18 = vld [vmem:[%s12787_s1 + $0x48] sm:$0xff]  }
  0x5f   : > { %1854 = vmatprep.subr.bf16.mxu0 %v9490_v1  ;;  %8798 = vmatprep.mubr.bf16.mxu1 %v1552_v5  ;;  %v409_v44 = vpack.c.bf16 %v387_v27, %v386_v19  ;;  %v624_v52 = vld [vmem:[#allocation2 + $0x88] sm:$0x1]  ;;  %v9900_v58 = vsel %vm9566_vm2, %v503_v49, %v627_v53  ;;  %v390_v5 = vld [vmem:[%s9618_s9 + $0xb0] sm:$0xff]  ;;  %v9305_v19 = vld [vmem:[%s12787_s1 + $0x38] sm:$0xff]  }
  0x60   : > { %2495 = vmatpush1.bf16.msra.mxu1 %v9301_v4  ;;  %v625_v40 = vsel %vm9606_vm5, %v9819_v59, %v624_v52  ;;  %v1233_v59 = vshrl.u32 %v9680_v2, 16  ;;  %629 = vst [vmem:[#allocation2 + $0x90] sm:$0xff] %v9900_v58  ;;  %v512_v49 = vrot.slane %v510_v32, 7  ;;  %v639_v53 = vld [vmem:[#allocation2 + $0xb0] sm:$0xff]  ;;  %v9951_v56 = vld [vmem:[#allocation2 + $0x78] sm:$0xff] }
  0x61   : > { %2496 = vmatprep.subr.bf16.mxu1 %v9490_v1  ;;  %v437_v43 = vsel %vm416_vm6, %v409_v44, 0  ;;  %626 = vst [vmem:[#allocation2 + $0x88] sm:$0x1] %v625_v40  ;;  %v9307_v61 = vld [vmem:[%s12787_s1 + $0x90] sm:$0xff]   ;;  %v1563_v14 = vrot.slane %v9951_v56, 1  ;;  %v395_v25 = vld [vmem:[%s9618_s9 + $0xd8] sm:$0xff] }
  0x62   : > { %1855 = vmatpush1.bf16.msra.mxu0 %v9293_v55  ;;  %v342_v55 = vsel %vm9566_vm2, 0, %v341_v35  ;;  %v504_v4 = vshrl.u32 %v437_v43, 16  ;;  %v507_v13 = vshll.u32 %v437_v43, 16  ;;  %v392_v35 = vld [vmem:[%s9618_s9 + $0xc0] sm:$0xff]  ;;  %v515_v40 = vor.u32 %v513_v39, %v512_v49  ;;  %v296_v39 = vld [vmem:[#allocation2 + $0xf0] sm:$0x1] }
  0x63   : > { %1856 = vmatprep.subr.bf16.mxu0 %v9490_v1  ;;  %343 = vst [vmem:[#allocation2 + $0xa8] sm:$0xff] %v342_v55  ;;  %v412_v55 = vpack.c.bf16 %v393_v36, %v392_v35  ;;  %v9991_v35 = vld [vmem:[#allocation2] sm:$0xff] }
  0x64   : > { %2497 = vmatpush1.bf16.msra.mxu1 %v9303_v30  ;;  %v506_v17 = vrot.slane %v504_v4, 7  ;;  %v631_v30 = vsel %vm9606_vm5, %v9862_v31, %v630_v22  ;;  %v1560_v31 = vsel %vm1034_vm8, %v1557_v11, %v1559_v16  ;;  %v350_v4 = vld [vmem:[#allocation2 + $0xd8] sm:$0xff] }
  0x65   : > { %2498 = vmatprep.subr.bf16.mxu1 %v9490_v1  ;;  %632 = vst [vmem:[#allocation2 + $0x98] sm:$0x1] %v631_v30  ;;  %v351_v32 = vsel %vm9566_vm2, 0, %v350_v4 }
  0x66   : > { %1857 = vmatpush1.bf16.msra.mxu0 %v9294_v6  ;;  %v391_v6 = vld [vmem:[%s9618_s9 + $0xb8] sm:$0xff]  ;;  %8799 = vmatmul.mubr.bf16.gmra.mrb[12].mxu1 %v1554_v51  ;;  %v290_v51 = vld [vmem:[#allocation2 + $0xd0] sm:$0x1]  ;;  %352 = vst [vmem:[#allocation2 + $0xd8] sm:$0xff] %v351_v32 }
  0x67   : > { %1858 = vmatprep.subr.bf16.mxu0 %v9490_v1  ;;  %8802 = vmatprep.mubr.bf16.mxu1 %v1556_v57  ;;  %v411_v27 = vpack.c.bf16 %v391_v6, %v390_v5  ;;  %v1241_v57 = vshrl.u32 %v9729_v45, 16  ;;  %v291_v3 = vsel %vm9606_vm5, 0, %v290_v51  ;;  %v1561_v5 = vrot.slane %v9838_v8, 1  ;;  %v9309_v51 = vld [vmem:[%s12787_s1 + $0x50] sm:$0xff]  }
  0x68   : > { %2499 = vmatpush1.bf16.msra.mxu1 %v9304_v60  ;;  %v9969_v6 = vsel %vm9566_vm2, %v515_v40, %v639_v53  ;;  %292 = vst [vmem:[#allocation2 + $0xd0] sm:$0x1] %v291_v3  ;;  %v9997_v36 = vld [vmem:[#allocation2 + $0x88] sm:$0xff]  ;;  %v1565_v40 = vrot.slane %v9853_v23, 1 }
  0x69   : > { %2500 = vmatprep.subr.bf16.mxu1 %v9490_v1  ;;  %v441_v44 = vsel %vm416_vm6, %v411_v27, 0  ;;  %641 = vst [vmem:[#allocation2 + $0xb0] sm:$0xff] %v9969_v6  ;;  %v1247_v27 = vrot.slane %v1245_v62, 1  ;;  %v356_v62 = vld [vmem:[#allocation2 + $0xf8] sm:$0xff] }
  0x6a   : > { %1859 = vmatpush1.bf16.msra.mxu0 %v9296_v37  ;;  %v509_v37 = vor.u32 %v507_v13, %v506_v17  ;;  %v636_v46 = vld [vmem:[#allocation2 + $0xa8] sm:$0x1]  ;;  %v516_v50 = vshrl.u32 %v441_v44, 16  ;;  %v519_v43 = vshll.u32 %v441_v44, 16  ;;  %v293_v13 = vld [vmem:[#allocation2 + $0xe0] sm:$0x1]  ;;  %v1564_v44 = vsel %vm1034_vm8, %v1561_v5, %v1563_v14 }
  0x6b   : > { %8850 = vmatprep.subr.bf16.mxu0 %v9297_v38  ;;  %v637_v52 = vsel %vm9606_vm5, %v506_v17, %v636_v46  ;;  %v443_v17 = vsel %vm416_vm6, %v412_v55, 0  ;;  %v1249_v46 = vshrl.u32 %v9699_v21, 16 }
  0x6c   : > { %2501 = vmatpush1.bf16.msra.mxu1 %v9305_v19  ;;  %638 = vst [vmem:[#allocation2 + $0xa8] sm:$0x1] %v637_v52  ;;  %v9955_v60 = vrot.slane %v516_v50, 7  ;;  %v1243_v19 = vor.u32 %v1241_v57, %v1239_v28  ;;  %v522_v22 = vshrl.u32 %v443_v17, 16  ;;  %v397_v50 = vld [vmem:[%s9618_s9 + $0xe8] sm:$0xff]  ;;  %v297_v57 = vsel %vm9606_vm5, 0, %v296_v39 }
  0x6d   : > { %1861 = vmatmul.mubr.bf16.vlgmr.msra.gmra.mrb[0].mxu0 %v9671_v54  ;;  %v1235_v54 = vor.u32 %v1233_v59, %v9876_v41  ;;  %v9943_v41 = vsel %vm9566_vm2, %v509_v37, %v633_v24  ;;  %2502 = vmatprep.subr.bf16.mxu1 %v9490_v1  ;;  %v348_v59 = vsel %vm9566_vm2, 0, %v347_v34  ;;  %v525_v24 = vshll.u32 %v443_v17, 16  ;;  %v353_v37 = vld [vmem:[#allocation2 + $0xe8] sm:$0xff]  ;;  %298 = vst [vmem:[#allocation2 + $0xf0] sm:$0x1] %v297_v57 }
  0x6e   : > { %8851 = vmatpush3.bf16.msra.mxu0 %v9297_v38  ;;  %1868 = vmatprep.mubr.bf16.mxu0 %v1232_v63  ;;  %v1558_v38 = vsel %vm1034_vm8, %v1555_v29, %v1557_v11  ;;  %v9306_v29 = vld [vmem:[%s12787_s1 + $0x40] sm:$0xff]   ;;  %635 = vst [vmem:[#allocation2 + $0xa0] sm:$0xff] %v9943_v41  ;;  %v642_v63 = vld [vmem:[#allocation2 + $0xb8] sm:$0x1]  ;;  %349 = vst [vmem:[#allocation2 + $0xc8] sm:$0xff] %v348_v59  ;;  %v521_v15 = vor.u32 %v519_v43, %v9955_v60  ;;  %v294_v34 = vsel %vm9606_vm5, 0, %v293_v13 }
  0x6f   : > { %8852 = vmatprep.subr.bf16.mxu0 %v9302_v12  ;;  %8803 = vmatmul.mubr.bf16.gmra.mrb[16].mxu1 %v1558_v38  ;;  %v1240_v1 = vsel %vm708_vm7, %v1235_v54, %v1239_v28  ;;  %v643_v11 = vsel %vm9606_vm5, %v512_v49, %v642_v63  ;;  %v1562_v28 = vsel %vm1034_vm8, %v1559_v16, %v1561_v5  ;;  %v524_v54 = vrot.slane %v522_v22, 7  ;;  %v651_v43 = vld [vmem:[#allocation2 + $0xd0] sm:$0xff]  ;;  %v654_v13 = vld [vmem:[#allocation2 + $0xd8] sm:$0x1] }
  0x70   : > { %8806 = vmatprep.mubr.bf16.mxu1 %v1560_v31  ;;  %644 = vst [vmem:[#allocation2 + $0xb8] sm:$0x1] %v643_v11  ;;  %2503 = vmatpush1.bf16.msra.mxu1 %v9306_v29  ;;  %295 = vst [vmem:[#allocation2 + $0xe0] sm:$0x1] %v294_v34  ;;  %v396_v31 = vld [vmem:[%s9618_s9 + $0xe0] sm:$0xff]  ;;  %v1253_v16 = vshll.u32 %v9764_v7, 16  ;;  %v1248_v52 = vsel %vm708_vm7, %v1243_v19, %v1247_v27  ;;  %v1251_v4 = vor.u32 %v1249_v46, %v1247_v27 }
  0x71   : > { %2504 = vmatprep.subr.bf16.mxu1 %v9991_v35  ;;  %v527_v49 = vor.u32 %v525_v24, %v524_v54  ;;  %v354_v29 = vsel %vm9566_vm2, 0, %v353_v37  ;;  %v1567_v63 = vrot.slane %v9997_v36, 1  ;;  %v414_v11 = vpack.c.bf16 %v397_v50, %v396_v31  ;;  %v399_v19 = vld [vmem:[%s9618_s9 + $0xf8] sm:$0xff] }
  0x72   : > { %8853 = vmatpush3.bf16.msra.mxu0 %v9302_v12  ;;  %v645_v12 = vld [vmem:[#allocation2 + $0xc0] sm:$0xff]  ;;  %355 = vst [vmem:[#allocation2 + $0xe8] sm:$0xff] %v354_v29  ;;  %v1255_v5 = vrot.slane %v1253_v16, 1  ;;  %v1566_v22 = vsel %vm1034_vm8, %v1563_v14, %v1565_v40  ;;  %v655_v24 = vsel %vm9606_vm5, %v524_v54, %v654_v13  ;;  %v10049_v54 = vld [vmem:[#allocation2 + $0x98] sm:$0xff]  ;;  %v1257_v39 = vshrl.u32 %v9764_v7, 16 }
  0x73   : > { %8854 = vmatprep.subr.bf16.mxu0 %v9307_v61  ;;  %v9985_v30 = vsel %vm9566_vm2, %v521_v15, %v645_v12  ;;  %v398_v12 = vld [vmem:[%s9618_s9 + $0xf0] sm:$0xff]  ;;  %v1568_v27 = vsel %vm1034_vm8, %v1565_v40, %v1567_v63  ;;  %656 = vst [vmem:[#allocation2 + $0xd8] sm:$0x1] %v655_v24  ;;  %v9311_v14 = vld [vmem:[%s12787_s1 + $0x60] sm:$0xff]   ;;  %v1261_v31 = vshll.u32 %v9725_v42, 16  ;;  %v1571_v57 = vrot.slane %v10049_v54, 1 }
  0x74   : > { %647 = vst [vmem:[#allocation2 + $0xc0] sm:$0xff] %v9985_v30  ;;  %2505 = vmatpush1.bf16.msra.mxu1 %v9308_v18  ;;  %v357_v18 = vsel %vm9566_vm2, 0, %v356_v62  ;;  %v1256_v37 = vsel %vm708_vm7, %v1251_v4, %v1255_v5  ;;  %v302_v29 = vld [vmem:[#allocation2 + $0x110] sm:$0x1]  ;;  %v251_v13 = vld [vmem:[#allocation2] sm:$0x1] }
  0x75   : > { %1869 = vmatmul.mubr.bf16.gmra.mrb[4].mxu0 %v9704_v26  ;;  %v394_v26 = vld [vmem:[%s9618_s9 + $0xd0] sm:$0xff]  ;;  %2506 = vmatprep.subr.bf16.mxu1 %v9991_v35  ;;  %v648_v53 = vld [vmem:[#allocation2 + $0xc8] sm:$0x1]  ;;  %358 = vst [vmem:[#allocation2 + $0xf8] sm:$0xff] %v357_v18  ;;  %v252_v18 = vsel %vm9606_vm5, 0, %v251_v13  ;;  %v10101_v24 = vsel %vm9566_vm2, 0, %v9991_v35 }
  0x76   : > { %1874 = vmatprep.mubr.bf16.mxu0 %v1240_v1  ;;  %8855 = vmatpush3.bf16.msra.mxu0 %v9307_v61  ;;  %v413_v38 = vpack.c.bf16 %v395_v25, %v394_v26  ;;  %v649_v61 = vsel %vm9606_vm5, %v9955_v60, %v648_v53  ;;  %v10023_v1 = vsel %vm9566_vm2, %v527_v49, %v651_v43  ;;  %v9310_v60 = vld [vmem:[%s12787_s1 + $0x58] sm:$0xff]   ;;  %v447_v26 = vsel %vm416_vm6, %v414_v11, 0  ;;  %v359_v25 = vld [vmem:[#allocation2 + $0x108] sm:$0xff]  ;;  %v663_v43 = vld [vmem:[#allocation2 + $0xf0] sm:$0xff] }
  0x77   : > { %8807 = vmatmul.mubr.bf16.gmra.mrb[20].mxu1 %v1562_v28  ;;  %650 = vst [vmem:[#allocation2 + $0xc8] sm:$0x1] %v649_v61  ;;  %653 = vst [vmem:[#allocation2 + $0xd0] sm:$0xff] %v10023_v1  ;;  %v657_v17 = vld [vmem:[#allocation2 + $0xe0] sm:$0xff]  ;;  %v534_v34 = vshrl.u32 %v447_v26, 16  ;;  %v537_v28 = vshll.u32 %v447_v26, 16 }
  0x78   : > { %v445_v55 = vsel %vm416_vm6, %v413_v38, 0  ;;  %8810 = vmatprep.mubr.bf16.mxu1 %v1564_v44  ;;  %2507 = vmatpush1.bf16.msra.mxu1 %v9309_v51  ;;  %v415_v38 = vpack.c.bf16 %v399_v19, %v398_v12  ;;  %v360_v50 = vsel %vm9566_vm2, 0, %v359_v25  ;;  %v9315_v51 = vld [vmem:[%s12787_s1 + $0x98] sm:$0xff]   ;;  %v1265_v19 = vshrl.u32 %v9725_v42, 16  ;;  %253 = vst [vmem:[#allocation2] sm:$0x1] %v252_v18 }
  0x79   : > { %v528_v59 = vshrl.u32 %v445_v55, 16  ;;  %v531_v3 = vshll.u32 %v445_v55, 16  ;;  %2508 = vmatprep.subr.bf16.mxu1 %v9991_v35  ;;  %v660_v16 = vld [vmem:[#allocation2 + $0xe8] sm:$0x1]  ;;  %v536_v49 = vrot.slane %v534_v34, 7  ;;  %361 = vst [vmem:[#allocation2 + $0x108] sm:$0xff] %v360_v50  ;;  %8856 = vmatprep.subr.bf16.mxu0 %v9315_v51 }
  0x7a   : > { %v449_v55 = vsel %vm416_vm6, %v415_v38, 0  ;;  %8857 = vmatpush3.bf16.msra.mxu0 %v9315_v51  ;;  %v1269_v25 = vshll.u32 %v9794_v33, 16  ;;  %313 = vst [vmem:[#allocation2 + $0x8] sm:$0xff] %v10101_v24  ;;  %v9317_v34 = vld [vmem:[%s12787_s1 + $0xa0] sm:$0xff]   ;;  %v1277_v50 = vshll.u32 %v9768_v9, 16  ;;  %v1577_v51 = vrot.slane %v9969_v6, 1 }
  0x7b   : > { %v530_v15 = vrot.slane %v528_v59, 7  ;;  %v539_v40 = vor.u32 %v537_v28, %v536_v49  ;;  %v540_v61 = vshrl.u32 %v449_v55, 16  ;;  %v543_v62 = vshll.u32 %v449_v55, 16  ;;  %8858 = vmatprep.subr.bf16.mxu0 %v9317_v34 }
  0x7c   : > { %2509 = vmatpush1.bf16.msra.mxu1 %v9310_v60  ;;  %v303_v59 = vsel %vm9606_vm5, 0, %v302_v29  ;;  %v1263_v60 = vrot.slane %v1261_v31, 1  ;;  %v666_v4 = vld [vmem:[#allocation2 + $0xf8] sm:$0x1]  ;;  %v1573_v28 = vrot.slane %v9943_v41, 1  ;;  %v1271_v41 = vrot.slane %v1269_v25, 1 }
  0x7d   : > { %1875 = vmatmul.mubr.bf16.gmra.mrb[8].mxu0 %v9680_v2  ;;  %v299_v2 = vld [vmem:[#allocation2 + $0x100] sm:$0x1]  ;;  %v533_v32 = vor.u32 %v531_v3, %v530_v15  ;;  %2510 = vmatprep.subr.bf16.mxu1 %v9991_v35  ;;  %v661_v53 = vsel %vm9606_vm5, %v530_v15, %v660_v16  ;;  %v1259_v3 = vor.u32 %v1257_v39, %v1255_v5  ;;  %v542_v11 = vrot.slane %v540_v61, 7  ;;  %v9314_v39 = vld [vmem:[%s12787_s1 + $0x78] sm:$0xff]  }
  0x7e   : > { %1882 = vmatprep.mubr.bf16.mxu0 %v1248_v52  ;;  %v300_v44 = vsel %vm9606_vm5, 0, %v299_v2  ;;  %v1569_v52 = vrot.slane %v9900_v58, 1  ;;  %662 = vst [vmem:[#allocation2 + $0xe8] sm:$0x1] %v661_v53  ;;  %v9312_v58 = vld [vmem:[%s12787_s1 + $0x68] sm:$0xff]   ;;  %v667_v12 = vsel %vm9606_vm5, %v536_v49, %v666_v4  ;;  %v1574_v38 = vsel %vm1034_vm8, %v1571_v57, %v1573_v28  ;;  %8859 = vmatpush3.bf16.msra.mxu0 %v9317_v34 }
  0x7f   : > { %8811 = vmatmul.mubr.bf16.gmra.mrb[24].mxu1 %v1566_v22  ;;  %v10058_v46 = vsel %vm9566_vm2, %v533_v32, %v657_v17  ;;  %301 = vst [vmem:[#allocation2 + $0x100] sm:$0x1] %v300_v44  ;;  %304 = vst [vmem:[#allocation2 + $0x110] sm:$0x1] %v303_v59  ;;  %v545_v15 = vor.u32 %v543_v62, %v542_v11  ;;  %v9313_v17 = vld [vmem:[%s12787_s1 + $0x70] sm:$0xff]   ;;  %v1264_v26 = vsel %vm708_vm7, %v1259_v3, %v1263_v60 }
  0x80   : > { %8814 = vmatprep.mubr.bf16.mxu1 %v1568_v27  ;;  %659 = vst [vmem:[#allocation2 + $0xe0] sm:$0xff] %v10058_v46  ;;  %2511 = vmatpush1.bf16.msra.mxu1 %v9311_v14  ;;  %v1570_v2 = vsel %vm1034_vm8, %v1567_v63, %v1569_v52  ;;  %v1572_v5 = vsel %vm1034_vm8, %v1569_v52, %v1571_v57  ;;  %668 = vst [vmem:[#allocation2 + $0xf8] sm:$0x1] %v667_v12  ;;  %v10094_v63 = vld [vmem:[#allocation2 + $0xa8] sm:$0xff]  ;;  %v1273_v49 = vshrl.u32 %v9794_v33, 16 }
  0x81   : > { %2512 = vmatprep.subr.bf16.mxu1 %v9991_v35  ;;  %v672_v32 = vld [vmem:[#allocation2 + $0x108] sm:$0x1]  ;;  %v1267_v44 = vor.u32 %v1265_v19, %v1263_v60  ;;  %v1279_v55 = vrot.slane %v1277_v50, 1  ;;  %v1281_v61 = vshrl.u32 %v9768_v9, 16  ;;  %v1581_v62 = vrot.slane %v9985_v30, 1  ;;  %v675_v50 = vld [vmem:[#allocation2] sm:$0xff] }
  0x82   : > { %v673_v14 = vsel %vm9606_vm5, %v542_v11, %v672_v32  ;;  %v9320_v52 = vld [vmem:[%s12787_s1 + $0xa8] sm:$0xff]   ;;  %v10149_v11 = vld [vmem:[#allocation2 + $0xd8] sm:$0xff]  ;;  %v1293_v30 = vshll.u32 %v9808_v48, 16  ;;  %v9323_v32 = vld [vmem:[%s12787_s1 + $0xb0] sm:$0xff]  }
  0x83   : > { %674 = vst [vmem:[#allocation2 + $0x108] sm:$0x1] %v673_v14  ;;  %v1272_v16 = vsel %vm708_vm7, %v1267_v44, %v1271_v41  ;;  %8860 = vmatprep.subr.bf16.mxu0 %v9320_v52  ;;  %v1283_v59 = vor.u32 %v1281_v61, %v1279_v55  ;;  %v1587_v12 = vrot.slane %v10149_v11, 1  ;;  %v1309_v14 = vshll.u32 %v9838_v8, 16 }
  0x84   : > { %2513 = vmatpush1.bf16.msra.mxu1 %v9312_v58  ;;  %8861 = vmatpush3.bf16.msra.mxu0 %v9320_v52  ;;  %v1305_v44 = vshrl.u32 %v9880_v47, 16  ;;  %v717_v61 = vshll.u32 %v10101_v24, 16 }
  0x85   : > { %1883 = vmatmul.mubr.bf16.gmra.mrb[12].mxu0 %v9729_v45  ;;  %v10080_v45 = vsel %vm9566_vm2, %v539_v40, %v663_v43  ;;  %2514 = vmatprep.subr.bf16.mxu1 %v9991_v35  ;;  %v1275_v43 = vor.u32 %v1273_v49, %v1271_v41  ;;  %v10139_v40 = vld [vmem:[#allocation2 + $0xc8] sm:$0xff]  ;;  %v1317_v49 = vshll.u32 %v9951_v56, 16 }
  0x86   : > { %1888 = vmatprep.mubr.bf16.mxu0 %v1256_v37  ;;  %665 = vst [vmem:[#allocation2 + $0xf0] sm:$0xff] %v10080_v45  ;;  %v669_v22 = vld [vmem:[#allocation2 + $0x100] sm:$0xff]  ;;  %v1575_v37 = vrot.slane %v10094_v63, 1  ;;  %v1583_v58 = vrot.slane %v10139_v40, 1  ;;  %v10159_v18 = vld [vmem:[#allocation2 + $0xe8] sm:$0xff]  ;;  %8862 = vmatprep.subr.bf16.mxu0 %v9323_v32  ;;  %v1593_v41 = vrot.slane %v10080_v45, 1 }
  0x87   : > { %8815 = vmatmul.mubr.bf16.gmra.mrb[28].mxu1 %v1570_v2  ;;  %v10107_v27 = vsel %vm9566_vm2, %v545_v15, %v669_v22  ;;  %v1280_v6 = vsel %vm708_vm7, %v1275_v43, %v1279_v55  ;;  %v1289_v2 = vshrl.u32 %v9847_v20, 16  ;;  %v1297_v22 = vshrl.u32 %v9808_v48, 16 }
  0x88   : > { %8818 = vmatprep.mubr.bf16.mxu1 %v1572_v5  ;;  %671 = vst [vmem:[#allocation2 + $0x100] sm:$0xff] %v10107_v27  ;;  %2515 = vmatpush1.bf16.msra.mxu1 %v9313_v17  ;;  %v1576_v31 = vsel %vm1034_vm8, %v1573_v28, %v1575_v37  ;;  %v1578_v29 = vsel %vm1034_vm8, %v1575_v37, %v1577_v51  ;;  %v1295_v5 = vrot.slane %v1293_v30, 1  ;;  %v1591_v25 = vrot.slane %v10159_v18, 1  ;;  %v10171_v37 = vld [vmem:[#allocation2 + $0xf8] sm:$0xff] }
  0x89   : > { %2516 = vmatprep.subr.bf16.mxu1 %v9991_v35  ;;  %v1584_v4 = vsel %vm1034_vm8, %v1581_v62, %v1583_v58  ;;  %8863 = vmatpush3.bf16.msra.mxu0 %v9323_v32  ;;  %v1313_v45 = vshrl.u32 %v9838_v8, 16  ;;  %v1597_v55 = vrot.slane %v10107_v27, 1  ;;  %v719_v30 = vrot.slane %v717_v61, 1  ;;  %v10240_v61 = vld [vmem:[#allocation2 + $0x28] sm:$0xff] }
  0x8a   : > { %v1299_v34 = vor.u32 %v1297_v22, %v1295_v5  ;;  %v10181_v52 = vld [vmem:[#allocation2 + $0x108] sm:$0xff] }
  0x8c   : > { %2517 = vmatpush1.bf16.msra.mxu1 %v9314_v39 }
  0x8d   : > { %1889 = vmatmul.mubr.bf16.gmra.mrb[16].mxu0 %v9699_v21  ;;  %v10125_v21 = vld [vmem:[#allocation2 + $0xb8] sm:$0xff]  ;;  %3649 = vmatprep.subr.bf16.mxu1 %v9991_v35 }
  0x8e   : > { %1896 = vmatprep.mubr.bf16.mxu0 %v1264_v26  ;;  %v1579_v53 = vrot.slane %v10125_v21, 1  ;;  %v9417_v26 = vld [vmem:[#allocation2 + $0x50] sm:$0xff] }
  0x8f   : > { %8819 = vmatmul.mubr.bf16.gmra.mrb[32].mxu1 %v1574_v38  ;;  %v1595_v38 = vrot.slane %v10171_v37, 1 }
  0x90   : > { %8822 = vmatprep.mubr.bf16.mxu1 %v1576_v31  ;;  %v1580_v57 = vsel %vm1034_vm8, %v1577_v51, %v1579_v53  ;;  %v1582_v60 = vsel %vm1034_vm8, %v1579_v53, %v1581_v62  ;;  %v1311_v31 = vrot.slane %v1309_v14, 1  ;;  %v1594_v51 = vsel %vm1034_vm8, %v1591_v25, %v1593_v41  ;;  %v10190_v62 = vld [vmem:[#allocation2 + $0x110] sm:$0xff]  ;;  %v9316_v14 = vld [vmem:[%s12787_s1 + $0x180] sm:$0xff]  }
  0x91   : > { %v1596_v53 = vsel %vm1034_vm8, %v1593_v41, %v1595_v38  ;;  %v1598_v8 = vsel %vm1034_vm8, %v1595_v38, %v1597_v55 }
  0x95   : > { %1897 = vmatmul.mubr.bf16.gmra.mrb[20].mxu0 %v9764_v7  ;;  %v1285_v7 = vshll.u32 %v9847_v20, 16 }
  0x96   : > { %1902 = vmatprep.mubr.bf16.mxu0 %v1272_v16 }
  0x97   : > { %8823 = vmatmul.mubr.bf16.gmra.mrb[36].mxu1 %v1578_v29  ;;  %v1287_v3 = vrot.slane %v1285_v7, 1  ;;  %v9418_v29 = vld [vmem:[#allocation2 + $0x60] sm:$0xff]  ;;  %v1325_v7 = vshll.u32 %v9853_v23, 16 }
  0x98   : > { %8826 = vmatprep.mubr.bf16.mxu1 %v1580_v57  ;;  %v1599_v57 = vrot.slane %v10181_v52, 1 }
  0x99   : > { %v1288_v9 = vsel %vm708_vm7, %v1283_v59, %v1287_v3  ;;  %v1291_v13 = vor.u32 %v1289_v2, %v1287_v3  ;;  %v710_v59 = vshrl.u32 %v675_v50, 16  ;;  %v10197_v2 = vld [vmem:[#allocation2 + $0x10] sm:$0xff] }
  0x9b   : > { %v1296_v19 = vsel %vm708_vm7, %v1291_v13, %v1295_v5  ;;  %v725_v5 = vshll.u32 %v10197_v2, 16 }
  0x9d   : > { %1903 = vmatmul.mubr.bf16.gmra.mrb[24].mxu0 %v9725_v42  ;;  %v1585_v42 = vrot.slane %v10023_v1, 1  ;;  %v1301_v1 = vshll.u32 %v9880_v47, 16  ;;  %v727_v32 = vrot.slane %v725_v5, 1  ;;  %v9423_v5 = vld [vmem:[#allocation2 + $0x88] sm:$0xff] }
  0x9e   : > { %1910 = vmatprep.mubr.bf16.mxu0 %v1280_v6  ;;  %v1319_v6 = vrot.slane %v1317_v49, 1 }
  0x9f   : > { %8827 = vmatmul.mubr.bf16.gmra.mrb[40].mxu1 %v1582_v60  ;;  %v1586_v15 = vsel %vm1034_vm8, %v1583_v58, %v1585_v42  ;;  %v1588_v17 = vsel %vm1034_vm8, %v1585_v42, %v1587_v12  ;;  %v1303_v28 = vrot.slane %v1301_v1, 1  ;;  %v1315_v58 = vor.u32 %v1313_v45, %v1311_v31  ;;  %v9419_v1 = vld [vmem:[#allocation2 + $0x80] sm:$0xff] }
  0xa0   : > { %8830 = vmatprep.mubr.bf16.mxu1 %v1584_v4  ;;  %v1600_v60 = vsel %vm1034_vm8, %v1597_v55, %v1599_v57  ;;  %v1321_v4 = vshrl.u32 %v9951_v56, 16  ;;  %v1327_v42 = vrot.slane %v1325_v7, 1  ;;  %v9321_v7 = vld [vmem:[%s12787_s1 + $0x198] sm:$0xff]  }
  0xa1   : > { %v1304_v39 = vsel %vm708_vm7, %v1299_v34, %v1303_v28  ;;  %v1307_v16 = vor.u32 %v1305_v44, %v1303_v28  ;;  %v1320_v27 = vsel %vm708_vm7, %v1315_v58, %v1319_v6  ;;  %v9326_v28 = vld [vmem:[%s12787_s1 + $0xb8] sm:$0xff]   ;;  %v10216_v44 = vld [vmem:[#allocation2 + $0x20] sm:$0xff] }
  0xa2   : > { %v1323_v13 = vor.u32 %v1321_v4, %v1319_v6  ;;  %8864 = vmatprep.subr.bf16.mxu0 %v9326_v28  ;;  %v741_v45 = vshll.u32 %v10216_v44, 16  ;;  %v10251_v4 = vld [vmem:[#allocation2 + $0x30] sm:$0xff] }
  0xa3   : > { %v1312_v43 = vsel %vm708_vm7, %v1307_v16, %v1311_v31  ;;  %8865 = vmatpush3.bf16.msra.mxu0 %v9326_v28  ;;  %v1337_v31 = vshrl.u32 %v9997_v36, 16  ;;  %v10221_v16 = vld [vmem:[#allocation2 + $0x90] sm:$0xff]  ;;  %v9327_v28 = vld [vmem:[%s12787_s1 + $0x1b8] sm:$0xff]  }
  0xa4   : > { %v1328_v22 = vsel %vm708_vm7, %v1323_v13, %v1327_v42  ;;  %v1341_v49 = vshll.u32 %v10221_v16, 16  ;;  %v1345_v6 = vshrl.u32 %v10221_v16, 16  ;;  %v9324_v13 = vld [vmem:[%s12787_s1 + $0x1a8] sm:$0xff]  }
  0xa5   : > { %1911 = vmatmul.mubr.bf16.gmra.mrb[28].mxu0 %v9794_v33  ;;  %v1589_v33 = vrot.slane %v10058_v46, 1 }
  0xa6   : > { %1916 = vmatprep.mubr.bf16.mxu0 %v1288_v9  ;;  %v1601_v9 = vrot.slane %v10190_v62, 1  ;;  %v1343_v55 = vrot.slane %v1341_v49, 1  ;;  %v761_v49 = vshrl.u32 %v10251_v4, 16 }
  0xa7   : > { %8831 = vmatmul.mubr.bf16.gmra.mrb[44].mxu1 %v1586_v15  ;;  %v1590_v48 = vsel %vm1034_vm8, %v1587_v12, %v1589_v33  ;;  %v1592_v46 = vsel %vm1034_vm8, %v1589_v33, %v1591_v25  ;;  %v721_v12 = vshrl.u32 %v10101_v24, 16  ;;  %v1333_v15 = vshll.u32 %v9997_v36, 16  ;;  %v10206_v33 = vld [vmem:[#allocation2 + $0x18] sm:$0xff]  ;;  %v9319_v36 = vld [vmem:[%s12787_s1 + $0x190] sm:$0xff]  }
  0xa8   : > { %8834 = vmatprep.mubr.bf16.mxu1 %v1588_v17  ;;  %v1602_v17 = vsel %vm1034_vm8, %v1599_v57, %v1601_v9 }
  0xa9   : > { %v723_v25 = vor.u32 %v721_v12, %v719_v30  ;;  %v1335_v34 = vrot.slane %v1333_v15, 1 }
  0xab   : > { %v728_v41 = vsel %vm708_vm7, %v723_v25, %v727_v32 }
  0xad   : > { %1917 = vmatmul.mubr.bf16.gmra.mrb[32].mxu0 %v9417_v26  ;;  %v9420_v26 = vld [vmem:[#allocation2 + $0x70] sm:$0xff] }
  0xae   : > { %1924 = vmatprep.mubr.bf16.mxu0 %v1296_v19 }
  0xaf   : > { %8835 = vmatmul.mubr.bf16.gmra.mrb[48].mxu1 %v1590_v48 }
  0xb0   : > { %8838 = vmatprep.mubr.bf16.mxu1 %v1592_v46  ;;  %v729_v46 = vshrl.u32 %v10197_v2, 16 }
  0xb5   : > { %1925 = vmatmul.mubr.bf16.gmra.mrb[36].mxu0 %v9847_v20  ;;  %v712_v20 = vshll.u32 %v675_v50, 16 }
  0xb6   : > { %1930 = vmatprep.mubr.bf16.mxu0 %v1304_v39  ;;  %v733_v39 = vshll.u32 %v10206_v33, 16 }
  0xb7   : > { %8839 = vmatmul.mubr.bf16.gmra.mrb[52].mxu1 %v1594_v51  ;;  %v714_v3 = vrot.slane %v712_v20, 1  ;;  %v9318_v51 = vld [vmem:[%s12787_s1 + $0x188] sm:$0xff]   ;;  %v1339_v20 = vor.u32 %v1337_v31, %v1335_v34  ;;  %v9328_v31 = vld [vmem:[%s12787_s1 + $0x1c0] sm:$0xff]  }
  0xb8   : > { %8842 = vmatprep.mubr.bf16.mxu1 %v1596_v53  ;;  %v731_v53 = vor.u32 %v729_v46, %v727_v32  ;;  %v10286_v46 = vld [vmem:[%s12787_s1 + $0x200] sm:$0xff]  }
  0xb9   : > { %v715_v23 = vor.u32 %v714_v3, %v710_v59  ;;  %v1344_v57 = vsel %vm708_vm7, %v1339_v20, %v1343_v55  ;;  %v743_v59 = vrot.slane %v741_v45, 1  ;;  %8930 = vmatprep.subr.bf16.mxu0 %v10286_v46 }
  0xbb   : > { %v720_v19 = vsel %vm708_vm7, %v715_v23, %v719_v30  ;;  %v1353_v30 = vshrl.u32 %v10049_v54, 16 }
  0xbd   : > { %1931 = vmatmul.mubr.bf16.gmra.mrb[40].mxu0 %v9418_v29  ;;  %v1349_v29 = vshll.u32 %v10049_v54, 16 }
  0xbe   : > { %1938 = vmatprep.mubr.bf16.mxu0 %v1312_v43  ;;  %v735_v43 = vrot.slane %v733_v39, 1  ;;  %v10288_v39 = vld [vmem:[#allocation2 + $0x38] sm:$0xff] }
  0xbf   : > { %8843 = vmatmul.mubr.bf16.gmra.mrb[56].mxu1 %v1598_v8  ;;  %v1351_v3 = vrot.slane %v1349_v29, 1  ;;  %v745_v8 = vshrl.u32 %v10216_v44, 16  ;;  %v10302_v29 = vld [vmem:[#allocation2 + $0x40] sm:$0xff] }
  0xc0   : > { %8846 = vmatprep.mubr.bf16.mxu1 %v1600_v60  ;;  %v749_v60 = vshll.u32 %v10240_v61, 16 }
  0xc1   : > { %v747_v15 = vor.u32 %v745_v8, %v743_v59  ;;  %v1355_v54 = vor.u32 %v1353_v30, %v1351_v3  ;;  %v1381_v8 = vshll.u32 %v10125_v21, 16 }
  0xc3   : > { %v1383_v30 = vrot.slane %v1381_v8, 1 }
  0xc5   : > { %1939 = vmatmul.mubr.bf16.gmra.mrb[44].mxu0 %v9880_v47  ;;  %v1329_v47 = vshrl.u32 %v9419_v1, 16 }
  0xc6   : > { %1944 = vmatprep.mubr.bf16.mxu0 %v1320_v27  ;;  %v9322_v27 = vld [vmem:[%s12787_s1 + $0x1a0] sm:$0xff]  }
  0xc7   : > { %8847 = vmatmul.mubr.bf16.gmra.mrb[60].mxu1 %v1602_v17  ;;  %v1331_v48 = vor.u32 %v1329_v47, %v1327_v42  ;;  %v10258_v42 = vld [vmem:[#allocation2 + $0xa0] sm:$0xff]  ;;  %v753_v17 = vshrl.u32 %v10240_v61, 16  ;;  %v9325_v47 = vld [vmem:[%s12787_s1 + $0x1b0] sm:$0xff]  }
  0xc8   : > { %2518 = vmatprep.mubr.bf16.mxu1 %v720_v19  ;;  %v1357_v12 = vshll.u32 %v10258_v42, 16  ;;  %v757_v19 = vshll.u32 %v10251_v4, 16  ;;  %v1361_v32 = vshrl.u32 %v10258_v42, 16 }
  0xc9   : > { %v1336_v38 = vsel %vm708_vm7, %v1331_v48, %v1335_v34  ;;  %v1365_v34 = vshll.u32 %v10094_v63, 16 }
  0xca   : > { %v759_v48 = vrot.slane %v757_v19, 1 }
  0xcc   : > { %v763_v20 = vor.u32 %v761_v49, %v759_v48 }
  0xcd   : > { %1945 = vmatmul.mubr.bf16.gmra.mrb[48].mxu0 %v9420_v26 }
  0xce   : > { %1952 = vmatprep.mubr.bf16.mxu0 %v1328_v22  ;;  %v10266_v22 = vld [vmem:[#allocation2 + $0x120] sm:$0xff] }
  0xcf   : > { %2519 = vmatmul.mubr.bf16.vlgmr.msra.gmra.mrb[64].mxu1 %v675_v50  ;;  %v737_v50 = vshrl.u32 %v10206_v33, 16 }
  0xd0   : > { %2526 = vmatprep.mubr.bf16.mxu1 %v728_v41  ;;  %3650 = vmatpush1.bf16.msra.mxu1 %v9316_v14 }
  0xd1   : > { %3651 = vmatprep.subr.bf16.mxu1 %v9991_v35  ;;  %v739_v58 = vor.u32 %v737_v50, %v735_v43  ;;  %v9425_v50 = vld [vmem:[#allocation2 + $0xb0] sm:$0xff] }
  0xd2   : > { %v1373_v45 = vshll.u32 %v9425_v50, 16 }
  0xd3   : > { %v744_v9 = vsel %vm708_vm7, %v739_v58, %v743_v59  ;;  %v773_v58 = vshll.u32 %v10302_v29, 16 }
  0xd4   : > { %3652 = vmatpush1.bf16.msra.mxu1 %v9318_v51  ;;  %v765_v51 = vshll.u32 %v10288_v39, 16 }
  0xd5   : > { %1953 = vmatmul.mubr.bf16.gmra.mrb[52].mxu0 %v9951_v56  ;;  %v736_v56 = vsel %vm708_vm7, %v731_v53, %v735_v43  ;;  %3653 = vmatprep.subr.bf16.mxu1 %v9991_v35  ;;  %v1369_v43 = vshrl.u32 %v10094_v63, 16 }
  0xd6   : > { %1958 = vmatprep.mubr.bf16.mxu0 %v1336_v38  ;;  %v1367_v38 = vrot.slane %v1365_v34, 1 }
  0xd7   : > { %2527 = vmatmul.mubr.bf16.gmra.mrb[68].mxu1 %v10101_v24  ;;  %v1347_v24 = vor.u32 %v1345_v6, %v1343_v55  ;;  %v767_v55 = vrot.slane %v765_v51, 1 }
  0xd8   : > { %2532 = vmatprep.mubr.bf16.mxu1 %v736_v56  ;;  %3654 = vmatpush1.bf16.msra.mxu1 %v9319_v36  ;;  %v9426_v36 = vld [vmem:[#allocation2 + $0x98] sm:$0xff]  ;;  %v1371_v56 = vor.u32 %v1369_v43, %v1367_v38 }
  0xd9   : > { %3655 = vmatprep.subr.bf16.mxu1 %v9991_v35  ;;  %v1352_v23 = vsel %vm708_vm7, %v1347_v24, %v1351_v3  ;;  %v768_v6 = vsel %vm708_vm7, %v763_v20, %v767_v55  ;;  %v1377_v3 = vshrl.u32 %v9425_v50, 16  ;;  %v9330_v24 = vld [vmem:[%s12787_s1 + $0x1c8] sm:$0xff]  }
  0xdc   : > { %3656 = vmatpush1.bf16.msra.mxu1 %v9321_v7  ;;  %v769_v7 = vshrl.u32 %v10288_v39, 16 }
  0xdd   : > { %1959 = vmatmul.mubr.bf16.gmra.mrb[56].mxu0 %v9419_v1  ;;  %3657 = vmatprep.subr.bf16.mxu1 %v9991_v35  ;;  %v751_v35 = vrot.slane %v749_v60, 1  ;;  %v1359_v1 = vrot.slane %v1357_v12, 1 }
  0xde   : > { %1966 = vmatprep.mubr.bf16.mxu0 %v1344_v57  ;;  %v1375_v57 = vrot.slane %v1373_v45, 1  ;;  %v771_v60 = vor.u32 %v769_v7, %v767_v55  ;;  %v1401_v45 = vshrl.u32 %v10139_v40, 16 }
  0xdf   : > { %2533 = vmatmul.mubr.bf16.gmra.mrb[72].mxu1 %v10197_v2  ;;  %v752_v26 = vsel %vm708_vm7, %v747_v15, %v751_v35  ;;  %v1360_v25 = vsel %vm708_vm7, %v1355_v54, %v1359_v1  ;;  %v755_v14 = vor.u32 %v753_v17, %v751_v35  ;;  %v1363_v41 = vor.u32 %v1361_v32, %v1359_v1  ;;  %v9427_v35 = vld [vmem:[#allocation2 + $0xc0] sm:$0xff]  ;;  %v10324_v1 = vld [vmem:[#allocation2 + $0x50] sm:$0xff] }
  0xe0   : > { %2540 = vmatprep.mubr.bf16.mxu1 %v744_v9  ;;  %3658 = vmatpush1.bf16.msra.mxu1 %v9322_v27  ;;  %v1376_v59 = vsel %vm708_vm7, %v1371_v56, %v1375_v57  ;;  %v775_v27 = vrot.slane %v773_v58, 1  ;;  %v10314_v9 = vld [vmem:[#allocation2 + $0x48] sm:$0xff]  ;;  %v1385_v15 = vshrl.u32 %v10125_v21, 16  ;;  %v1389_v17 = vshll.u32 %v9427_v35, 16 }
  0xe1   : > { %3659 = vmatprep.subr.bf16.mxu1 %v10266_v22  ;;  %v1368_v53 = vsel %vm708_vm7, %v1363_v41, %v1367_v38  ;;  %v785_v32 = vshrl.u32 %v10314_v9, 16  ;;  %v789_v34 = vshll.u32 %v10324_v1, 16 }
  0xe2   : > { %v776_v12 = vsel %vm708_vm7, %v771_v60, %v775_v27  ;;  %v9334_v60 = vld [vmem:[%s12787_s1 + $0x1d8] sm:$0xff]  }
  0xe3   : > { %v791_v38 = vrot.slane %v789_v34, 1 }
  0xe4   : > { %3660 = vmatpush1.bf16.msra.mxu1 %v9324_v13  ;;  %v777_v13 = vshrl.u32 %v10302_v29, 16 }
  0xe5   : > { %1967 = vmatmul.mubr.bf16.gmra.mrb[60].mxu0 %v9423_v5  ;;  %3661 = vmatprep.subr.bf16.mxu1 %v10266_v22  ;;  %v781_v5 = vshll.u32 %v10314_v9, 16 }
  0xe6   : > { %1972 = vmatprep.mubr.bf16.mxu0 %v1352_v23  ;;  %v1379_v23 = vor.u32 %v1377_v3, %v1375_v57  ;;  %v779_v19 = vor.u32 %v777_v13, %v775_v27  ;;  %v10345_v57 = vld [vmem:[#allocation2 + $0x60] sm:$0xff] }
  0xe7   : > { %2541 = vmatmul.mubr.bf16.gmra.mrb[76].mxu1 %v10206_v33  ;;  %v783_v54 = vrot.slane %v781_v5, 1  ;;  %v805_v3 = vshll.u32 %v10345_v57, 16 }
  0xe8   : > { %2546 = vmatprep.mubr.bf16.mxu1 %v752_v26  ;;  %3662 = vmatpush1.bf16.msra.mxu1 %v9325_v47  ;;  %v1387_v47 = vor.u32 %v1385_v15, %v1383_v30  ;;  %v1391_v26 = vrot.slane %v1389_v17, 1  ;;  %v1417_v17 = vshrl.u32 %v10149_v11, 16 }
  0xe9   : > { %3663 = vmatprep.subr.bf16.mxu1 %v10266_v22  ;;  %v787_v41 = vor.u32 %v785_v32, %v783_v54 }
  0xeb   : > { %v792_v51 = vsel %vm708_vm7, %v787_v41, %v791_v38 }
  0xec   : > { %3664 = vmatpush1.bf16.msra.mxu1 %v9327_v28  ;;  %v1392_v28 = vsel %vm708_vm7, %v1387_v47, %v1391_v26 }
  0xed   : > { %1973 = vmatmul.mubr.bf16.gmra.mrb[64].mxu0 %v10221_v16  ;;  %v760_v16 = vsel %vm708_vm7, %v755_v14, %v759_v48  ;;  %3665 = vmatprep.subr.bf16.mxu1 %v10266_v22  ;;  %v1393_v14 = vshrl.u32 %v9427_v35, 16  ;;  %v9332_v48 = vld [vmem:[%s12787_s1 + $0x1d0] sm:$0xff]  }
  0xee   : > { %1980 = vmatprep.mubr.bf16.mxu0 %v1360_v25  ;;  %v784_v25 = vsel %vm708_vm7, %v779_v19, %v783_v54  ;;  %v10365_v19 = vld [vmem:[#allocation2 + $0xe0] sm:$0xff] }
  0xef   : > { %2547 = vmatmul.mubr.bf16.gmra.mrb[80].mxu1 %v10216_v44  ;;  %v1421_v54 = vshll.u32 %v10365_v19, 16 }
  0xf0   : > { %2554 = vmatprep.mubr.bf16.mxu1 %v760_v16  ;;  %3666 = vmatpush1.bf16.msra.mxu1 %v9328_v31  ;;  %v10335_v31 = vld [vmem:[#allocation2 + $0x58] sm:$0xff]  ;;  %v1395_v16 = vor.u32 %v1393_v14, %v1391_v26 }
  0xf1   : > { %3667 = vmatprep.subr.bf16.mxu1 %v10266_v22  ;;  %v797_v43 = vshll.u32 %v10335_v31, 16 }
  0xf3   : > { %v799_v56 = vrot.slane %v797_v43, 1 }
  0xf4   : > { %3668 = vmatpush1.bf16.msra.mxu1 %v9330_v24 }
  0xf5   : > { %1981 = vmatmul.mubr.bf16.gmra.mrb[68].mxu0 %v9426_v36  ;;  %3669 = vmatprep.subr.bf16.mxu1 %v10266_v22  ;;  %v9428_v36 = vld [vmem:[#allocation2 + $0xd0] sm:$0xff] }
  0xf6   : > { %1986 = vmatprep.mubr.bf16.mxu0 %v1368_v53  ;;  %v793_v53 = vshrl.u32 %v10324_v1, 16  ;;  %v1405_v20 = vshll.u32 %v9428_v36, 16  ;;  %v1409_v24 = vshrl.u32 %v9428_v36, 16 }
  0xf7   : > { %2555 = vmatmul.mubr.bf16.gmra.mrb[84].mxu1 %v10240_v61 }
  0xf8   : > { %2560 = vmatprep.mubr.bf16.mxu1 %v768_v6  ;;  %3670 = vmatpush1.bf16.msra.mxu1 %v9332_v48  ;;  %v795_v55 = vor.u32 %v793_v53, %v791_v38  ;;  %v1407_v7 = vrot.slane %v1405_v20, 1  ;;  %v9336_v53 = vld [vmem:[%s12787_s1 + $0x1e0] sm:$0xff]  }
  0xf9   : > { %3671 = vmatprep.subr.bf16.mxu1 %v10266_v22 }
  0xfa   : > { %v800_v58 = vsel %vm708_vm7, %v795_v55, %v799_v56 }
  0xfc   : > { %3672 = vmatpush1.bf16.msra.mxu1 %v9334_v60 }
  0xfd   : > { %1987 = vmatmul.mubr.bf16.gmra.mrb[72].mxu0 %v10258_v42  ;;  %v1384_v42 = vsel %vm708_vm7, %v1379_v23, %v1383_v30  ;;  %v807_v23 = vrot.slane %v805_v3, 1  ;;  %v10356_v30 = vld [vmem:[#allocation2 + $0x68] sm:$0xff]  ;;  %3673 = vmatprep.subr.bf16.mxu1 %v10266_v22 }
  0xfe   : > { %1994 = vmatprep.mubr.bf16.mxu0 %v1376_v59  ;;  %v801_v59 = vshrl.u32 %v10335_v31, 16  ;;  %v813_v15 = vshll.u32 %v10356_v30, 16  ;;  %v817_v41 = vshrl.u32 %v10356_v30, 16 }
  0xff   : > { %2561 = vmatmul.mubr.bf16.gmra.mrb[88].mxu1 %v10251_v4 }
 0x100   : > { %2568 = vmatprep.mubr.bf16.mxu1 %v776_v12  ;;  %v803_v27 = vor.u32 %v801_v59, %v799_v56  ;;  %v1411_v12 = vor.u32 %v1409_v24, %v1407_v7  ;;  %v815_v26 = vrot.slane %v813_v15, 1  ;;  %3674 = vmatpush1.bf16.msra.mxu1 %v9336_v53  ;;  %v1433_v24 = vshrl.u32 %v10159_v18, 16 }
 0x101   : > { %3675 = vmatprep.subr.bf16.mxu1 %v10266_v22 }
 0x102   : > { %v808_v5 = vsel %vm708_vm7, %v803_v27, %v807_v23  ;;  %v819_v43 = vor.u32 %v817_v41, %v815_v26 }
 0x105   : > { %1995 = vmatmul.mubr.bf16.gmra.mrb[76].mxu0 %v10094_v63  ;;  %v1397_v63 = vshll.u32 %v10139_v40, 16 }
 0x106   : > { %2000 = vmatprep.mubr.bf16.mxu0 %v1384_v42  ;;  %v809_v42 = vshrl.u32 %v10345_v57, 16 }
 0x107   : > { %2569 = vmatmul.mubr.bf16.gmra.mrb[92].mxu1 %v10288_v39  ;;  %v1399_v49 = vrot.slane %v1397_v63, 1 }
 0x108   : > { %2574 = vmatprep.mubr.bf16.mxu1 %v784_v25  ;;  %v811_v47 = vor.u32 %v809_v42, %v807_v23  ;;  %v10369_v25 = vld [vmem:[#allocation2 + $0x70] sm:$0xff] }
 0x109   : > { %v1403_v6 = vor.u32 %v1401_v45, %v1399_v49  ;;  %v821_v38 = vshll.u32 %v10369_v25, 16  ;;  %v10385_v45 = vld [vmem:[#allocation2 + $0x78] sm:$0xff]  ;;  %v825_v59 = vshrl.u32 %v10369_v25, 16 }
 0x10a   : > { %v816_v48 = vsel %vm708_vm7, %v811_v47, %v815_v26 }
 0x10b   : > { %v1408_v8 = vsel %vm708_vm7, %v1403_v6, %v1407_v7 }
 0x10d   : > { %2001 = vmatmul.mubr.bf16.gmra.mrb[80].mxu0 %v9425_v50  ;;  %v1400_v50 = vsel %vm708_vm7, %v1395_v16, %v1399_v49  ;;  %v1425_v49 = vshrl.u32 %v10365_v19, 16 }
 0x10e   : > { %2008 = vmatprep.mubr.bf16.mxu0 %v1392_v28  ;;  %v1423_v28 = vrot.slane %v1421_v54, 1 }
 0x10f   : > { %2575 = vmatmul.mubr.bf16.gmra.mrb[96].mxu1 %v10302_v29 }
 0x110   : > { %2582 = vmatprep.mubr.bf16.mxu1 %v792_v51  ;;  %v1429_v51 = vshll.u32 %v10159_v18, 16  ;;  %v1427_v55 = vor.u32 %v1425_v49, %v1423_v28 }
 0x112   : > { %v1431_v56 = vrot.slane %v1429_v51, 1 }
 0x115   : > { %2009 = vmatmul.mubr.bf16.gmra.mrb[84].mxu0 %v10125_v21  ;;  %v1413_v21 = vshll.u32 %v10149_v11, 16 }
 0x116   : > { %2014 = vmatprep.mubr.bf16.mxu0 %v1400_v50  ;;  %v823_v50 = vrot.slane %v821_v38, 1 }
 0x117   : > { %2583 = vmatmul.mubr.bf16.gmra.mrb[100].mxu1 %v10314_v9  ;;  %v1415_v13 = vrot.slane %v1413_v21, 1  ;;  %v10398_v21 = vld [vmem:[#allocation2 + $0xf0] sm:$0xff] }
 0x118   : > { %2588 = vmatprep.mubr.bf16.mxu1 %v800_v58  ;;  %v824_v58 = vsel %vm708_vm7, %v819_v43, %v823_v50  ;;  %v1437_v60 = vshll.u32 %v10398_v21, 16  ;;  %v827_v27 = vor.u32 %v825_v59, %v823_v50  ;;  %v1441_v26 = vshrl.u32 %v10398_v21, 16 }
 0x119   : > { %v1419_v34 = vor.u32 %v1417_v17, %v1415_v13  ;;  %v833_v17 = vshrl.u32 %v10385_v45, 16 }
 0x11a   : > { %v1439_v42 = vrot.slane %v1437_v60, 1  ;;  %v9432_v60 = vld [vmem:[#allocation2 + $0xe8] sm:$0xff] }
 0x11c   : > { %v1443_v38 = vor.u32 %v1441_v26, %v1439_v42 }
 0x11d   : > { %2015 = vmatmul.mubr.bf16.gmra.mrb[88].mxu0 %v9427_v35  ;;  %v1416_v35 = vsel %vm708_vm7, %v1411_v12, %v1415_v13  ;;  %v10402_v12 = vld [vmem:[#allocation2 + $0x80] sm:$0xff] }
 0x11e   : > { %2022 = vmatprep.mubr.bf16.mxu0 %v1408_v8  ;;  %v1432_v8 = vsel %vm708_vm7, %v1427_v55, %v1431_v56  ;;  %v837_v54 = vshll.u32 %v10402_v12, 16 }
 0x11f   : > { %2589 = vmatmul.mubr.bf16.gmra.mrb[104].mxu1 %v10324_v1 }
 0x120   : > { %2596 = vmatprep.mubr.bf16.mxu1 %v808_v5  ;;  %v1435_v5 = vor.u32 %v1433_v24, %v1431_v56 }
 0x121   : > { %v8788_v32 = vpop.f32.mrb[0].mxu1 }
 0x122   : > { %v10371_v14 = vpop.f32.mrb[1].mxu1  ;;  %v1445_v32 = vshll.u32 %v10171_v37, 16 }
 0x123   : > { %v8789_v63 = vpop.f32.mrb[2].mxu1 }
 0x124   : > { %v10376_v16 = vpop.f32.mrb[3].mxu1  ;;  %v839_v63 = vrot.slane %v837_v54, 1 }
 0x125   : > { %2023 = vmatmul.mubr.bf16.gmra.mrb[92].mxu0 %v10139_v40  ;;  %v1424_v40 = vsel %vm708_vm7, %v1419_v34, %v1423_v28  ;;  %v9338_v34 = vld [vmem:[%s12787_s1 + $0x1e8] sm:$0xff]  }
 0x126   : > { %2028 = vmatprep.mubr.bf16.mxu0 %v1416_v35  ;;  %3676 = vmatpush1.bf16.msra.mxu1 %v9338_v34 }
 0x127   : > { %2597 = vmatmul.mubr.bf16.gmra.mrb[108].mxu1 %v10335_v31  ;;  %3677 = vmatprep.subr.bf16.mxu1 %v10266_v22 }
 0x128   : > { %2602 = vmatprep.mubr.bf16.mxu1 %v816_v48  ;;  %v10419_v48 = vld [vmem:[#allocation2 + $0x88] sm:$0xff] }
 0x129   : > { %v8792_v20 = vpop.f32.mrb[4].mxu1  ;;  %v845_v55 = vshll.u32 %v10419_v48, 16 }
 0x12a   : > { %v10388_v6 = vpop.f32.mrb[5].mxu1  ;;  %v841_v20 = vshrl.u32 %v10402_v12, 16 }
 0x12b   : > { %v8793_v7 = vpop.f32.mrb[6].mxu1 }
 0x12c   : > { %v10393_v3 = vpop.f32.mrb[7].mxu1 }
 0x12d   : > { %2029 = vmatmul.mubr.bf16.gmra.mrb[96].mxu0 %v9428_v36  ;;  %v829_v36 = vshll.u32 %v10385_v45, 16 }
 0x12e   : > { %2036 = vmatprep.mubr.bf16.mxu0 %v1424_v40  ;;  %v1447_v40 = vrot.slane %v1445_v32, 1 }
 0x12f   : > { %2603 = vmatmul.mubr.bf16.gmra.mrb[112].mxu1 %v10345_v57  ;;  %v831_v23 = vrot.slane %v829_v36, 1 }
 0x130   : > { %2610 = vmatprep.mubr.bf16.mxu1 %v824_v58  ;;  %v1448_v36 = vsel %vm708_vm7, %v1443_v38, %v1447_v40 }
 0x131   : > { %v8796_v13 = vpop.f32.mrb[8].mxu1  ;;  %v832_v18 = vsel %vm708_vm7, %v827_v27, %v831_v23  ;;  %v835_v28 = vor.u32 %v833_v17, %v831_v23  ;;  %v843_v27 = vor.u32 %v841_v20, %v839_v63  ;;  %v847_v23 = vrot.slane %v845_v55, 1 }
 0x132   : > { %v10404_v15 = vpop.f32.mrb[9].mxu1  ;;  %v10441_v13 = vld [vmem:[#allocation2 + $0x90] sm:$0xff] }
 0x133   : > { %v8797_v35 = vpop.f32.mrb[10].mxu1  ;;  %v848_v54 = vsel %vm708_vm7, %v843_v27, %v847_v23  ;;  %v853_v26 = vshll.u32 %v10441_v13, 16 }
 0x134   : > { %v10409_v47 = vpop.f32.mrb[11].mxu1 }
 0x135   : > { %2037 = vmatmul.mubr.bf16.gmra.mrb[100].mxu0 %v10149_v11  ;;  %v1440_v11 = vsel %vm708_vm7, %v1435_v5, %v1439_v42 }
 0x136   : > { %2042 = vmatprep.mubr.bf16.mxu0 %v1432_v8  ;;  %v10438_v8 = vld [vmem:[#allocation2 + $0x100] sm:$0xff] }
 0x137   : > { %2611 = vmatmul.mubr.bf16.gmra.mrb[116].mxu1 %v10356_v30  ;;  %v1453_v24 = vshll.u32 %v10438_v8, 16  ;;  %v1457_v38 = vshrl.u32 %v10438_v8, 16 }
 0x138   : > { %2616 = vmatprep.mubr.bf16.mxu1 %v832_v18 }
 0x139   : > { %v8800_v41 = vpop.f32.mrb[12].mxu1  ;;  %v1455_v42 = vrot.slane %v1453_v24, 1 }
 0x13a   : > { %v10422_v49 = vpop.f32.mrb[13].mxu1 }
 0x13b   : > { %v8801_v53 = vpop.f32.mrb[14].mxu1  ;;  %v1459_v55 = vor.u32 %v1457_v38, %v1455_v42 }
 0x13c   : > { %v10430_v56 = vpop.f32.mrb[15].mxu1 }
 0x13d   : > { %2043 = vmatmul.mubr.bf16.gmra.mrb[104].mxu0 %v10365_v19  ;;  %v840_v19 = vsel %vm708_vm7, %v835_v28, %v839_v63  ;;  %v9340_v28 = vld [vmem:[%s12787_s1 + $0x1f0] sm:$0xff]  }
 0x13e   : > { %2050 = vmatprep.mubr.bf16.mxu0 %v1440_v11  ;;  %v849_v11 = vshrl.u32 %v10419_v48, 16  ;;  %3678 = vmatpush1.bf16.msra.mxu1 %v9340_v28 }
 0x13f   : > { %2617 = vmatmul.mubr.bf16.gmra.mrb[120].mxu1 %v10369_v25  ;;  %3679 = vmatprep.subr.bf16.mxu1 %v10266_v22 }
 0x140   : > { %v1862_v51 = vpop.f32.mrb[0].mxu0  ;;  %2624 = vmatprep.mubr.bf16.mxu1 %v840_v19  ;;  %v851_v53 = vor.u32 %v849_v11, %v847_v23  ;;  %v10462_v19 = vld [vmem:[#allocation2 + $0x98] sm:$0xff] }
 0x141   : > { %v10425_v43 = vadd.f32 %v10371_v14, %v1862_v51  ;;  %v1864_v50 = vpop.f32.mrb[1].mxu0  ;;  %v1449_v14 = vshrl.u32 %v10171_v37, 16  ;;  %v9341_v51 = vld [vmem:[%s12787_s1 + $0x1f8] sm:$0xff]   ;;  %v861_v27 = vshll.u32 %v10462_v19, 16 }
 0x142   : > { %v1865_v7 = vpop.f32.mrb[2].mxu0  ;;  %v8804_v5 = vpop.f32.mrb[16].mxu1  ;;  %v855_v50 = vrot.slane %v853_v26, 1  ;;  %3680 = vmatpush1.bf16.msra.mxu1 %v9341_v51 }
 0x143   : > { %v10434_v58 = vadd.f32 %v10376_v16, %v1865_v7  ;;  %v1867_v59 = vpop.f32.mrb[3].mxu0  ;;  %v1451_v16 = vor.u32 %v1449_v14, %v1447_v40  ;;  %v10443_v35 = vpop.f32.mrb[17].mxu1  ;;  %v1461_v40 = vshll.u32 %v10181_v52, 16  ;;  %v863_v26 = vrot.slane %v861_v27, 1  ;;  %v9435_v27 = vld [vmem:[#allocation2] sm:$0xff] }
 0x144   : > { %v8805_v17 = vpop.f32.mrb[18].mxu1 }
 0x145   : > { %2051 = vmatmul.mubr.bf16.gmra.mrb[108].mxu0 %v9432_v60  ;;  %v10448_v32 = vpop.f32.mrb[19].mxu1  ;;  %v1456_v41 = vsel %vm708_vm7, %v1451_v16, %v1455_v42  ;;  %v1463_v7 = vrot.slane %v1461_v40, 1  ;;  %v857_v60 = vshrl.u32 %v10441_v13, 16 }
 0x146   : > { %2056 = vmatprep.mubr.bf16.mxu0 %v1448_v36 }
 0x147   : > { %2625 = vmatmul.mubr.bf16.gmra.mrb[124].mxu1 %v10385_v45  ;;  %v859_v11 = vor.u32 %v857_v60, %v855_v50 }
 0x148   : > { %v1870_v18 = vpop.f32.mrb[4].mxu0  ;;  %2630 = vmatprep.mubr.bf16.mxu1 %v848_v54  ;;  %v9434_v54 = vld [vmem:[#allocation2 + $0xf8] sm:$0xff] }
 0x149   : > { %v1871_v37 = vpop.f32.mrb[5].mxu0  ;;  %v1464_v18 = vsel %vm708_vm7, %v1459_v55, %v1463_v7 }
 0x14a   : > { %v1872_v34 = vpop.f32.mrb[6].mxu0  ;;  %v8808_v20 = vpop.f32.mrb[20].mxu1  ;;  %v1469_v37 = vshll.u32 %v10190_v62, 16  ;;  %v865_v62 = vshrl.u32 %v10462_v19, 16 }
 0x14b   : > { %v1873_v63 = vpop.f32.mrb[7].mxu0  ;;  %v10464_v59 = vpop.f32.mrb[21].mxu1  ;;  %v10480_v34 = vld [vmem:[#allocation2 + $0xa0] sm:$0xff] }
 0x14c   : > { %v8809_v36 = vpop.f32.mrb[22].mxu1  ;;  %v869_v20 = vshll.u32 %v10480_v34, 16 }
 0x14d   : > { %2057 = vmatmul.mubr.bf16.gmra.mrb[112].mxu0 %v10398_v21  ;;  %v856_v21 = vsel %vm708_vm7, %v851_v53, %v855_v50  ;;  %v10472_v23 = vpop.f32.mrb[23].mxu1  ;;  %v864_v53 = vsel %vm708_vm7, %v859_v11, %v863_v26  ;;  %v867_v36 = vor.u32 %v865_v62, %v863_v26  ;;  %v873_v26 = vshrl.u32 %v10480_v34, 16 }
 0x14e   : > { %2064 = vmatprep.mubr.bf16.mxu0 %v1456_v41  ;;  %v1471_v41 = vrot.slane %v1469_v37, 1 }
 0x14f   : > { %2631 = vmatmul.mubr.bf16.gmra.mrb[128].mxu1 %v10402_v12 }
 0x150   : > { %v1876_v52 = vpop.f32.mrb[8].mxu0  ;;  %2638 = vmatprep.mubr.bf16.mxu1 %v856_v21  ;;  %v10492_v21 = vld [vmem:[#allocation2 + $0xa8] sm:$0xff] }
 0x151   : > { %v10467_v14 = vadd.f32 %v10388_v6, %v1876_v52  ;;  %v1878_v24 = vpop.f32.mrb[9].mxu0  ;;  %v9433_v6 = vld [vmem:[#allocation2 + $0x108] sm:$0xff] }
 0x152   : > { %v1879_v5 = vpop.f32.mrb[10].mxu0  ;;  %v1465_v17 = vshrl.u32 %v9433_v6, 16  ;;  %v8812_v28 = vpop.f32.mrb[24].mxu1  ;;  %v871_v24 = vrot.slane %v869_v20, 1  ;;  %v1038_v20 = vrot.slane %v10197_v2, 1 }
 0x153   : > { %v10476_v16 = vadd.f32 %v10393_v3, %v1879_v5  ;;  %v1881_v42 = vpop.f32.mrb[11].mxu0  ;;  %v10482_v3 = vpop.f32.mrb[25].mxu1  ;;  %v1035_v5 = vrot.slane %v9435_v27, 1 }
 0x154   : > { %v1467_v63 = vor.u32 %v1465_v17, %v1463_v7  ;;  %v8813_v40 = vpop.f32.mrb[26].mxu1  ;;  %v9436_v42 = vld [vmem:[#allocation2 + $0x8] sm:$0xff] }
 0x155   : > { %2065 = vmatmul.mubr.bf16.gmra.mrb[116].mxu0 %v9434_v54  ;;  %v10487_v55 = vpop.f32.mrb[27].mxu1 }
 0x156   : > { %2070 = vmatprep.mubr.bf16.mxu0 %v1464_v18  ;;  %v1472_v7 = vsel %vm708_vm7, %v1467_v63, %v1471_v41  ;;  %v1036_v18 = vrot.slane %v9436_v42, 1  ;;  %v877_v63 = vshll.u32 %v10492_v21, 16 }
 0x157   : > { %2639 = vmatmul.mubr.bf16.gmra.mrb[132].mxu1 %v10419_v48 }
 0x158   : > { %v1884_v38 = vpop.f32.mrb[12].mxu0  ;;  %2644 = vmatprep.mubr.bf16.mxu1 %v864_v53  ;;  %v1037_v53 = vsel %vm1034_vm8, %v1035_v5, %v1036_v18  ;;  %v879_v62 = vrot.slane %v877_v63, 1  ;;  %v881_v5 = vshrl.u32 %v10492_v21, 16  ;;  %v1039_v2 = vsel %vm1034_vm8, %v1036_v18, %v1038_v20 }
 0x159   : > { %v1885_v51 = vpop.f32.mrb[13].mxu0  ;;  %v1042_v63 = vrot.slane %v10216_v44, 1 }
 0x15a   : > { %v1886_v50 = vpop.f32.mrb[14].mxu0  ;;  %v8816_v60 = vpop.f32.mrb[28].mxu1 }
 0x15b   : > { %v1887_v52 = vpop.f32.mrb[15].mxu0  ;;  %v10494_v17 = vpop.f32.mrb[29].mxu1  ;;  %v10510_v50 = vld [vmem:[#allocation2 + $0xb0] sm:$0xff] }
 0x15c   : > { %v8817_v54 = vpop.f32.mrb[30].mxu1 }
 0x15d   : > { %2071 = vmatmul.mubr.bf16.gmra.mrb[120].mxu0 %v10438_v8  ;;  %v872_v8 = vsel %vm708_vm7, %v867_v36, %v871_v24  ;;  %v10502_v41 = vpop.f32.mrb[31].mxu1 }
 0x15e   : > { %2078 = vmatprep.mubr.bf16.mxu0 %v1472_v7  ;;  %v1040_v7 = vrot.slane %v10206_v33, 1 }
 0x15f   : > { %2645 = vmatmul.mubr.bf16.gmra.mrb[136].mxu1 %v10441_v13 }
 0x160   : > { %v1890_v37 = vpop.f32.mrb[16].mxu0  ;;  %2652 = vmatprep.mubr.bf16.mxu1 %v872_v8  ;;  %v1041_v33 = vsel %vm1034_vm8, %v1038_v20, %v1040_v7  ;;  %v883_v8 = vor.u32 %v881_v5, %v879_v62 }
 0x161   : > { %v10497_v11 = vadd.f32 %v10404_v15, %v1890_v37  ;;  %v1892_v28 = vpop.f32.mrb[17].mxu0  ;;  %v875_v15 = vor.u32 %v873_v26, %v871_v24 }
 0x162   : > { %v1893_v38 = vpop.f32.mrb[18].mxu0  ;;  %v8820_v52 = vpop.f32.mrb[32].mxu1  ;;  %v9331_v28 = vld [vmem:[%s12787_s1 + $0x208] sm:$0xff]  }
 0x163   : > { %v10506_v40 = vadd.f32 %v10409_v47, %v1893_v38  ;;  %v1895_v51 = vpop.f32.mrb[19].mxu0  ;;  %v10513_v36 = vpop.f32.mrb[33].mxu1  ;;  %v880_v42 = vsel %vm708_vm7, %v875_v15, %v879_v62  ;;  %v10528_v38 = vld [vmem:[#allocation2 + $0xb8] sm:$0xff]  ;;  %v9333_v15 = vld [vmem:[%s12787_s1 + $0x210] sm:$0xff]  }
 0x164   : > { %v8821_v47 = vpop.f32.mrb[34].mxu1  ;;  %v1044_v51 = vrot.slane %v10240_v61, 1 }
 0x165   : > { %2079 = vmatmul.mubr.bf16.gmra.mrb[124].mxu0 %v9433_v6  ;;  %v885_v6 = vshll.u32 %v10510_v50, 16  ;;  %v10518_v24 = vpop.f32.mrb[35].mxu1  ;;  %v893_v47 = vshll.u32 %v10528_v38, 16 }
 0x166   : > { %8866 = vmatprep.mubr.bf16.mxu0 %v1037_v53 }
 0x167   : > { %2653 = vmatmul.mubr.bf16.gmra.mrb[140].mxu1 %v10462_v19  ;;  %v887_v26 = vrot.slane %v885_v6, 1  ;;  %v1045_v6 = vsel %vm1034_vm8, %v1042_v63, %v1044_v51 }
 0x168   : > { %v1898_v60 = vpop.f32.mrb[20].mxu0  ;;  %2658 = vmatprep.mubr.bf16.mxu1 %v880_v42  ;;  %v1043_v42 = vsel %vm1034_vm8, %v1040_v7, %v1042_v63  ;;  %v1046_v7 = vrot.slane %v10251_v4, 1  ;;  %v9337_v63 = vld [vmem:[%s12787_s1 + $0x220] sm:$0xff]   ;;  %v897_v4 = vshrl.u32 %v10528_v38, 16 }
 0x169   : > { %v1899_v27 = vpop.f32.mrb[21].mxu0  ;;  %v888_v44 = vsel %vm708_vm7, %v883_v8, %v887_v26  ;;  %v889_v60 = vshrl.u32 %v10510_v50, 16 }
 0x16a   : > { %v1900_v37 = vpop.f32.mrb[22].mxu0  ;;  %v8824_v18 = vpop.f32.mrb[36].mxu1 }
 0x16b   : > { %v1901_v54 = vpop.f32.mrb[23].mxu0  ;;  %v10531_v53 = vpop.f32.mrb[37].mxu1  ;;  %v9335_v37 = vld [vmem:[%s12787_s1 + $0x218] sm:$0xff]  }
 0x16c   : > { %v8825_v62 = vpop.f32.mrb[38].mxu1  ;;  %v895_v54 = vrot.slane %v893_v47, 1 }
 0x16d   : > { %8867 = vmatmul.mubr.bf16.vlgmr.msra.gmra.mrb[128].mxu0 %v1039_v2  ;;  %v10542_v61 = vpop.f32.mrb[39].mxu1  ;;  %v891_v2 = vor.u32 %v889_v60, %v887_v26 }
 0x16e   : > { %8931 = vmatpush3.bf16.msra.mxu0 %v10286_v46  ;;  %8870 = vmatprep.mubr.bf16.mxu0 %v1041_v33  ;;  %v10554_v33 = vld [vmem:[#allocation2 + $0xc0] sm:$0xff] }
 0x16f   : > { %8932 = vmatprep.subr.bf16.mxu0 %v9331_v28  ;;  %2659 = vmatmul.mubr.bf16.gmra.mrb[144].mxu1 %v10480_v34  ;;  %v896_v62 = vsel %vm708_vm7, %v891_v2, %v895_v54 }
 0x170   : > { %v1904_v20 = vpop.f32.mrb[24].mxu0  ;;  %2666 = vmatprep.mubr.bf16.mxu1 %v888_v44 }
 0x171   : > { %v10537_v52 = vadd.f32 %v10422_v49, %v1904_v20  ;;  %v1906_v46 = vpop.f32.mrb[25].mxu0 }
 0x172   : > { %v1907_v27 = vpop.f32.mrb[26].mxu0  ;;  %8933 = vmatpush3.bf16.msra.mxu0 %v9331_v28  ;;  %v8828_v28 = vpop.f32.mrb[40].mxu1  ;;  %v901_v46 = vshll.u32 %v10554_v33, 16 }
 0x173   : > { %v10547_v5 = vadd.f32 %v10430_v56, %v1907_v27  ;;  %v1909_v49 = vpop.f32.mrb[27].mxu0  ;;  %8934 = vmatprep.subr.bf16.mxu0 %v9333_v15  ;;  %v1048_v56 = vrot.slane %v10288_v39, 1  ;;  %v10557_v8 = vpop.f32.mrb[41].mxu1  ;;  %v1047_v39 = vsel %vm1034_vm8, %v1044_v51, %v1046_v7  ;;  %v9339_v27 = vld [vmem:[%s12787_s1 + $0x228] sm:$0xff]  }
 0x174   : > { %v8829_v20 = vpop.f32.mrb[42].mxu1  ;;  %v903_v49 = vrot.slane %v901_v46, 1  ;;  %v10574_v51 = vld [vmem:[#allocation2 + $0xc8] sm:$0xff] }
 0x175   : > { %8871 = vmatmul.mubr.bf16.gmra.mrb[132].mxu0 %v1043_v42  ;;  %v10565_v44 = vpop.f32.mrb[43].mxu1  ;;  %v1049_v47 = vsel %vm1034_vm8, %v1046_v7, %v1048_v56  ;;  %v899_v42 = vor.u32 %v897_v4, %v895_v54  ;;  %v9342_v7 = vld [vmem:[%s12787_s1 + $0x230] sm:$0xff]  }
 0x176   : > { %8874 = vmatprep.mubr.bf16.mxu0 %v1045_v6  ;;  %8935 = vmatpush3.bf16.msra.mxu0 %v9333_v15  ;;  %v1050_v6 = vrot.slane %v10302_v29, 1 }
 0x177   : > { %8936 = vmatprep.subr.bf16.mxu0 %v9335_v37  ;;  %2667 = vmatmul.mubr.bf16.gmra.mrb[148].mxu1 %v10492_v21  ;;  %v904_v29 = vsel %vm708_vm7, %v899_v42, %v903_v49 }
 0x178   : > { %v1912_v18 = vpop.f32.mrb[28].mxu0  ;;  %2672 = vmatprep.mubr.bf16.mxu1 %v896_v62  ;;  %v905_v62 = vshrl.u32 %v10554_v33, 16  ;;  %v1051_v46 = vsel %vm1034_vm8, %v1048_v56, %v1050_v6  ;;  %v1054_v56 = vrot.slane %v10324_v1, 1 }
 0x179   : > { %v1913_v26 = vpop.f32.mrb[29].mxu0 }
 0x17a   : > { %v1914_v15 = vpop.f32.mrb[30].mxu0  ;;  %8937 = vmatpush3.bf16.msra.mxu0 %v9335_v37  ;;  %v8832_v2 = vpop.f32.mrb[44].mxu1  ;;  %v1052_v37 = vrot.slane %v10314_v9, 1 }
 0x17b   : > { %v1915_v60 = vpop.f32.mrb[31].mxu0  ;;  %8938 = vmatprep.subr.bf16.mxu0 %v9337_v63  ;;  %v10577_v28 = vpop.f32.mrb[45].mxu1  ;;  %v10600_v2 = vld [vmem:[#allocation2 + $0xd0] sm:$0xff] }
 0x17c   : > { %v8833_v20 = vpop.f32.mrb[46].mxu1  ;;  %v9343_v60 = vld [vmem:[%s12787_s1 + $0x238] sm:$0xff]   ;;  %v917_v1 = vshll.u32 %v10600_v2, 16 }
 0x17d   : > { %8875 = vmatmul.mubr.bf16.gmra.mrb[136].mxu0 %v1047_v39  ;;  %v10588_v9 = vpop.f32.mrb[47].mxu1  ;;  %v1053_v39 = vsel %vm1034_vm8, %v1050_v6, %v1052_v37  ;;  %v1056_v6 = vrot.slane %v10335_v31, 1 }
 0x17e   : > { %8878 = vmatprep.mubr.bf16.mxu0 %v1049_v47  ;;  %8939 = vmatpush3.bf16.msra.mxu0 %v9337_v63  ;;  %v909_v63 = vshll.u32 %v10574_v51, 16  ;;  %v907_v47 = vor.u32 %v905_v62, %v903_v49  ;;  %v913_v49 = vshrl.u32 %v10574_v51, 16 }
 0x17f   : > { %8940 = vmatprep.subr.bf16.mxu0 %v9339_v27  ;;  %2673 = vmatmul.mubr.bf16.gmra.mrb[152].mxu1 %v10510_v50  ;;  %v1057_v31 = vsel %vm1034_vm8, %v1054_v56, %v1056_v6 }
 0x180   : > { %v1918_v18 = vpop.f32.mrb[32].mxu0  ;;  %2680 = vmatprep.mubr.bf16.mxu1 %v904_v29  ;;  %v911_v42 = vrot.slane %v909_v63, 1  ;;  %v1055_v63 = vsel %vm1034_vm8, %v1052_v37, %v1054_v56  ;;  %v1060_v37 = vrot.slane %v10356_v30, 1 }
 0x181   : > { %v10583_v54 = vadd.f32 %v10443_v35, %v1918_v18  ;;  %v1920_v26 = vpop.f32.mrb[33].mxu0 }
 0x182   : > { %v1921_v4 = vpop.f32.mrb[34].mxu0  ;;  %8941 = vmatpush3.bf16.msra.mxu0 %v9339_v27  ;;  %v8836_v27 = vpop.f32.mrb[48].mxu1  ;;  %v912_v29 = vsel %vm708_vm7, %v907_v47, %v911_v42  ;;  %v1058_v47 = vrot.slane %v10345_v57, 1 }
 0x183   : > { %v10593_v15 = vadd.f32 %v10448_v32, %v1921_v4  ;;  %v1923_v35 = vpop.f32.mrb[35].mxu0  ;;  %8942 = vmatprep.subr.bf16.mxu0 %v9342_v7  ;;  %v10602_v32 = vpop.f32.mrb[49].mxu1  ;;  %v10615_v27 = vld [vmem:[#allocation2 + $0xd8] sm:$0xff] }
 0x184   : > { %v8837_v20 = vpop.f32.mrb[50].mxu1  ;;  %v919_v35 = vrot.slane %v917_v1, 1  ;;  %v925_v57 = vshll.u32 %v10615_v27, 16  ;;  %v1059_v1 = vsel %vm1034_vm8, %v1056_v6, %v1058_v47  ;;  %v1064_v6 = vrot.slane %v10385_v45, 1 }
 0x185   : > { %8879 = vmatmul.mubr.bf16.gmra.mrb[140].mxu0 %v1051_v46  ;;  %v10606_v4 = vpop.f32.mrb[51].mxu1  ;;  %v915_v46 = vor.u32 %v913_v49, %v911_v42 }
 0x186   : > { %8882 = vmatprep.mubr.bf16.mxu0 %v1053_v39  ;;  %8943 = vmatpush3.bf16.msra.mxu0 %v9342_v7 }
 0x187   : > { %8944 = vmatprep.subr.bf16.mxu0 %v9343_v60  ;;  %2681 = vmatmul.mubr.bf16.gmra.mrb[156].mxu1 %v10528_v38 }
 0x188   : > { %v1926_v18 = vpop.f32.mrb[36].mxu0  ;;  %2686 = vmatprep.mubr.bf16.mxu1 %v912_v29  ;;  %v921_v29 = vshrl.u32 %v10600_v2, 16 }
 0x189   : > { %v1927_v26 = vpop.f32.mrb[37].mxu0 }
 0x18a   : > { %v1928_v62 = vpop.f32.mrb[38].mxu0  ;;  %8945 = vmatpush3.bf16.msra.mxu0 %v9343_v60  ;;  %v8840_v39 = vpop.f32.mrb[52].mxu1  ;;  %v920_v26 = vsel %vm708_vm7, %v915_v46, %v919_v35  ;;  %v1062_v46 = vrot.slane %v10369_v25, 1 }
 0x18b   : > { %v1929_v7 = vpop.f32.mrb[39].mxu0  ;;  %5673 = vmatprep.subr.bf16.mxu0 %v10266_v22  ;;  %v10617_v18 = vpop.f32.mrb[53].mxu1  ;;  %v10635_v39 = vld [vmem:[#allocation2 + $0xe0] sm:$0xff] }
 0x18c   : > { %v8841_v20 = vpop.f32.mrb[54].mxu1  ;;  %v927_v7 = vrot.slane %v925_v57, 1  ;;  %v1063_v25 = vsel %vm1034_vm8, %v1060_v37, %v1062_v46 }
 0x18d   : > { %8883 = vmatmul.mubr.bf16.gmra.mrb[144].mxu0 %v1055_v63  ;;  %v10624_v42 = vpop.f32.mrb[55].mxu1  ;;  %v923_v63 = vor.u32 %v921_v29, %v919_v35  ;;  %v929_v35 = vshrl.u32 %v10615_v27, 16 }
 0x18e   : > { %8886 = vmatprep.mubr.bf16.mxu0 %v1057_v31 }
 0x18f   : > { %2687 = vmatmul.mubr.bf16.gmra.mrb[160].mxu1 %v10554_v33  ;;  %v931_v45 = vor.u32 %v929_v35, %v927_v7  ;;  %v937_v35 = vshrl.u32 %v10635_v39, 16 }
 0x190   : > { %v1932_v60 = vpop.f32.mrb[40].mxu0  ;;  %2694 = vmatprep.mubr.bf16.mxu1 %v920_v26  ;;  %v933_v26 = vshll.u32 %v10635_v39, 16 }
 0x191   : > { %v10621_v56 = vadd.f32 %v10464_v59, %v1932_v60  ;;  %v1934_v22 = vpop.f32.mrb[41].mxu0  ;;  %v1061_v59 = vsel %vm1034_vm8, %v1058_v47, %v1060_v37  ;;  %v928_v47 = vsel %vm708_vm7, %v923_v63, %v927_v7  ;;  %v1066_v63 = vrot.slane %v10402_v12, 1 }
 0x192   : > { %v1935_v49 = vpop.f32.mrb[42].mxu0  ;;  %v8844_v31 = vpop.f32.mrb[56].mxu1 }
 0x193   : > { %v10631_v30 = vadd.f32 %v10472_v23, %v1935_v49  ;;  %v1937_v62 = vpop.f32.mrb[43].mxu0  ;;  %v10637_v60 = vpop.f32.mrb[57].mxu1  ;;  %v10649_v31 = vld [vmem:[#allocation2 + $0xe8] sm:$0xff] }
 0x194   : > { %v8845_v23 = vpop.f32.mrb[58].mxu1  ;;  %v935_v62 = vrot.slane %v933_v26, 1  ;;  %v941_v12 = vshll.u32 %v10649_v31, 16 }
 0x195   : > { %8887 = vmatmul.mubr.bf16.gmra.mrb[148].mxu0 %v1059_v1  ;;  %v10640_v49 = vpop.f32.mrb[59].mxu1  ;;  %v1065_v1 = vsel %vm1034_vm8, %v1062_v46, %v1064_v6  ;;  %v1068_v23 = vrot.slane %v10419_v48, 1 }
 0x196   : > { %8890 = vmatprep.mubr.bf16.mxu0 %v1061_v59  ;;  %v936_v7 = vsel %vm708_vm7, %v931_v45, %v935_v62 }
 0x197   : > { %2695 = vmatmul.mubr.bf16.gmra.mrb[164].mxu1 %v10574_v51 }
 0x198   : > { %v1940_v20 = vpop.f32.mrb[44].mxu0  ;;  %2700 = vmatprep.mubr.bf16.mxu1 %v928_v47 }
 0x199   : > { %v1941_v22 = vpop.f32.mrb[45].mxu0 }
 0x19a   : > { %v1942_v29 = vpop.f32.mrb[46].mxu0  ;;  %v8848_v59 = vpop.f32.mrb[60].mxu1 }
 0x19b   : > { %v1943_v57 = vpop.f32.mrb[47].mxu0  ;;  %v10651_v20 = vpop.f32.mrb[61].mxu1  ;;  %v943_v59 = vrot.slane %v941_v12, 1  ;;  %v945_v12 = vshrl.u32 %v10649_v31, 16 }
 0x19c   : > { %v8849_v37 = vpop.f32.mrb[62].mxu1 }
 0x19d   : > { %8891 = vmatmul.mubr.bf16.gmra.mrb[152].mxu0 %v1063_v25  ;;  %v10657_v46 = vpop.f32.mrb[63].mxu1  ;;  %v1067_v25 = vsel %vm1034_vm8, %v1064_v6, %v1066_v63  ;;  %v1070_v37 = vrot.slane %v10441_v13, 1 }
 0x19e   : > { %8894 = vmatprep.mubr.bf16.mxu0 %v1065_v1  ;;  %v939_v1 = vor.u32 %v937_v35, %v935_v62 }
 0x19f   : > { %2701 = vmatmul.mubr.bf16.gmra.mrb[168].mxu1 %v10600_v2 }
 0x1a0   : > { %v1946_v22 = vpop.f32.mrb[48].mxu0  ;;  %2708 = vmatprep.mubr.bf16.mxu1 %v936_v7  ;;  %v944_v35 = vsel %vm708_vm7, %v939_v1, %v943_v59  ;;  %v1074_v1 = vrot.slane %v10480_v34, 1 }
 0x1a1   : > { %v10655_v29 = vadd.f32 %v10482_v3, %v1946_v22  ;;  %v1948_v47 = vpop.f32.mrb[49].mxu0  ;;  %v1069_v3 = vsel %vm1034_vm8, %v1066_v63, %v1068_v23  ;;  %v10669_v22 = vld [vmem:[#allocation2 + $0xf0] sm:$0xff] }
 0x1a2   : > { %v1949_v26 = vpop.f32.mrb[50].mxu0  ;;  %v2520_v45 = vpop.f32.mrb[64].mxu1  ;;  %v949_v13 = vshll.u32 %v10669_v22, 16 }
 0x1a3   : > { %v10665_v48 = vadd.f32 %v10487_v55, %v1949_v26  ;;  %v1951_v57 = vpop.f32.mrb[51].mxu0  ;;  %v10672_v6 = vadd.f32 %v2520_v45, %v10425_v43  ;;  %v2522_v47 = vpop.f32.mrb[65].mxu1  ;;  %v1072_v55 = vrot.slane %v10462_v19, 1  ;;  %v1071_v43 = vsel %vm1034_vm8, %v1068_v23, %v1070_v37 }
 0x1a4   : > { %v2523_v26 = vpop.f32.mrb[66].mxu1  ;;  %v951_v45 = vrot.slane %v949_v13, 1 }
 0x1a5   : > { %8895 = vmatmul.mubr.bf16.gmra.mrb[156].mxu0 %v1067_v25  ;;  %v10676_v63 = vadd.f32 %v2523_v26, %v10434_v58  ;;  %v2525_v62 = vpop.f32.mrb[67].mxu1  ;;  %v1073_v19 = vsel %vm1034_vm8, %v1070_v37, %v1072_v55  ;;  %v947_v58 = vor.u32 %v945_v12, %v943_v59  ;;  %v10685_v26 = vld [vmem:[#allocation2 + $0xf8] sm:$0xff]  ;;  %v953_v59 = vshrl.u32 %v10669_v22, 16 }
 0x1a6   : > { %8898 = vmatprep.mubr.bf16.mxu0 %v1069_v3  ;;  %v957_v12 = vshll.u32 %v10685_v26, 16  ;;  %v1075_v34 = vsel %vm1034_vm8, %v1072_v55, %v1074_v1 }
 0x1a7   : > { %2709 = vmatmul.mubr.bf16.gmra.mrb[172].mxu1 %v10615_v27 }
 0x1a8   : > { %v1954_v57 = vpop.f32.mrb[52].mxu0  ;;  %2714 = vmatprep.mubr.bf16.mxu1 %v944_v35  ;;  %v952_v35 = vsel %vm708_vm7, %v947_v58, %v951_v45  ;;  %v10700_v58 = vld [vmem:[#allocation2 + $0x100] sm:$0xff] }
 0x1a9   : > { %v1955_v7 = vpop.f32.mrb[53].mxu0 }
 0x1aa   : > { %v1956_v25 = vpop.f32.mrb[54].mxu0  ;;  %v2528_v47 = vpop.f32.mrb[68].mxu1  ;;  %v1076_v7 = vrot.slane %v10492_v21, 1 }
 0x1ab   : > { %v1957_v3 = vpop.f32.mrb[55].mxu0  ;;  %v2529_v57 = vpop.f32.mrb[69].mxu1  ;;  %v959_v47 = vrot.slane %v957_v12, 1 }
 0x1ac   : > { %v2530_v62 = vpop.f32.mrb[70].mxu1 }
 0x1ad   : > { %8899 = vmatmul.mubr.bf16.gmra.mrb[160].mxu0 %v1071_v43  ;;  %v2531_v3 = vpop.f32.mrb[71].mxu1  ;;  %v1078_v62 = vrot.slane %v10510_v50, 1 }
 0x1ae   : > { %8902 = vmatprep.mubr.bf16.mxu0 %v1073_v19  ;;  %v955_v19 = vor.u32 %v953_v59, %v951_v45 }
 0x1af   : > { %2715 = vmatmul.mubr.bf16.gmra.mrb[176].mxu1 %v10635_v39 }
 0x1b0   : > { %v1960_v23 = vpop.f32.mrb[56].mxu0  ;;  %2722 = vmatprep.mubr.bf16.mxu1 %v952_v35  ;;  %v965_v35 = vshll.u32 %v10700_v58, 16 }
 0x1b1   : > { %v10689_v25 = vadd.f32 %v10494_v17, %v1960_v23  ;;  %v1962_v37 = vpop.f32.mrb[57].mxu0  ;;  %v1077_v17 = vsel %vm1034_vm8, %v1074_v1, %v1076_v7  ;;  %v961_v1 = vshrl.u32 %v10685_v26, 16 }
 0x1b2   : > { %v1963_v13 = vpop.f32.mrb[58].mxu0  ;;  %v2534_v57 = vpop.f32.mrb[72].mxu1 }
 0x1b3   : > { %v10697_v21 = vadd.f32 %v10502_v41, %v1963_v13  ;;  %v1965_v43 = vpop.f32.mrb[59].mxu0  ;;  %v10704_v55 = vadd.f32 %v2534_v57, %v10467_v14  ;;  %v2536_v23 = vpop.f32.mrb[73].mxu1  ;;  %v1080_v41 = vrot.slane %v10528_v38, 1  ;;  %v960_v13 = vsel %vm708_vm7, %v955_v19, %v959_v47 }
 0x1b4   : > { %v2537_v3 = vpop.f32.mrb[74].mxu1  ;;  %v1079_v14 = vsel %vm1034_vm8, %v1076_v7, %v1078_v62  ;;  %v967_v57 = vrot.slane %v965_v35, 1  ;;  %v1082_v19 = vrot.slane %v10554_v33, 1 }
 0x1b5   : > { %8903 = vmatmul.mubr.bf16.gmra.mrb[164].mxu0 %v1075_v34  ;;  %v10710_v45 = vadd.f32 %v2537_v3, %v10476_v16  ;;  %v2539_v12 = vpop.f32.mrb[75].mxu1  ;;  %v10714_v34 = vld [vmem:[#allocation2 + $0x20] sm:$0xff]  ;;  %v1081_v43 = vsel %vm1034_vm8, %v1078_v62, %v1080_v41  ;;  %v10720_v3 = vld [vmem:[#allocation2 + $0x28] sm:$0xff] }
 0x1b6   : > { %8906 = vmatprep.mubr.bf16.mxu0 %v1077_v17  ;;  %v963_v17 = vor.u32 %v961_v1, %v959_v47  ;;  %v3037_v16 = vshll.u32 %v10714_v34, 16  ;;  %v3035_v35 = vshrl.u32 %v10714_v34, 16 }
 0x1b7   : > { %2723 = vmatmul.mubr.bf16.gmra.mrb[180].mxu1 %v10649_v31 }
 0x1b8   : > { %v1968_v37 = vpop.f32.mrb[60].mxu0  ;;  %2728 = vmatprep.mubr.bf16.mxu1 %v960_v13  ;;  %v3039_v13 = vrot.slane %v3037_v16, 1  ;;  %v1086_v16 = vrot.slane %v10600_v2, 1 }
 0x1b9   : > { %v1969_v59 = vpop.f32.mrb[61].mxu0  ;;  %v1084_v37 = vrot.slane %v10574_v51, 1 }
 0x1ba   : > { %v1970_v50 = vpop.f32.mrb[62].mxu0  ;;  %v2542_v23 = vpop.f32.mrb[76].mxu1 }
 0x1bb   : > { %v1971_v38 = vpop.f32.mrb[63].mxu0  ;;  %v2543_v7 = vpop.f32.mrb[77].mxu1  ;;  %v968_v50 = vsel %vm708_vm7, %v963_v17, %v967_v57  ;;  %v1085_v17 = vsel %vm1034_vm8, %v1082_v19, %v1084_v37 }
 0x1bc   : > { %v2544_v59 = vpop.f32.mrb[78].mxu1  ;;  %v1083_v38 = vsel %vm1034_vm8, %v1080_v41, %v1082_v19  ;;  %v10736_v7 = vld [vmem:[#allocation2 + $0x30] sm:$0xff] }
 0x1bd   : > { %8907 = vmatmul.mubr.bf16.gmra.mrb[168].mxu0 %v1079_v14  ;;  %v2545_v47 = vpop.f32.mrb[79].mxu1  ;;  %v3042_v14 = vshll.u32 %v10720_v3, 16  ;;  %v3050_v2 = vshll.u32 %v10736_v7, 16 }
 0x1be   : > { %8910 = vmatprep.mubr.bf16.mxu0 %v1081_v43 }
 0x1bf   : > { %2729 = vmatmul.mubr.bf16.gmra.mrb[184].mxu1 %v10669_v22  ;;  %v3044_v57 = vrot.slane %v3042_v14, 1 }
 0x1c0   : > { %v1974_v12 = vpop.f32.mrb[64].mxu0  ;;  %2736 = vmatprep.mubr.bf16.mxu1 %v968_v50 }
 0x1c1   : > { %v10725_v62 = vadd.f32 %v10513_v36, %v1974_v12  ;;  %v1976_v1 = vpop.f32.mrb[65].mxu0  ;;  %v3040_v36 = vor.u32 %v3039_v13, %v3035_v35  ;;  %v3046_v13 = vshrl.u32 %v10720_v3, 16 }
 0x1c2   : > { %v1977_v33 = vpop.f32.mrb[66].mxu0  ;;  %v2548_v23 = vpop.f32.mrb[80].mxu1 }
 0x1c3   : > { %v10732_v51 = vadd.f32 %v10518_v24, %v1977_v33  ;;  %v1979_v43 = vpop.f32.mrb[67].mxu0  ;;  %v10739_v41 = vadd.f32 %v2548_v23, %v10497_v11  ;;  %v2550_v59 = vpop.f32.mrb[81].mxu1  ;;  %v1088_v24 = vrot.slane %v10615_v27, 1  ;;  %v3045_v35 = vsel %vm708_vm7, %v3040_v36, %v3044_v57  ;;  %v10752_v36 = vld [vmem:[#allocation2 + $0x38] sm:$0xff] }
 0x1c4   : > { %v2551_v12 = vpop.f32.mrb[82].mxu1  ;;  %v1087_v11 = vsel %vm1034_vm8, %v1084_v37, %v1086_v16  ;;  %v1092_v59 = vrot.slane %v10649_v31, 1 }
 0x1c5   : > { %8911 = vmatmul.mubr.bf16.gmra.mrb[172].mxu0 %v1083_v38  ;;  %v10743_v19 = vadd.f32 %v2551_v12, %v10506_v40  ;;  %v2553_v1 = vpop.f32.mrb[83].mxu1  ;;  %v1089_v27 = vsel %vm1034_vm8, %v1086_v16, %v1088_v24  ;;  %v3048_v40 = vor.u32 %v3046_v13, %v3044_v57  ;;  %v3052_v38 = vrot.slane %v3050_v2, 1 }
 0x1c6   : > { %8914 = vmatprep.mubr.bf16.mxu0 %v1085_v17  ;;  %v1090_v17 = vrot.slane %v10635_v39, 1  ;;  %v3054_v57 = vshrl.u32 %v10736_v7, 16 }
 0x1c7   : > { %2737 = vmatmul.mubr.bf16.gmra.mrb[188].mxu1 %v10685_v26  ;;  %v3053_v1 = vsel %vm708_vm7, %v3048_v40, %v3052_v38  ;;  %v10768_v40 = vld [vmem:[#allocation2 + $0x40] sm:$0xff] }
 0x1c8   : > { %v1982_v47 = vpop.f32.mrb[68].mxu0  ;;  %3681 = vmatprep.mubr.bf16.mxu1 %v3045_v35  ;;  %v3058_v35 = vshll.u32 %v10752_v36, 16  ;;  %v1091_v39 = vsel %vm1034_vm8, %v1088_v24, %v1090_v17 }
 0x1c9   : > { %v1983_v50 = vpop.f32.mrb[69].mxu0 }
 0x1ca   : > { %v1984_v14 = vpop.f32.mrb[70].mxu0  ;;  %v2556_v43 = vpop.f32.mrb[84].mxu1 }
 0x1cb   : > { %v1985_v33 = vpop.f32.mrb[71].mxu0  ;;  %v2557_v23 = vpop.f32.mrb[85].mxu1  ;;  %v3056_v14 = vor.u32 %v3054_v57, %v3052_v38 }
 0x1cc   : > { %v2558_v12 = vpop.f32.mrb[86].mxu1 }
 0x1cd   : > { %8915 = vmatmul.mubr.bf16.gmra.mrb[176].mxu0 %v1087_v11  ;;  %v2559_v50 = vpop.f32.mrb[87].mxu1  ;;  %v3060_v11 = vrot.slane %v3058_v35, 1  ;;  %v9344_v35 = vld [vmem:[#allocation3 + $0x140] sm:$0xff]  }
 0x1ce   : > { %8918 = vmatprep.mubr.bf16.mxu0 %v1089_v27  ;;  %v1094_v27 = vrot.slane %v10669_v22, 1  ;;  %v3066_v22 = vshll.u32 %v10768_v40, 16  ;;  %9010 = vmatprep.subr.bf16.mxu1 %v9344_v35 }
 0x1cf   : > { %3682 = vmatmul.mubr.bf16.vlgmr.msra.gmra.mrb[192].mxu1 %v10714_v34  ;;  %v3061_v50 = vsel %vm708_vm7, %v3056_v14, %v3060_v11 }
 0x1d0   : > { %v1988_v37 = vpop.f32.mrb[72].mxu0  ;;  %3689 = vmatprep.mubr.bf16.mxu1 %v3053_v1  ;;  %9011 = vmatpush3.bf16.msra.mxu1 %v9344_v35 }
 0x1d1   : > { %v10756_v47 = vadd.f32 %v10531_v53, %v1988_v37  ;;  %v1990_v16 = vpop.f32.mrb[73].mxu0  ;;  %v1093_v53 = vsel %vm1034_vm8, %v1090_v17, %v1092_v59 }
 0x1d2   : > { %v1991_v13 = vpop.f32.mrb[74].mxu0  ;;  %v2562_v33 = vpop.f32.mrb[88].mxu1  ;;  %v3062_v16 = vshrl.u32 %v10752_v36, 16 }
 0x1d3   : > { %v10764_v31 = vadd.f32 %v10542_v61, %v1991_v13  ;;  %v1993_v2 = vpop.f32.mrb[75].mxu0  ;;  %v10771_v24 = vadd.f32 %v2562_v33, %v10537_v52  ;;  %v2564_v43 = vpop.f32.mrb[89].mxu1  ;;  %v1096_v61 = vrot.slane %v10685_v26, 1  ;;  %v1095_v52 = vsel %vm1034_vm8, %v1092_v59, %v1094_v27 }
 0x1d4   : > { %v2565_v23 = vpop.f32.mrb[90].mxu1  ;;  %v3068_v13 = vrot.slane %v3066_v22, 1  ;;  %v1098_v2 = vrot.slane %v10700_v58, 1  ;;  %v3359_v59 = vrot.slane %v10714_v34, 1  ;;  %v3360_v33 = vrot.slane %v10720_v3, 1 }
 0x1d5   : > { %8919 = vmatmul.mubr.bf16.gmra.mrb[180].mxu0 %v1091_v39  ;;  %v10775_v17 = vadd.f32 %v2565_v23, %v10547_v5  ;;  %v2567_v38 = vpop.f32.mrb[91].mxu1  ;;  %v1097_v26 = vsel %vm1034_vm8, %v1094_v27, %v1096_v61  ;;  %v3064_v5 = vor.u32 %v3062_v16, %v3060_v11  ;;  %v3070_v58 = vshrl.u32 %v10768_v40, 16 }
 0x1d6   : > { %8922 = vmatprep.mubr.bf16.mxu0 %v1093_v53  ;;  %v10784_v53 = vld [vmem:[#allocation2 + $0x48] sm:$0xff]  ;;  %v1099_v16 = vsel %vm1034_vm8, %v1096_v61, %v1098_v2 }
 0x1d7   : > { %3690 = vmatmul.mubr.bf16.gmra.mrb[196].mxu1 %v10720_v3  ;;  %v3074_v38 = vshll.u32 %v10784_v53, 16  ;;  %v3072_v22 = vor.u32 %v3070_v58, %v3068_v13 }
 0x1d8   : > { %v1996_v12 = vpop.f32.mrb[76].mxu0  ;;  %3695 = vmatprep.mubr.bf16.mxu1 %v3061_v50 }
 0x1d9   : > { %v1997_v37 = vpop.f32.mrb[77].mxu0 }
 0x1da   : > { %v1998_v1 = vpop.f32.mrb[78].mxu0  ;;  %v2570_v39 = vpop.f32.mrb[92].mxu1  ;;  %v3069_v37 = vsel %vm708_vm7, %v3064_v5, %v3068_v13 }
 0x1db   : > { %v1999_v57 = vpop.f32.mrb[79].mxu0  ;;  %v2571_v14 = vpop.f32.mrb[93].mxu1  ;;  %v3076_v1 = vrot.slane %v3074_v38, 1 }
 0x1dc   : > { %v2572_v43 = vpop.f32.mrb[94].mxu1  ;;  %v3362_v57 = vrot.slane %v10736_v7, 1 }
 0x1dd   : > { %8923 = vmatmul.mubr.bf16.gmra.mrb[184].mxu0 %v1095_v52  ;;  %v2573_v11 = vpop.f32.mrb[95].mxu1  ;;  %v3078_v43 = vshrl.u32 %v10784_v53, 16 }
 0x1de   : > { %8926 = vmatprep.mubr.bf16.mxu0 %v1097_v26  ;;  %v10801_v26 = vld [vmem:[#allocation2 + $0x50] sm:$0xff] }
 0x1df   : > { %3696 = vmatmul.mubr.bf16.gmra.mrb[200].mxu1 %v10736_v7  ;;  %v3082_v7 = vshll.u32 %v10801_v26, 16 }
 0x1e0   : > { %v2002_v27 = vpop.f32.mrb[80].mxu0  ;;  %3703 = vmatprep.mubr.bf16.mxu1 %v3069_v37  ;;  %v9345_v37 = vld [vmem:[#allocation3 + $0xc0] sm:$0xff]  }
 0x1e1   : > { %v10789_v23 = vadd.f32 %v10557_v8, %v2002_v27  ;;  %v2004_v12 = vpop.f32.mrb[81].mxu0  ;;  %v3361_v8 = vsel %vm1034_vm8, %v3359_v59, %v3360_v33  ;;  %v3077_v59 = vsel %vm708_vm7, %v3072_v22, %v3076_v1  ;;  %v3084_v58 = vrot.slane %v3082_v7, 1  ;;  %v9346_v7 = vld [vmem:[#allocation3 + $0xc8] sm:$0xff]  }
 0x1e2   : > { %v2005_v50 = vpop.f32.mrb[82].mxu0  ;;  %v2576_v52 = vpop.f32.mrb[96].mxu1 }
 0x1e3   : > { %v10797_v34 = vadd.f32 %v10565_v44, %v2005_v50  ;;  %v2007_v3 = vpop.f32.mrb[83].mxu0  ;;  %v10804_v61 = vadd.f32 %v2576_v52, %v10583_v54  ;;  %v2578_v35 = vpop.f32.mrb[97].mxu1  ;;  %v3364_v44 = vrot.slane %v10752_v36, 1  ;;  %v3363_v54 = vsel %vm1034_vm8, %v3360_v33, %v3362_v57 }
 0x1e4   : > { %v2579_v5 = vpop.f32.mrb[98].mxu1  ;;  %v3366_v50 = vrot.slane %v10768_v40, 1  ;;  %v3368_v33 = vrot.slane %v10784_v53, 1 }
 0x1e5   : > { %8927 = vmatmul.mubr.bf16.gmra.mrb[188].mxu0 %v1099_v16  ;;  %v10808_v2 = vadd.f32 %v2579_v5, %v10593_v15  ;;  %v2581_v13 = vpop.f32.mrb[99].mxu1  ;;  %v3365_v12 = vsel %vm1034_vm8, %v3362_v57, %v3364_v44  ;;  %v3080_v15 = vor.u32 %v3078_v43, %v3076_v1  ;;  %v10817_v16 = vld [vmem:[#allocation2 + $0x58] sm:$0xff]  ;;  %v3086_v5 = vshrl.u32 %v10801_v26, 16 }
 0x1e6   : > { %8946 = vmatprep.mubr.bf16.mxu0 %v3361_v8  ;;  %v10820_v8 = vld [vmem:[#allocation2 + $0x120] sm:$0xff]  ;;  %v3367_v13 = vsel %vm1034_vm8, %v3364_v44, %v3366_v50  ;;  %v3372_v44 = vrot.slane %v10817_v16, 1 }
 0x1e7   : > { %3704 = vmatmul.mubr.bf16.gmra.mrb[204].mxu1 %v10752_v36  ;;  %v3085_v35 = vsel %vm708_vm7, %v3080_v15, %v3084_v58 }
 0x1e8   : > { %v2010_v39 = vpop.f32.mrb[84].mxu0  ;;  %3709 = vmatprep.mubr.bf16.mxu1 %v3077_v59 }
 0x1e9   : > { %v2011_v14 = vpop.f32.mrb[85].mxu0  ;;  %v3090_v39 = vshll.u32 %v10817_v16, 16 }
 0x1ea   : > { %v2012_v27 = vpop.f32.mrb[86].mxu0  ;;  %v2584_v38 = vpop.f32.mrb[100].mxu1 }
 0x1eb   : > { %v2013_v11 = vpop.f32.mrb[87].mxu0  ;;  %v2585_v3 = vpop.f32.mrb[101].mxu1  ;;  %v3088_v27 = vor.u32 %v3086_v5, %v3084_v58 }
 0x1ec   : > { %v2586_v36 = vpop.f32.mrb[102].mxu1 }
 0x1ed   : > { %8947 = vmatmul.mubr.bf16.vlgmr.msra.gmra.mrb[192].mxu0 %v3363_v54  ;;  %v2587_v1 = vpop.f32.mrb[103].mxu1  ;;  %v3092_v54 = vrot.slane %v3090_v39, 1  ;;  %v9347_v39 = vld [vmem:[#allocation3 + $0xd0] sm:$0xff]  }
 0x1ee   : > { %8950 = vmatprep.mubr.bf16.mxu0 %v3365_v12  ;;  %5674 = vmatpush1.bf16.msra.mxu0 %v9345_v37  ;;  %v3370_v12 = vrot.slane %v10801_v26, 1  ;;  %v10836_v37 = vld [vmem:[#allocation2 + $0x60] sm:$0xff] }
 0x1ef   : > { %5675 = vmatprep.subr.bf16.mxu0 %v10820_v8  ;;  %3710 = vmatmul.mubr.bf16.gmra.mrb[208].mxu1 %v10768_v40  ;;  %v3093_v36 = vsel %vm708_vm7, %v3088_v27, %v3092_v54  ;;  %v3098_v1 = vshll.u32 %v10836_v37, 16 }
 0x1f0   : > { %v2016_v22 = vpop.f32.mrb[88].mxu0  ;;  %3717 = vmatprep.mubr.bf16.mxu1 %v3085_v35  ;;  %v3373_v5 = vsel %vm1034_vm8, %v3370_v12, %v3372_v44 }
 0x1f1   : > { %v10824_v52 = vadd.f32 %v10577_v28, %v2016_v22  ;;  %v2018_v57 = vpop.f32.mrb[89].mxu0  ;;  %v3369_v28 = vsel %vm1034_vm8, %v3366_v50, %v3368_v33  ;;  %v3094_v22 = vshrl.u32 %v10817_v16, 16 }
 0x1f2   : > { %v2019_v14 = vpop.f32.mrb[90].mxu0  ;;  %v2590_v11 = vpop.f32.mrb[104].mxu1  ;;  %5676 = vmatpush1.bf16.msra.mxu0 %v9346_v7  ;;  %v3371_v57 = vsel %vm1034_vm8, %v3368_v33, %v3370_v12  ;;  %v3374_v7 = vrot.slane %v10836_v37, 1 }
 0x1f3   : > { %v10832_v59 = vadd.f32 %v10588_v9, %v2019_v14  ;;  %v2021_v43 = vpop.f32.mrb[91].mxu0  ;;  %v10839_v40 = vadd.f32 %v2590_v11, %v10621_v56  ;;  %v2592_v9 = vpop.f32.mrb[105].mxu1  ;;  %5677 = vmatprep.subr.bf16.mxu0 %v10820_v8  ;;  %v9348_v14 = vld [vmem:[#allocation3 + $0x148] sm:$0xff]  }
 0x1f4   : > { %v2593_v15 = vpop.f32.mrb[106].mxu1  ;;  %v3100_v43 = vrot.slane %v3098_v1, 1  ;;  %9012 = vmatprep.subr.bf16.mxu1 %v9348_v14 }
 0x1f5   : > { %8951 = vmatmul.mubr.bf16.gmra.mrb[196].mxu0 %v3367_v13  ;;  %v10844_v58 = vadd.f32 %v2593_v15, %v10631_v30  ;;  %v2595_v3 = vpop.f32.mrb[107].mxu1  ;;  %v10852_v30 = vld [vmem:[#allocation2 + $0x68] sm:$0xff]  ;;  %v3096_v13 = vor.u32 %v3094_v22, %v3092_v54  ;;  %9013 = vmatpush3.bf16.msra.mxu1 %v9348_v14 }
 0x1f6   : > { %8954 = vmatprep.mubr.bf16.mxu0 %v3369_v28  ;;  %5678 = vmatpush1.bf16.msra.mxu0 %v9347_v39  ;;  %v3376_v33 = vrot.slane %v10852_v30, 1 }
 0x1f7   : > { %3718 = vmatmul.mubr.bf16.gmra.mrb[212].mxu1 %v10784_v53  ;;  %5679 = vmatprep.subr.bf16.mxu0 %v10820_v8  ;;  %v3101_v15 = vsel %vm708_vm7, %v3096_v13, %v3100_v43 }
 0x1f8   : > { %v2024_v38 = vpop.f32.mrb[92].mxu0  ;;  %3723 = vmatprep.mubr.bf16.mxu1 %v3093_v36  ;;  %v3375_v36 = vsel %vm1034_vm8, %v3372_v44, %v3374_v7 }
 0x1f9   : > { %v2025_v50 = vpop.f32.mrb[93].mxu0  ;;  %v3102_v38 = vshrl.u32 %v10836_v37, 16 }
 0x1fa   : > { %v2026_v56 = vpop.f32.mrb[94].mxu0  ;;  %v2598_v28 = vpop.f32.mrb[108].mxu1  ;;  %v3106_v50 = vshll.u32 %v10852_v30, 16 }
 0x1fb   : > { %v2027_v35 = vpop.f32.mrb[95].mxu0  ;;  %v2599_v27 = vpop.f32.mrb[109].mxu1  ;;  %v10869_v56 = vld [vmem:[#allocation2 + $0x70] sm:$0xff] }
 0x1fc   : > { %v2600_v53 = vpop.f32.mrb[110].mxu1  ;;  %v10871_v35 = vld [vmem:[#allocation2 + $0x78] sm:$0xff]  ;;  %v3108_v39 = vrot.slane %v3106_v50, 1  ;;  %v3378_v44 = vrot.slane %v10869_v56, 1 }
 0x1fd   : > { %8955 = vmatmul.mubr.bf16.gmra.mrb[200].mxu0 %v3371_v57  ;;  %v2601_v9 = vpop.f32.mrb[111].mxu1  ;;  %v9349_v57 = vld [vmem:[#allocation3 + $0xd8] sm:$0xff]   ;;  %v3380_v13 = vrot.slane %v10871_v35, 1 }
 0x1fe   : > { %8958 = vmatprep.mubr.bf16.mxu0 %v3373_v5  ;;  %v3104_v5 = vor.u32 %v3102_v38, %v3100_v43  ;;  %5680 = vmatpush1.bf16.msra.mxu0 %v9349_v57  ;;  %v3110_v9 = vshrl.u32 %v10852_v30, 16 }
 0x1ff   : > { %3724 = vmatmul.mubr.bf16.gmra.mrb[216].mxu1 %v10801_v26  ;;  %5681 = vmatprep.subr.bf16.mxu0 %v10820_v8  ;;  %v3381_v50 = vsel %vm1034_vm8, %v3378_v44, %v3380_v13 }
 0x200   : > { %v2030_v11 = vpop.f32.mrb[96].mxu0  ;;  %3731 = vmatprep.mubr.bf16.mxu1 %v3101_v15  ;;  %v3379_v15 = vsel %vm1034_vm8, %v3376_v33, %v3378_v44 }
 0x201   : > { %v10858_v12 = vadd.f32 %v10602_v32, %v2030_v11  ;;  %v2032_v54 = vpop.f32.mrb[97].mxu0  ;;  %v3377_v32 = vsel %vm1034_vm8, %v3374_v7, %v3376_v33  ;;  %v3109_v11 = vsel %vm708_vm7, %v3104_v5, %v3108_v39 }
 0x202   : > { %v2033_v3 = vpop.f32.mrb[98].mxu0  ;;  %v2604_v14 = vpop.f32.mrb[112].mxu1  ;;  %v3114_v54 = vshll.u32 %v10869_v56, 16 }
 0x203   : > { %v10866_v22 = vadd.f32 %v10606_v4, %v2033_v3  ;;  %v2035_v1 = vpop.f32.mrb[99].mxu0  ;;  %v10875_v4 = vadd.f32 %v2604_v14, %v10655_v29  ;;  %v2606_v26 = vpop.f32.mrb[113].mxu1  ;;  %v10888_v3 = vld [vmem:[#allocation2 + $0x80] sm:$0xff] }
 0x204   : > { %v2607_v28 = vpop.f32.mrb[114].mxu1  ;;  %v3112_v1 = vor.u32 %v3110_v9, %v3108_v39  ;;  %v3382_v5 = vrot.slane %v10888_v3, 1 }
 0x205   : > { %8959 = vmatmul.mubr.bf16.gmra.mrb[204].mxu0 %v3375_v36  ;;  %v10880_v27 = vadd.f32 %v2607_v28, %v10665_v48  ;;  %v2609_v53 = vpop.f32.mrb[115].mxu1  ;;  %v9350_v48 = vld [vmem:[#allocation3 + $0xe0] sm:$0xff]   ;;  %v10890_v36 = vld [vmem:[#allocation2 + $0x88] sm:$0xff] }
 0x206   : > { %8962 = vmatprep.mubr.bf16.mxu0 %v3377_v32  ;;  %v3116_v32 = vrot.slane %v3114_v54, 1  ;;  %5682 = vmatpush1.bf16.msra.mxu0 %v9350_v48  ;;  %v3122_v53 = vshll.u32 %v10871_v35, 16  ;;  %v3383_v9 = vsel %vm1034_vm8, %v3380_v13, %v3382_v5 }
 0x207   : > { %3732 = vmatmul.mubr.bf16.gmra.mrb[220].mxu1 %v10817_v16  ;;  %v3384_v16 = vrot.slane %v10890_v36, 1  ;;  %5683 = vmatprep.subr.bf16.mxu0 %v10820_v8 }
 0x208   : > { %v2038_v7 = vpop.f32.mrb[100].mxu0  ;;  %3737 = vmatprep.mubr.bf16.mxu1 %v3109_v11  ;;  %v3117_v39 = vsel %vm708_vm7, %v3112_v1, %v3116_v32  ;;  %v3124_v1 = vrot.slane %v3122_v53, 1 }
 0x209   : > { %v2039_v43 = vpop.f32.mrb[101].mxu0 }
 0x20a   : > { %v2040_v29 = vpop.f32.mrb[102].mxu0  ;;  %v2612_v57 = vpop.f32.mrb[116].mxu1  ;;  %v3118_v43 = vshrl.u32 %v10869_v56, 16 }
 0x20b   : > { %v2041_v38 = vpop.f32.mrb[103].mxu0  ;;  %v2613_v33 = vpop.f32.mrb[117].mxu1 }
 0x20c   : > { %v2614_v14 = vpop.f32.mrb[118].mxu1  ;;  %v9351_v38 = vld [vmem:[#allocation3 + $0xe8] sm:$0xff]   ;;  %v3120_v48 = vor.u32 %v3118_v43, %v3116_v32  ;;  %v3130_v43 = vshll.u32 %v10888_v3, 16 }
 0x20d   : > { %8963 = vmatmul.mubr.bf16.gmra.mrb[208].mxu0 %v3379_v15  ;;  %v2615_v28 = vpop.f32.mrb[119].mxu1  ;;  %v10907_v15 = vld [vmem:[#allocation2 + $0x90] sm:$0xff] }
 0x20e   : > { %8966 = vmatprep.mubr.bf16.mxu0 %v3381_v50  ;;  %v10909_v50 = vld [vmem:[#allocation2 + $0x98] sm:$0xff]  ;;  %v3386_v13 = vrot.slane %v10907_v15, 1  ;;  %5684 = vmatpush1.bf16.msra.mxu0 %v9351_v38  ;;  %v9353_v38 = vld [vmem:[#allocation3 + $0x150] sm:$0xff]  }
 0x20f   : > { %3738 = vmatmul.mubr.bf16.gmra.mrb[224].mxu1 %v10836_v37  ;;  %5685 = vmatprep.subr.bf16.mxu0 %v10820_v8 }
 0x210   : > { %v2044_v44 = vpop.f32.mrb[104].mxu0  ;;  %3745 = vmatprep.mubr.bf16.mxu1 %v3117_v39  ;;  %v3126_v39 = vshrl.u32 %v10871_v35, 16  ;;  %v3387_v53 = vsel %vm1034_vm8, %v3384_v16, %v3386_v13  ;;  %9014 = vmatprep.subr.bf16.mxu1 %v9353_v38 }
 0x211   : > { %v10896_v26 = vadd.f32 %v10617_v18, %v2044_v44  ;;  %v2046_v7 = vpop.f32.mrb[105].mxu0  ;;  %v3385_v18 = vsel %vm1034_vm8, %v3382_v5, %v3384_v16  ;;  %v3388_v5 = vrot.slane %v10909_v50, 1  ;;  %9015 = vmatpush3.bf16.msra.mxu1 %v9353_v38  ;;  %v9354_v38 = vld [vmem:[#allocation3 + $0xf8] sm:$0xff]  }
 0x212   : > { %v2047_v11 = vpop.f32.mrb[106].mxu0  ;;  %v2618_v57 = vpop.f32.mrb[120].mxu1  ;;  %v3125_v7 = vsel %vm708_vm7, %v3120_v48, %v3124_v1  ;;  %v3128_v48 = vor.u32 %v3126_v39, %v3124_v1  ;;  %v3134_v39 = vshrl.u32 %v10888_v3, 16 }
 0x213   : > { %v10904_v54 = vadd.f32 %v10624_v42, %v2047_v11  ;;  %v2049_v29 = vpop.f32.mrb[107].mxu0  ;;  %v10913_v42 = vadd.f32 %v2618_v57, %v10689_v25  ;;  %v2620_v37 = vpop.f32.mrb[121].mxu1  ;;  %v3132_v57 = vrot.slane %v3130_v43, 1  ;;  %v3138_v43 = vshll.u32 %v10890_v36, 16 }
 0x214   : > { %v2621_v33 = vpop.f32.mrb[122].mxu1  ;;  %v10926_v29 = vld [vmem:[#allocation2 + $0xa0] sm:$0xff] }
 0x215   : > { %8967 = vmatmul.mubr.bf16.gmra.mrb[212].mxu0 %v3383_v9  ;;  %v10918_v44 = vadd.f32 %v2621_v33, %v10697_v21  ;;  %v2623_v28 = vpop.f32.mrb[123].mxu1  ;;  %v3389_v9 = vsel %vm1034_vm8, %v3386_v13, %v3388_v5  ;;  %v9352_v21 = vld [vmem:[#allocation3 + $0xf0] sm:$0xff]   ;;  %v3390_v33 = vrot.slane %v10926_v29, 1 }
 0x216   : > { %8970 = vmatprep.mubr.bf16.mxu0 %v3385_v18  ;;  %v10928_v18 = vld [vmem:[#allocation2 + $0xa8] sm:$0xff]  ;;  %5686 = vmatpush1.bf16.msra.mxu0 %v9352_v21  ;;  %v10945_v21 = vld [vmem:[#allocation2 + $0xb0] sm:$0xff] }
 0x217   : > { %3746 = vmatmul.mubr.bf16.gmra.mrb[228].mxu1 %v10852_v30  ;;  %v3392_v30 = vrot.slane %v10928_v18, 1  ;;  %5687 = vmatprep.subr.bf16.mxu0 %v10820_v8 }
 0x218   : > { %v2052_v14 = vpop.f32.mrb[108].mxu0  ;;  %3751 = vmatprep.mubr.bf16.mxu1 %v3125_v7  ;;  %v3133_v7 = vsel %vm708_vm7, %v3128_v48, %v3132_v57  ;;  %v10947_v48 = vld [vmem:[#allocation2 + $0xb8] sm:$0xff] }
 0x219   : > { %v2053_v32 = vpop.f32.mrb[109].mxu0 }
 0x21a   : > { %v2054_v25 = vpop.f32.mrb[110].mxu0  ;;  %v2626_v37 = vpop.f32.mrb[124].mxu1  ;;  %5688 = vmatpush1.bf16.msra.mxu0 %v9354_v38  ;;  %v10964_v38 = vld [vmem:[#allocation2 + $0xc0] sm:$0xff] }
 0x21b   : > { %v2055_v11 = vpop.f32.mrb[111].mxu0  ;;  %v2627_v16 = vpop.f32.mrb[125].mxu1  ;;  %v3136_v37 = vor.u32 %v3134_v39, %v3132_v57  ;;  %5689 = vmatprep.subr.bf16.mxu0 %v10820_v8 }
 0x21c   : > { %v2628_v13 = vpop.f32.mrb[126].mxu1  ;;  %v3140_v16 = vrot.slane %v3138_v43, 1  ;;  %v3142_v43 = vshrl.u32 %v10890_v36, 16 }
 0x21d   : > { %8971 = vmatmul.mubr.bf16.gmra.mrb[216].mxu0 %v3387_v53  ;;  %v2629_v1 = vpop.f32.mrb[127].mxu1  ;;  %v3391_v53 = vsel %vm1034_vm8, %v3388_v5, %v3390_v33  ;;  %v3394_v5 = vrot.slane %v10945_v21, 1 }
 0x21e   : > { %8974 = vmatprep.mubr.bf16.mxu0 %v3389_v9  ;;  %v3141_v39 = vsel %vm708_vm7, %v3136_v37, %v3140_v16 }
 0x21f   : > { %3752 = vmatmul.mubr.bf16.gmra.mrb[232].mxu1 %v10869_v56 }
 0x220   : > { %v2058_v14 = vpop.f32.mrb[112].mxu0  ;;  %3759 = vmatprep.mubr.bf16.mxu1 %v3133_v7 }
 0x221   : > { %v10934_v32 = vadd.f32 %v10637_v60, %v2058_v14  ;;  %v2060_v28 = vpop.f32.mrb[113].mxu0  ;;  %v3393_v60 = vsel %vm1034_vm8, %v3390_v33, %v3392_v30  ;;  %v3396_v33 = vrot.slane %v10947_v48, 1 }
 0x222   : > { %v2061_v25 = vpop.f32.mrb[114].mxu0  ;;  %v2632_v13 = vpop.f32.mrb[128].mxu1 }
 0x223   : > { %v10942_v11 = vadd.f32 %v10640_v49, %v2061_v25  ;;  %v2063_v9 = vpop.f32.mrb[115].mxu0  ;;  %v10951_v49 = vadd.f32 %v2632_v13, %v10725_v62  ;;  %v2634_v56 = vpop.f32.mrb[129].mxu1  ;;  %v3146_v25 = vshll.u32 %v10907_v15, 16  ;;  %v10966_v13 = vld [vmem:[#allocation2 + $0xc8] sm:$0xff] }
 0x224   : > { %v2635_v14 = vpop.f32.mrb[130].mxu1  ;;  %v3144_v56 = vor.u32 %v3142_v43, %v3140_v16  ;;  %v3150_v43 = vshrl.u32 %v10907_v15, 16 }
 0x225   : > { %8975 = vmatmul.mubr.bf16.gmra.mrb[220].mxu0 %v3391_v53  ;;  %v10956_v28 = vadd.f32 %v2635_v14, %v10732_v51  ;;  %v2637_v7 = vpop.f32.mrb[131].mxu1  ;;  %v3395_v53 = vsel %vm1034_vm8, %v3392_v30, %v3394_v5  ;;  %v9355_v51 = vld [vmem:[#allocation3 + $0x100] sm:$0xff]   ;;  %v3148_v37 = vrot.slane %v3146_v25, 1  ;;  %v3154_v25 = vshll.u32 %v10909_v50, 16 }
 0x226   : > { %8978 = vmatprep.mubr.bf16.mxu0 %v3393_v60  ;;  %v3397_v60 = vsel %vm1034_vm8, %v3394_v5, %v3396_v33  ;;  %5690 = vmatpush1.bf16.msra.mxu0 %v9355_v51 }
 0x227   : > { %3760 = vmatmul.mubr.bf16.gmra.mrb[236].mxu1 %v10871_v35  ;;  %v3400_v35 = vrot.slane %v10966_v13, 1  ;;  %5691 = vmatprep.subr.bf16.mxu0 %v10820_v8  ;;  %v3149_v16 = vsel %vm708_vm7, %v3144_v56, %v3148_v37  ;;  %v10985_v56 = vld [vmem:[#allocation2 + $0xd8] sm:$0xff] }
 0x228   : > { %v2066_v1 = vpop.f32.mrb[116].mxu0  ;;  %3765 = vmatprep.mubr.bf16.mxu1 %v3141_v39 }
 0x229   : > { %v2067_v57 = vpop.f32.mrb[117].mxu0  ;;  %v3398_v1 = vrot.slane %v10964_v38, 1 }
 0x22a   : > { %v2068_v62 = vpop.f32.mrb[118].mxu0  ;;  %v2640_v14 = vpop.f32.mrb[132].mxu1 }
 0x22b   : > { %v2069_v9 = vpop.f32.mrb[119].mxu0  ;;  %v2641_v30 = vpop.f32.mrb[133].mxu1  ;;  %v10983_v14 = vld [vmem:[#allocation2 + $0xd0] sm:$0xff] }
 0x22c   : > { %v2642_v5 = vpop.f32.mrb[134].mxu1  ;;  %v3399_v9 = vsel %vm1034_vm8, %v3396_v33, %v3398_v1  ;;  %v9356_v30 = vld [vmem:[#allocation3 + $0x108] sm:$0xff]  }
 0x22d   : > { %8979 = vmatmul.mubr.bf16.gmra.mrb[224].mxu0 %v3395_v53  ;;  %v2643_v39 = vpop.f32.mrb[135].mxu1  ;;  %v3152_v5 = vor.u32 %v3150_v43, %v3148_v37 }
 0x22e   : > { %8982 = vmatprep.mubr.bf16.mxu0 %v3397_v60  ;;  %v305_v39 = vld [vmem:[#allocation2 + $0x120] sm:$0x1]  ;;  %5692 = vmatpush1.bf16.msra.mxu0 %v9356_v30 }
 0x22f   : > { %3766 = vmatmul.mubr.bf16.gmra.mrb[240].mxu1 %v10888_v3  ;;  %v3402_v3 = vrot.slane %v10983_v14, 1  ;;  %5693 = vmatprep.subr.bf16.mxu0 %v10820_v8 }
 0x230   : > { %v2072_v57 = vpop.f32.mrb[120].mxu0  ;;  %3773 = vmatprep.mubr.bf16.mxu1 %v3149_v16  ;;  %v3404_v16 = vrot.slane %v10985_v56, 1 }
 0x231   : > { %v10972_v7 = vadd.f32 %v10651_v20, %v2072_v57  ;;  %v2074_v62 = vpop.f32.mrb[121].mxu0  ;;  %v3401_v20 = vsel %vm1034_vm8, %v3398_v1, %v3400_v35  ;;  %v3156_v57 = vrot.slane %v3154_v25, 1 }
 0x232   : > { %v2075_v53 = vpop.f32.mrb[122].mxu0  ;;  %v2646_v62 = vpop.f32.mrb[136].mxu1 }
 0x233   : > { %v10980_v60 = vadd.f32 %v10657_v46, %v2075_v53  ;;  %v2077_v51 = vpop.f32.mrb[123].mxu0  ;;  %v306_v46 = vsel %vm9606_vm5, 0, %v305_v39  ;;  %v10991_v33 = vadd.f32 %v2646_v62, %v10756_v47  ;;  %v2648_v1 = vpop.f32.mrb[137].mxu1  ;;  %v3162_v47 = vshll.u32 %v10926_v29, 16 }
 0x234   : > { %307 = vst [vmem:[#allocation2 + $0x120] sm:$0x1] %v306_v46  ;;  %v2649_v37 = vpop.f32.mrb[138].mxu1  ;;  %v3157_v51 = vsel %vm708_vm7, %v3152_v5, %v3156_v57  ;;  %v3403_v39 = vsel %vm1034_vm8, %v3400_v35, %v3402_v3  ;;  %v3405_v46 = vsel %vm1034_vm8, %v3402_v3, %v3404_v16  ;;  %v11004_v1 = vld [vmem:[#allocation2 + $0xe0] sm:$0xff]  ;;  %v11011_v5 = vsel %vm9566_vm2, 0, %v10820_v8 }
 0x235   : > { %8983 = vmatmul.mubr.bf16.gmra.mrb[228].mxu0 %v3399_v9  ;;  %v10996_v25 = vadd.f32 %v2649_v37, %v10764_v31  ;;  %v2651_v9 = vpop.f32.mrb[139].mxu1  ;;  %v9357_v31 = vld [vmem:[#allocation3 + $0x110] sm:$0xff]   ;;  %v11006_v37 = vld [vmem:[#allocation2 + $0xe8] sm:$0xff]  ;;  %364 = vst [vmem:[#allocation2 + $0x118] sm:$0xff] %v11011_v5  ;;  %v3406_v35 = vrot.slane %v11004_v1, 1 }
 0x236   : > { %8986 = vmatprep.mubr.bf16.mxu0 %v3401_v20  ;;  %v3158_v20 = vshrl.u32 %v10909_v50, 16  ;;  %v3164_v9 = vrot.slane %v3162_v47, 1  ;;  %5694 = vmatpush1.bf16.msra.mxu0 %v9357_v31  ;;  %v3166_v47 = vshrl.u32 %v10926_v29, 16 }
 0x237   : > { %3774 = vmatmul.mubr.bf16.gmra.mrb[244].mxu1 %v10890_v36  ;;  %5695 = vmatprep.subr.bf16.mxu0 %v10820_v8 }
 0x238   : > { %v2080_v43 = vpop.f32.mrb[124].mxu0  ;;  %3779 = vmatprep.mubr.bf16.mxu1 %v3157_v51  ;;  %v3408_v51 = vrot.slane %v11006_v37, 1  ;;  %v3168_v10 = vor.u32 %v3166_v47, %v3164_v9 }
 0x239   : > { %v2081_v53 = vpop.f32.mrb[125].mxu0  ;;  %v9358_v43 = vld [vmem:[#allocation3 + $0x158] sm:$0xff]  }
 0x23a   : > { %v2082_v30 = vpop.f32.mrb[126].mxu0  ;;  %v3160_v53 = vor.u32 %v3158_v20, %v3156_v57  ;;  %v2654_v36 = vpop.f32.mrb[140].mxu1  ;;  %9016 = vmatprep.subr.bf16.mxu1 %v9358_v43 }
 0x23b   : > { %v2083_v62 = vpop.f32.mrb[127].mxu0  ;;  %v2655_v3 = vpop.f32.mrb[141].mxu1  ;;  %9017 = vmatpush3.bf16.msra.mxu1 %v9358_v43  ;;  %v3407_v36 = vsel %vm1034_vm8, %v3404_v16, %v3406_v35  ;;  %v11026_v43 = vld [vmem:[#allocation2 + $0xf0] sm:$0xff] }
 0x23c   : > { %v2656_v30 = vpop.f32.mrb[142].mxu1  ;;  %v3165_v20 = vsel %vm708_vm7, %v3160_v53, %v3164_v9  ;;  %v3410_v16 = vrot.slane %v11026_v43, 1 }
 0x23d   : > { %8987 = vmatmul.mubr.bf16.gmra.mrb[232].mxu0 %v3403_v39  ;;  %v2657_v0 = vpop.f32.mrb[143].mxu1  ;;  %v3170_v39 = vshll.u32 %v10928_v18, 16  ;;  %v3409_v30 = vsel %vm1034_vm8, %v3406_v35, %v3408_v51 }
 0x23e   : > { %8990 = vmatprep.mubr.bf16.mxu0 %v3405_v46  ;;  %v9359_v0 = vld [vmem:[#allocation3 + $0x118] sm:$0xff]  }
 0x23f   : > { %3780 = vmatmul.mubr.bf16.gmra.mrb[248].mxu1 %v10907_v15  ;;  %5696 = vmatpush1.bf16.msra.mxu0 %v9359_v0 }
 0x240   : > { %v8868_v62 = vpop.f32.mrb[128].mxu0  ;;  %3787 = vmatprep.mubr.bf16.mxu1 %v3165_v20  ;;  %5697 = vmatprep.subr.bf16.mxu0 %v10820_v8 }
 0x241   : > { %v2777_v57 = vpop.f32.mrb[129].mxu0  ;;  %v11031_v62 = vld [vmem:[#allocation2 + $0xf8] sm:$0xff] }
 0x242   : > { %v11021_v46 = vadd.f32 %v2777_v57, %v10672_v6  ;;  %v8869_v31 = vpop.f32.mrb[130].mxu0  ;;  %v3172_v6 = vrot.slane %v3170_v39, 1  ;;  %v2660_v57 = vpop.f32.mrb[144].mxu1 }
 0x243   : > { %v2780_v3 = vpop.f32.mrb[131].mxu0  ;;  %v11035_v15 = vadd.f32 %v2660_v57, %v10789_v23  ;;  %v2662_v35 = vpop.f32.mrb[145].mxu1  ;;  %v3412_v31 = vrot.slane %v11031_v62, 1  ;;  %v3411_v57 = vsel %vm1034_vm8, %v3408_v51, %v3410_v16 }
 0x244   : > { %12813 = vst [vmem:[#allocation8_spill] sm:$0xff] %v11021_v46  ;;  %v11029_v53 = vadd.f32 %v2780_v3, %v10676_v63  ;;  %v2663_v63 = vpop.f32.mrb[146].mxu1  ;;  %v3173_v39 = vsel %vm708_vm7, %v3168_v10, %v3172_v6  ;;  %v11056_v10 = vld [vmem:[#allocation2 + $0x108] sm:$0xff] }
 0x245   : > { %8991 = vmatmul.mubr.bf16.gmra.mrb[236].mxu0 %v3407_v36  ;;  %v11040_v3 = vadd.f32 %v2663_v63, %v10797_v34  ;;  %v2665_v47 = vpop.f32.mrb[147].mxu1  ;;  %v3174_v36 = vshrl.u32 %v10928_v18, 16  ;;  %v3413_v34 = vsel %vm1034_vm8, %v3410_v16, %v3412_v31  ;;  %v11051_v63 = vld [vmem:[#allocation2 + $0x100] sm:$0xff] }
 0x246   : > { %12814 = vst [vmem:[#allocation9_spill] sm:$0xff] %v11029_v53  ;;  %8994 = vmatprep.mubr.bf16.mxu0 %v3409_v30  ;;  %v3178_v30 = vshll.u32 %v10945_v21, 16  ;;  %v3414_v51 = vrot.slane %v11051_v63, 1 }
 0x247   : > { %3788 = vmatmul.mubr.bf16.gmra.mrb[252].mxu1 %v10909_v50  ;;  %v3176_v47 = vor.u32 %v3174_v36, %v3172_v6  ;;  %v3416_v50 = vrot.slane %v11056_v10, 1 }
 0x248   : > { %v8872_v20 = vpop.f32.mrb[132].mxu0  ;;  %3793 = vmatprep.mubr.bf16.mxu1 %v3173_v39  ;;  %v3180_v53 = vrot.slane %v3178_v30, 1  ;;  %v3182_v39 = vshrl.u32 %v10945_v21, 16  ;;  %v3415_v30 = vsel %vm1034_vm8, %v3412_v31, %v3414_v51 }
 0x249   : > { %v2791_v9 = vpop.f32.mrb[133].mxu0 }
 0x24a   : > { %v11046_v23 = vadd.f32 %v2791_v9, %v10704_v55  ;;  %v8873_v0 = vpop.f32.mrb[134].mxu0  ;;  %v2668_v55 = vpop.f32.mrb[148].mxu1 }
 0x24b   : > { %v2794_v35 = vpop.f32.mrb[135].mxu0  ;;  %v2669_v9 = vpop.f32.mrb[149].mxu1  ;;  %v11069_v55 = vld [vmem:[#allocation2 + $0x110] sm:$0xff] }
 0x24c   : > { %12815 = vst [vmem:[#allocation10_spill] sm:$0xff] %v11046_v23  ;;  %v11054_v20 = vadd.f32 %v2794_v35, %v10710_v45  ;;  %v2670_v0 = vpop.f32.mrb[150].mxu1  ;;  %v3181_v45 = vsel %vm708_vm7, %v3176_v47, %v3180_v53  ;;  %v3186_v35 = vshll.u32 %v10947_v48, 16  ;;  %v3184_v9 = vor.u32 %v3182_v39, %v3180_v53 }
 0x24d   : > { %8995 = vmatmul.mubr.bf16.gmra.mrb[240].mxu0 %v3411_v57  ;;  %v2671_v23 = vpop.f32.mrb[151].mxu1  ;;  %v3418_v31 = vrot.slane %v11069_v55, 1 }
 0x24e   : > { %8998 = vmatprep.mubr.bf16.mxu0 %v3413_v34  ;;  %v3417_v34 = vsel %vm1034_vm8, %v3414_v51, %v3416_v50  ;;  %v9363_v23 = vld [vmem:[#allocation3 + $0x160] sm:$0xff]   ;;  %v3188_v0 = vrot.slane %v3186_v35, 1 }
 0x24f   : > { %3794 = vmatmul.mubr.bf16.gmra.mrb[0].mxu1 %v10926_v29  ;;  %9018 = vmatprep.subr.bf16.mxu1 %v9363_v23 }
 0x250   : > { %v8876_v16 = vpop.f32.mrb[136].mxu0  ;;  %3801 = vmatprep.mubr.bf16.mxu1 %v3181_v45  ;;  %9019 = vmatpush3.bf16.msra.mxu1 %v9363_v23 }
 0x251   : > { %v2805_v46 = vpop.f32.mrb[137].mxu0  ;;  %v3420_v16 = vrot.slane %v11011_v5, 1 }
 0x252   : > { %v11064_v6 = vadd.f32 %v2805_v46, %v10739_v41  ;;  %v8877_v36 = vpop.f32.mrb[138].mxu0  ;;  %v9360_v41 = vld [vmem:[#allocation3 + $0x120] sm:$0xff]   ;;  %v2674_v46 = vpop.f32.mrb[152].mxu1 }
 0x253   : > { %v2808_v57 = vpop.f32.mrb[139].mxu0  ;;  %v11076_v29 = vadd.f32 %v2674_v46, %v10824_v52  ;;  %v2676_v51 = vpop.f32.mrb[153].mxu1  ;;  %5698 = vmatpush1.bf16.msra.mxu0 %v9360_v41  ;;  %v3194_v52 = vshll.u32 %v10964_v38, 16  ;;  %v3419_v46 = vsel %vm1034_vm8, %v3416_v50, %v3418_v31  ;;  %v9362_v50 = vld [vmem:[#allocation3 + $0x130] sm:$0xff]  }
 0x254   : > { %v11072_v47 = vadd.f32 %v2808_v57, %v10743_v19  ;;  %v9364_v19 = vld [vmem:[#allocation3 + $0x168] sm:$0xff]   ;;  %v2677_v36 = vpop.f32.mrb[154].mxu1  ;;  %5699 = vmatprep.subr.bf16.mxu0 %v10820_v8  ;;  %v3190_v57 = vshrl.u32 %v10947_v48, 16  ;;  %v3421_v51 = vsel %vm1034_vm8, %v3418_v31, %v3420_v16 }
 0x255   : > { %8999 = vmatmul.mubr.bf16.gmra.mrb[244].mxu0 %v3415_v30  ;;  %v11081_v53 = vadd.f32 %v2677_v36, %v10832_v59  ;;  %v2679_v35 = vpop.f32.mrb[155].mxu1  ;;  %v3189_v30 = vsel %vm708_vm7, %v3184_v9, %v3188_v0  ;;  %9020 = vmatprep.subr.bf16.mxu1 %v9364_v19  ;;  %v11092_v36 = vld [vmem:[#allocation2 + $0x120] sm:$0xff] }
 0x256   : > { %9002 = vmatprep.mubr.bf16.mxu0 %v3417_v34  ;;  %v9361_v34 = vld [vmem:[#allocation3 + $0x128] sm:$0xff]   ;;  %9021 = vmatpush3.bf16.msra.mxu1 %v9364_v19  ;;  %v9366_v9 = vld [vmem:[#allocation3 + $0x170] sm:$0xff]   ;;  %v9367_v35 = vld [vmem:[#allocation3 + $0x178] sm:$0xff]  }
 0x257   : > { %3802 = vmatmul.mubr.bf16.gmra.mrb[4].mxu1 %v10928_v18  ;;  %5700 = vmatpush1.bf16.msra.mxu0 %v9361_v34  ;;  %v3422_v18 = vrot.slane %v11092_v36, 1 }
 0x258   : > { %v8880_v45 = vpop.f32.mrb[140].mxu0  ;;  %3807 = vmatprep.mubr.bf16.mxu1 %v3189_v30  ;;  %5701 = vmatprep.subr.bf16.mxu0 %v10820_v8 }
 0x259   : > { %v2819_v39 = vpop.f32.mrb[141].mxu0  ;;  %9022 = vmatprep.subr.bf16.mxu1 %v9366_v9 }
 0x25a   : > { %v11087_v23 = vadd.f32 %v2819_v39, %v10771_v24  ;;  %v8881_v41 = vpop.f32.mrb[142].mxu0  ;;  %v3192_v24 = vor.u32 %v3190_v57, %v3188_v0  ;;  %v3196_v39 = vrot.slane %v3194_v52, 1  ;;  %v2682_v19 = vpop.f32.mrb[156].mxu1  ;;  %9023 = vmatpush3.bf16.msra.mxu1 %v9366_v9  ;;  %v3198_v57 = vshrl.u32 %v10964_v38, 16 }
 0x25b   : > { %v2822_v59 = vpop.f32.mrb[143].mxu0  ;;  %v2683_v31 = vpop.f32.mrb[157].mxu1  ;;  %5702 = vmatpush1.bf16.msra.mxu0 %v9362_v50  ;;  %v3202_v52 = vshll.u32 %v10966_v13, 16  ;;  %9024 = vmatprep.subr.bf16.mxu1 %v9367_v35  ;;  %v3423_v9 = vsel %vm1034_vm8, %v3420_v16, %v3422_v18 }
 0x25c   : > { %v11095_v45 = vadd.f32 %v2822_v59, %v10775_v17  ;;  %v2684_v34 = vpop.f32.mrb[158].mxu1  ;;  %5703 = vmatprep.subr.bf16.mxu0 %v10820_v8  ;;  %v3197_v0 = vsel %vm708_vm7, %v3192_v24, %v3196_v39  ;;  %v3200_v24 = vor.u32 %v3198_v57, %v3196_v39  ;;  %v3210_v39 = vshll.u32 %v10983_v14, 16 }
 0x25d   : > { %9003 = vmatmul.mubr.bf16.gmra.mrb[248].mxu0 %v3419_v46  ;;  %v2685_v17 = vpop.f32.mrb[159].mxu1  ;;  %v9365_v46 = vld [vmem:[#allocation3 + $0x138] sm:$0xff]   ;;  %v3204_v31 = vrot.slane %v3202_v52, 1 }
 0x25e   : > { %9006 = vmatprep.mubr.bf16.mxu0 %v3421_v51  ;;  %9025 = vmatpush3.bf16.msra.mxu1 %v9367_v35 }
 0x25f   : > { %3808 = vmatmul.mubr.bf16.gmra.mrb[8].mxu1 %v10945_v21  ;;  %5704 = vmatpush1.bf16.msra.mxu0 %v9365_v46  ;;  %v3212_v46 = vrot.slane %v3210_v39, 1 }
 0x260   : > { %v8884_v41 = vpop.f32.mrb[144].mxu0  ;;  %3815 = vmatprep.mubr.bf16.mxu1 %v3197_v0  ;;  %6331 = vmatprep.subr.bf16.mxu1 %v10820_v8 }
 0x261   : > { %v2833_v30 = vpop.f32.mrb[145].mxu0 }
 0x262   : > { %v11104_v59 = vadd.f32 %v2833_v30, %v10804_v61  ;;  %v8885_v51 = vpop.f32.mrb[146].mxu0  ;;  %v2688_v34 = vpop.f32.mrb[160].mxu1  ;;  %v3206_v30 = vshrl.u32 %v10966_v13, 16 }
 0x263   : > { %v2836_v50 = vpop.f32.mrb[147].mxu0  ;;  %v11113_v61 = vadd.f32 %v2688_v34, %v10858_v12  ;;  %v2690_v41 = vpop.f32.mrb[161].mxu1 }
 0x264   : > { %v11109_v19 = vadd.f32 %v2836_v50, %v10808_v2  ;;  %v2691_v16 = vpop.f32.mrb[162].mxu1  ;;  %v3205_v2 = vsel %vm708_vm7, %v3200_v24, %v3204_v31 }
 0x265   : > { %9007 = vmatmul.mubr.bf16.gmra.mrb[252].mxu0 %v3423_v9  ;;  %v11116_v21 = vadd.f32 %v2691_v16, %v10866_v22  ;;  %v2693_v17 = vpop.f32.mrb[163].mxu1  ;;  %v3208_v22 = vor.u32 %v3206_v30, %v3204_v31 }
 0x267   : > { %3816 = vmatmul.mubr.bf16.gmra.mrb[12].mxu1 %v10947_v48  ;;  %v3213_v16 = vsel %vm708_vm7, %v3208_v22, %v3212_v46 }
 0x268   : > { %v8888_v18 = vpop.f32.mrb[148].mxu0  ;;  %3821 = vmatprep.mubr.bf16.mxu1 %v3205_v2 }
 0x269   : > { %v2847_v35 = vpop.f32.mrb[149].mxu0  ;;  %v3218_v18 = vshll.u32 %v10985_v56, 16 }
 0x26a   : > { %v11122_v0 = vadd.f32 %v2847_v35, %v10839_v40  ;;  %v8889_v57 = vpop.f32.mrb[150].mxu0  ;;  %v2696_v51 = vpop.f32.mrb[164].mxu1  ;;  %v3214_v40 = vshrl.u32 %v10983_v14, 16 }
 0x26b   : > { %v2850_v12 = vpop.f32.mrb[151].mxu0  ;;  %v2697_v9 = vpop.f32.mrb[165].mxu1  ;;  %v3220_v2 = vrot.slane %v3218_v18, 1 }
 0x26c   : > { %v11126_v52 = vadd.f32 %v2850_v12, %v10844_v58  ;;  %v2698_v50 = vpop.f32.mrb[166].mxu1  ;;  %v3216_v17 = vor.u32 %v3214_v40, %v3212_v46 }
 0x26d   : > { %v2699_v34 = vpop.f32.mrb[167].mxu1  ;;  %v3226_v50 = vshll.u32 %v11004_v1, 16 }
 0x26f   : > { %3822 = vmatmul.mubr.bf16.gmra.mrb[16].mxu1 %v10964_v38  ;;  %v3221_v38 = vsel %vm708_vm7, %v3216_v17, %v3220_v2 }
 0x270   : > { %v8892_v24 = vpop.f32.mrb[152].mxu0  ;;  %3829 = vmatprep.mubr.bf16.mxu1 %v3213_v16  ;;  %v3228_v16 = vrot.slane %v3226_v50, 1 }
 0x271   : > { %v2861_v41 = vpop.f32.mrb[153].mxu0 }
 0x272   : > { %v11132_v48 = vadd.f32 %v2861_v41, %v10875_v4  ;;  %v8893_v58 = vpop.f32.mrb[154].mxu0  ;;  %v2702_v30 = vpop.f32.mrb[168].mxu1 }
 0x273   : > { %v2864_v31 = vpop.f32.mrb[155].mxu0  ;;  %v11139_v39 = vadd.f32 %v2702_v30, %v10896_v26  ;;  %v2704_v57 = vpop.f32.mrb[169].mxu1  ;;  %v11150_v26 = vld [vmem:[#allocation3 + $0x80] sm:$0xff]  }
 0x274   : > { %v11136_v35 = vadd.f32 %v2864_v31, %v10880_v27  ;;  %v2705_v12 = vpop.f32.mrb[170].mxu1  ;;  %v3222_v27 = vshrl.u32 %v10985_v56, 16  ;;  %9090 = vmatprep.subr.bf16.mxu0 %v11150_v26  ;;  %v3230_v57 = vshrl.u32 %v11004_v1, 16 }
 0x275   : > { %v11142_v4 = vadd.f32 %v2705_v12, %v10904_v54  ;;  %v2707_v9 = vpop.f32.mrb[171].mxu1 }
 0x276   : > { %v3224_v41 = vor.u32 %v3222_v27, %v3220_v2 }
 0x277   : > { %3830 = vmatmul.mubr.bf16.gmra.mrb[20].mxu1 %v10966_v13  ;;  %v3234_v13 = vshll.u32 %v11006_v37, 16 }
 0x278   : > { %v8896_v22 = vpop.f32.mrb[156].mxu0  ;;  %3835 = vmatprep.mubr.bf16.mxu1 %v3221_v38  ;;  %v3229_v30 = vsel %vm708_vm7, %v3224_v41, %v3228_v16 }
 0x279   : > { %v2875_v51 = vpop.f32.mrb[157].mxu0  ;;  %v3236_v9 = vrot.slane %v3234_v13, 1 }
 0x27a   : > { %v11148_v46 = vadd.f32 %v2875_v51, %v10913_v42  ;;  %v8897_v24 = vpop.f32.mrb[158].mxu0  ;;  %v2710_v40 = vpop.f32.mrb[172].mxu1  ;;  %v3232_v51 = vor.u32 %v3230_v57, %v3228_v16 }
 0x27b   : > { %v2878_v34 = vpop.f32.mrb[159].mxu0  ;;  %v2711_v18 = vpop.f32.mrb[173].mxu1 }
 0x27c   : > { %v11154_v54 = vadd.f32 %v2878_v34, %v10918_v44  ;;  %v2712_v58 = vpop.f32.mrb[174].mxu1  ;;  %v3242_v18 = vshll.u32 %v11026_v43, 16 }
 0x27d   : > { %v2713_v42 = vpop.f32.mrb[175].mxu1 }
 0x27e   : > { %v3244_v42 = vrot.slane %v3242_v18, 1 }
 0x27f   : > { %3836 = vmatmul.mubr.bf16.gmra.mrb[24].mxu1 %v10983_v14  ;;  %v3237_v14 = vsel %vm708_vm7, %v3232_v51, %v3236_v9 }
 0x280   : > { %v8900_v31 = vpop.f32.mrb[160].mxu0  ;;  %3843 = vmatprep.mubr.bf16.mxu1 %v3229_v30 }
 0x281   : > { %v2889_v17 = vpop.f32.mrb[161].mxu0 }
 0x282   : > { %v11161_v44 = vadd.f32 %v2889_v17, %v10951_v49  ;;  %v8901_v12 = vpop.f32.mrb[162].mxu0  ;;  %v2716_v38 = vpop.f32.mrb[176].mxu1 }
 0x283   : > { %v2892_v2 = vpop.f32.mrb[163].mxu0  ;;  %v11168_v27 = vadd.f32 %v2716_v38, %v10934_v32  ;;  %v2718_v50 = vpop.f32.mrb[177].mxu1  ;;  %v3250_v38 = vshll.u32 %v11031_v62, 16 }
 0x284   : > { %v11165_v22 = vadd.f32 %v2892_v2, %v10956_v28  ;;  %v2719_v24 = vpop.f32.mrb[178].mxu1  ;;  %v3238_v28 = vshrl.u32 %v11006_v37, 16 }
 0x285   : > { %v11171_v49 = vadd.f32 %v2719_v24, %v10942_v11  ;;  %v2721_v40 = vpop.f32.mrb[179].mxu1 }
 0x286   : > { %v3240_v11 = vor.u32 %v3238_v28, %v3236_v9 }
 0x287   : > { %3844 = vmatmul.mubr.bf16.gmra.mrb[28].mxu1 %v10985_v56 }
 0x288   : > { %v8904_v34 = vpop.f32.mrb[164].mxu0  ;;  %3849 = vmatprep.mubr.bf16.mxu1 %v3237_v14  ;;  %v3245_v51 = vsel %vm708_vm7, %v3240_v11, %v3244_v42 }
 0x289   : > { %v2903_v41 = vpop.f32.mrb[165].mxu0  ;;  %v3252_v34 = vrot.slane %v3250_v38, 1 }
 0x28a   : > { %v11177_v16 = vadd.f32 %v2903_v41, %v10991_v33  ;;  %v8905_v58 = vpop.f32.mrb[166].mxu0  ;;  %v2724_v17 = vpop.f32.mrb[180].mxu1  ;;  %v3246_v33 = vshrl.u32 %v11026_v43, 16 }
 0x28b   : > { %v2906_v32 = vpop.f32.mrb[167].mxu0  ;;  %v2725_v30 = vpop.f32.mrb[181].mxu1 }
 0x28c   : > { %v11181_v31 = vadd.f32 %v2906_v32, %v10996_v25  ;;  %v2726_v57 = vpop.f32.mrb[182].mxu1  ;;  %v3248_v24 = vor.u32 %v3246_v33, %v3244_v42  ;;  %v3254_v32 = vshrl.u32 %v11031_v62, 16 }
 0x28d   : > { %v2727_v12 = vpop.f32.mrb[183].mxu1 }
 0x28f   : > { %3850 = vmatmul.mubr.bf16.gmra.mrb[32].mxu1 %v11004_v1  ;;  %v3253_v1 = vsel %vm708_vm7, %v3248_v24, %v3252_v34 }
 0x290   : > { %v8908_v13 = vpop.f32.mrb[168].mxu0  ;;  %3857 = vmatprep.mubr.bf16.mxu1 %v3245_v51 }
 0x291   : > { %v2917_v2 = vpop.f32.mrb[169].mxu0 }
 0x292   : > { %v11187_v56 = vadd.f32 %v2917_v2, %v11035_v15  ;;  %v8909_v25 = vpop.f32.mrb[170].mxu0  ;;  %v2730_v41 = vpop.f32.mrb[184].mxu1 }
 0x293   : > { %v2920_v9 = vpop.f32.mrb[171].mxu0  ;;  %v11194_v40 = vadd.f32 %v2730_v41, %v10972_v7  ;;  %v2732_v14 = vpop.f32.mrb[185].mxu1  ;;  %v3266_v25 = vshll.u32 %v11056_v10, 16 }
 0x294   : > { %v11191_v50 = vadd.f32 %v2920_v9, %v11040_v3  ;;  %v2733_v28 = vpop.f32.mrb[186].mxu1  ;;  %v3258_v3 = vshll.u32 %v11051_v63, 16 }
 0x295   : > { %v11197_v15 = vadd.f32 %v2733_v28, %v10980_v60  ;;  %v2735_v11 = vpop.f32.mrb[187].mxu1  ;;  %v3256_v60 = vor.u32 %v3254_v32, %v3252_v34  ;;  %v3268_v14 = vrot.slane %v3266_v25, 1  ;;  %v3282_v25 = vshll.u32 %v11011_v5, 16 }
 0x296   : > { %v3260_v57 = vrot.slane %v3258_v3, 1  ;;  %v3274_v11 = vshll.u32 %v11069_v55, 16 }
 0x297   : > { %3858 = vmatmul.mubr.bf16.gmra.mrb[36].mxu1 %v11006_v37 }
 0x298   : > { %v8912_v18 = vpop.f32.mrb[172].mxu0  ;;  %3863 = vmatprep.mubr.bf16.mxu1 %v3253_v1  ;;  %v3261_v38 = vsel %vm708_vm7, %v3256_v60, %v3260_v57 }
 0x299   : > { %v2931_v58 = vpop.f32.mrb[173].mxu0 }
 0x29a   : > { %v11203_v42 = vadd.f32 %v2931_v58, %v11076_v29  ;;  %v8913_v17 = vpop.f32.mrb[174].mxu0  ;;  %v2738_v13 = vpop.f32.mrb[188].mxu1  ;;  %v3262_v29 = vshrl.u32 %v11051_v63, 16 }
 0x29b   : > { %v2934_v7 = vpop.f32.mrb[175].mxu0  ;;  %v2739_v12 = vpop.f32.mrb[189].mxu1  ;;  %v3276_v13 = vrot.slane %v3274_v11, 1 }
 0x29c   : > { %v11207_v30 = vadd.f32 %v2934_v7, %v11081_v53  ;;  %v2740_v51 = vpop.f32.mrb[190].mxu1  ;;  %v3264_v41 = vor.u32 %v3262_v29, %v3260_v57 }
 0x29d   : > { %v2741_v9 = vpop.f32.mrb[191].mxu1 }
 0x29e   : > { %v3269_v3 = vsel %vm708_vm7, %v3264_v41, %v3268_v14 }
 0x29f   : > { %3864 = vmatmul.mubr.bf16.gmra.mrb[40].mxu1 %v11026_v43 }
 0x2a0   : > { %v8916_v2 = vpop.f32.mrb[176].mxu0  ;;  %3871 = vmatprep.mubr.bf16.mxu1 %v3261_v38 }
 0x2a1   : > { %v2945_v33 = vpop.f32.mrb[177].mxu0 }
 0x2a2   : > { %v11213_v37 = vadd.f32 %v2945_v33, %v11113_v61  ;;  %v8917_v53 = vpop.f32.mrb[178].mxu0  ;;  %v3683_v28 = vpop.f32.mrb[192].mxu1  ;;  %v3270_v61 = vshrl.u32 %v11056_v10, 16 }
 0x2a3   : > { %v2948_v24 = vpop.f32.mrb[179].mxu0  ;;  %v3685_v18 = vpop.f32.mrb[193].mxu1 }
 0x2a4   : > { %v11217_v34 = vadd.f32 %v2948_v24, %v11116_v21  ;;  %v3686_v1 = vpop.f32.mrb[194].mxu1  ;;  %v3272_v57 = vor.u32 %v3270_v61, %v3268_v14  ;;  %v3284_v14 = vrot.slane %v3282_v25, 1 }
 0x2a5   : > { %v3688_v17 = vpop.f32.mrb[195].mxu1 }
 0x2a6   : > { %v3277_v29 = vsel %vm708_vm7, %v3272_v57, %v3276_v13 }
 0x2a7   : > { %3872 = vmatmul.mubr.bf16.gmra.mrb[44].mxu1 %v11031_v62 }
 0x2a8   : > { %v8920_v58 = vpop.f32.mrb[180].mxu0  ;;  %3877 = vmatprep.mubr.bf16.mxu1 %v3269_v3 }
 0x2a9   : > { %v2959_v32 = vpop.f32.mrb[181].mxu0 }
 0x2aa   : > { %v11223_v43 = vadd.f32 %v2959_v32, %v11139_v39  ;;  %v8921_v21 = vpop.f32.mrb[182].mxu0  ;;  %v3691_v12 = vpop.f32.mrb[196].mxu1  ;;  %v3278_v39 = vshrl.u32 %v11069_v55, 16 }
 0x2ab   : > { %v2962_v7 = vpop.f32.mrb[183].mxu0  ;;  %v3692_v2 = vpop.f32.mrb[197].mxu1  ;;  %v3290_v21 = vshll.u32 %v11092_v36, 16 }
 0x2ac   : > { %v11227_v60 = vadd.f32 %v2962_v7, %v11142_v4  ;;  %v3693_v33 = vpop.f32.mrb[198].mxu1  ;;  %v3280_v41 = vor.u32 %v3278_v39, %v3276_v13 }
 0x2ad   : > { %v3694_v9 = vpop.f32.mrb[199].mxu1  ;;  %v3292_v12 = vrot.slane %v3290_v21, 1 }
 0x2ae   : > { %v3285_v11 = vsel %vm708_vm7, %v3280_v41, %v3284_v14  ;;  %v12816_v9 = vld [vmem:[#allocation8_spill] sm:$0xff] }
 0x2af   : > { %3878 = vmatmul.mubr.bf16.gmra.mrb[48].mxu1 %v11051_v63 }
 0x2b0   : > { %v8924_v51 = vpop.f32.mrb[184].mxu0  ;;  %3885 = vmatprep.mubr.bf16.mxu1 %v3277_v29 }
 0x2b1   : > { %v2973_v38 = vpop.f32.mrb[185].mxu0 }
 0x2b2   : > { %v11233_v62 = vadd.f32 %v2973_v38, %v11168_v27  ;;  %v8925_v4 = vpop.f32.mrb[186].mxu0  ;;  %v3697_v18 = vpop.f32.mrb[200].mxu1  ;;  %v3286_v27 = vshrl.u32 %v11011_v5, 16 }
 0x2b3   : > { %v2976_v53 = vpop.f32.mrb[187].mxu0  ;;  %v3699_v58 = vpop.f32.mrb[201].mxu1 }
 0x2b4   : > { %v11237_v24 = vadd.f32 %v2976_v53, %v11171_v49  ;;  %v3700_v3 = vpop.f32.mrb[202].mxu1  ;;  %v3288_v13 = vor.u32 %v3286_v27, %v3284_v14  ;;  %v12817_v14 = vld [vmem:[#allocation9_spill] sm:$0xff] }
 0x2b5   : > { %v3702_v17 = vpop.f32.mrb[203].mxu1 }
 0x2b6   : > { %v3293_v36 = vsel %vm708_vm7, %v3288_v13, %v3292_v12 }
 0x2b7   : > { %3886 = vmatmul.mubr.bf16.gmra.mrb[52].mxu1 %v11056_v10  ;;  %v11254_v10 = vld [vmem:[%s12789_s3] ss:$0 sm:$0xff] }
 0x2b8   : > { %v8928_v32 = vpop.f32.mrb[188].mxu0  ;;  %3891 = vmatprep.mubr.bf16.mxu1 %v3285_v11 }
 0x2b9   : > { %v2987_v61 = vpop.f32.mrb[189].mxu0 }
 0x2ba   : > { %v11243_v63 = vadd.f32 %v2987_v61, %v11194_v40  ;;  %v8929_v49 = vpop.f32.mrb[190].mxu0  ;;  %v3705_v2 = vpop.f32.mrb[204].mxu1 }
 0x2bb   : > { %v2990_v7 = vpop.f32.mrb[191].mxu0  ;;  %v3706_v51 = vpop.f32.mrb[205].mxu1  ;;  %v12818_v2 = vld [vmem:[#allocation10_spill] sm:$0xff] }
 0x2bc   : > { %v11247_v57 = vadd.f32 %v2990_v7, %v11197_v15  ;;  %v3707_v38 = vpop.f32.mrb[206].mxu1 }
 0x2bd   : > { %v3708_v39 = vpop.f32.mrb[207].mxu1 }
 0x2bf   : > { %3892 = vmatmul.mubr.bf16.gmra.mrb[56].mxu1 %v11069_v55 }
 0x2c0   : > { %v8948_v33 = vpop.f32.mrb[192].mxu0  ;;  %3899 = vmatprep.mubr.bf16.mxu1 %v3293_v36 }
 0x2c1   : > { %v3940_v29 = vpop.f32.mrb[193].mxu0 }
 0x2c2   : > { %v3941_v40 = vadd.f32 %v3940_v29, %v3683_v28  ;;  %v8949_v25 = vpop.f32.mrb[194].mxu0  ;;  %v3711_v32 = vpop.f32.mrb[208].mxu1 }
 0x2c3   : > { %v3943_v15 = vpop.f32.mrb[195].mxu0  ;;  %v3713_v61 = vpop.f32.mrb[209].mxu1 }
 0x2c4   : > { %v4163_v4 = vadd.f32 %v3941_v40, %v12816_v9  ;;  %v3944_v53 = vadd.f32 %v3943_v15, %v3686_v1  ;;  %v3714_v55 = vpop.f32.mrb[210].mxu1  ;;  %v4429_v40 = vld [vmem:[#allocation2 + $0x18] sm:$0x1] }
 0x2c5   : > { %v3716_v27 = vpop.f32.mrb[211].mxu1 }
 0x2c6   : > { %v4202_v41 = vadd.f32 %v11254_v10, %v4163_v4  ;;  %v4164_v58 = vadd.f32 %v3944_v53, %v12817_v14 }
 0x2c7   : > { %3900 = vmatmul.mubr.bf16.gmra.mrb[60].mxu1 %v11011_v5 }
 0x2c8   : > { %v4203_v28 = vadd.f32 %v11254_v10, %v4164_v58  ;;  %v8952_v11 = vpop.f32.mrb[196].mxu0  ;;  %v4234_v21 = vmax.f32 %v4202_v41, 0.0  ;;  %v4426_v41 = vld [vmem:[#allocation2 + $0x10] sm:$0xff] }
 0x2c9   : > { %v3954_v17 = vpop.f32.mrb[197].mxu0 }
 0x2ca   : > { %v4235_v49 = vmax.f32 %v4203_v28, 0.0  ;;  %v3955_v7 = vadd.f32 %v3954_v17, %v3697_v18  ;;  %v8953_v13 = vpop.f32.mrb[198].mxu0  ;;  %v3719_v36 = vpop.f32.mrb[212].mxu1 }
 0x2cb   : > { %v3957_v12 = vpop.f32.mrb[199].mxu0  ;;  %v3720_v25 = vpop.f32.mrb[213].mxu1 }
 0x2cc   : > { %v4266_v1 = vpack.c.bf16 %v4235_v49, %v4234_v21  ;;  %v4165_v51 = vadd.f32 %v3955_v7, %v12818_v2  ;;  %v3958_v33 = vadd.f32 %v3957_v12, %v3700_v3  ;;  %v3721_v53 = vpop.f32.mrb[214].mxu1  ;;  %v11729_v3 = vld [vmem:[#allocation2 + $0x8] sm:$0xff] }
 0x2cd   : > { %v3722_v58 = vpop.f32.mrb[215].mxu1 }
 0x2ce   : > { %v4283_v38 = vshrl.u32 %v4266_v1, 16  ;;  %v4204_v29 = vadd.f32 %v11254_v10, %v4165_v51  ;;  %v4166_v39 = vadd.f32 %v3958_v33, %v11054_v20  ;;  %v4286_v9 = vshll.u32 %v4266_v1, 16 }
 0x2d0   : > { %v4285_v15 = vrot.slane %v4283_v38, 7  ;;  %v4205_v18 = vadd.f32 %v11254_v10, %v4166_v39  ;;  %v8956_v4 = vpop.f32.mrb[200].mxu0  ;;  %v4236_v5 = vmax.f32 %v4204_v29, 0.0  ;;  %v4435_v38 = vld [vmem:[#allocation2 + $0x28] sm:$0x1] }
 0x2d1   : > { %v3968_v14 = vpop.f32.mrb[201].mxu0 }
 0x2d2   : > { %v4288_v61 = vor.u32 %v4286_v9, %v4285_v15  ;;  %v4430_v28 = vsel %vm9606_vm5, %v4285_v15, %v4429_v40  ;;  %v4237_v11 = vmax.f32 %v4205_v18, 0.0  ;;  %v3969_v17 = vadd.f32 %v3968_v14, %v3711_v32  ;;  %v8957_v20 = vpop.f32.mrb[202].mxu0  ;;  %v3725_v33 = vpop.f32.mrb[216].mxu1 }
 0x2d3   : > { %4431 = vst [vmem:[#allocation2 + $0x18] sm:$0x1] %v4430_v28  ;;  %v3971_v27 = vpop.f32.mrb[203].mxu0  ;;  %v3727_v29 = vpop.f32.mrb[217].mxu1 }
 0x2d4   : > { %v11269_v49 = vsel %vm9566_vm2, %v4288_v61, %v4426_v41  ;;  %v4267_v7 = vpack.c.bf16 %v4237_v11, %v4236_v5  ;;  %v4167_v13 = vadd.f32 %v3969_v17, %v11064_v6  ;;  %v3972_v12 = vadd.f32 %v3971_v27, %v3714_v55  ;;  %v3728_v6 = vpop.f32.mrb[218].mxu1  ;;  %v4432_v55 = vld [vmem:[#allocation2 + $0x20] sm:$0xff] }
 0x2d5   : > { %4428 = vst [vmem:[#allocation2 + $0x10] sm:$0xff] %v11269_v49  ;;  %v5061_v1 = vshll.u32 %v11269_v49, 16  ;;  %v3730_v4 = vpop.f32.mrb[219].mxu1  ;;  %v5383_v53 = vrot.slane %v11269_v49, 1  ;;  %v5059_v41 = vshrl.u32 %v11269_v49, 16 }
 0x2d6   : > { %v4290_v2 = vshrl.u32 %v4267_v7, 16  ;;  %v4206_v51 = vadd.f32 %v11254_v10, %v4167_v13  ;;  %v4168_v32 = vadd.f32 %v3972_v12, %v11072_v47  ;;  %v4293_v40 = vshll.u32 %v4267_v7, 16 }
 0x2d7   : > { %v5063_v39 = vrot.slane %v5061_v1, 1 }
 0x2d8   : > { %v4292_v36 = vrot.slane %v4290_v2, 7  ;;  %v4207_v25 = vadd.f32 %v11254_v10, %v4168_v32  ;;  %v8960_v15 = vpop.f32.mrb[204].mxu0  ;;  %v4238_v9 = vmax.f32 %v4206_v51, 0.0 }
 0x2d9   : > { %v3982_v18 = vpop.f32.mrb[205].mxu0  ;;  %v5064_v20 = vor.u32 %v5063_v39, %v5059_v41 }
 0x2da   : > { %v4295_v5 = vor.u32 %v4293_v40, %v4292_v36  ;;  %v4436_v47 = vsel %vm9606_vm5, %v4292_v36, %v4435_v38  ;;  %v4239_v14 = vmax.f32 %v4207_v25, 0.0  ;;  %v3983_v58 = vadd.f32 %v3982_v18, %v3725_v33  ;;  %v8961_v61 = vpop.f32.mrb[206].mxu0  ;;  %v11281_v28 = vld [vmem:[#allocation2 + $0x18] sm:$0xff]  ;;  %v3733_v40 = vpop.f32.mrb[220].mxu1 }
 0x2db   : > { %4437 = vst [vmem:[#allocation2 + $0x28] sm:$0x1] %v4436_v47  ;;  %v3985_v11 = vpop.f32.mrb[207].mxu0  ;;  %v5384_v17 = vrot.slane %v11281_v28, 1  ;;  %v5066_v27 = vshll.u32 %v11281_v28, 16  ;;  %v5070_v7 = vshrl.u32 %v11281_v28, 16 }
 0x2dc   : > { %v11288_v13 = vsel %vm9566_vm2, %v4295_v5, %v4432_v55  ;;  %v4268_v12 = vpack.c.bf16 %v4239_v14, %v4238_v9  ;;  %v4169_v1 = vadd.f32 %v3983_v58, %v11087_v23  ;;  %v3986_v2 = vadd.f32 %v3985_v11, %v3728_v6  ;;  %v4441_v25 = vld [vmem:[#allocation2 + $0x38] sm:$0x1]  ;;  %v3734_v15 = vpop.f32.mrb[221].mxu1 }
 0x2dd   : > { %4434 = vst [vmem:[#allocation2 + $0x20] sm:$0xff] %v11288_v13  ;;  %v5385_v51 = vsel %vm1034_vm8, %v5383_v53, %v5384_v17  ;;  %v5386_v32 = vrot.slane %v11288_v13, 1  ;;  %v5068_v33 = vrot.slane %v5066_v27, 1  ;;  %v5074_v38 = vshll.u32 %v11288_v13, 16  ;;  %v9369_v18 = vld [vmem:[#allocation3 + $0x88] sm:$0xff]   ;;  %v3735_v5 = vpop.f32.mrb[222].mxu1 }
 0x2de   : > { %v4297_v29 = vshrl.u32 %v4268_v12, 16  ;;  %v4208_v39 = vadd.f32 %v11254_v10, %v4169_v1  ;;  %v4170_v36 = vadd.f32 %v3986_v2, %v11095_v45  ;;  %9026 = vmatprep.mubr.bf16.mxu1 %v5385_v51  ;;  %v4300_v53 = vshll.u32 %v4268_v12, 16  ;;  %v4438_v45 = vld [vmem:[#allocation2 + $0x30] sm:$0xff]  ;;  %v3736_v14 = vpop.f32.mrb[223].mxu1  ;;  %v9370_v51 = vld [vmem:[#allocation3 + $0x90] sm:$0xff]  }
 0x2df   : > { %v5387_v23 = vsel %vm1034_vm8, %v5384_v17, %v5386_v32  ;;  %v5069_v6 = vsel %vm708_vm7, %v5064_v20, %v5068_v33  ;;  %v5072_v55 = vor.u32 %v5070_v7, %v5068_v33  ;;  %v5076_v9 = vrot.slane %v5074_v38, 1  ;;  %v4447_v15 = vld [vmem:[#allocation2 + $0x48] sm:$0x1] }
 0x2e0   : > { %v4299_v4 = vrot.slane %v4297_v29, 7  ;;  %v4209_v41 = vadd.f32 %v11254_v10, %v4170_v36  ;;  %v8964_v47 = vpop.f32.mrb[208].mxu0  ;;  %5705 = vmatprep.mubr.bf16.mxu0 %v5069_v6  ;;  %9027 = vmatmul.mubr.bf16.vlgmr.msra.gmra.mrb[64].mxu1 %v5387_v23  ;;  %v4240_v20 = vmax.f32 %v4208_v39, 0.0  ;;  %v5078_v39 = vshrl.u32 %v11288_v13, 16 }
 0x2e1   : > { %v3996_v58 = vpop.f32.mrb[209].mxu0  ;;  %5706 = vmatmul.mubr.bf16.vlgmr.msra.gmra.mrb[0].mxu0 %v11269_v49  ;;  %v5077_v61 = vsel %vm708_vm7, %v5072_v55, %v5076_v9  ;;  %v9371_v47 = vld [vmem:[#allocation3 + $0x98] sm:$0xff]  }
 0x2e2   : > { %v4302_v11 = vor.u32 %v4300_v53, %v4299_v4  ;;  %v4442_v17 = vsel %vm9606_vm5, %v4299_v4, %v4441_v25  ;;  %v4241_v27 = vmax.f32 %v4209_v41, 0.0  ;;  %v8965_v7 = vpop.f32.mrb[210].mxu0  ;;  %9091 = vmatpush3.bf16.msra.mxu0 %v11150_v26  ;;  %v11305_v12 = vld [vmem:[#allocation2 + $0x28] sm:$0xff]  ;;  %5713 = vmatprep.mubr.bf16.mxu0 %v5077_v61  ;;  %v3739_v25 = vpop.f32.mrb[224].mxu1  ;;  %v5080_v4 = vor.u32 %v5078_v39, %v5076_v9 }
 0x2e3   : > { %4443 = vst [vmem:[#allocation2 + $0x38] sm:$0x1] %v4442_v17  ;;  %v3999_v1 = vpop.f32.mrb[211].mxu0  ;;  %v5388_v2 = vrot.slane %v11305_v12, 1  ;;  %v5082_v49 = vshll.u32 %v11305_v12, 16  ;;  %9092 = vmatprep.subr.bf16.mxu0 %v9369_v18  ;;  %v3997_v23 = vadd.f32 %v3996_v58, %v3739_v25  ;;  %v3741_v6 = vpop.f32.mrb[225].mxu1 }
 0x2e4   : > { %v11311_v33 = vsel %vm9566_vm2, %v4302_v11, %v4438_v45  ;;  %v4269_v38 = vpack.c.bf16 %v4241_v27, %v4240_v20  ;;  %v3742_v5 = vpop.f32.mrb[226].mxu1  ;;  %v4444_v45 = vld [vmem:[#allocation2 + $0x40] sm:$0xff] }
 0x2e5   : > { %4440 = vst [vmem:[#allocation2 + $0x30] sm:$0xff] %v11311_v33  ;;  %v5389_v26 = vsel %vm1034_vm8, %v5386_v32, %v5388_v2  ;;  %v5390_v29 = vrot.slane %v11311_v33, 1  ;;  %v5084_v36 = vrot.slane %v5082_v49, 1  ;;  %v4171_v14 = vadd.f32 %v3997_v23, %v11104_v59  ;;  %v3744_v11 = vpop.f32.mrb[227].mxu1  ;;  %v9372_v59 = vld [vmem:[#allocation3] sm:$0xff]  }
 0x2e6   : > { %v4304_v40 = vshrl.u32 %v4269_v38, 16  ;;  %9030 = vmatprep.mubr.bf16.mxu1 %v5389_v26  ;;  %9093 = vmatpush3.bf16.msra.mxu0 %v9369_v18  ;;  %v4307_v41 = vshll.u32 %v4269_v38, 16  ;;  %v4000_v61 = vadd.f32 %v3999_v1, %v3742_v5  ;;  %v5090_v17 = vshll.u32 %v11311_v33, 16 }
 0x2e7   : > { %v5391_v55 = vsel %vm1034_vm8, %v5388_v2, %v5390_v29  ;;  %9094 = vmatprep.subr.bf16.mxu0 %v9370_v51  ;;  %v5085_v18 = vsel %vm708_vm7, %v5080_v4, %v5084_v36  ;;  %v5086_v2 = vshrl.u32 %v11305_v12, 16  ;;  %v4210_v1 = vadd.f32 %v11254_v10, %v4171_v14  ;;  %6332 = vmatpush1.bf16.msra.mxu1 %v9372_v59  ;;  %v4450_v59 = vld [vmem:[#allocation2 + $0x50] sm:$0xff] }
 0x2e8   : > { %v4306_v53 = vrot.slane %v4304_v40, 7  ;;  %v8968_v32 = vpop.f32.mrb[212].mxu0  ;;  %9031 = vmatmul.mubr.bf16.gmra.mrb[68].mxu1 %v5391_v55  ;;  %6333 = vmatprep.subr.bf16.mxu1 %v10820_v8 }
 0x2e9   : > { %5714 = vmatmul.mubr.bf16.gmra.mrb[4].mxu0 %v11281_v28  ;;  %v4010_v58 = vpop.f32.mrb[213].mxu0  ;;  %v4172_v28 = vadd.f32 %v4000_v61, %v11109_v19  ;;  %v5088_v39 = vor.u32 %v5086_v2, %v5084_v36  ;;  %v5092_v19 = vrot.slane %v5090_v17, 1  ;;  %v4453_v17 = vld [vmem:[#allocation2 + $0x58] sm:$0x1] }
 0x2ea   : > { %v4309_v9 = vor.u32 %v4307_v41, %v4306_v53  ;;  %v4448_v20 = vsel %vm9606_vm5, %v4306_v53, %v4447_v15  ;;  %5719 = vmatprep.mubr.bf16.mxu0 %v5085_v18  ;;  %v11324_v27 = vld [vmem:[#allocation2 + $0x38] sm:$0xff]  ;;  %v8969_v7 = vpop.f32.mrb[214].mxu0  ;;  %9095 = vmatpush3.bf16.msra.mxu0 %v9370_v51  ;;  %v3747_v23 = vpop.f32.mrb[228].mxu1  ;;  %v4242_v51 = vmax.f32 %v4210_v1, 0.0 }
 0x2eb   : > { %4449 = vst [vmem:[#allocation2 + $0x48] sm:$0x1] %v4448_v20  ;;  %v5392_v49 = vrot.slane %v11324_v27, 1  ;;  %v4013_v38 = vpop.f32.mrb[215].mxu0  ;;  %9096 = vmatprep.subr.bf16.mxu0 %v9371_v47  ;;  %v4211_v40 = vadd.f32 %v11254_v10, %v4172_v28  ;;  %v3748_v55 = vpop.f32.mrb[229].mxu1  ;;  %v5098_v32 = vshll.u32 %v11324_v27, 16 }
 0x2ec   : > { %v11332_v26 = vsel %vm9566_vm2, %v4309_v9, %v4444_v45  ;;  %v3749_v4 = vpop.f32.mrb[230].mxu1  ;;  %v5094_v9 = vshrl.u32 %v11311_v33, 16 }
 0x2ed   : > { %4446 = vst [vmem:[#allocation2 + $0x40] sm:$0xff] %v11332_v26  ;;  %v5393_v25 = vsel %vm1034_vm8, %v5390_v29, %v5392_v49  ;;  %v5394_v15 = vrot.slane %v11332_v26, 1  ;;  %v4243_v6 = vmax.f32 %v4211_v40, 0.0  ;;  %v3750_v5 = vpop.f32.mrb[231].mxu1  ;;  %v5093_v29 = vsel %vm708_vm7, %v5088_v39, %v5092_v19 }
 0x2ee   : > { %9034 = vmatprep.mubr.bf16.mxu1 %v5393_v25  ;;  %9097 = vmatpush3.bf16.msra.mxu0 %v9371_v47  ;;  %v5100_v2 = vrot.slane %v5098_v32, 1  ;;  %v5096_v25 = vor.u32 %v5094_v9, %v5092_v19  ;;  %v9373_v5 = vld [vmem:[#allocation3 + $0x8] sm:$0xff]  }
 0x2ef   : > { %v5395_v36 = vsel %vm1034_vm8, %v5392_v49, %v5394_v15  ;;  %v4270_v41 = vpack.c.bf16 %v4243_v6, %v4242_v51  ;;  %v5106_v51 = vshll.u32 %v11332_v26, 16  ;;  %6334 = vmatpush1.bf16.msra.mxu1 %v9373_v5 }
 0x2f0   : > { %9035 = vmatmul.mubr.bf16.gmra.mrb[72].mxu1 %v5395_v36  ;;  %v8972_v53 = vpop.f32.mrb[216].mxu0  ;;  %6335 = vmatprep.subr.bf16.mxu1 %v10820_v8 }
 0x2f1   : > { %5720 = vmatmul.mubr.bf16.gmra.mrb[8].mxu0 %v11288_v13  ;;  %v11343_v45 = vpop.f32.mrb[217].mxu0  ;;  %v4311_v11 = vshrl.u32 %v4270_v41, 16  ;;  %v4314_v13 = vshll.u32 %v4270_v41, 16  ;;  %v5101_v53 = vsel %vm708_vm7, %v5096_v25, %v5100_v2 }
 0x2f2   : > { %5727 = vmatprep.mubr.bf16.mxu0 %v5093_v29  ;;  %v11345_v14 = vld [vmem:[#allocation2 + $0x48] sm:$0xff]  ;;  %v8973_v61 = vpop.f32.mrb[218].mxu0  ;;  %v3753_v1 = vpop.f32.mrb[232].mxu1  ;;  %v9374_v29 = vld [vmem:[#allocation3 + $0xa0] sm:$0xff]  }
 0x2f3   : > { %v5396_v47 = vrot.slane %v11345_v14, 1  ;;  %v11348_v18 = vpop.f32.mrb[219].mxu0  ;;  %v4313_v20 = vrot.slane %v4311_v11, 7  ;;  %v4011_v39 = vadd.f32 %v4010_v58, %v3753_v1  ;;  %v3755_v40 = vpop.f32.mrb[233].mxu1  ;;  %9098 = vmatprep.subr.bf16.mxu0 %v9374_v29 }
 0x2f4   : > { %v3756_v23 = vpop.f32.mrb[234].mxu1  ;;  %9099 = vmatpush3.bf16.msra.mxu0 %v9374_v29  ;;  %v5114_v40 = vshll.u32 %v11345_v14, 16 }
 0x2f5   : > { %v5397_v7 = vsel %vm1034_vm8, %v5394_v15, %v5396_v47  ;;  %v4316_v28 = vor.u32 %v4314_v13, %v4313_v20  ;;  %v4454_v49 = vsel %vm9606_vm5, %v4313_v20, %v4453_v17  ;;  %v4173_v15 = vadd.f32 %v4011_v39, %v11122_v0  ;;  %v3758_v4 = vpop.f32.mrb[235].mxu1  ;;  %v9375_v17 = vld [vmem:[#allocation3 + $0x10] sm:$0xff]  }
 0x2f6   : > { %9038 = vmatprep.mubr.bf16.mxu1 %v5397_v7  ;;  %4455 = vst [vmem:[#allocation2 + $0x58] sm:$0x1] %v4454_v49  ;;  %v4014_v36 = vadd.f32 %v4013_v38, %v3756_v23  ;;  %v5102_v38 = vshrl.u32 %v11324_v27, 16  ;;  %v5108_v13 = vrot.slane %v5106_v51, 1  ;;  %6336 = vmatpush1.bf16.msra.mxu1 %v9375_v17  ;;  %v4527_v23 = vld [vmem:[#allocation2 + $0x28] sm:$0xff] }
 0x2f7   : > { %v11357_v55 = vsel %vm9566_vm2, %v4316_v28, %v4450_v59  ;;  %v4212_v32 = vadd.f32 %v11254_v10, %v4173_v15  ;;  %6337 = vmatprep.subr.bf16.mxu1 %v10820_v8  ;;  %v4595_v29 = vshll.u32 %v4527_v23, 16 }
 0x2f8   : > { %v8976_v6 = vpop.f32.mrb[220].mxu0  ;;  %4452 = vst [vmem:[#allocation2 + $0x50] sm:$0xff] %v11357_v55  ;;  %v5398_v19 = vrot.slane %v11357_v55, 1  ;;  %v4174_v0 = vadd.f32 %v4014_v36, %v11126_v52  ;;  %v5104_v20 = vor.u32 %v5102_v38, %v5100_v2 }
 0x2f9   : > { %5728 = vmatmul.mubr.bf16.gmra.mrb[12].mxu0 %v11305_v12  ;;  %v11362_v58 = vpop.f32.mrb[221].mxu0  ;;  %v4526_v12 = vld [vmem:[#allocation2 + $0x20] sm:$0xff]  ;;  %v4244_v59 = vmax.f32 %v4212_v32, 0.0  ;;  %v4459_v32 = vld [vmem:[#allocation2 + $0x68] sm:$0x1] }
 0x2fa   : > { %5733 = vmatprep.mubr.bf16.mxu0 %v5101_v53  ;;  %v8977_v41 = vpop.f32.mrb[222].mxu0  ;;  %v5399_v11 = vsel %vm1034_vm8, %v5396_v47, %v5398_v19  ;;  %v4213_v9 = vadd.f32 %v11254_v10, %v4174_v0  ;;  %v3761_v7 = vpop.f32.mrb[236].mxu1  ;;  %v4587_v52 = vshll.u32 %v4526_v12, 16  ;;  %v5109_v6 = vsel %vm708_vm7, %v5104_v20, %v5108_v13 }
 0x2fb   : > { %v11369_v61 = vpop.f32.mrb[223].mxu0  ;;  %9039 = vmatmul.mubr.bf16.gmra.mrb[76].mxu1 %v5399_v11  ;;  %v3762_v28 = vpop.f32.mrb[237].mxu1  ;;  %v5116_v0 = vrot.slane %v5114_v40, 1  ;;  %v4591_v38 = vshrl.u32 %v4526_v12, 16  ;;  %v5122_v40 = vshll.u32 %v11357_v55, 16 }
 0x2fc   : > { %v4245_v1 = vmax.f32 %v4213_v9, 0.0  ;;  %v3763_v39 = vpop.f32.mrb[238].mxu1  ;;  %v11384_v53 = vrot.slane %v4587_v52, 1  ;;  %v4456_v9 = vld [vmem:[#allocation2 + $0x60] sm:$0xff] }
 0x2fd   : > { %v11374_v49 = vld [vmem:[#allocation2 + $0x58] sm:$0xff]  ;;  %v3764_v51 = vpop.f32.mrb[239].mxu1  ;;  %v11393_v39 = vrot.slane %v4595_v29, 1 }
 0x2fe   : > { %v5400_v47 = vrot.slane %v11374_v49, 1  ;;  %v4271_v2 = vpack.c.bf16 %v4245_v1, %v4244_v59 }
 0x300   : > { %v8980_v25 = vpop.f32.mrb[224].mxu0  ;;  %v5401_v36 = vsel %vm1034_vm8, %v5398_v19, %v5400_v47  ;;  %v4318_v41 = vshrl.u32 %v4271_v2, 16  ;;  %v4321_v17 = vshll.u32 %v4271_v2, 16  ;;  %v6884_v19 = vor.u32 %v4591_v38, %v11384_v53  ;;  %v9376_v2 = vld [vmem:[#allocation3 + $0x18] sm:$0xff]  }
 0x301   : > { %5734 = vmatmul.mubr.bf16.gmra.mrb[16].mxu0 %v11311_v33  ;;  %v11380_v15 = vpop.f32.mrb[225].mxu0  ;;  %9042 = vmatprep.mubr.bf16.mxu1 %v5401_v36  ;;  %v5110_v33 = vshrl.u32 %v11332_v26, 16 }
 0x302   : > { %5741 = vmatprep.mubr.bf16.mxu0 %v5109_v6  ;;  %v8981_v4 = vpop.f32.mrb[226].mxu0  ;;  %v4320_v11 = vrot.slane %v4318_v41, 7  ;;  %v3767_v20 = vpop.f32.mrb[240].mxu1  ;;  %6338 = vmatpush1.bf16.msra.mxu1 %v9376_v2 }
 0x303   : > { %v11386_v5 = vpop.f32.mrb[227].mxu0  ;;  %v5112_v7 = vor.u32 %v5110_v33, %v5108_v13  ;;  %v4025_v1 = vadd.f32 %v11343_v45, %v3767_v20  ;;  %v3769_v28 = vpop.f32.mrb[241].mxu1  ;;  %v11408_v4 = vsel %vm708_vm7, %v6884_v19, %v11393_v39  ;;  %6339 = vmatprep.subr.bf16.mxu1 %v10820_v8 }
 0x304   : > { %v4323_v59 = vor.u32 %v4321_v17, %v4320_v11  ;;  %v4460_v52 = vsel %vm9606_vm5, %v4320_v11, %v4459_v32  ;;  %v3770_v25 = vpop.f32.mrb[242].mxu1  ;;  %v9377_v32 = vld [vmem:[#allocation3 + $0x20] sm:$0xff]   ;;  %v5130_v28 = vshll.u32 %v11374_v49, 16 }
 0x305   : > { %4461 = vst [vmem:[#allocation2 + $0x68] sm:$0x1] %v4460_v52  ;;  %v5117_v12 = vsel %vm708_vm7, %v5112_v7, %v5116_v0  ;;  %v4175_v51 = vadd.f32 %v4025_v1, %v11132_v48  ;;  %v4028_v6 = vadd.f32 %v11348_v18, %v3770_v25  ;;  %v3772_v45 = vpop.f32.mrb[243].mxu1  ;;  %v9378_v25 = vld [vmem:[#allocation3 + $0x28] sm:$0xff]  }
 0x306   : > { %v11399_v13 = vsel %vm9566_vm2, %v4323_v59, %v4456_v9  ;;  %v5124_v9 = vrot.slane %v5122_v40, 1  ;;  %6340 = vmatpush1.bf16.msra.mxu1 %v9377_v32  ;;  %v5126_v32 = vshrl.u32 %v11357_v55, 16 }
 0x307   : > { %4458 = vst [vmem:[#allocation2 + $0x60] sm:$0xff] %v11399_v13  ;;  %v5402_v41 = vrot.slane %v11399_v13, 1  ;;  %v4214_v48 = vadd.f32 %v11254_v10, %v4175_v51  ;;  %v4176_v18 = vadd.f32 %v4028_v6, %v11136_v35  ;;  %6341 = vmatprep.subr.bf16.mxu1 %v10820_v8 }
 0x308   : > { %v8984_v23 = vpop.f32.mrb[228].mxu0 }
 0x309   : > { %5742 = vmatmul.mubr.bf16.gmra.mrb[20].mxu0 %v11324_v27  ;;  %v11404_v36 = vpop.f32.mrb[229].mxu0  ;;  %v5118_v27 = vshrl.u32 %v11345_v14, 16  ;;  %v5403_v38 = vsel %vm1034_vm8, %v5400_v47, %v5402_v41  ;;  %v4215_v11 = vadd.f32 %v11254_v10, %v4176_v18  ;;  %v4246_v7 = vmax.f32 %v4214_v48, 0.0 }
 0x30a   : > { %5747 = vmatprep.mubr.bf16.mxu0 %v5117_v12  ;;  %v8985_v29 = vpop.f32.mrb[230].mxu0  ;;  %9043 = vmatmul.mubr.bf16.gmra.mrb[80].mxu1 %v5403_v38  ;;  %v3775_v20 = vpop.f32.mrb[244].mxu1  ;;  %v5132_v48 = vrot.slane %v5130_v28, 1  ;;  %v4462_v38 = vld [vmem:[#allocation2 + $0x70] sm:$0xff] }
 0x30b   : > { %v11415_v33 = vpop.f32.mrb[231].mxu0  ;;  %v5120_v17 = vor.u32 %v5118_v27, %v5116_v0  ;;  %v4247_v19 = vmax.f32 %v4215_v11, 0.0  ;;  %v3776_v59 = vpop.f32.mrb[245].mxu1  ;;  %6342 = vmatpush1.bf16.msra.mxu1 %v9378_v25  ;;  %v4465_v29 = vld [vmem:[#allocation2 + $0x78] sm:$0x1] }
 0x30c   : > { %v11420_v52 = vld [vmem:[#allocation2 + $0x68] sm:$0xff]  ;;  %v3777_v35 = vpop.f32.mrb[246].mxu1  ;;  %6343 = vmatprep.subr.bf16.mxu1 %v10820_v8 }
 0x30d   : > { %v5404_v1 = vrot.slane %v11420_v52, 1  ;;  %v4272_v12 = vpack.c.bf16 %v4247_v19, %v4246_v7  ;;  %v3778_v23 = vpop.f32.mrb[247].mxu1  ;;  %v5125_v0 = vsel %vm708_vm7, %v5120_v17, %v5124_v9  ;;  %v5128_v17 = vor.u32 %v5126_v32, %v5124_v9  ;;  %v9382_v32 = vld [vmem:[#allocation3 + $0x40] sm:$0xff]  }
 0x30f   : > { %v5405_v2 = vsel %vm1034_vm8, %v5402_v41, %v5404_v1  ;;  %v4325_v6 = vshrl.u32 %v4272_v12, 16  ;;  %v4328_v27 = vshll.u32 %v4272_v12, 16  ;;  %v5133_v35 = vsel %vm708_vm7, %v5128_v17, %v5132_v48 }
 0x310   : > { %v8988_v47 = vpop.f32.mrb[232].mxu0  ;;  %9046 = vmatprep.mubr.bf16.mxu1 %v5405_v2 }
 0x311   : > { %5748 = vmatmul.mubr.bf16.gmra.mrb[24].mxu0 %v11332_v26  ;;  %v11427_v40 = vpop.f32.mrb[233].mxu0  ;;  %v9380_v26 = vld [vmem:[#allocation3 + $0x30] sm:$0xff]   ;;  %v4327_v18 = vrot.slane %v4325_v6, 7  ;;  %v9381_v47 = vld [vmem:[#allocation3 + $0x38] sm:$0xff]   ;;  %v9379_v6 = vld [vmem:[#allocation3 + $0xa8] sm:$0xff]  }
 0x312   : > { %5755 = vmatprep.mubr.bf16.mxu0 %v5125_v0  ;;  %v8989_v51 = vpop.f32.mrb[234].mxu0  ;;  %v3781_v11 = vpop.f32.mrb[248].mxu1  ;;  %6344 = vmatpush1.bf16.msra.mxu1 %v9380_v26 }
 0x313   : > { %v11430_v45 = vpop.f32.mrb[235].mxu0  ;;  %v4330_v41 = vor.u32 %v4328_v27, %v4327_v18  ;;  %v4466_v20 = vsel %vm9606_vm5, %v4327_v18, %v4465_v29  ;;  %v4039_v7 = vadd.f32 %v11362_v58, %v3781_v11  ;;  %v3783_v19 = vpop.f32.mrb[249].mxu1  ;;  %6345 = vmatprep.subr.bf16.mxu1 %v10820_v8  ;;  %v5138_v58 = vshll.u32 %v11399_v13, 16  ;;  %9100 = vmatprep.subr.bf16.mxu0 %v9379_v6 }
 0x314   : > { %4467 = vst [vmem:[#allocation2 + $0x78] sm:$0x1] %v4466_v20  ;;  %v3784_v59 = vpop.f32.mrb[250].mxu1  ;;  %v5134_v18 = vshrl.u32 %v11374_v49, 16  ;;  %9101 = vmatpush3.bf16.msra.mxu0 %v9379_v6  ;;  %v5146_v19 = vshll.u32 %v11420_v52, 16 }
 0x315   : > { %v11441_v25 = vsel %vm9566_vm2, %v4330_v41, %v4462_v38  ;;  %v4177_v9 = vadd.f32 %v4039_v7, %v11148_v46  ;;  %v4042_v12 = vadd.f32 %v11369_v61, %v3784_v59  ;;  %v3786_v23 = vpop.f32.mrb[251].mxu1  ;;  %v5140_v27 = vrot.slane %v5138_v58, 1  ;;  %v4471_v6 = vld [vmem:[#allocation2 + $0x88] sm:$0x1] }
 0x316   : > { %4464 = vst [vmem:[#allocation2 + $0x70] sm:$0xff] %v11441_v25  ;;  %v5406_v2 = vrot.slane %v11441_v25, 1  ;;  %6346 = vmatpush1.bf16.msra.mxu1 %v9381_v47  ;;  %v5136_v20 = vor.u32 %v5134_v18, %v5132_v48 }
 0x317   : > { %v4216_v29 = vadd.f32 %v11254_v10, %v4177_v9  ;;  %v4178_v46 = vadd.f32 %v4042_v12, %v11154_v54  ;;  %6347 = vmatprep.subr.bf16.mxu1 %v10820_v8 }
 0x318   : > { %v8992_v28 = vpop.f32.mrb[236].mxu0  ;;  %v5141_v9 = vsel %vm708_vm7, %v5136_v20, %v5140_v27 }
 0x319   : > { %5756 = vmatmul.mubr.bf16.gmra.mrb[28].mxu0 %v11345_v14  ;;  %v11447_v0 = vpop.f32.mrb[237].mxu0  ;;  %v5407_v14 = vsel %vm1034_vm8, %v5404_v1, %v5406_v2  ;;  %v4217_v26 = vadd.f32 %v11254_v10, %v4178_v46  ;;  %v4248_v11 = vmax.f32 %v4216_v29, 0.0  ;;  %v5142_v29 = vshrl.u32 %v11399_v13, 16 }
 0x31a   : > { %5761 = vmatprep.mubr.bf16.mxu0 %v5133_v35  ;;  %v8993_v51 = vpop.f32.mrb[238].mxu0  ;;  %9047 = vmatmul.mubr.bf16.gmra.mrb[84].mxu1 %v5407_v14  ;;  %v3789_v38 = vpop.f32.mrb[252].mxu1  ;;  %v9383_v35 = vld [vmem:[#allocation3 + $0x48] sm:$0xff]   ;;  %v5148_v46 = vrot.slane %v5146_v19, 1 }
 0x31b   : > { %v11453_v61 = vpop.f32.mrb[239].mxu0  ;;  %6348 = vmatpush1.bf16.msra.mxu1 %v9382_v32  ;;  %v4249_v17 = vmax.f32 %v4217_v26, 0.0  ;;  %v3790_v54 = vpop.f32.mrb[253].mxu1  ;;  %v11459_v41 = vld [vmem:[#allocation2 + $0x78] sm:$0xff]  ;;  %v4468_v26 = vld [vmem:[#allocation2 + $0x80] sm:$0xff]  ;;  %v5144_v38 = vor.u32 %v5142_v29, %v5140_v27  ;;  %v9387_v29 = vld [vmem:[#allocation3 + $0x60] sm:$0xff]  }
 0x31c   : > { %6349 = vmatprep.subr.bf16.mxu1 %v10820_v8  ;;  %v3791_v1 = vpop.f32.mrb[254].mxu1  ;;  %v5408_v7 = vrot.slane %v11459_v41, 1 }
 0x31d   : > { %v4273_v28 = vpack.c.bf16 %v4249_v17, %v4248_v11  ;;  %v3792_v47 = vpop.f32.mrb[255].mxu1  ;;  %v5149_v1 = vsel %vm708_vm7, %v5144_v38, %v5148_v46 }
 0x31e   : > { %v5409_v23 = vsel %vm1034_vm8, %v5406_v2, %v5408_v7 }
 0x31f   : > { %6350 = vmatpush1.bf16.msra.mxu1 %v9383_v35  ;;  %v4332_v58 = vshrl.u32 %v4273_v28, 16  ;;  %9050 = vmatprep.mubr.bf16.mxu1 %v5409_v23  ;;  %v4335_v32 = vshll.u32 %v4273_v28, 16 }
 0x320   : > { %v8996_v59 = vpop.f32.mrb[240].mxu0  ;;  %6351 = vmatprep.subr.bf16.mxu1 %v10820_v8 }
 0x321   : > { %5762 = vmatmul.mubr.bf16.gmra.mrb[32].mxu0 %v11357_v55  ;;  %v11466_v12 = vpop.f32.mrb[241].mxu0  ;;  %v9385_v55 = vld [vmem:[#allocation3 + $0x50] sm:$0xff]   ;;  %v4334_v14 = vrot.slane %v4332_v58, 7  ;;  %v9386_v59 = vld [vmem:[#allocation3 + $0x58] sm:$0xff]  }
 0x322   : > { %5769 = vmatprep.mubr.bf16.mxu0 %v5141_v9  ;;  %v8997_v48 = vpop.f32.mrb[242].mxu0  ;;  %v3795_v18 = vpop.f32.mrb[0].mxu1 }
 0x323   : > { %v11469_v51 = vpop.f32.mrb[243].mxu0  ;;  %6352 = vmatpush1.bf16.msra.mxu1 %v9385_v55  ;;  %v4337_v2 = vor.u32 %v4335_v32, %v4334_v14  ;;  %v4472_v11 = vsel %vm9606_vm5, %v4334_v14, %v4471_v6  ;;  %v4053_v17 = vadd.f32 %v11380_v15, %v3795_v18  ;;  %v3797_v54 = vpop.f32.mrb[1].mxu1  ;;  %v5154_v15 = vshll.u32 %v11441_v25, 16 }
 0x324   : > { %6353 = vmatprep.subr.bf16.mxu1 %v10820_v8  ;;  %4473 = vst [vmem:[#allocation2 + $0x88] sm:$0x1] %v4472_v11  ;;  %v3798_v20 = vpop.f32.mrb[2].mxu1  ;;  %v5150_v14 = vshrl.u32 %v11420_v52, 16 }
 0x325   : > { %v11480_v35 = vsel %vm9566_vm2, %v4337_v2, %v4468_v26  ;;  %v4179_v27 = vadd.f32 %v4053_v17, %v11161_v44  ;;  %v4056_v28 = vadd.f32 %v11386_v5, %v3798_v20  ;;  %v3800_v47 = vpop.f32.mrb[3].mxu1  ;;  %v9384_v5 = vld [vmem:[#allocation3 + $0xb0] sm:$0xff]   ;;  %v5156_v32 = vrot.slane %v5154_v15, 1 }
 0x326   : > { %4470 = vst [vmem:[#allocation2 + $0x80] sm:$0xff] %v11480_v35  ;;  %v5410_v23 = vrot.slane %v11480_v35, 1  ;;  %9102 = vmatprep.subr.bf16.mxu0 %v9384_v5  ;;  %v5152_v11 = vor.u32 %v5150_v14, %v5148_v46 }
 0x327   : > { %6354 = vmatpush1.bf16.msra.mxu1 %v9386_v59  ;;  %v4218_v58 = vadd.f32 %v11254_v10, %v4179_v27  ;;  %v4180_v44 = vadd.f32 %v4056_v28, %v11165_v22  ;;  %9103 = vmatpush3.bf16.msra.mxu0 %v9384_v5  ;;  %v9388_v27 = vld [vmem:[#allocation3 + $0x68] sm:$0xff]  }
 0x328   : > { %v9000_v19 = vpop.f32.mrb[244].mxu0  ;;  %6355 = vmatprep.subr.bf16.mxu1 %v10820_v8 }
 0x329   : > { %5770 = vmatmul.mubr.bf16.gmra.mrb[36].mxu0 %v11374_v49  ;;  %v11486_v9 = vpop.f32.mrb[245].mxu0  ;;  %v5411_v49 = vsel %vm1034_vm8, %v5408_v7, %v5410_v23  ;;  %v4219_v55 = vadd.f32 %v11254_v10, %v4180_v44  ;;  %v4250_v18 = vmax.f32 %v4218_v58, 0.0  ;;  %v5162_v10 = vshll.u32 %v11459_v41, 16 }
 0x32a   : > { %5775 = vmatprep.mubr.bf16.mxu0 %v5149_v1  ;;  %v9001_v48 = vpop.f32.mrb[246].mxu0  ;;  %9051 = vmatmul.mubr.bf16.gmra.mrb[88].mxu1 %v5411_v49  ;;  %v3803_v26 = vpop.f32.mrb[4].mxu1  ;;  %v5157_v19 = vsel %vm708_vm7, %v5152_v11, %v5156_v32  ;;  %v5158_v58 = vshrl.u32 %v11441_v25, 16 }
 0x32b   : > { %v11492_v6 = vpop.f32.mrb[247].mxu0  ;;  %6356 = vmatpush1.bf16.msra.mxu1 %v9387_v29  ;;  %v4251_v38 = vmax.f32 %v4219_v55, 0.0  ;;  %v3804_v22 = vpop.f32.mrb[5].mxu1  ;;  %v11498_v2 = vld [vmem:[#allocation2 + $0x88] sm:$0xff]  ;;  %v4477_v48 = vld [vmem:[#allocation2 + $0x98] sm:$0x1] }
 0x32c   : > { %6357 = vmatprep.subr.bf16.mxu1 %v10820_v8  ;;  %v3805_v7 = vpop.f32.mrb[6].mxu1  ;;  %v5412_v17 = vrot.slane %v11498_v2, 1  ;;  %v5164_v44 = vrot.slane %v5162_v10, 1  ;;  %v4474_v29 = vld [vmem:[#allocation2 + $0x90] sm:$0xff]  ;;  %v5160_v14 = vor.u32 %v5158_v58, %v5156_v32  ;;  %v9390_v10 = vld [vmem:[#allocation3 + $0x78] sm:$0xff]   ;;  %v5166_v58 = vshrl.u32 %v11459_v41, 16 }
 0x32d   : > { %v4274_v20 = vpack.c.bf16 %v4251_v38, %v4250_v18  ;;  %v3806_v1 = vpop.f32.mrb[7].mxu1 }
 0x32e   : > { %v5413_v46 = vsel %vm1034_vm8, %v5410_v23, %v5412_v17  ;;  %v5165_v11 = vsel %vm708_vm7, %v5160_v14, %v5164_v44 }
 0x32f   : > { %v4339_v47 = vshrl.u32 %v4274_v20, 16  ;;  %9054 = vmatprep.mubr.bf16.mxu1 %v5413_v46  ;;  %6358 = vmatpush1.bf16.msra.mxu1 %v9388_v27  ;;  %v4342_v5 = vshll.u32 %v4274_v20, 16 }
 0x330   : > { %v9004_v54 = vpop.f32.mrb[248].mxu0  ;;  %6359 = vmatprep.subr.bf16.mxu1 %v10820_v8 }
 0x331   : > { %5776 = vmatmul.mubr.bf16.gmra.mrb[40].mxu0 %v11399_v13  ;;  %v11505_v59 = vpop.f32.mrb[249].mxu0  ;;  %v9389_v13 = vld [vmem:[#allocation3 + $0x70] sm:$0xff]   ;;  %v4341_v49 = vrot.slane %v4339_v47, 7 }
 0x332   : > { %5783 = vmatprep.mubr.bf16.mxu0 %v5157_v19  ;;  %v9005_v28 = vpop.f32.mrb[250].mxu0  ;;  %v3809_v55 = vpop.f32.mrb[8].mxu1 }
 0x333   : > { %v11508_v15 = vpop.f32.mrb[251].mxu0  ;;  %v4344_v23 = vor.u32 %v4342_v5, %v4341_v49  ;;  %v4478_v26 = vsel %vm9606_vm5, %v4341_v49, %v4477_v48  ;;  %v4067_v18 = vadd.f32 %v11404_v36, %v3809_v55  ;;  %v3811_v38 = vpop.f32.mrb[9].mxu1  ;;  %6360 = vmatpush1.bf16.msra.mxu1 %v9389_v13  ;;  %v5170_v36 = vshll.u32 %v11480_v35, 16  ;;  %v11532_v28 = vld [vmem:[%s12789_s3] ss:$0 sm:$0xff] }
 0x334   : > { %4479 = vst [vmem:[#allocation2 + $0x98] sm:$0x1] %v4478_v26  ;;  %v3812_v22 = vpop.f32.mrb[10].mxu1  ;;  %6361 = vmatprep.subr.bf16.mxu1 %v10820_v8 }
 0x335   : > { %v11519_v54 = vsel %vm9566_vm2, %v4344_v23, %v4474_v29  ;;  %v4181_v32 = vadd.f32 %v4067_v18, %v11177_v16  ;;  %v4070_v20 = vadd.f32 %v11415_v33, %v3812_v22  ;;  %v3814_v1 = vpop.f32.mrb[11].mxu1  ;;  %v5172_v13 = vrot.slane %v5170_v36, 1 }
 0x336   : > { %4476 = vst [vmem:[#allocation2 + $0x90] sm:$0xff] %v11519_v54  ;;  %v5414_v27 = vrot.slane %v11519_v54, 1  ;;  %v5168_v23 = vor.u32 %v5166_v58, %v5164_v44  ;;  %v5178_v18 = vshll.u32 %v11498_v2, 16  ;;  %v5174_v44 = vshrl.u32 %v11480_v35, 16 }
 0x337   : > { %v4220_v16 = vadd.f32 %v11532_v28, %v4181_v32  ;;  %v4182_v33 = vadd.f32 %v4070_v20, %v11181_v31  ;;  %6362 = vmatpush1.bf16.msra.mxu1 %v9390_v10  ;;  %v4483_v32 = vld [vmem:[#allocation2 + $0xa8] sm:$0x1] }
 0x338   : > { %v9008_v7 = vpop.f32.mrb[252].mxu0  ;;  %v5415_v47 = vsel %vm1034_vm8, %v5412_v17, %v5414_v27  ;;  %v5173_v22 = vsel %vm708_vm7, %v5168_v23, %v5172_v13  ;;  %v5180_v20 = vrot.slane %v5178_v18, 1  ;;  %v5186_v23 = vshll.u32 %v11519_v54, 16 }
 0x339   : > { %5784 = vmatmul.mubr.bf16.gmra.mrb[44].mxu0 %v11420_v52  ;;  %v11525_v19 = vpop.f32.mrb[253].mxu0  ;;  %v4221_v48 = vadd.f32 %v11532_v28, %v4182_v33  ;;  %9055 = vmatmul.mubr.bf16.gmra.mrb[92].mxu1 %v5415_v47  ;;  %v4252_v5 = vmax.f32 %v4220_v16, 0.0  ;;  %v5176_v16 = vor.u32 %v5174_v44, %v5172_v13 }
 0x33a   : > { %5789 = vmatprep.mubr.bf16.mxu0 %v5165_v11  ;;  %v9009_v46 = vpop.f32.mrb[254].mxu0  ;;  %v3817_v49 = vpop.f32.mrb[12].mxu1  ;;  %v9391_v11 = vld [vmem:[#allocation3 + $0xb8] sm:$0xff]  }
 0x33b   : > { %v11536_v52 = vpop.f32.mrb[255].mxu0  ;;  %v4253_v29 = vmax.f32 %v4221_v48, 0.0  ;;  %v3818_v55 = vpop.f32.mrb[13].mxu1  ;;  %v11541_v14 = vld [vmem:[#allocation2 + $0x98] sm:$0xff]  ;;  %9104 = vmatprep.subr.bf16.mxu0 %v9391_v11  ;;  %v4480_v46 = vld [vmem:[#allocation2 + $0xa0] sm:$0xff]  ;;  %v5181_v49 = vsel %vm708_vm7, %v5176_v16, %v5180_v20 }
 0x33c   : > { %v3819_v26 = vpop.f32.mrb[14].mxu1  ;;  %v5416_v31 = vrot.slane %v11541_v14, 1  ;;  %9105 = vmatpush3.bf16.msra.mxu0 %v9391_v11 }
 0x33d   : > { %v4275_v38 = vpack.c.bf16 %v4253_v29, %v4252_v5  ;;  %v3820_v17 = vpop.f32.mrb[15].mxu1  ;;  %7493 = vmatprep.subr.bf16.mxu0 %v10820_v8 }
 0x33e   : > { %v5417_v7 = vsel %vm1034_vm8, %v5414_v27, %v5416_v31  ;;  %v5188_v17 = vrot.slane %v5186_v23, 1 }
 0x33f   : > { %v4346_v10 = vshrl.u32 %v4275_v38, 16  ;;  %9058 = vmatprep.mubr.bf16.mxu1 %v5417_v7  ;;  %v4349_v36 = vshll.u32 %v4275_v38, 16 }
 0x341   : > { %5790 = vmatmul.mubr.bf16.gmra.mrb[48].mxu0 %v11441_v25  ;;  %v4348_v1 = vrot.slane %v4346_v10, 7 }
 0x342   : > { %5797 = vmatprep.mubr.bf16.mxu0 %v5173_v22  ;;  %v3823_v25 = vpop.f32.mrb[16].mxu1 }
 0x343   : > { %v4351_v33 = vor.u32 %v4349_v36, %v4348_v1  ;;  %v4484_v27 = vsel %vm9606_vm5, %v4348_v1, %v4483_v32  ;;  %v4081_v47 = vadd.f32 %v11427_v40, %v3823_v25  ;;  %v3825_v48 = vpop.f32.mrb[17].mxu1 }
 0x344   : > { %4485 = vst [vmem:[#allocation2 + $0xa8] sm:$0x1] %v4484_v27  ;;  %v3826_v58 = vpop.f32.mrb[18].mxu1  ;;  %v5190_v27 = vshrl.u32 %v11519_v54, 16 }
 0x345   : > { %v11556_v5 = vsel %vm9566_vm2, %v4351_v33, %v4480_v46  ;;  %v4183_v29 = vadd.f32 %v4081_v47, %v11187_v56  ;;  %v4084_v55 = vadd.f32 %v11430_v45, %v3826_v58  ;;  %v3828_v13 = vpop.f32.mrb[19].mxu1  ;;  %v5182_v45 = vshrl.u32 %v11498_v2, 16  ;;  %v4489_v33 = vld [vmem:[#allocation2 + $0xb8] sm:$0x1]  ;;  %v4486_v58 = vld [vmem:[#allocation2 + $0xb0] sm:$0xff] }
 0x346   : > { %4482 = vst [vmem:[#allocation2 + $0xa0] sm:$0xff] %v11556_v5  ;;  %v5418_v40 = vrot.slane %v11556_v5, 1 }
 0x347   : > { %v4222_v26 = vadd.f32 %v11532_v28, %v4183_v29  ;;  %v4184_v18 = vadd.f32 %v4084_v55, %v11191_v50  ;;  %v5184_v32 = vor.u32 %v5182_v45, %v5180_v20  ;;  %v5194_v50 = vshll.u32 %v11541_v14, 16 }
 0x348   : > { %v5419_v38 = vsel %vm1034_vm8, %v5416_v31, %v5418_v40  ;;  %v5192_v29 = vor.u32 %v5190_v27, %v5188_v17 }
 0x349   : > { %5798 = vmatmul.mubr.bf16.gmra.mrb[52].mxu0 %v11459_v41  ;;  %v4223_v56 = vadd.f32 %v11532_v28, %v4184_v18  ;;  %9059 = vmatmul.mubr.bf16.gmra.mrb[96].mxu1 %v5419_v38  ;;  %v4254_v22 = vmax.f32 %v4222_v26, 0.0  ;;  %v5189_v46 = vsel %vm708_vm7, %v5184_v32, %v5188_v17  ;;  %v5196_v20 = vrot.slane %v5194_v50, 1 }
 0x34a   : > { %5803 = vmatprep.mubr.bf16.mxu0 %v5181_v49  ;;  %v3831_v41 = vpop.f32.mrb[20].mxu1 }
 0x34b   : > { %v4255_v11 = vmax.f32 %v4223_v56, 0.0  ;;  %v3832_v7 = vpop.f32.mrb[21].mxu1  ;;  %v11569_v10 = vld [vmem:[#allocation2 + $0xa8] sm:$0xff]  ;;  %v5197_v18 = vsel %vm708_vm7, %v5192_v29, %v5196_v20 }
 0x34c   : > { %v3833_v44 = vpop.f32.mrb[22].mxu1  ;;  %v5420_v1 = vrot.slane %v11569_v10, 1 }
 0x34d   : > { %v4276_v36 = vpack.c.bf16 %v4255_v11, %v4254_v22  ;;  %v3834_v31 = vpop.f32.mrb[23].mxu1 }
 0x34e   : > { %v5421_v25 = vsel %vm1034_vm8, %v5418_v40, %v5420_v1  ;;  %v11580_v40 = vld [vmem:[#allocation3 + $0x200] sm:$0xff]  }
 0x34f   : > { %v4353_v16 = vshrl.u32 %v4276_v36, 16  ;;  %9062 = vmatprep.mubr.bf16.mxu1 %v5421_v25  ;;  %v4356_v48 = vshll.u32 %v4276_v36, 16  ;;  %9170 = vmatprep.subr.bf16.mxu1 %v11580_v40 }
 0x351   : > { %5804 = vmatmul.mubr.bf16.gmra.mrb[56].mxu0 %v11480_v35  ;;  %v4355_v47 = vrot.slane %v4353_v16, 7 }
 0x352   : > { %5811 = vmatprep.mubr.bf16.mxu0 %v5189_v46  ;;  %v3837_v49 = vpop.f32.mrb[24].mxu1 }
 0x353   : > { %v4358_v55 = vor.u32 %v4356_v48, %v4355_v47  ;;  %v4490_v35 = vsel %vm9606_vm5, %v4355_v47, %v4489_v33  ;;  %v4095_v13 = vadd.f32 %v11447_v0, %v3837_v49  ;;  %v3839_v23 = vpop.f32.mrb[25].mxu1  ;;  %v5202_v0 = vshll.u32 %v11556_v5, 16 }
 0x354   : > { %4491 = vst [vmem:[#allocation2 + $0xb8] sm:$0x1] %v4490_v35  ;;  %v3840_v26 = vpop.f32.mrb[26].mxu1  ;;  %v5206_v49 = vshrl.u32 %v11556_v5, 16  ;;  %v4492_v35 = vld [vmem:[#allocation2 + $0xc0] sm:$0xff] }
 0x355   : > { %v11585_v38 = vsel %vm9566_vm2, %v4358_v55, %v4486_v58  ;;  %v4185_v56 = vadd.f32 %v4095_v13, %v11203_v42  ;;  %v4098_v45 = vadd.f32 %v11453_v61, %v3840_v26  ;;  %v3842_v17 = vpop.f32.mrb[27].mxu1  ;;  %v5204_v7 = vrot.slane %v5202_v0, 1  ;;  %v4495_v58 = vld [vmem:[#allocation2 + $0xc8] sm:$0x1] }
 0x356   : > { %4488 = vst [vmem:[#allocation2 + $0xb0] sm:$0xff] %v11585_v38  ;;  %v5422_v41 = vrot.slane %v11585_v38, 1 }
 0x357   : > { %v4224_v22 = vadd.f32 %v11532_v28, %v4185_v56  ;;  %v4186_v11 = vadd.f32 %v4098_v45, %v11207_v30  ;;  %v5210_v30 = vshll.u32 %v11569_v10, 16  ;;  %v5208_v23 = vor.u32 %v5206_v49, %v5204_v7 }
 0x358   : > { %v5423_v42 = vsel %vm1034_vm8, %v5420_v1, %v5422_v41  ;;  %v5222_v49 = vshrl.u32 %v11585_v38, 16 }
 0x359   : > { %5812 = vmatmul.mubr.bf16.gmra.mrb[60].mxu0 %v11498_v2  ;;  %v4225_v61 = vadd.f32 %v11532_v28, %v4186_v11  ;;  %9063 = vmatmul.mubr.bf16.gmra.mrb[100].mxu1 %v5423_v42  ;;  %v5198_v2 = vshrl.u32 %v11541_v14, 16  ;;  %v4256_v44 = vmax.f32 %v4224_v22, 0.0  ;;  %v5218_v42 = vshll.u32 %v11585_v38, 16 }
 0x35a   : > { %5817 = vmatprep.mubr.bf16.mxu0 %v5197_v18  ;;  %v3845_v32 = vpop.f32.mrb[28].mxu1 }
 0x35b   : > { %v4257_v50 = vmax.f32 %v4225_v61, 0.0  ;;  %v3846_v36 = vpop.f32.mrb[29].mxu1  ;;  %v11599_v31 = vld [vmem:[#allocation2 + $0xb8] sm:$0xff]  ;;  %v5200_v46 = vor.u32 %v5198_v2, %v5196_v20  ;;  %v5212_v20 = vrot.slane %v5210_v30, 1  ;;  %v5220_v32 = vrot.slane %v5218_v42, 1 }
 0x35c   : > { %v3847_v25 = vpop.f32.mrb[30].mxu1  ;;  %v5424_v16 = vrot.slane %v11599_v31, 1 }
 0x35d   : > { %v4277_v33 = vpack.c.bf16 %v4257_v50, %v4256_v44  ;;  %v3848_v1 = vpop.f32.mrb[31].mxu1  ;;  %v5205_v27 = vsel %vm708_vm7, %v5200_v46, %v5204_v7  ;;  %v5213_v17 = vsel %vm708_vm7, %v5208_v23, %v5212_v20  ;;  %v5224_v23 = vor.u32 %v5222_v49, %v5220_v32  ;;  %v4504_v49 = vld [vmem:[#allocation2 + $0xe0] sm:$0xff] }
 0x35e   : > { %v5425_v47 = vsel %vm1034_vm8, %v5422_v41, %v5424_v16 }
 0x35f   : > { %v4360_v48 = vshrl.u32 %v4277_v33, 16  ;;  %9066 = vmatprep.mubr.bf16.mxu1 %v5425_v47  ;;  %v4363_v55 = vshll.u32 %v4277_v33, 16 }
 0x361   : > { %5818 = vmatmul.mubr.bf16.gmra.mrb[64].mxu0 %v11519_v54  ;;  %v4362_v29 = vrot.slane %v4360_v48, 7 }
 0x362   : > { %5825 = vmatprep.mubr.bf16.mxu0 %v5205_v27  ;;  %v3851_v13 = vpop.f32.mrb[32].mxu1 }
 0x363   : > { %v4365_v26 = vor.u32 %v4363_v55, %v4362_v29  ;;  %v4496_v54 = vsel %vm9606_vm5, %v4362_v29, %v4495_v58  ;;  %v4109_v18 = vadd.f32 %v11466_v12, %v3851_v13  ;;  %v3853_v56 = vpop.f32.mrb[33].mxu1  ;;  %v4501_v58 = vld [vmem:[#allocation2 + $0xd8] sm:$0x1] }
 0x364   : > { %4497 = vst [vmem:[#allocation2 + $0xc8] sm:$0x1] %v4496_v54  ;;  %v3854_v45 = vpop.f32.mrb[34].mxu1 }
 0x365   : > { %v11613_v0 = vsel %vm9566_vm2, %v4365_v26, %v4492_v35  ;;  %v4187_v41 = vadd.f32 %v4109_v18, %v11213_v37  ;;  %v4112_v22 = vadd.f32 %v11469_v51, %v3854_v45  ;;  %v3856_v11 = vpop.f32.mrb[35].mxu1  ;;  %v5214_v51 = vshrl.u32 %v11569_v10, 16  ;;  %v4498_v35 = vld [vmem:[#allocation2 + $0xd0] sm:$0xff] }
 0x366   : > { %4494 = vst [vmem:[#allocation2 + $0xc0] sm:$0xff] %v11613_v0  ;;  %v5426_v12 = vrot.slane %v11613_v0, 1  ;;  %v5234_v42 = vshll.u32 %v11613_v0, 16 }
 0x367   : > { %v4226_v61 = vadd.f32 %v11532_v28, %v4187_v41  ;;  %v4188_v2 = vadd.f32 %v4112_v22, %v11217_v34  ;;  %v5216_v25 = vor.u32 %v5214_v51, %v5212_v20  ;;  %v5226_v34 = vshll.u32 %v11599_v31, 16 }
 0x368   : > { %v5427_v7 = vsel %vm1034_vm8, %v5424_v16, %v5426_v12 }
 0x369   : > { %5826 = vmatmul.mubr.bf16.gmra.mrb[68].mxu0 %v11541_v14  ;;  %v4227_v37 = vadd.f32 %v11532_v28, %v4188_v2  ;;  %9067 = vmatmul.mubr.bf16.gmra.mrb[104].mxu1 %v5427_v7  ;;  %v4258_v44 = vmax.f32 %v4226_v61, 0.0  ;;  %v5221_v27 = vsel %vm708_vm7, %v5216_v25, %v5220_v32  ;;  %v5228_v20 = vrot.slane %v5226_v34, 1 }
 0x36a   : > { %5831 = vmatprep.mubr.bf16.mxu0 %v5213_v17  ;;  %v3859_v14 = vpop.f32.mrb[36].mxu1  ;;  %v5236_v7 = vrot.slane %v5234_v42, 1 }
 0x36b   : > { %v4259_v50 = vmax.f32 %v4227_v37, 0.0  ;;  %v3860_v36 = vpop.f32.mrb[37].mxu1  ;;  %v11626_v46 = vld [vmem:[#allocation2 + $0xc8] sm:$0xff]  ;;  %v5229_v45 = vsel %vm708_vm7, %v5224_v23, %v5228_v20 }
 0x36c   : > { %v3861_v30 = vpop.f32.mrb[38].mxu1  ;;  %v5428_v33 = vrot.slane %v11626_v46, 1 }
 0x36d   : > { %v4278_v1 = vpack.c.bf16 %v4259_v50, %v4258_v44  ;;  %v3862_v16 = vpop.f32.mrb[39].mxu1 }
 0x36e   : > { %v5429_v47 = vsel %vm1034_vm8, %v5426_v12, %v5428_v33  ;;  %v4507_v16 = vld [vmem:[#allocation2 + $0xe8] sm:$0x1] }
 0x36f   : > { %v4367_v48 = vshrl.u32 %v4278_v1, 16  ;;  %9070 = vmatprep.mubr.bf16.mxu1 %v5429_v47  ;;  %v4370_v55 = vshll.u32 %v4278_v1, 16 }
 0x371   : > { %5832 = vmatmul.mubr.bf16.gmra.mrb[72].mxu0 %v11556_v5  ;;  %v4369_v29 = vrot.slane %v4367_v48, 7 }
 0x372   : > { %5839 = vmatprep.mubr.bf16.mxu0 %v5221_v27  ;;  %v3865_v13 = vpop.f32.mrb[40].mxu1  ;;  %v5238_v27 = vshrl.u32 %v11613_v0, 16 }
 0x373   : > { %v4372_v26 = vor.u32 %v4370_v55, %v4369_v29  ;;  %v4502_v5 = vsel %vm9606_vm5, %v4369_v29, %v4501_v58  ;;  %v4123_v54 = vadd.f32 %v11486_v9, %v3865_v13  ;;  %v3867_v18 = vpop.f32.mrb[41].mxu1 }
 0x374   : > { %4503 = vst [vmem:[#allocation2 + $0xd8] sm:$0x1] %v4502_v5  ;;  %v3868_v56 = vpop.f32.mrb[42].mxu1  ;;  %v5240_v29 = vor.u32 %v5238_v27, %v5236_v7 }
 0x375   : > { %v11640_v17 = vsel %vm9566_vm2, %v4372_v26, %v4498_v35  ;;  %v4189_v41 = vadd.f32 %v4123_v54, %v11223_v43  ;;  %v4126_v22 = vadd.f32 %v11492_v6, %v3868_v56  ;;  %v3870_v11 = vpop.f32.mrb[43].mxu1  ;;  %v5230_v6 = vshrl.u32 %v11599_v31, 16 }
 0x376   : > { %4500 = vst [vmem:[#allocation2 + $0xd0] sm:$0xff] %v11640_v17  ;;  %v5430_v9 = vrot.slane %v11640_v17, 1 }
 0x377   : > { %v4228_v12 = vadd.f32 %v11532_v28, %v4189_v41  ;;  %v4190_v61 = vadd.f32 %v4126_v22, %v11227_v60  ;;  %v5232_v44 = vor.u32 %v5230_v6, %v5228_v20  ;;  %v5242_v60 = vshll.u32 %v11626_v46, 16 }
 0x378   : > { %v5431_v2 = vsel %vm1034_vm8, %v5428_v33, %v5430_v9 }
 0x379   : > { %5840 = vmatmul.mubr.bf16.gmra.mrb[76].mxu0 %v11569_v10  ;;  %v4229_v43 = vadd.f32 %v11532_v28, %v4190_v61  ;;  %9071 = vmatmul.mubr.bf16.gmra.mrb[108].mxu1 %v5431_v2  ;;  %v4260_v37 = vmax.f32 %v4228_v12, 0.0  ;;  %v5237_v33 = vsel %vm708_vm7, %v5232_v44, %v5236_v7  ;;  %v5244_v47 = vrot.slane %v5242_v60, 1 }
 0x37a   : > { %5845 = vmatprep.mubr.bf16.mxu0 %v5229_v45  ;;  %v3873_v10 = vpop.f32.mrb[44].mxu1  ;;  %v5250_v45 = vshll.u32 %v11640_v17, 16 }
 0x37b   : > { %v4261_v51 = vmax.f32 %v4229_v43, 0.0  ;;  %v3874_v32 = vpop.f32.mrb[45].mxu1  ;;  %v11653_v14 = vld [vmem:[#allocation2 + $0xd8] sm:$0xff]  ;;  %v5245_v26 = vsel %vm708_vm7, %v5240_v29, %v5244_v47 }
 0x37c   : > { %v3875_v50 = vpop.f32.mrb[46].mxu1  ;;  %v5432_v36 = vrot.slane %v11653_v14, 1  ;;  %v5252_v42 = vrot.slane %v5250_v45, 1 }
 0x37d   : > { %v4279_v25 = vpack.c.bf16 %v4261_v51, %v4260_v37  ;;  %v3876_v30 = vpop.f32.mrb[47].mxu1  ;;  %v4513_v50 = vld [vmem:[#allocation2 + $0xf8] sm:$0x1] }
 0x37e   : > { %v5433_v34 = vsel %vm1034_vm8, %v5430_v9, %v5432_v36 }
 0x37f   : > { %v4374_v1 = vshrl.u32 %v4279_v25, 16  ;;  %9074 = vmatprep.mubr.bf16.mxu1 %v5433_v34  ;;  %v4377_v58 = vshll.u32 %v4279_v25, 16 }
 0x381   : > { %5846 = vmatmul.mubr.bf16.gmra.mrb[80].mxu0 %v11585_v38  ;;  %v4376_v48 = vrot.slane %v4374_v1, 7 }
 0x382   : > { %5853 = vmatprep.mubr.bf16.mxu0 %v5237_v33  ;;  %v3879_v20 = vpop.f32.mrb[48].mxu1  ;;  %v4510_v33 = vld [vmem:[#allocation2 + $0xf0] sm:$0xff] }
 0x383   : > { %v4379_v55 = vor.u32 %v4377_v58, %v4376_v48  ;;  %v4508_v38 = vsel %vm9606_vm5, %v4376_v48, %v4507_v16  ;;  %v4137_v35 = vadd.f32 %v11505_v59, %v3879_v20  ;;  %v3881_v13 = vpop.f32.mrb[49].mxu1 }
 0x384   : > { %4509 = vst [vmem:[#allocation2 + $0xe8] sm:$0x1] %v4508_v38  ;;  %v3882_v23 = vpop.f32.mrb[50].mxu1 }
 0x385   : > { %v11667_v5 = vsel %vm9566_vm2, %v4379_v55, %v4504_v49  ;;  %v4191_v54 = vadd.f32 %v4137_v35, %v11233_v62  ;;  %v4140_v18 = vadd.f32 %v11508_v15, %v3882_v23  ;;  %v3884_v56 = vpop.f32.mrb[51].mxu1  ;;  %v5246_v15 = vshrl.u32 %v11626_v46, 16 }
 0x386   : > { %4506 = vst [vmem:[#allocation2 + $0xe0] sm:$0xff] %v11667_v5  ;;  %v5434_v59 = vrot.slane %v11667_v5, 1  ;;  %v5266_v55 = vshll.u32 %v11667_v5, 16 }
 0x387   : > { %v4230_v41 = vadd.f32 %v11532_v28, %v4191_v54  ;;  %v4192_v22 = vadd.f32 %v4140_v18, %v11237_v24  ;;  %v5248_v43 = vor.u32 %v5246_v15, %v5244_v47  ;;  %v5258_v24 = vshll.u32 %v11653_v14, 16 }
 0x388   : > { %v5435_v11 = vsel %vm1034_vm8, %v5432_v36, %v5434_v59  ;;  %v5254_v36 = vshrl.u32 %v11640_v17, 16 }
 0x389   : > { %5854 = vmatmul.mubr.bf16.gmra.mrb[84].mxu0 %v11599_v31  ;;  %v4231_v62 = vadd.f32 %v11532_v28, %v4192_v22  ;;  %9075 = vmatmul.mubr.bf16.gmra.mrb[112].mxu1 %v5435_v11  ;;  %v4262_v9 = vmax.f32 %v4230_v41, 0.0  ;;  %v5253_v51 = vsel %vm708_vm7, %v5248_v43, %v5252_v42  ;;  %v5260_v60 = vrot.slane %v5258_v24, 1 }
 0x38a   : > { %5859 = vmatprep.mubr.bf16.mxu0 %v5245_v26  ;;  %v3887_v31 = vpop.f32.mrb[52].mxu1  ;;  %v5256_v1 = vor.u32 %v5254_v36, %v5252_v42  ;;  %v5270_v43 = vshrl.u32 %v11667_v5, 16 }
 0x38b   : > { %v4263_v12 = vmax.f32 %v4231_v62, 0.0  ;;  %v3888_v61 = vpop.f32.mrb[53].mxu1  ;;  %v11680_v2 = vld [vmem:[#allocation2 + $0xe8] sm:$0xff] }
 0x38c   : > { %v3889_v6 = vpop.f32.mrb[54].mxu1  ;;  %v5436_v7 = vrot.slane %v11680_v2, 1  ;;  %v5261_v58 = vsel %vm708_vm7, %v5256_v1, %v5260_v60  ;;  %v4519_v31 = vld [vmem:[#allocation2 + $0x108] sm:$0x1] }
 0x38d   : > { %v4280_v10 = vpack.c.bf16 %v4263_v12, %v4262_v9  ;;  %v3890_v37 = vpop.f32.mrb[55].mxu1  ;;  %v11714_v9 = vld [vmem:[#allocation2] sm:$0xff] }
 0x38e   : > { %v5437_v32 = vsel %vm1034_vm8, %v5434_v59, %v5436_v7  ;;  %v4558_v37 = vshll.u32 %v11714_v9, 16  ;;  %v4556_v36 = vshrl.u32 %v11714_v9, 16 }
 0x38f   : > { %v4381_v44 = vshrl.u32 %v4280_v10, 16  ;;  %9078 = vmatprep.mubr.bf16.mxu1 %v5437_v32  ;;  %v4384_v30 = vshll.u32 %v4280_v10, 16 }
 0x391   : > { %5860 = vmatmul.mubr.bf16.gmra.mrb[88].mxu0 %v11613_v0  ;;  %v4383_v25 = vrot.slane %v4381_v44, 7 }
 0x392   : > { %5867 = vmatprep.mubr.bf16.mxu0 %v5253_v51  ;;  %v3893_v34 = vpop.f32.mrb[56].mxu1 }
 0x393   : > { %v4386_v16 = vor.u32 %v4384_v30, %v4383_v25  ;;  %v4514_v0 = vsel %vm9606_vm5, %v4383_v25, %v4513_v50  ;;  %v4151_v27 = vadd.f32 %v11525_v19, %v3893_v34  ;;  %v3895_v47 = vpop.f32.mrb[57].mxu1  ;;  %v11733_v25 = vld [vmem:[#allocation2 + $0x110] sm:$0xff] }
 0x394   : > { %4515 = vst [vmem:[#allocation2 + $0xf8] sm:$0x1] %v4514_v0  ;;  %v3896_v48 = vpop.f32.mrb[58].mxu1 }
 0x395   : > { %v11694_v49 = vsel %vm9566_vm2, %v4386_v16, %v4510_v33  ;;  %v4193_v20 = vadd.f32 %v4151_v27, %v11243_v63  ;;  %v4154_v29 = vadd.f32 %v11536_v52, %v3896_v48  ;;  %v3898_v38 = vpop.f32.mrb[59].mxu1  ;;  %v5262_v52 = vshrl.u32 %v11653_v14, 16 }
 0x396   : > { %4512 = vst [vmem:[#allocation2 + $0xf0] sm:$0xff] %v11694_v49  ;;  %v5438_v19 = vrot.slane %v11694_v49, 1  ;;  %v5282_v44 = vshll.u32 %v11694_v49, 16  ;;  %v4563_v33 = vshll.u32 %v11729_v3, 16  ;;  %v5446_v27 = vrot.slane %v11733_v25, 1 }
 0x397   : > { %v4232_v35 = vadd.f32 %v11532_v28, %v4193_v20  ;;  %v4194_v13 = vadd.f32 %v4154_v29, %v11247_v57  ;;  %v5264_v45 = vor.u32 %v5262_v52, %v5260_v60  ;;  %v4560_v60 = vrot.slane %v4558_v37, 1  ;;  %v11745_v29 = vld [vmem:[#allocation2 + $0x10] sm:$0xff] }
 0x398   : > { %v5439_v23 = vsel %vm1034_vm8, %v5436_v7, %v5438_v19  ;;  %v4516_v7 = vld [vmem:[#allocation2 + $0x100] sm:$0xff]  ;;  %v5284_v30 = vrot.slane %v5282_v44, 1  ;;  %v4575_v44 = vshrl.u32 %v11745_v29, 16 }
 0x399   : > { %5868 = vmatmul.mubr.bf16.gmra.mrb[92].mxu0 %v11626_v46  ;;  %v4233_v63 = vadd.f32 %v11532_v28, %v4194_v13  ;;  %9079 = vmatmul.mubr.bf16.gmra.mrb[116].mxu1 %v5439_v23  ;;  %v5268_v46 = vrot.slane %v5266_v55, 1  ;;  %v4264_v54 = vmax.f32 %v4232_v35, 0.0  ;;  %v5274_v28 = vshll.u32 %v11680_v2, 16 }
 0x39a   : > { %5873 = vmatprep.mubr.bf16.mxu0 %v5261_v58  ;;  %v3901_v26 = vpop.f32.mrb[60].mxu1  ;;  %v4561_v16 = vor.u32 %v4560_v60, %v4556_v36  ;;  %v4565_v58 = vrot.slane %v4563_v33, 1  ;;  %v9401_v36 = vld [vmem:[#allocation3 + $0x210] sm:$0xff]  }
 0x39b   : > { %v4265_v18 = vmax.f32 %v4233_v63, 0.0  ;;  %v11707_v56 = vld [vmem:[#allocation2 + $0xf8] sm:$0xff]  ;;  %v3902_v59 = vpop.f32.mrb[61].mxu1  ;;  %v5269_v57 = vsel %vm708_vm7, %v5264_v45, %v5268_v46  ;;  %v5276_v6 = vrot.slane %v5274_v28, 1  ;;  %v5272_v10 = vor.u32 %v5270_v43, %v5268_v46 }
 0x39c   : > { %v5440_v41 = vrot.slane %v11707_v56, 1  ;;  %v3903_v22 = vpop.f32.mrb[62].mxu1  ;;  %v5290_v48 = vshll.u32 %v11707_v56, 16  ;;  %v4566_v38 = vsel %vm708_vm7, %v4561_v16, %v4565_v58  ;;  %v5286_v46 = vshrl.u32 %v11694_v49, 16 }
 0x39d   : > { %v4281_v11 = vpack.c.bf16 %v4265_v18, %v4264_v54  ;;  %v3904_v62 = vpop.f32.mrb[63].mxu1  ;;  %v5277_v32 = vsel %vm708_vm7, %v5272_v10, %v5276_v6  ;;  %v4571_v54 = vshll.u32 %v11745_v29, 16 }
 0x39e   : > { %v5441_v15 = vsel %vm1034_vm8, %v5438_v19, %v5440_v41  ;;  %v5292_v26 = vrot.slane %v5290_v48, 1 }
 0x39f   : > { %v4388_v42 = vshrl.u32 %v4281_v11, 16  ;;  %9082 = vmatprep.mubr.bf16.mxu1 %v5441_v15  ;;  %v4391_v61 = vshll.u32 %v4281_v11, 16  ;;  %v4573_v28 = vrot.slane %v4571_v54, 1 }
 0x3a1   : > { %5874 = vmatmul.mubr.bf16.gmra.mrb[96].mxu0 %v11640_v17  ;;  %v4390_v12 = vrot.slane %v4388_v42, 7  ;;  %v9396_v42 = vld [vmem:[#allocation3 + $0x208] sm:$0xff]  }
 0x3a2   : > { %5881 = vmatprep.mubr.bf16.mxu0 %v5269_v57 }
 0x3a3   : > { %v4393_v17 = vor.u32 %v4391_v61, %v4390_v12  ;;  %v4520_v24 = vsel %vm9606_vm5, %v4390_v12, %v4519_v31  ;;  %v11759_v61 = vld [vmem:[#allocation2 + $0x18] sm:$0xff] }
 0x3a4   : > { %4521 = vst [vmem:[#allocation2 + $0x108] sm:$0x1] %v4520_v24 }
 0x3a5   : > { %v11722_v51 = vsel %vm9566_vm2, %v4393_v17, %v4516_v7 }
 0x3a6   : > { %4518 = vst [vmem:[#allocation2 + $0x100] sm:$0xff] %v11722_v51  ;;  %v5442_v50 = vrot.slane %v11722_v51, 1  ;;  %v5298_v62 = vshll.u32 %v11722_v51, 16 }
 0x3a8   : > { %v5443_v21 = vsel %vm1034_vm8, %v5440_v41, %v5442_v50  ;;  %v5288_v41 = vor.u32 %v5286_v46, %v5284_v30  ;;  %v5300_v17 = vrot.slane %v5298_v62, 1  ;;  %v11787_v62 = vld [vmem:[#allocation2 + $0x30] sm:$0xff] }
 0x3a9   : > { %5882 = vmatmul.mubr.bf16.gmra.mrb[100].mxu0 %v11653_v14  ;;  %9083 = vmatmul.mubr.bf16.gmra.mrb[120].mxu1 %v5443_v21  ;;  %v5278_v14 = vshrl.u32 %v11680_v2, 16  ;;  %v4577_v21 = vor.u32 %v4575_v44, %v4573_v28 }
 0x3aa   : > { %5887 = vmatprep.mubr.bf16.mxu0 %v5277_v32  ;;  %v5293_v11 = vsel %vm708_vm7, %v5288_v41, %v5292_v26 }
 0x3ab   : > { %v11737_v34 = vld [vmem:[#allocation2 + $0x108] sm:$0xff]  ;;  %v5280_v1 = vor.u32 %v5278_v14, %v5276_v6 }
 0x3ac   : > { %v5444_v0 = vrot.slane %v11737_v34, 1  ;;  %v5306_v14 = vshll.u32 %v11737_v34, 16  ;;  %v5310_v46 = vshrl.u32 %v11737_v34, 16 }
 0x3ad   : > { %v5285_v47 = vsel %vm708_vm7, %v5280_v1, %v5284_v30 }
 0x3ae   : > { %v5445_v20 = vsel %vm1034_vm8, %v5442_v50, %v5444_v0  ;;  %v5447_v19 = vsel %vm1034_vm8, %v5444_v0, %v5446_v27  ;;  %v4579_v50 = vshll.u32 %v11759_v61, 16  ;;  %v5308_v48 = vrot.slane %v5306_v14, 1  ;;  %v9393_v14 = vld [vmem:[#allocation3 + $0x180] sm:$0xff]  }
 0x3af   : > { %9086 = vmatprep.mubr.bf16.mxu1 %v5445_v20 }
 0x3b0   : > { %v4581_v30 = vrot.slane %v4579_v50, 1  ;;  %v11807_v50 = vld [vmem:[#allocation2 + $0x38] sm:$0xff] }
 0x3b1   : > { %5888 = vmatmul.mubr.bf16.gmra.mrb[104].mxu0 %v11667_v5  ;;  %v4567_v5 = vshrl.u32 %v11729_v3, 16  ;;  %9087 = vmatmul.mubr.bf16.gmra.mrb[124].mxu1 %v5447_v19 }
 0x3b2   : > { %5895 = vmatprep.mubr.bf16.mxu0 %v5285_v47  ;;  %6363 = vmatprep.mubr.bf16.mxu1 %v4566_v38  ;;  %v4582_v27 = vsel %vm708_vm7, %v4577_v21, %v4581_v30 }
 0x3b3   : > { %v9028_v55 = vpop.f32.mrb[64].mxu1  ;;  %v4569_v57 = vor.u32 %v4567_v5, %v4565_v58  ;;  %v4583_v5 = vshrl.u32 %v11759_v61, 16 }
 0x3b4   : > { %v5707_v35 = vpop.f32.mrb[0].mxu0  ;;  %v5964_v13 = vpop.f32.mrb[65].mxu1 }
 0x3b5   : > { %v5709_v23 = vpop.f32.mrb[1].mxu0  ;;  %v11750_v63 = vadd.f32 %v5964_v13, %v5707_v35  ;;  %v9029_v52 = vpop.f32.mrb[66].mxu1  ;;  %v4574_v6 = vsel %vm708_vm7, %v4569_v57, %v4573_v28 }
 0x3b6   : > { %v5710_v18 = vpop.f32.mrb[2].mxu0  ;;  %v5967_v45 = vpop.f32.mrb[67].mxu1  ;;  %v5314_v23 = vshll.u32 %v11733_v25, 16  ;;  %v4585_v52 = vor.u32 %v4583_v5, %v4581_v30 }
 0x3b7   : > { %v5712_v59 = vpop.f32.mrb[3].mxu0  ;;  %v11754_v22 = vadd.f32 %v5967_v45, %v5710_v18  ;;  %v5312_v45 = vor.u32 %v5310_v46, %v5308_v48  ;;  %v9395_v46 = vld [vmem:[#allocation3 + $0x190] sm:$0xff]  }
 0x3b8   : > { %v4590_v18 = vsel %vm708_vm7, %v4585_v52, %v11384_v53 }
 0x3b9   : > { %5896 = vmatmul.mubr.bf16.gmra.mrb[108].mxu0 %v11680_v2  ;;  %6364 = vmatmul.mubr.bf16.vlgmr.msra.gmra.mrb[128].mxu1 %v11714_v9  ;;  %v5294_v2 = vshrl.u32 %v11707_v56, 16 }
 0x3ba   : > { %5901 = vmatprep.mubr.bf16.mxu0 %v5293_v11  ;;  %6371 = vmatprep.mubr.bf16.mxu1 %v4574_v6 }
 0x3bb   : > { %v9032_v15 = vpop.f32.mrb[68].mxu1  ;;  %9171 = vmatpush3.bf16.msra.mxu1 %v11580_v40  ;;  %v5296_v32 = vor.u32 %v5294_v2, %v5292_v26  ;;  %v9406_v40 = vld [vmem:[#allocation3 + $0x218] sm:$0xff]  }
 0x3bc   : > { %v5715_v31 = vpop.f32.mrb[4].mxu0  ;;  %v5978_v12 = vpop.f32.mrb[69].mxu1  ;;  %9172 = vmatprep.subr.bf16.mxu1 %v9396_v42 }
 0x3bd   : > { %v5716_v43 = vpop.f32.mrb[5].mxu0  ;;  %v9033_v7 = vpop.f32.mrb[70].mxu1  ;;  %v5301_v60 = vsel %vm708_vm7, %v5296_v32, %v5300_v17  ;;  %v4883_v32 = vrot.slane %v11745_v29, 1 }
 0x3be   : > { %v5717_v24 = vpop.f32.mrb[6].mxu0  ;;  %v5981_v10 = vpop.f32.mrb[71].mxu1  ;;  %v4881_v43 = vrot.slane %v11729_v3, 1 }
 0x3bf   : > { %v5718_v37 = vpop.f32.mrb[7].mxu0  ;;  %9173 = vmatpush3.bf16.msra.mxu1 %v9396_v42  ;;  %v4880_v42 = vrot.slane %v11714_v9, 1  ;;  %v11802_v9 = vld [vmem:[#allocation2 + $0x28] sm:$0xff] }
 0x3c0   : > { %9174 = vmatprep.subr.bf16.mxu1 %v9401_v36 }
 0x3c1   : > { %5902 = vmatmul.mubr.bf16.gmra.mrb[112].mxu0 %v11694_v49  ;;  %6372 = vmatmul.mubr.bf16.gmra.mrb[132].mxu1 %v11729_v3  ;;  %v5302_v49 = vshrl.u32 %v11722_v51, 16  ;;  %v4882_v2 = vsel %vm1034_vm8, %v4880_v42, %v4881_v43 }
 0x3c2   : > { %5909 = vmatprep.mubr.bf16.mxu0 %v5301_v60  ;;  %6377 = vmatprep.mubr.bf16.mxu1 %v4582_v27 }
 0x3c3   : > { %v9036_v33 = vpop.f32.mrb[72].mxu1  ;;  %9175 = vmatpush3.bf16.msra.mxu1 %v9401_v36  ;;  %v5304_v19 = vor.u32 %v5302_v49, %v5300_v17  ;;  %v9411_v17 = vld [vmem:[#allocation3 + $0x220] sm:$0xff]   ;;  %v11809_v36 = vld [vmem:[#allocation2 + $0x20] sm:$0xff]  ;;  %v9394_v49 = vld [vmem:[#allocation3 + $0x188] sm:$0xff]  }
 0x3c4   : > { %v5721_v1 = vpop.f32.mrb[8].mxu0  ;;  %v5992_v16 = vpop.f32.mrb[73].mxu1  ;;  %9176 = vmatprep.subr.bf16.mxu1 %v9406_v40  ;;  %v4611_v33 = vshll.u32 %v11807_v50, 16 }
 0x3c5   : > { %v5723_v0 = vpop.f32.mrb[9].mxu0  ;;  %v9037_v47 = vpop.f32.mrb[74].mxu1  ;;  %v11773_v58 = vadd.f32 %v5978_v12, %v5721_v1  ;;  %v5309_v13 = vsel %vm708_vm7, %v5304_v19, %v5308_v48  ;;  %v4603_v12 = vshll.u32 %v11787_v62, 16  ;;  %v4884_v1 = vsel %vm1034_vm8, %v4881_v43, %v4883_v32  ;;  %v11823_v48 = vld [vmem:[#allocation2 + $0x40] sm:$0xff] }
 0x3c6   : > { %v5724_v20 = vpop.f32.mrb[10].mxu0  ;;  %v5995_v55 = vpop.f32.mrb[75].mxu1  ;;  %v4619_v5 = vshll.u32 %v11823_v48, 16 }
 0x3c7   : > { %v5726_v38 = vpop.f32.mrb[11].mxu0  ;;  %v11775_v35 = vadd.f32 %v5981_v10, %v5724_v20  ;;  %9177 = vmatpush3.bf16.msra.mxu1 %v9406_v40  ;;  %v4599_v10 = vshrl.u32 %v11802_v9, 16  ;;  %v4605_v37 = vrot.slane %v4603_v12, 1  ;;  %v4613_v20 = vrot.slane %v4611_v33, 1  ;;  %v9398_v12 = vld [vmem:[#allocation3 + $0x1a0] sm:$0xff]  }
 0x3c8   : > { %9178 = vmatprep.subr.bf16.mxu1 %v9411_v17 }
 0x3c9   : > { %5910 = vmatmul.mubr.bf16.gmra.mrb[116].mxu0 %v11707_v56  ;;  %6378 = vmatmul.mubr.bf16.gmra.mrb[136].mxu1 %v11745_v29  ;;  %v5316_v56 = vrot.slane %v5314_v23, 1  ;;  %v4601_v3 = vor.u32 %v4599_v10, %v11393_v39  ;;  %v4885_v39 = vrot.slane %v11759_v61, 1  ;;  %v4607_v29 = vshrl.u32 %v11787_v62, 16 }
 0x3ca   : > { %5915 = vmatprep.mubr.bf16.mxu0 %v5309_v13  ;;  %6385 = vmatprep.mubr.bf16.mxu1 %v4590_v18 }
 0x3cb   : > { %v5317_v25 = vsel %vm708_vm7, %v5312_v45, %v5316_v56  ;;  %9179 = vmatpush3.bf16.msra.mxu1 %v9411_v17  ;;  %v11813_v60 = vsel %vm708_vm7, %v4601_v3, %v4605_v37  ;;  %v4886_v0 = vsel %vm1034_vm8, %v4883_v32, %v4885_v39  ;;  %v4609_v27 = vor.u32 %v4607_v29, %v4605_v37 }
 0x3cc   : > { %v5729_v26 = vpop.f32.mrb[12].mxu0 }
 0x3cd   : > { %v5730_v54 = vpop.f32.mrb[13].mxu0  ;;  %v11831_v13 = vsel %vm708_vm7, %v4609_v27, %v4613_v20 }
 0x3ce   : > { %v5731_v59 = vpop.f32.mrb[14].mxu0  ;;  %v9040_v11 = vpop.f32.mrb[76].mxu1  ;;  %v4889_v54 = vrot.slane %v11802_v9, 1 }
 0x3cf   : > { %v5732_v41 = vpop.f32.mrb[15].mxu0  ;;  %v6006_v57 = vpop.f32.mrb[77].mxu1  ;;  %v4615_v59 = vshrl.u32 %v11807_v50, 16  ;;  %v9397_v11 = vld [vmem:[#allocation3 + $0x198] sm:$0xff]  }
 0x3d0   : > { %v9041_v28 = vpop.f32.mrb[78].mxu1  ;;  %v4621_v41 = vrot.slane %v4619_v5, 1 }
 0x3d1   : > { %5916 = vmatmul.mubr.bf16.gmra.mrb[120].mxu0 %v11722_v51  ;;  %v11789_v15 = vpop.f32.mrb[79].mxu1  ;;  %6386 = vmatmul.mubr.bf16.gmra.mrb[140].mxu1 %v11759_v61 }
 0x3d2   : > { %5923 = vmatprep.mubr.bf16.mxu0 %v5317_v25  ;;  %6391 = vmatprep.mubr.bf16.mxu1 %v11408_v4  ;;  %v11847_v25 = vrot.slane %v11787_v62, 1 }
 0x3d4   : > { %v5735_v53 = vpop.f32.mrb[16].mxu0  ;;  %v4892_v17 = vsel %vm1034_vm8, %v4889_v54, %v11847_v25 }
 0x3d5   : > { %v5737_v31 = vpop.f32.mrb[17].mxu0  ;;  %v11795_v6 = vadd.f32 %v5992_v16, %v5735_v53 }
 0x3d6   : > { %v5738_v51 = vpop.f32.mrb[18].mxu0 }
 0x3d7   : > { %v5740_v7 = vpop.f32.mrb[19].mxu0  ;;  %v11799_v24 = vadd.f32 %v5995_v55, %v5738_v51  ;;  %v4887_v55 = vrot.slane %v11809_v36, 1  ;;  %v4893_v51 = vrot.slane %v11807_v50, 1 }
 0x3d8   : > { %v4623_v7 = vshrl.u32 %v11823_v48, 16 }
 0x3d9   : > { %5924 = vmatmul.mubr.bf16.gmra.mrb[124].mxu0 %v11737_v34  ;;  %6392 = vmatmul.mubr.bf16.gmra.mrb[144].mxu1 %v11809_v36  ;;  %v4888_v45 = vsel %vm1034_vm8, %v4885_v39, %v4887_v55  ;;  %v4890_v56 = vsel %vm1034_vm8, %v4887_v55, %v4889_v54  ;;  %v4894_v3 = vsel %vm1034_vm8, %v11847_v25, %v4893_v51  ;;  %v11872_v39 = vrot.slane %v11823_v48, 1  ;;  %v9413_v55 = vld [vmem:[#allocation3 + $0x228] sm:$0xff]  }
 0x3da   : > { %9106 = vmatprep.mubr.bf16.mxu0 %v4882_v2  ;;  %6399 = vmatprep.mubr.bf16.mxu1 %v11813_v60  ;;  %v4625_v32 = vor.u32 %v4623_v7, %v4621_v41  ;;  %v11912_v7 = vld [vmem:[#allocation2 + $0x60] sm:$0xff] }
 0x3db   : > { %9180 = vmatprep.subr.bf16.mxu1 %v9413_v55 }
 0x3dc   : > { %v5743_v44 = vpop.f32.mrb[20].mxu0  ;;  %9181 = vmatpush3.bf16.msra.mxu1 %v9413_v55 }
 0x3dd   : > { %v5744_v34 = vpop.f32.mrb[21].mxu0  ;;  %v9044_v40 = vpop.f32.mrb[80].mxu1 }
 0x3de   : > { %v5745_v21 = vpop.f32.mrb[22].mxu0  ;;  %v11820_v16 = vpop.f32.mrb[81].mxu1  ;;  %v11866_v34 = vld [vmem:[#allocation2 + $0x50] sm:$0xff] }
 0x3df   : > { %v5746_v30 = vpop.f32.mrb[23].mxu0  ;;  %v9045_v47 = vpop.f32.mrb[82].mxu1  ;;  %v9399_v21 = vld [vmem:[#allocation3 + $0x1a8] sm:$0xff]  }
 0x3e0   : > { %v11825_v61 = vpop.f32.mrb[83].mxu1  ;;  %v9400_v47 = vld [vmem:[#allocation3 + $0x1b0] sm:$0xff]  }
 0x3e1   : > { %9107 = vmatmul.mubr.bf16.vlgmr.msra.gmra.mrb[128].mxu0 %v4884_v1  ;;  %6400 = vmatmul.mubr.bf16.gmra.mrb[148].mxu1 %v11802_v9  ;;  %v4635_v1 = vshll.u32 %v11866_v34, 16 }
 0x3e2   : > { %9110 = vmatprep.mubr.bf16.mxu0 %v4886_v0  ;;  %7494 = vmatpush1.bf16.msra.mxu0 %v9393_v14 }
 0x3e3   : > { %7495 = vmatprep.subr.bf16.mxu0 %v10820_v8  ;;  %6405 = vmatprep.mubr.bf16.mxu1 %v11831_v13 }
 0x3e4   : > { %v5749_v38 = vpop.f32.mrb[24].mxu0 }
 0x3e5   : > { %v5751_v19 = vpop.f32.mrb[25].mxu0  ;;  %v11834_v23 = vadd.f32 %v6006_v57, %v5749_v38  ;;  %v4617_v57 = vor.u32 %v4615_v59, %v4613_v20 }
 0x3e6   : > { %v5752_v52 = vpop.f32.mrb[26].mxu0  ;;  %7496 = vmatpush1.bf16.msra.mxu0 %v9394_v49  ;;  %v4896_v19 = vsel %vm1034_vm8, %v4893_v51, %v11872_v39 }
 0x3e7   : > { %v5754_v26 = vpop.f32.mrb[27].mxu0  ;;  %7497 = vmatprep.subr.bf16.mxu0 %v10820_v8  ;;  %v11840_v18 = vadd.f32 %v11789_v15, %v5752_v52  ;;  %v11849_v15 = vld [vmem:[#allocation2 + $0x48] sm:$0xff]  ;;  %v11853_v53 = vsel %vm708_vm7, %v4617_v57, %v4621_v41  ;;  %v4637_v52 = vrot.slane %v4635_v1, 1 }
 0x3e8   : > { %v4627_v2 = vshll.u32 %v11849_v15, 16  ;;  %v4897_v20 = vrot.slane %v11849_v15, 1  ;;  %v4631_v5 = vshrl.u32 %v11849_v15, 16 }
 0x3e9   : > { %9111 = vmatmul.mubr.bf16.gmra.mrb[132].mxu0 %v4888_v45  ;;  %6406 = vmatmul.mubr.bf16.gmra.mrb[152].mxu1 %v11787_v62  ;;  %v11897_v45 = vld [vmem:[#allocation2 + $0x58] sm:$0xff] }
 0x3ea   : > { %9114 = vmatprep.mubr.bf16.mxu0 %v4890_v56  ;;  %7498 = vmatpush1.bf16.msra.mxu0 %v9395_v46  ;;  %v4629_v30 = vrot.slane %v4627_v2, 1  ;;  %v9402_v46 = vld [vmem:[#allocation3 + $0x1b8] sm:$0xff]  }
 0x3eb   : > { %7499 = vmatprep.subr.bf16.mxu0 %v10820_v8  ;;  %6413 = vmatprep.mubr.bf16.mxu1 %v11853_v53 }
 0x3ec   : > { %v5757_v28 = vpop.f32.mrb[28].mxu0  ;;  %v11876_v40 = vsel %vm708_vm7, %v4625_v32, %v4629_v30  ;;  %v4633_v26 = vor.u32 %v4631_v5, %v4629_v30 }
 0x3ed   : > { %v5758_v42 = vpop.f32.mrb[29].mxu0  ;;  %v9048_v10 = vpop.f32.mrb[84].mxu1  ;;  %v4901_v28 = vrot.slane %v11897_v45, 1 }
 0x3ee   : > { %v5759_v31 = vpop.f32.mrb[30].mxu0  ;;  %7500 = vmatpush1.bf16.msra.mxu0 %v9397_v11  ;;  %v11862_v37 = vpop.f32.mrb[85].mxu1  ;;  %v11901_v59 = vsel %vm708_vm7, %v4633_v26, %v4637_v52  ;;  %v9403_v11 = vld [vmem:[#allocation3 + $0x1c0] sm:$0xff]   ;;  %v4639_v42 = vshrl.u32 %v11866_v34, 16 }
 0x3ef   : > { %v5760_v43 = vpop.f32.mrb[31].mxu0  ;;  %7501 = vmatprep.subr.bf16.mxu0 %v10820_v8  ;;  %v9049_v44 = vpop.f32.mrb[86].mxu1  ;;  %v4643_v31 = vshll.u32 %v11897_v45, 16 }
 0x3f0   : > { %v11868_v14 = vpop.f32.mrb[87].mxu1 }
 0x3f1   : > { %9115 = vmatmul.mubr.bf16.gmra.mrb[136].mxu0 %v4892_v17  ;;  %6414 = vmatmul.mubr.bf16.gmra.mrb[156].mxu1 %v11807_v50  ;;  %v4641_v17 = vor.u32 %v4639_v42, %v4637_v52  ;;  %v4645_v44 = vrot.slane %v4643_v31, 1  ;;  %v11940_v52 = vld [vmem:[#allocation2 + $0x70] sm:$0xff] }
 0x3f2   : > { %9118 = vmatprep.mubr.bf16.mxu0 %v4894_v3  ;;  %7502 = vmatpush1.bf16.msra.mxu0 %v9398_v12  ;;  %v9404_v3 = vld [vmem:[#allocation3 + $0x1c8] sm:$0xff]   ;;  %v9408_v31 = vld [vmem:[#allocation3 + $0x1e0] sm:$0xff]  }
 0x3f3   : > { %7503 = vmatprep.subr.bf16.mxu0 %v10820_v8  ;;  %6419 = vmatprep.mubr.bf16.mxu1 %v11876_v40  ;;  %v11926_v1 = vsel %vm708_vm7, %v4641_v17, %v4645_v44 }
 0x3f4   : > { %v5763_v29 = vpop.f32.mrb[32].mxu0 }
 0x3f5   : > { %v5765_v33 = vpop.f32.mrb[33].mxu0  ;;  %v11880_v0 = vadd.f32 %v11820_v16, %v5763_v29  ;;  %v4898_v16 = vsel %vm1034_vm8, %v11872_v39, %v4897_v20  ;;  %v11922_v29 = vld [vmem:[#allocation2 + $0x68] sm:$0xff] }
 0x3f6   : > { %v5766_v27 = vpop.f32.mrb[34].mxu0  ;;  %7504 = vmatpush1.bf16.msra.mxu0 %v9399_v21  ;;  %v11920_v21 = vrot.slane %v11912_v7, 1  ;;  %v4659_v17 = vshll.u32 %v11922_v29, 16 }
 0x3f7   : > { %12821 = vst [vmem:[#allocation8_spill] sm:$0xff] %v11880_v0  ;;  %v5768_v49 = vpop.f32.mrb[35].mxu0  ;;  %7505 = vmatprep.subr.bf16.mxu0 %v10820_v8  ;;  %v11886_v38 = vadd.f32 %v11825_v61, %v5766_v27  ;;  %v11895_v61 = vrot.slane %v11866_v34, 1  ;;  %v4651_v27 = vshll.u32 %v11912_v7, 16 }
 0x3f8   : > { %12824 = vst [vmem:[#allocation7_spill] sm:$0xff] %v11920_v21  ;;  %v4904_v5 = vsel %vm1034_vm8, %v4901_v28, %v11920_v21 }
 0x3f9   : > { %12822 = vst [vmem:[#allocation9_spill] sm:$0xff] %v11886_v38  ;;  %9119 = vmatmul.mubr.bf16.gmra.mrb[140].mxu0 %v4896_v19  ;;  %12823 = vst [vmem:[#allocation10_spill] sm:$0xff] %v11895_v61  ;;  %6420 = vmatmul.mubr.bf16.gmra.mrb[160].mxu1 %v11823_v48  ;;  %v4900_v12 = vsel %vm1034_vm8, %v4897_v20, %v11895_v61  ;;  %v4902_v2 = vsel %vm1034_vm8, %v11895_v61, %v4901_v28  ;;  %v9405_v20 = vld [vmem:[#allocation3 + $0x1d0] sm:$0xff]   ;;  %v4905_v19 = vrot.slane %v11922_v29, 1 }
 0x3fa   : > { %9122 = vmatprep.mubr.bf16.mxu0 %v4898_v16  ;;  %7506 = vmatpush1.bf16.msra.mxu0 %v9400_v47  ;;  %v4653_v26 = vrot.slane %v4651_v27, 1 }
 0x3fb   : > { %7507 = vmatprep.subr.bf16.mxu0 %v10820_v8  ;;  %6427 = vmatprep.mubr.bf16.mxu1 %v11901_v59 }
 0x3fc   : > { %v5771_v54 = vpop.f32.mrb[36].mxu0 }
 0x3fd   : > { %v5772_v56 = vpop.f32.mrb[37].mxu0  ;;  %v9052_v43 = vpop.f32.mrb[88].mxu1  ;;  %v9407_v54 = vld [vmem:[#allocation3 + $0x1d8] sm:$0xff]  }
 0x3fe   : > { %v5773_v41 = vpop.f32.mrb[38].mxu0  ;;  %7508 = vmatpush1.bf16.msra.mxu0 %v9402_v46  ;;  %v11910_v51 = vpop.f32.mrb[89].mxu1  ;;  %v4647_v46 = vshrl.u32 %v11897_v45, 16 }
 0x3ff   : > { %v5774_v57 = vpop.f32.mrb[39].mxu0  ;;  %7509 = vmatprep.subr.bf16.mxu0 %v10820_v8  ;;  %v9053_v10 = vpop.f32.mrb[90].mxu1 }
 0x400   : > { %v11916_v32 = vpop.f32.mrb[91].mxu1  ;;  %v4649_v56 = vor.u32 %v4647_v46, %v4645_v44  ;;  %v11968_v46 = vld [vmem:[#allocation2 + $0x88] sm:$0xff] }
 0x401   : > { %9123 = vmatmul.mubr.bf16.gmra.mrb[144].mxu0 %v4900_v12  ;;  %6428 = vmatmul.mubr.bf16.gmra.mrb[164].mxu1 %v11849_v15 }
 0x402   : > { %9126 = vmatprep.mubr.bf16.mxu0 %v4902_v2  ;;  %7510 = vmatpush1.bf16.msra.mxu0 %v9403_v11  ;;  %v11947_v11 = vld [vmem:[#allocation2 + $0x78] sm:$0xff]  ;;  %v11951_v28 = vsel %vm708_vm7, %v4649_v56, %v4653_v26  ;;  %v4655_v2 = vshrl.u32 %v11912_v7, 16 }
 0x403   : > { %7511 = vmatprep.subr.bf16.mxu0 %v10820_v8  ;;  %6433 = vmatprep.mubr.bf16.mxu1 %v11926_v1  ;;  %v4909_v43 = vrot.slane %v11947_v11, 1 }
 0x404   : > { %v5777_v30 = vpop.f32.mrb[40].mxu0  ;;  %v4657_v27 = vor.u32 %v4655_v2, %v4653_v26  ;;  %v4667_v26 = vshll.u32 %v11940_v52, 16 }
 0x405   : > { %v5779_v33 = vpop.f32.mrb[41].mxu0  ;;  %v11930_v47 = vadd.f32 %v11862_v37, %v5777_v30  ;;  %v4906_v37 = vsel %vm1034_vm8, %v11920_v21, %v4905_v19  ;;  %v11961_v30 = vld [vmem:[#allocation2 + $0x80] sm:$0xff]  ;;  %v12064_v21 = vld [vmem:[#allocation2 + $0xe8] sm:$0xff] }
 0x406   : > { %v5780_v49 = vpop.f32.mrb[42].mxu0  ;;  %7512 = vmatpush1.bf16.msra.mxu0 %v9404_v3 }
 0x407   : > { %12825 = vst [vmem:[#allocation6_spill] sm:$0xff] %v11930_v47  ;;  %v5782_v55 = vpop.f32.mrb[43].mxu0  ;;  %7513 = vmatprep.subr.bf16.mxu0 %v10820_v8  ;;  %v11936_v16 = vadd.f32 %v11868_v14, %v5780_v49  ;;  %v4907_v14 = vrot.slane %v11940_v52, 1 }
 0x409   : > { %12826 = vst [vmem:[#allocation11_spill] sm:$0xff] %v11936_v16  ;;  %9127 = vmatmul.mubr.bf16.gmra.mrb[148].mxu0 %v4904_v5  ;;  %6434 = vmatmul.mubr.bf16.gmra.mrb[168].mxu1 %v11866_v34  ;;  %v4908_v10 = vsel %vm1034_vm8, %v4905_v19, %v4907_v14  ;;  %v4910_v33 = vsel %vm1034_vm8, %v4907_v14, %v4909_v43  ;;  %v4661_v5 = vrot.slane %v4659_v17, 1  ;;  %v4911_v19 = vrot.slane %v11961_v30, 1  ;;  %v12036_v16 = vld [vmem:[#allocation2 + $0xc8] sm:$0xff] }
 0x40a   : > { %9130 = vmatprep.mubr.bf16.mxu0 %v4906_v37  ;;  %7514 = vmatpush1.bf16.msra.mxu0 %v9405_v20  ;;  %v9409_v20 = vld [vmem:[#allocation3 + $0x1e8] sm:$0xff]  }
 0x40b   : > { %7515 = vmatprep.subr.bf16.mxu0 %v10820_v8  ;;  %6441 = vmatprep.mubr.bf16.mxu1 %v11951_v28  ;;  %v11972_v56 = vsel %vm708_vm7, %v4657_v27, %v4661_v5  ;;  %v4912_v17 = vsel %vm1034_vm8, %v4909_v43, %v4911_v19  ;;  %v9412_v27 = vld [vmem:[#allocation3 + $0x1f8] sm:$0xff]  }
 0x40c   : > { %v5785_v41 = vpop.f32.mrb[44].mxu0  ;;  %v9056_v3 = vpop.f32.mrb[92].mxu1 }
 0x40d   : > { %v5786_v57 = vpop.f32.mrb[45].mxu0  ;;  %v11959_v44 = vpop.f32.mrb[93].mxu1  ;;  %v4663_v3 = vshrl.u32 %v11922_v29, 16 }
 0x40e   : > { %v5787_v42 = vpop.f32.mrb[46].mxu0  ;;  %7516 = vmatpush1.bf16.msra.mxu0 %v9407_v54  ;;  %v9057_v49 = vpop.f32.mrb[94].mxu1  ;;  %v9410_v57 = vld [vmem:[#allocation3 + $0x1f0] sm:$0xff]  }
 0x40f   : > { %v5788_v12 = vpop.f32.mrb[47].mxu0  ;;  %7517 = vmatprep.subr.bf16.mxu0 %v10820_v8  ;;  %v11964_v55 = vpop.f32.mrb[95].mxu1  ;;  %v11989_v49 = vor.u32 %v4663_v3, %v4661_v5 }
 0x410   : > { %v9414_v12 = vld [vmem:[#allocation3 + $0x230] sm:$0xff]  }
 0x411   : > { %9131 = vmatmul.mubr.bf16.gmra.mrb[152].mxu0 %v4908_v10  ;;  %6442 = vmatmul.mubr.bf16.gmra.mrb[172].mxu1 %v11897_v45  ;;  %v11985_v10 = vld [vmem:[#allocation2 + $0x90] sm:$0xff] }
 0x412   : > { %9134 = vmatprep.mubr.bf16.mxu0 %v4910_v33  ;;  %7518 = vmatpush1.bf16.msra.mxu0 %v9408_v31  ;;  %v4913_v31 = vrot.slane %v11968_v46, 1  ;;  %v4669_v33 = vrot.slane %v4667_v26, 1 }
 0x413   : > { %7519 = vmatprep.subr.bf16.mxu0 %v10820_v8  ;;  %6447 = vmatprep.mubr.bf16.mxu1 %v11972_v56 }
 0x414   : > { %v5791_v37 = vpop.f32.mrb[48].mxu0  ;;  %9182 = vmatprep.subr.bf16.mxu1 %v9414_v12 }
 0x415   : > { %v5793_v54 = vpop.f32.mrb[49].mxu0  ;;  %v11976_v14 = vadd.f32 %v11910_v51, %v5791_v37  ;;  %v4914_v51 = vsel %vm1034_vm8, %v4911_v19, %v4913_v31  ;;  %9183 = vmatpush3.bf16.msra.mxu1 %v9414_v12  ;;  %v4670_v37 = vsel %vm708_vm7, %v11989_v49, %v4669_v33 }
 0x416   : > { %v5794_v41 = vpop.f32.mrb[50].mxu0  ;;  %7520 = vmatpush1.bf16.msra.mxu0 %v9409_v20  ;;  %v11993_v20 = vld [vmem:[#allocation2 + $0x98] sm:$0xff] }
 0x417   : > { %12827 = vst [vmem:[#allocation12_spill] sm:$0xff] %v11976_v14  ;;  %v5796_v42 = vpop.f32.mrb[51].mxu0  ;;  %7521 = vmatprep.subr.bf16.mxu0 %v10820_v8  ;;  %v11982_v2 = vadd.f32 %v11916_v32, %v5794_v41  ;;  %v4915_v32 = vrot.slane %v11985_v10, 1  ;;  %v4917_v5 = vrot.slane %v11993_v20, 1  ;;  %v4675_v41 = vshll.u32 %v11947_v11, 16 }
 0x419   : > { %12828 = vst [vmem:[#allocation13_spill] sm:$0xff] %v11982_v2  ;;  %9135 = vmatmul.mubr.bf16.gmra.mrb[156].mxu0 %v4912_v17  ;;  %6448 = vmatmul.mubr.bf16.gmra.mrb[176].mxu1 %v11912_v7  ;;  %v12002_v17 = vld [vmem:[#allocation2 + $0xa0] sm:$0xff] }
 0x41a   : > { %9138 = vmatprep.mubr.bf16.mxu0 %v4914_v51  ;;  %7522 = vmatpush1.bf16.msra.mxu0 %v9410_v57  ;;  %v4916_v57 = vsel %vm1034_vm8, %v4913_v31, %v4915_v32  ;;  %v4918_v51 = vsel %vm1034_vm8, %v4915_v32, %v4917_v5 }
 0x41b   : > { %7523 = vmatprep.subr.bf16.mxu0 %v10820_v8  ;;  %6455 = vmatprep.mubr.bf16.mxu1 %v4670_v37  ;;  %v4671_v8 = vshrl.u32 %v11940_v52, 16  ;;  %v4919_v37 = vrot.slane %v12002_v17, 1 }
 0x41c   : > { %v5799_v43 = vpop.f32.mrb[52].mxu0  ;;  %v9060_v42 = vpop.f32.mrb[96].mxu1 }
 0x41d   : > { %v5800_v19 = vpop.f32.mrb[53].mxu0  ;;  %v6076_v12 = vpop.f32.mrb[97].mxu1  ;;  %v4673_v3 = vor.u32 %v4671_v8, %v4669_v33 }
 0x41e   : > { %v5801_v54 = vpop.f32.mrb[54].mxu0  ;;  %7524 = vmatpush1.bf16.msra.mxu0 %v9412_v27  ;;  %v9061_v43 = vpop.f32.mrb[98].mxu1  ;;  %v4677_v19 = vrot.slane %v4675_v41, 1 }
 0x41f   : > { %v5802_v26 = vpop.f32.mrb[55].mxu0  ;;  %v6079_v27 = vpop.f32.mrb[99].mxu1  ;;  %v12019_v43 = vld [vmem:[#allocation2 + $0xb0] sm:$0xff] }
 0x420   : > { %v12006_v26 = vld [vmem:[#allocation2 + $0xa8] sm:$0xff]  ;;  %v4678_v42 = vsel %vm708_vm7, %v4673_v3, %v4677_v19 }
 0x421   : > { %9139 = vmatmul.mubr.bf16.gmra.mrb[160].mxu0 %v4916_v57  ;;  %6456 = vmatmul.mubr.bf16.gmra.mrb[180].mxu1 %v11922_v29  ;;  %v4683_v57 = vshll.u32 %v11961_v30, 16  ;;  %v4921_v8 = vrot.slane %v12006_v26, 1 }
 0x422   : > { %9142 = vmatprep.mubr.bf16.mxu0 %v4918_v51  ;;  %6461 = vmatprep.mubr.bf16.mxu1 %v4678_v42  ;;  %v4920_v51 = vsel %vm1034_vm8, %v4917_v5, %v4919_v37 }
 0x423   : > { %v4922_v3 = vsel %vm1034_vm8, %v4919_v37, %v4921_v8  ;;  %v4685_v14 = vrot.slane %v4683_v57, 1  ;;  %v4691_v57 = vshll.u32 %v11968_v46, 16 }
 0x424   : > { %v5805_v54 = vpop.f32.mrb[56].mxu0 }
 0x425   : > { %v5807_v31 = vpop.f32.mrb[57].mxu0  ;;  %v12012_v2 = vadd.f32 %v11959_v44, %v5805_v54  ;;  %v4923_v54 = vrot.slane %v12019_v43, 1 }
 0x426   : > { %v5808_v33 = vpop.f32.mrb[58].mxu0  ;;  %v4679_v31 = vshrl.u32 %v11947_v11, 16 }
 0x427   : > { %12829 = vst [vmem:[#allocation14_spill] sm:$0xff] %v12012_v2  ;;  %v5810_v32 = vpop.f32.mrb[59].mxu0  ;;  %v12016_v41 = vadd.f32 %v11964_v55, %v5808_v33 }
 0x428   : > { %v4681_v44 = vor.u32 %v4679_v31, %v4677_v19  ;;  %v12024_v32 = vld [vmem:[#allocation2 + $0xb8] sm:$0xff]  ;;  %v4924_v19 = vsel %vm1034_vm8, %v4921_v8, %v4923_v54 }
 0x429   : > { %12830 = vst [vmem:[#allocation15_spill] sm:$0xff] %v12016_v41  ;;  %9143 = vmatmul.mubr.bf16.gmra.mrb[164].mxu0 %v4920_v51  ;;  %6462 = vmatmul.mubr.bf16.gmra.mrb[184].mxu1 %v11940_v52  ;;  %v4925_v37 = vrot.slane %v12024_v32, 1  ;;  %v4687_v41 = vshrl.u32 %v11961_v30, 16 }
 0x42a   : > { %9146 = vmatprep.mubr.bf16.mxu0 %v4922_v3  ;;  %v4686_v5 = vsel %vm708_vm7, %v4681_v44, %v4685_v14 }
 0x42b   : > { %6469 = vmatprep.mubr.bf16.mxu1 %v4686_v5  ;;  %v4926_v52 = vsel %vm1034_vm8, %v4923_v54, %v4925_v37 }
 0x42c   : > { %v5813_v42 = vpop.f32.mrb[60].mxu0  ;;  %v9064_v3 = vpop.f32.mrb[100].mxu1 }
 0x42d   : > { %v5814_v55 = vpop.f32.mrb[61].mxu0  ;;  %v6090_v31 = vpop.f32.mrb[101].mxu1  ;;  %v12032_v42 = vld [vmem:[#allocation2 + $0xc0] sm:$0xff]  ;;  %v4699_v3 = vshll.u32 %v11985_v10, 16 }
 0x42e   : > { %v5815_v33 = vpop.f32.mrb[62].mxu0  ;;  %v4689_v55 = vor.u32 %v4687_v41, %v4685_v14  ;;  %v9065_v44 = vpop.f32.mrb[102].mxu1 }
 0x42f   : > { %v5816_v51 = vpop.f32.mrb[63].mxu0  ;;  %v6093_v5 = vpop.f32.mrb[103].mxu1  ;;  %v4693_v33 = vrot.slane %v4691_v57, 1  ;;  %v4929_v57 = vrot.slane %v12036_v16, 1  ;;  %v12047_v44 = vld [vmem:[#allocation2 + $0xd0] sm:$0xff] }
 0x430   : > { %v4927_v51 = vrot.slane %v12032_v42, 1 }
 0x431   : > { %9147 = vmatmul.mubr.bf16.gmra.mrb[168].mxu0 %v4924_v19  ;;  %6470 = vmatmul.mubr.bf16.gmra.mrb[188].mxu1 %v11947_v11  ;;  %v4694_v19 = vsel %vm708_vm7, %v4689_v55, %v4693_v33  ;;  %v4695_v11 = vshrl.u32 %v11968_v46, 16  ;;  %v9415_v55 = vld [vmem:[#allocation3 + $0x238] sm:$0xff]  }
 0x432   : > { %9150 = vmatprep.mubr.bf16.mxu0 %v4926_v52  ;;  %6475 = vmatprep.mubr.bf16.mxu1 %v4694_v19  ;;  %v4928_v52 = vsel %vm1034_vm8, %v4925_v37, %v4927_v51 }
 0x433   : > { %9184 = vmatprep.subr.bf16.mxu1 %v9415_v55 }
 0x434   : > { %v5819_v2 = vpop.f32.mrb[64].mxu0  ;;  %9185 = vmatpush3.bf16.msra.mxu1 %v9415_v55  ;;  %v12060_v55 = vld [vmem:[#allocation2 + $0xe0] sm:$0xff] }
 0x435   : > { %v12038_v47 = vadd.f32 %v6076_v12, %v5819_v2  ;;  %v5821_v8 = vpop.f32.mrb[65].mxu0  ;;  %v4930_v2 = vsel %vm1034_vm8, %v4927_v51, %v4929_v57  ;;  %v4701_v12 = vrot.slane %v4699_v3, 1 }
 0x436   : > { %v5822_v14 = vpop.f32.mrb[66].mxu0  ;;  %v4697_v8 = vor.u32 %v4695_v11, %v4693_v33  ;;  %v4707_v33 = vshll.u32 %v11993_v20, 16 }
 0x437   : > { %12831 = vst [vmem:[#allocation16_spill] sm:$0xff] %v12038_v47  ;;  %v12043_v41 = vadd.f32 %v6079_v27, %v5822_v14  ;;  %v5824_v54 = vpop.f32.mrb[67].mxu0  ;;  %v4931_v27 = vrot.slane %v12047_v44, 1  ;;  %v12052_v14 = vld [vmem:[#allocation2 + $0xd8] sm:$0xff] }
 0x438   : > { %v4702_v54 = vsel %vm708_vm7, %v4697_v8, %v4701_v12  ;;  %v4933_v3 = vrot.slane %v12052_v14, 1 }
 0x439   : > { %12832 = vst [vmem:[#allocation17_spill] sm:$0xff] %v12043_v41  ;;  %9151 = vmatmul.mubr.bf16.gmra.mrb[172].mxu0 %v4928_v52  ;;  %6476 = vmatmul.mubr.bf16.gmra.mrb[192].mxu1 %v11961_v30  ;;  %v4932_v11 = vsel %vm1034_vm8, %v4929_v57, %v4931_v27 }
 0x43a   : > { %9154 = vmatprep.mubr.bf16.mxu0 %v4930_v2  ;;  %6483 = vmatprep.mubr.bf16.mxu1 %v4702_v54  ;;  %v4703_v2 = vshrl.u32 %v11985_v10, 16  ;;  %v4934_v30 = vsel %vm1034_vm8, %v4931_v27, %v4933_v3 }
 0x43c   : > { %v5827_v19 = vpop.f32.mrb[68].mxu0 }
 0x43d   : > { %v5828_v37 = vpop.f32.mrb[69].mxu0  ;;  %v9068_v19 = vpop.f32.mrb[104].mxu1 }
 0x43e   : > { %v5829_v51 = vpop.f32.mrb[70].mxu0  ;;  %v6104_v41 = vpop.f32.mrb[105].mxu1  ;;  %v4705_v37 = vor.u32 %v4703_v2, %v4701_v12  ;;  %v4715_v19 = vshll.u32 %v12002_v17, 16 }
 0x43f   : > { %v5830_v52 = vpop.f32.mrb[71].mxu0  ;;  %v9069_v8 = vpop.f32.mrb[106].mxu1  ;;  %v4709_v51 = vrot.slane %v4707_v33, 1  ;;  %v4937_v33 = vrot.slane %v12064_v21, 1 }
 0x440   : > { %v6107_v54 = vpop.f32.mrb[107].mxu1  ;;  %v4935_v52 = vrot.slane %v12060_v55, 1  ;;  %v12075_v8 = vld [vmem:[#allocation2 + $0xf0] sm:$0xff] }
 0x441   : > { %9155 = vmatmul.mubr.bf16.gmra.mrb[176].mxu0 %v4932_v11  ;;  %6484 = vmatmul.mubr.bf16.gmra.mrb[196].mxu1 %v11968_v46  ;;  %v4710_v11 = vsel %vm708_vm7, %v4705_v37, %v4709_v51  ;;  %v4711_v46 = vshrl.u32 %v11993_v20, 16 }
 0x442   : > { %9158 = vmatprep.mubr.bf16.mxu0 %v4934_v30  ;;  %6489 = vmatprep.mubr.bf16.mxu1 %v4710_v11  ;;  %v4936_v30 = vsel %vm1034_vm8, %v4933_v3, %v4935_v52 }
 0x443   : > { %v4713_v37 = vor.u32 %v4711_v46, %v4709_v51 }
 0x444   : > { %v5833_v47 = vpop.f32.mrb[72].mxu0 }
 0x445   : > { %v12066_v38 = vadd.f32 %v6090_v31, %v5833_v47  ;;  %v5835_v57 = vpop.f32.mrb[73].mxu0  ;;  %v4938_v47 = vsel %vm1034_vm8, %v4935_v52, %v4937_v33  ;;  %v4717_v31 = vrot.slane %v4715_v19, 1  ;;  %v4723_v19 = vshll.u32 %v12006_v26, 16 }
 0x446   : > { %v5836_v12 = vpop.f32.mrb[74].mxu0  ;;  %v4939_v57 = vrot.slane %v12075_v8, 1 }
 0x447   : > { %12833 = vst [vmem:[#allocation18_spill] sm:$0xff] %v12066_v38  ;;  %v12071_v27 = vadd.f32 %v6093_v5, %v5836_v12  ;;  %v5838_v2 = vpop.f32.mrb[75].mxu0  ;;  %v12080_v5 = vld [vmem:[#allocation2 + $0xf8] sm:$0xff]  ;;  %v4718_v3 = vsel %vm708_vm7, %v4713_v37, %v4717_v31 }
 0x448   : > { %v4941_v52 = vrot.slane %v12080_v5, 1  ;;  %v4940_v51 = vsel %vm1034_vm8, %v4937_v33, %v4939_v57 }
 0x449   : > { %12834 = vst [vmem:[#allocation19_spill] sm:$0xff] %v12071_v27  ;;  %9159 = vmatmul.mubr.bf16.gmra.mrb[180].mxu0 %v4936_v30  ;;  %6490 = vmatmul.mubr.bf16.gmra.mrb[200].mxu1 %v11985_v10  ;;  %v4719_v27 = vshrl.u32 %v12002_v17, 16 }
 0x44a   : > { %9162 = vmatprep.mubr.bf16.mxu0 %v4938_v47  ;;  %6497 = vmatprep.mubr.bf16.mxu1 %v4718_v3  ;;  %v4942_v10 = vsel %vm1034_vm8, %v4939_v57, %v4941_v52 }
 0x44c   : > { %v5841_v11 = vpop.f32.mrb[76].mxu0  ;;  %v9072_v47 = vpop.f32.mrb[108].mxu1 }
 0x44d   : > { %v5842_v12 = vpop.f32.mrb[77].mxu0  ;;  %v6118_v46 = vpop.f32.mrb[109].mxu1  ;;  %v12088_v11 = vld [vmem:[#allocation2 + $0x100] sm:$0xff] }
 0x44e   : > { %v5843_v2 = vpop.f32.mrb[78].mxu0  ;;  %v4721_v12 = vor.u32 %v4719_v27, %v4717_v31  ;;  %v9073_v37 = vpop.f32.mrb[110].mxu1 }
 0x44f   : > { %v5844_v30 = vpop.f32.mrb[79].mxu0  ;;  %v6121_v3 = vpop.f32.mrb[111].mxu1  ;;  %v4725_v2 = vrot.slane %v4723_v19, 1  ;;  %v4727_v19 = vshrl.u32 %v12006_v26, 16 }
 0x450   : > { %v4943_v30 = vrot.slane %v12088_v11, 1 }
 0x451   : > { %9163 = vmatmul.mubr.bf16.gmra.mrb[184].mxu0 %v4940_v51  ;;  %6498 = vmatmul.mubr.bf16.gmra.mrb[204].mxu1 %v11993_v20  ;;  %v4726_v47 = vsel %vm708_vm7, %v4721_v12, %v4725_v2  ;;  %v4731_v51 = vshll.u32 %v12019_v43, 16 }
 0x452   : > { %9166 = vmatprep.mubr.bf16.mxu0 %v4942_v10  ;;  %6503 = vmatprep.mubr.bf16.mxu1 %v4726_v47  ;;  %v4944_v31 = vsel %vm1034_vm8, %v4941_v52, %v4943_v30  ;;  %v4739_v52 = vshll.u32 %v12024_v32, 16 }
 0x453   : > { %v4733_v10 = vrot.slane %v4731_v51, 1 }
 0x454   : > { %v5847_v38 = vpop.f32.mrb[80].mxu0 }
 0x455   : > { %v12092_v0 = vadd.f32 %v6104_v41, %v5847_v38  ;;  %v5849_v33 = vpop.f32.mrb[81].mxu0  ;;  %v4729_v38 = vor.u32 %v4727_v19, %v4725_v2 }
 0x456   : > { %v5850_v61 = vpop.f32.mrb[82].mxu0 }
 0x457   : > { %v12097_v57 = vadd.f32 %v6107_v54, %v5850_v61  ;;  %v5852_v27 = vpop.f32.mrb[83].mxu0  ;;  %v4734_v12 = vsel %vm708_vm7, %v4729_v38, %v4733_v10  ;;  %v4735_v54 = vshrl.u32 %v12019_v43, 16  ;;  %v4747_v38 = vshll.u32 %v12032_v42, 16 }
 0x459   : > { %9167 = vmatmul.mubr.bf16.gmra.mrb[188].mxu0 %v4944_v31  ;;  %6504 = vmatmul.mubr.bf16.gmra.mrb[208].mxu1 %v12002_v17  ;;  %v4737_v47 = vor.u32 %v4735_v54, %v4733_v10  ;;  %v4741_v17 = vrot.slane %v4739_v52, 1  ;;  %v4749_v10 = vrot.slane %v4747_v38, 1  ;;  %v4755_v52 = vshll.u32 %v12036_v16, 16 }
 0x45a   : > { %7525 = vmatprep.mubr.bf16.mxu0 %v11408_v4  ;;  %6511 = vmatprep.mubr.bf16.mxu1 %v4734_v12  ;;  %v4763_v38 = vshll.u32 %v12047_v44, 16 }
 0x45b   : > { %v4742_v19 = vsel %vm708_vm7, %v4737_v47, %v4741_v17 }
 0x45c   : > { %v5855_v20 = vpop.f32.mrb[84].mxu0  ;;  %v9076_v30 = vpop.f32.mrb[112].mxu1 }
 0x45d   : > { %v5856_v41 = vpop.f32.mrb[85].mxu0  ;;  %v6132_v33 = vpop.f32.mrb[113].mxu1 }
 0x45e   : > { %v5857_v37 = vpop.f32.mrb[86].mxu0  ;;  %v9077_v4 = vpop.f32.mrb[114].mxu1 }
 0x45f   : > { %v5858_v61 = vpop.f32.mrb[87].mxu0  ;;  %v6135_v2 = vpop.f32.mrb[115].mxu1 }
 0x461   : > { %7526 = vmatmul.mubr.bf16.vlgmr.msra.gmra.mrb[192].mxu0 %v11809_v36  ;;  %6512 = vmatmul.mubr.bf16.gmra.mrb[212].mxu1 %v12006_v26 }
 0x462   : > { %7533 = vmatprep.mubr.bf16.mxu0 %v11813_v60  ;;  %6517 = vmatprep.mubr.bf16.mxu1 %v4742_v19  ;;  %v4743_v60 = vshrl.u32 %v12024_v32, 16 }
 0x464   : > { %v5861_v51 = vpop.f32.mrb[88].mxu0 }
 0x465   : > { %v12108_v27 = vadd.f32 %v6118_v46, %v5861_v51  ;;  %v5863_v31 = vpop.f32.mrb[89].mxu0  ;;  %v4745_v46 = vor.u32 %v4743_v60, %v4741_v17  ;;  %v4765_v60 = vrot.slane %v4763_v38, 1 }
 0x466   : > { %v5864_v20 = vpop.f32.mrb[90].mxu0 }
 0x467   : > { %v12113_v41 = vadd.f32 %v6121_v3, %v5864_v20  ;;  %v5866_v36 = vpop.f32.mrb[91].mxu0  ;;  %v4750_v37 = vsel %vm708_vm7, %v4745_v46, %v4749_v10  ;;  %v4751_v3 = vshrl.u32 %v12032_v42, 16 }
 0x469   : > { %7534 = vmatmul.mubr.bf16.gmra.mrb[196].mxu0 %v11802_v9  ;;  %6518 = vmatmul.mubr.bf16.gmra.mrb[216].mxu1 %v12019_v43  ;;  %v4753_v47 = vor.u32 %v4751_v3, %v4749_v10  ;;  %v4757_v43 = vrot.slane %v4755_v52, 1 }
 0x46a   : > { %7539 = vmatprep.mubr.bf16.mxu0 %v11831_v13  ;;  %6525 = vmatprep.mubr.bf16.mxu1 %v4750_v37  ;;  %v4771_v37 = vshll.u32 %v12052_v14, 16 }
 0x46b   : > { %v4758_v19 = vsel %vm708_vm7, %v4753_v47, %v4757_v43 }
 0x46c   : > { %v5869_v12 = vpop.f32.mrb[92].mxu0  ;;  %v9080_v9 = vpop.f32.mrb[116].mxu1 }
 0x46d   : > { %v5870_v26 = vpop.f32.mrb[93].mxu0  ;;  %v6146_v30 = vpop.f32.mrb[117].mxu1 }
 0x46e   : > { %v5871_v61 = vpop.f32.mrb[94].mxu0  ;;  %v9081_v13 = vpop.f32.mrb[118].mxu1 }
 0x46f   : > { %v5872_v54 = vpop.f32.mrb[95].mxu0  ;;  %v6149_v4 = vpop.f32.mrb[119].mxu1 }
 0x471   : > { %7540 = vmatmul.mubr.bf16.gmra.mrb[200].mxu0 %v11787_v62  ;;  %6526 = vmatmul.mubr.bf16.gmra.mrb[220].mxu1 %v12024_v32 }
 0x472   : > { %7547 = vmatprep.mubr.bf16.mxu0 %v11853_v53  ;;  %6531 = vmatprep.mubr.bf16.mxu1 %v4758_v19  ;;  %v4759_v53 = vshrl.u32 %v12036_v16, 16 }
 0x474   : > { %v5875_v17 = vpop.f32.mrb[96].mxu0 }
 0x475   : > { %v12124_v51 = vadd.f32 %v6132_v33, %v5875_v17  ;;  %v5877_v31 = vpop.f32.mrb[97].mxu0  ;;  %v4761_v33 = vor.u32 %v4759_v53, %v4757_v43  ;;  %v4779_v43 = vshll.u32 %v12060_v55, 16 }
 0x476   : > { %v5878_v20 = vpop.f32.mrb[98].mxu0 }
 0x477   : > { %v12129_v36 = vadd.f32 %v6135_v2, %v5878_v20  ;;  %v5880_v62 = vpop.f32.mrb[99].mxu0  ;;  %v4766_v46 = vsel %vm708_vm7, %v4761_v33, %v4765_v60  ;;  %v4767_v2 = vshrl.u32 %v12047_v44, 16 }
 0x479   : > { %7548 = vmatmul.mubr.bf16.gmra.mrb[204].mxu0 %v11807_v50  ;;  %6532 = vmatmul.mubr.bf16.gmra.mrb[224].mxu1 %v12032_v42  ;;  %v4769_v54 = vor.u32 %v4767_v2, %v4765_v60  ;;  %v4773_v42 = vrot.slane %v4771_v37, 1 }
 0x47a   : > { %7553 = vmatprep.mubr.bf16.mxu0 %v11876_v40  ;;  %6539 = vmatprep.mubr.bf16.mxu1 %v4766_v46 }
 0x47b   : > { %v4774_v13 = vsel %vm708_vm7, %v4769_v54, %v4773_v42 }
 0x47c   : > { %v5883_v10 = vpop.f32.mrb[100].mxu0  ;;  %v9084_v50 = vpop.f32.mrb[120].mxu1 }
 0x47d   : > { %v5884_v32 = vpop.f32.mrb[101].mxu0  ;;  %v6160_v61 = vpop.f32.mrb[121].mxu1 }
 0x47e   : > { %v5885_v12 = vpop.f32.mrb[102].mxu0  ;;  %v9085_v40 = vpop.f32.mrb[122].mxu1  ;;  %v4787_v32 = vshll.u32 %v12064_v21, 16 }
 0x47f   : > { %v5886_v26 = vpop.f32.mrb[103].mxu0  ;;  %v6163_v3 = vpop.f32.mrb[123].mxu1 }
 0x480   : > { %v4789_v37 = vrot.slane %v4787_v32, 1 }
 0x481   : > { %7554 = vmatmul.mubr.bf16.gmra.mrb[208].mxu0 %v11823_v48  ;;  %6540 = vmatmul.mubr.bf16.gmra.mrb[228].mxu1 %v12036_v16 }
 0x482   : > { %7561 = vmatprep.mubr.bf16.mxu0 %v11901_v59  ;;  %6545 = vmatprep.mubr.bf16.mxu1 %v4774_v13  ;;  %v4775_v59 = vshrl.u32 %v12052_v14, 16 }
 0x484   : > { %v5889_v52 = vpop.f32.mrb[104].mxu0  ;;  %v9088_v19 = vpop.f32.mrb[124].mxu1  ;;  %v4777_v62 = vor.u32 %v4775_v59, %v4773_v42 }
 0x485   : > { %v12140_v9 = vadd.f32 %v6146_v30, %v5889_v52  ;;  %v5891_v47 = vpop.f32.mrb[105].mxu0  ;;  %v12147_v38 = vpop.f32.mrb[125].mxu1  ;;  %v4781_v30 = vrot.slane %v4779_v43, 1  ;;  %v4795_v52 = vshll.u32 %v12075_v8, 16 }
 0x486   : > { %v5892_v17 = vpop.f32.mrb[106].mxu0  ;;  %v9089_v20 = vpop.f32.mrb[126].mxu1  ;;  %v12171_v47 = vld [vmem:[#allocation2 + $0x70] sm:$0xff] }
 0x487   : > { %v12145_v31 = vadd.f32 %v6149_v4, %v5892_v17  ;;  %v5894_v48 = vpop.f32.mrb[107].mxu0  ;;  %v12152_v16 = vpop.f32.mrb[127].mxu1  ;;  %v4782_v60 = vsel %vm708_vm7, %v4777_v62, %v4781_v30  ;;  %v4797_v17 = vrot.slane %v4795_v52, 1  ;;  %v12202_v52 = vld [vmem:[#allocation2 + $0x80] sm:$0xff] }
 0x489   : > { %7562 = vmatmul.mubr.bf16.gmra.mrb[212].mxu0 %v11849_v15  ;;  %6546 = vmatmul.mubr.bf16.gmra.mrb[232].mxu1 %v12047_v44  ;;  %v4783_v15 = vshrl.u32 %v12060_v55, 16 }
 0x48a   : > { %7567 = vmatprep.mubr.bf16.mxu0 %v11926_v1  ;;  %6553 = vmatprep.mubr.bf16.mxu1 %v4782_v60  ;;  %v4803_v60 = vshll.u32 %v12080_v5, 16 }
 0x48b   : > { %v4785_v26 = vor.u32 %v4783_v15, %v4781_v30 }
 0x48c   : > { %v5897_v53 = vpop.f32.mrb[108].mxu0  ;;  %v6365_v46 = vpop.f32.mrb[128].mxu1 }
 0x48d   : > { %v5898_v4 = vpop.f32.mrb[109].mxu0  ;;  %v12159_v12 = vadd.f32 %v6365_v46, %v11750_v63  ;;  %v6367_v1 = vpop.f32.mrb[129].mxu1  ;;  %v4790_v63 = vsel %vm708_vm7, %v4785_v26, %v4789_v37 }
 0x48e   : > { %v5899_v33 = vpop.f32.mrb[110].mxu0  ;;  %v6368_v2 = vpop.f32.mrb[130].mxu1  ;;  %v4799_v4 = vshrl.u32 %v12075_v8, 16 }
 0x48f   : > { %v5900_v10 = vpop.f32.mrb[111].mxu0  ;;  %v12164_v44 = vadd.f32 %v6368_v2, %v11754_v22  ;;  %v6370_v50 = vpop.f32.mrb[131].mxu1  ;;  %v4805_v2 = vrot.slane %v4803_v60, 1 }
 0x490   : > { %v12183_v10 = vld [vmem:[#allocation2 + $0x78] sm:$0xff]  ;;  %v4801_v32 = vor.u32 %v4799_v4, %v4797_v17  ;;  %v12214_v4 = vld [vmem:[#allocation2 + $0x88] sm:$0xff] }
 0x491   : > { %7568 = vmatmul.mubr.bf16.gmra.mrb[216].mxu0 %v11866_v34  ;;  %6554 = vmatmul.mubr.bf16.gmra.mrb[236].mxu1 %v12052_v14  ;;  %v6958_v14 = vshll.u32 %v12171_v47, 16  ;;  %v6966_v50 = vshll.u32 %v12183_v10, 16 }
 0x492   : > { %7575 = vmatprep.mubr.bf16.mxu0 %v11951_v28  ;;  %6559 = vmatprep.mubr.bf16.mxu1 %v4790_v63  ;;  %v4811_v63 = vshll.u32 %v12088_v11, 16  ;;  %v6974_v11 = vshll.u32 %v12202_v52, 16 }
 0x493   : > { %v6960_v62 = vrot.slane %v6958_v14, 1 }
 0x494   : > { %v5903_v54 = vpop.f32.mrb[112].mxu0  ;;  %v6373_v13 = vpop.f32.mrb[132].mxu1 }
 0x495   : > { %v12166_v40 = vadd.f32 %v6160_v61, %v5903_v54  ;;  %v5905_v42 = vpop.f32.mrb[113].mxu0  ;;  %v6374_v43 = vpop.f32.mrb[133].mxu1  ;;  %v4791_v61 = vshrl.u32 %v12064_v21, 16  ;;  %v6968_v13 = vrot.slane %v6966_v50, 1  ;;  %v6978_v50 = vshrl.u32 %v12202_v52, 16 }
 0x496   : > { %v5906_v34 = vpop.f32.mrb[114].mxu0  ;;  %v6375_v48 = vpop.f32.mrb[134].mxu1 }
 0x497   : > { %v12173_v28 = vadd.f32 %v6163_v3, %v5906_v34  ;;  %v5908_v22 = vpop.f32.mrb[115].mxu0  ;;  %v4793_v19 = vor.u32 %v4791_v61, %v4789_v37  ;;  %v6376_v59 = vpop.f32.mrb[135].mxu1  ;;  %v6962_v37 = vshrl.u32 %v12171_v47, 16  ;;  %v4807_v61 = vshrl.u32 %v12080_v5, 16 }
 0x499   : > { %7576 = vmatmul.mubr.bf16.gmra.mrb[220].mxu0 %v11897_v45  ;;  %6560 = vmatmul.mubr.bf16.gmra.mrb[240].mxu1 %v12060_v55  ;;  %v4798_v20 = vsel %vm708_vm7, %v4793_v19, %v4797_v17  ;;  %v6961_v55 = vsel %vm708_vm7, %v11989_v49, %v6960_v62  ;;  %v4806_v49 = vsel %vm708_vm7, %v4801_v32, %v4805_v2  ;;  %v4813_v17 = vrot.slane %v4811_v63, 1 }
 0x49a   : > { %7581 = vmatprep.mubr.bf16.mxu0 %v11972_v56  ;;  %6567 = vmatprep.mubr.bf16.mxu1 %v4798_v20  ;;  %v6964_v42 = vor.u32 %v6962_v37, %v6960_v62  ;;  %v4809_v19 = vor.u32 %v4807_v61, %v4805_v2  ;;  %v9442_v2 = vld [vmem:[#allocation2 + $0x28] sm:$0xff] }
 0x49b   : > { %v7204_v37 = vrot.slane %v9442_v2, 1 }
 0x49c   : > { %v5911_v30 = vpop.f32.mrb[116].mxu0  ;;  %v6379_v33 = vpop.f32.mrb[136].mxu1 }
 0x49d   : > { %v5912_v3 = vpop.f32.mrb[117].mxu0  ;;  %v12186_v56 = vadd.f32 %v6379_v33, %v11773_v58  ;;  %v6381_v15 = vpop.f32.mrb[137].mxu1  ;;  %v4814_v30 = vsel %vm708_vm7, %v4809_v19, %v4813_v17 }
 0x49e   : > { %v5913_v45 = vpop.f32.mrb[118].mxu0  ;;  %v6382_v46 = vpop.f32.mrb[138].mxu1  ;;  %v6970_v3 = vshrl.u32 %v12183_v10, 16  ;;  %v9441_v15 = vld [vmem:[#allocation2 + $0x20] sm:$0xff] }
 0x49f   : > { %v5914_v53 = vpop.f32.mrb[119].mxu0  ;;  %v12192_v1 = vadd.f32 %v6382_v46, %v11775_v35  ;;  %v6384_v26 = vpop.f32.mrb[139].mxu1 }
 0x4a0   : > { %v6972_v45 = vor.u32 %v6970_v3, %v6968_v13 }
 0x4a1   : > { %7582 = vmatmul.mubr.bf16.gmra.mrb[224].mxu0 %v11912_v7  ;;  %6568 = vmatmul.mubr.bf16.gmra.mrb[244].mxu1 %v12064_v21  ;;  %v6969_v21 = vsel %vm708_vm7, %v6964_v42, %v6968_v13 }
 0x4a2   : > { %7589 = vmatprep.mubr.bf16.mxu0 %v6961_v55  ;;  %6573 = vmatprep.mubr.bf16.mxu1 %v4806_v49  ;;  %v7203_v55 = vrot.slane %v9441_v15, 1 }
 0x4a4   : > { %v5917_v58 = vpop.f32.mrb[120].mxu0  ;;  %v6387_v43 = vpop.f32.mrb[140].mxu1  ;;  %v7205_v49 = vsel %vm1034_vm8, %v7203_v55, %v7204_v37 }
 0x4a5   : > { %v12197_v54 = vadd.f32 %v12147_v38, %v5917_v58  ;;  %v5919_v7 = vpop.f32.mrb[121].mxu0  ;;  %v6388_v38 = vpop.f32.mrb[141].mxu1 }
 0x4a6   : > { %v5920_v35 = vpop.f32.mrb[122].mxu0  ;;  %v6389_v14 = vpop.f32.mrb[142].mxu1 }
 0x4a7   : > { %v12205_v34 = vadd.f32 %v12152_v16, %v5920_v35  ;;  %v5922_v22 = vpop.f32.mrb[123].mxu0  ;;  %v6390_v48 = vpop.f32.mrb[143].mxu1  ;;  %v12231_v35 = vld [vmem:[#allocation2 + $0x90] sm:$0xff] }
 0x4a8   : > { %v6990_v61 = vshll.u32 %v12231_v35, 16  ;;  %v7207_v48 = vsel %vm1034_vm8, %v7204_v37, %v11847_v25  ;;  %v6994_v37 = vshrl.u32 %v12231_v35, 16 }
 0x4a9   : > { %7590 = vmatmul.mubr.bf16.gmra.mrb[228].mxu0 %v11922_v29  ;;  %6574 = vmatmul.mubr.bf16.gmra.mrb[248].mxu1 %v12075_v8  ;;  %v6976_v29 = vrot.slane %v6974_v11, 1  ;;  %v9443_v11 = vld [vmem:[#allocation2 + $0x38] sm:$0xff] }
 0x4aa   : > { %7595 = vmatprep.mubr.bf16.mxu0 %v6969_v21  ;;  %6581 = vmatprep.mubr.bf16.mxu1 %v4814_v30  ;;  %v7208_v14 = vrot.slane %v9443_v11, 1  ;;  %v6992_v30 = vrot.slane %v6990_v61, 1  ;;  %v12835_v11 = vld [vmem:[#allocation10_spill] sm:$0xff] }
 0x4ab   : > { %v6977_v8 = vsel %vm708_vm7, %v6972_v45, %v6976_v29  ;;  %v6980_v42 = vor.u32 %v6978_v50, %v6976_v29 }
 0x4ac   : > { %v5925_v59 = vpop.f32.mrb[124].mxu0  ;;  %v6393_v53 = vpop.f32.mrb[144].mxu1  ;;  %v7211_v50 = vsel %vm1034_vm8, %v7208_v14, %v11872_v39 }
 0x4ad   : > { %v5926_v16 = vpop.f32.mrb[125].mxu0  ;;  %v12217_v60 = vadd.f32 %v6393_v53, %v11795_v6  ;;  %v6395_v33 = vpop.f32.mrb[145].mxu1  ;;  %v6982_v6 = vshll.u32 %v12214_v4, 16 }
 0x4ae   : > { %v5927_v20 = vpop.f32.mrb[126].mxu0  ;;  %v6396_v32 = vpop.f32.mrb[146].mxu1  ;;  %v6986_v16 = vshrl.u32 %v12214_v4, 16  ;;  %v12250_v33 = vld [vmem:[#allocation2 + $0x98] sm:$0xff] }
 0x4af   : > { %v5928_v62 = vpop.f32.mrb[127].mxu0  ;;  %v12222_v46 = vadd.f32 %v6396_v32, %v11799_v24  ;;  %v6398_v26 = vpop.f32.mrb[147].mxu1  ;;  %v6984_v13 = vrot.slane %v6982_v6, 1 }
 0x4b0   : > { %v9444_v26 = vld [vmem:[#allocation2 + $0x48] sm:$0xff] }
 0x4b1   : > { %7596 = vmatmul.mubr.bf16.gmra.mrb[232].mxu0 %v12171_v47  ;;  %6582 = vmatmul.mubr.bf16.gmra.mrb[252].mxu1 %v12080_v5  ;;  %v6985_v5 = vsel %vm708_vm7, %v6980_v42, %v6984_v13  ;;  %v6988_v62 = vor.u32 %v6986_v16, %v6984_v13  ;;  %v7212_v2 = vrot.slane %v9444_v26, 1  ;;  %v12265_v42 = vld [vmem:[#allocation2 + $0xa0] sm:$0xff] }
 0x4b2   : > { %7603 = vmatprep.mubr.bf16.mxu0 %v6977_v8  ;;  %9186 = vmatprep.mubr.bf16.mxu1 %v7205_v49 }
 0x4b4   : > { %v9108_v58 = vpop.f32.mrb[128].mxu0  ;;  %v6401_v43 = vpop.f32.mrb[148].mxu1 }
 0x4b5   : > { %v6622_v7 = vpop.f32.mrb[129].mxu0  ;;  %v6402_v21 = vpop.f32.mrb[149].mxu1  ;;  %v7213_v58 = vsel %vm1034_vm8, %v11872_v39, %v7212_v2  ;;  %v7006_v39 = vshll.u32 %v12265_v42, 16 }
 0x4b6   : > { %v12229_v63 = vadd.f32 %v6622_v7, %v12159_v12  ;;  %v9109_v24 = vpop.f32.mrb[130].mxu0  ;;  %v6403_v17 = vpop.f32.mrb[150].mxu1  ;;  %v6996_v7 = vor.u32 %v6994_v37, %v6992_v30 }
 0x4b7   : > { %v6625_v22 = vpop.f32.mrb[131].mxu0  ;;  %v6404_v12 = vpop.f32.mrb[151].mxu1  ;;  %v9445_v17 = vld [vmem:[#allocation2 + $0x58] sm:$0xff] }
 0x4b8   : > { %v12234_v38 = vadd.f32 %v6625_v22, %v12164_v44  ;;  %v7209_v44 = vsel %vm1034_vm8, %v11847_v25, %v7208_v14  ;;  %v6993_v25 = vsel %vm708_vm7, %v6988_v62, %v6992_v30  ;;  %v7216_v12 = vrot.slane %v9445_v17, 1 }
 0x4b9   : > { %7604 = vmatmul.mubr.bf16.gmra.mrb[236].mxu0 %v12183_v10  ;;  %9187 = vmatmul.mubr.bf16.vlgmr.msra.gmra.mrb[0].mxu1 %v7207_v48  ;;  %v7215_v14 = vsel %vm1034_vm8, %v7212_v2, %v12835_v11  ;;  %v7222_v17 = vrot.slane %v12171_v47, 1 }
 0x4ba   : > { %7609 = vmatprep.mubr.bf16.mxu0 %v6985_v5  ;;  %9190 = vmatprep.mubr.bf16.mxu1 %v7209_v44  ;;  %v7008_v44 = vrot.slane %v7006_v39, 1  ;;  %v12296_v39 = vld [vmem:[#allocation2 + $0xb0] sm:$0xff] }
 0x4bc   : > { %v9112_v19 = vpop.f32.mrb[132].mxu0  ;;  %v6407_v45 = vpop.f32.mrb[152].mxu1 }
 0x4bd   : > { %v6636_v59 = vpop.f32.mrb[133].mxu0  ;;  %v6408_v8 = vadd.f32 %v6407_v45, %v11834_v23  ;;  %v6409_v15 = vpop.f32.mrb[153].mxu1 }
 0x4be   : > { %v12245_v3 = vadd.f32 %v6636_v59, %v12186_v56  ;;  %v9113_v29 = vpop.f32.mrb[134].mxu0  ;;  %v6410_v55 = vpop.f32.mrb[154].mxu1  ;;  %v7002_v59 = vshrl.u32 %v12250_v33, 16  ;;  %v12282_v15 = vld [vmem:[#allocation2 + $0xa8] sm:$0xff] }
 0x4bf   : > { %v6639_v20 = vpop.f32.mrb[135].mxu0  ;;  %v6411_v56 = vadd.f32 %v6410_v55, %v11840_v18  ;;  %v6412_v32 = vpop.f32.mrb[155].mxu1 }
 0x4c0   : > { %v12248_v53 = vadd.f32 %v6639_v20, %v12192_v1  ;;  %v6998_v1 = vshll.u32 %v12250_v33, 16 }
 0x4c1   : > { %7610 = vmatmul.mubr.bf16.gmra.mrb[240].mxu0 %v12202_v52  ;;  %9191 = vmatmul.mubr.bf16.gmra.mrb[4].mxu1 %v7211_v50  ;;  %v9446_v50 = vld [vmem:[#allocation2 + $0x68] sm:$0xff] }
 0x4c2   : > { %7617 = vmatprep.mubr.bf16.mxu0 %v6993_v25  ;;  %9194 = vmatprep.mubr.bf16.mxu1 %v7213_v58  ;;  %v7000_v22 = vrot.slane %v6998_v1, 1  ;;  %v12836_v25 = vld [vmem:[#allocation8_spill] sm:$0xff]  ;;  %v12838_v58 = vld [vmem:[#allocation7_spill] sm:$0xff] }
 0x4c4   : > { %v9116_v23 = vpop.f32.mrb[136].mxu0  ;;  %v6415_v13 = vpop.f32.mrb[156].mxu1  ;;  %v7001_v5 = vsel %vm708_vm7, %v6996_v7, %v7000_v22  ;;  %v7004_v20 = vor.u32 %v7002_v59, %v7000_v22  ;;  %v7219_v7 = vsel %vm1034_vm8, %v7216_v12, %v12838_v58 }
 0x4c5   : > { %v6650_v6 = vpop.f32.mrb[137].mxu0  ;;  %v6416_v21 = vpop.f32.mrb[157].mxu1  ;;  %v7220_v23 = vrot.slane %v9446_v50, 1 }
 0x4c6   : > { %v12263_v49 = vadd.f32 %v6650_v6, %v12217_v60  ;;  %v9117_v18 = vpop.f32.mrb[138].mxu0  ;;  %v6417_v61 = vpop.f32.mrb[158].mxu1  ;;  %v7009_v26 = vsel %vm708_vm7, %v7004_v20, %v7008_v44  ;;  %v7010_v6 = vshrl.u32 %v12265_v42, 16 }
 0x4c7   : > { %v6653_v24 = vpop.f32.mrb[139].mxu0  ;;  %v6418_v60 = vpop.f32.mrb[159].mxu1  ;;  %v7221_v22 = vsel %vm1034_vm8, %v12838_v58, %v7220_v23 }
 0x4c8   : > { %v12268_v43 = vadd.f32 %v6653_v24, %v12222_v46  ;;  %v7217_v46 = vsel %vm1034_vm8, %v12835_v11, %v7216_v12  ;;  %v7012_v13 = vor.u32 %v7010_v6, %v7008_v44  ;;  %v7224_v44 = vrot.slane %v12183_v10, 1  ;;  %v12839_v10 = vld [vmem:[#allocation6_spill] sm:$0xff] }
 0x4c9   : > { %7618 = vmatmul.mubr.bf16.gmra.mrb[244].mxu0 %v12214_v4  ;;  %9195 = vmatmul.mubr.bf16.gmra.mrb[8].mxu1 %v7215_v14 }
 0x4ca   : > { %7623 = vmatprep.mubr.bf16.mxu0 %v7001_v5  ;;  %9198 = vmatprep.mubr.bf16.mxu1 %v7217_v46  ;;  %v7225_v20 = vsel %vm1034_vm8, %v7222_v17, %v7224_v44 }
 0x4cc   : > { %v9120_v48 = vpop.f32.mrb[140].mxu0  ;;  %v6421_v62 = vpop.f32.mrb[160].mxu1 }
 0x4cd   : > { %v6664_v19 = vpop.f32.mrb[141].mxu0  ;;  %v6422_v55 = vadd.f32 %v6421_v62, %v12836_v25  ;;  %v6423_v32 = vpop.f32.mrb[161].mxu1  ;;  %v7018_v62 = vshrl.u32 %v12282_v15, 16 }
 0x4ce   : > { %v12278_v16 = vadd.f32 %v6664_v19, %v6408_v8  ;;  %v9121_v30 = vpop.f32.mrb[142].mxu0  ;;  %v6424_v2 = vpop.f32.mrb[162].mxu1  ;;  %v12837_v8 = vld [vmem:[#allocation9_spill] sm:$0xff]  ;;  %v7022_v19 = vshll.u32 %v12296_v39, 16 }
 0x4cf   : > { %v6667_v29 = vpop.f32.mrb[143].mxu0  ;;  %v6425_v37 = vadd.f32 %v6424_v2, %v12837_v8  ;;  %v6426_v1 = vpop.f32.mrb[163].mxu1  ;;  %v7223_v30 = vsel %vm1034_vm8, %v7220_v23, %v7222_v17  ;;  %v7226_v2 = vrot.slane %v12202_v52, 1  ;;  %v7026_v52 = vshrl.u32 %v12296_v39, 16 }
 0x4d0   : > { %v12280_v45 = vadd.f32 %v6667_v29, %v6411_v56  ;;  %v7014_v56 = vshll.u32 %v12282_v15, 16  ;;  %v7024_v25 = vrot.slane %v7022_v19, 1 }
 0x4d1   : > { %7624 = vmatmul.mubr.bf16.gmra.mrb[248].mxu0 %v12231_v35  ;;  %9199 = vmatmul.mubr.bf16.gmra.mrb[12].mxu1 %v7219_v7  ;;  %v12840_v7 = vld [vmem:[#allocation11_spill] sm:$0xff] }
 0x4d2   : > { %7631 = vmatprep.mubr.bf16.mxu0 %v7009_v26  ;;  %9202 = vmatprep.mubr.bf16.mxu1 %v7221_v22  ;;  %v7016_v60 = vrot.slane %v7014_v56, 1  ;;  %v7228_v56 = vrot.slane %v12214_v4, 1 }
 0x4d4   : > { %v9124_v18 = vpop.f32.mrb[144].mxu0  ;;  %v6429_v11 = vpop.f32.mrb[164].mxu1  ;;  %v7017_v48 = vsel %vm708_vm7, %v7012_v13, %v7016_v60  ;;  %v7020_v26 = vor.u32 %v7018_v62, %v7016_v60  ;;  %v7227_v13 = vsel %vm1034_vm8, %v7224_v44, %v7226_v2  ;;  %v7229_v17 = vsel %vm1034_vm8, %v7226_v2, %v7228_v56 }
 0x4d5   : > { %v6678_v24 = vpop.f32.mrb[145].mxu0  ;;  %v6430_v12 = vpop.f32.mrb[165].mxu1  ;;  %v7028_v11 = vor.u32 %v7026_v52, %v7024_v25  ;;  %v7232_v62 = vrot.slane %v12250_v33, 1  ;;  %v7236_v52 = vrot.slane %v12282_v15, 1 }
 0x4d6   : > { %v12294_v21 = vadd.f32 %v6678_v24, %v6422_v55  ;;  %v9125_v5 = vpop.f32.mrb[146].mxu0  ;;  %v6431_v46 = vpop.f32.mrb[166].mxu1  ;;  %v7025_v23 = vsel %vm708_vm7, %v7020_v26, %v7024_v25  ;;  %v12324_v12 = vld [vmem:[#allocation2 + $0xc0] sm:$0xff] }
 0x4d7   : > { %v6681_v61 = vpop.f32.mrb[147].mxu0  ;;  %v6432_v59 = vpop.f32.mrb[167].mxu1  ;;  %v7230_v46 = vrot.slane %v12231_v35, 1 }
 0x4d8   : > { %v12299_v14 = vadd.f32 %v6681_v61, %v6425_v37  ;;  %v12309_v37 = vld [vmem:[#allocation2 + $0xb8] sm:$0xff] }
 0x4d9   : > { %7632 = vmatmul.mubr.bf16.gmra.mrb[252].mxu0 %v12250_v33  ;;  %9203 = vmatmul.mubr.bf16.gmra.mrb[16].mxu1 %v7223_v30  ;;  %v7030_v22 = vshll.u32 %v12309_v37, 16  ;;  %v7231_v25 = vsel %vm1034_vm8, %v7228_v56, %v7230_v46  ;;  %v7233_v35 = vsel %vm1034_vm8, %v7230_v46, %v7232_v62  ;;  %v7034_v26 = vshrl.u32 %v12309_v37, 16  ;;  %v12339_v33 = vld [vmem:[#allocation2 + $0xc8] sm:$0xff] }
 0x4da   : > { %7637 = vmatprep.mubr.bf16.mxu0 %v7017_v48  ;;  %9206 = vmatprep.mubr.bf16.mxu1 %v7225_v20 }
 0x4db   : > { %v7032_v19 = vrot.slane %v7030_v22, 1 }
 0x4dc   : > { %v9128_v29 = vpop.f32.mrb[148].mxu0  ;;  %v6435_v8 = vpop.f32.mrb[168].mxu1 }
 0x4dd   : > { %v6692_v47 = vpop.f32.mrb[149].mxu0  ;;  %v6436_v1 = vadd.f32 %v6435_v8, %v12839_v10  ;;  %v6437_v50 = vpop.f32.mrb[169].mxu1  ;;  %v7033_v44 = vsel %vm708_vm7, %v7028_v11, %v7032_v19  ;;  %v7038_v29 = vshll.u32 %v12324_v12, 16  ;;  %v7046_v11 = vshll.u32 %v12339_v33, 16 }
 0x4de   : > { %v9129_v55 = vpop.f32.mrb[150].mxu0  ;;  %v6438_v6 = vpop.f32.mrb[170].mxu1  ;;  %v7234_v50 = vrot.slane %v12265_v42, 1 }
 0x4df   : > { %v6695_v32 = vpop.f32.mrb[151].mxu0  ;;  %v12315_v58 = vadd.f32 %v6692_v47, %v6436_v1  ;;  %v6439_v18 = vadd.f32 %v6438_v6, %v12840_v7  ;;  %v6440_v24 = vpop.f32.mrb[171].mxu1  ;;  %v7040_v2 = vrot.slane %v7038_v29, 1  ;;  %v7036_v1 = vor.u32 %v7034_v26, %v7032_v19  ;;  %v12841_v6 = vld [vmem:[#allocation12_spill] sm:$0xff] }
 0x4e1   : > { %7638 = vmatmul.mubr.bf16.gmra.mrb[0].mxu0 %v12265_v42  ;;  %v12321_v61 = vadd.f32 %v6695_v32, %v6439_v18  ;;  %9207 = vmatmul.mubr.bf16.gmra.mrb[20].mxu1 %v7227_v13  ;;  %v7041_v18 = vsel %vm708_vm7, %v7036_v1, %v7040_v2  ;;  %v12842_v13 = vld [vmem:[#allocation13_spill] sm:$0xff]  ;;  %v7042_v42 = vshrl.u32 %v12324_v12, 16 }
 0x4e2   : > { %7645 = vmatprep.mubr.bf16.mxu0 %v7025_v23  ;;  %9210 = vmatprep.mubr.bf16.mxu1 %v7229_v17 }
 0x4e4   : > { %v9132_v5 = vpop.f32.mrb[152].mxu0  ;;  %v6443_v59 = vpop.f32.mrb[172].mxu1 }
 0x4e5   : > { %v6706_v60 = vpop.f32.mrb[153].mxu0  ;;  %v6444_v30 = vpop.f32.mrb[173].mxu1 }
 0x4e6   : > { %v9133_v4 = vpop.f32.mrb[154].mxu0  ;;  %v6445_v47 = vpop.f32.mrb[174].mxu1  ;;  %v7237_v30 = vsel %vm1034_vm8, %v7234_v50, %v7236_v52 }
 0x4e7   : > { %v6709_v48 = vpop.f32.mrb[155].mxu0  ;;  %v6446_v20 = vpop.f32.mrb[175].mxu1  ;;  %v7235_v4 = vsel %vm1034_vm8, %v7232_v62, %v7234_v50  ;;  %v7048_v47 = vrot.slane %v7046_v11, 1 }
 0x4e8   : > { %v7238_v20 = vrot.slane %v12296_v39, 1 }
 0x4e9   : > { %7646 = vmatmul.mubr.bf16.gmra.mrb[4].mxu0 %v12282_v15  ;;  %9211 = vmatmul.mubr.bf16.gmra.mrb[24].mxu1 %v7231_v25  ;;  %v7044_v15 = vor.u32 %v7042_v42, %v7040_v2  ;;  %v7240_v2 = vrot.slane %v12309_v37, 1 }
 0x4ea   : > { %7651 = vmatprep.mubr.bf16.mxu0 %v7033_v44  ;;  %9214 = vmatprep.mubr.bf16.mxu1 %v7233_v35  ;;  %v12356_v44 = vld [vmem:[#allocation2 + $0xd0] sm:$0xff] }
 0x4ec   : > { %v9136_v55 = vpop.f32.mrb[156].mxu0  ;;  %v6449_v23 = vpop.f32.mrb[176].mxu1 }
 0x4ed   : > { %v12332_v32 = vpop.f32.mrb[157].mxu0  ;;  %v6450_v56 = vadd.f32 %v6449_v23, %v12841_v6  ;;  %v6451_v7 = vpop.f32.mrb[177].mxu1  ;;  %v7054_v55 = vshll.u32 %v12356_v44, 16  ;;  %v7050_v23 = vshrl.u32 %v12339_v33, 16 }
 0x4ee   : > { %v9137_v8 = vpop.f32.mrb[158].mxu0  ;;  %v6452_v24 = vpop.f32.mrb[178].mxu1 }
 0x4ef   : > { %v12336_v10 = vpop.f32.mrb[159].mxu0  ;;  %v12345_v22 = vadd.f32 %v6706_v60, %v6450_v56  ;;  %v6453_v5 = vadd.f32 %v6452_v24, %v12842_v13  ;;  %v6454_v17 = vpop.f32.mrb[179].mxu1  ;;  %v7239_v8 = vsel %vm1034_vm8, %v7236_v52, %v7238_v20  ;;  %v7056_v6 = vrot.slane %v7054_v55, 1  ;;  %v12843_v52 = vld [vmem:[#allocation14_spill] sm:$0xff] }
 0x4f0   : > { %v7242_v24 = vrot.slane %v12324_v12, 1 }
 0x4f1   : > { %7652 = vmatmul.mubr.bf16.gmra.mrb[8].mxu0 %v12296_v39  ;;  %v12351_v46 = vadd.f32 %v6709_v48, %v6453_v5  ;;  %9215 = vmatmul.mubr.bf16.gmra.mrb[28].mxu1 %v7235_v4  ;;  %v7049_v48 = vsel %vm708_vm7, %v7044_v15, %v7048_v47  ;;  %v7241_v39 = vsel %vm1034_vm8, %v7238_v20, %v7240_v2  ;;  %v7244_v4 = vrot.slane %v12339_v33, 1 }
 0x4f2   : > { %7659 = vmatprep.mubr.bf16.mxu0 %v7041_v18  ;;  %9218 = vmatprep.mubr.bf16.mxu1 %v7237_v30  ;;  %v7052_v18 = vor.u32 %v7050_v23, %v7048_v47  ;;  %v12844_v30 = vld [vmem:[#allocation15_spill] sm:$0xff]  ;;  %v7058_v47 = vshrl.u32 %v12356_v44, 16 }
 0x4f3   : > { %v7245_v55 = vsel %vm1034_vm8, %v7242_v24, %v7244_v4 }
 0x4f4   : > { %v9140_v19 = vpop.f32.mrb[160].mxu0  ;;  %v6457_v25 = vpop.f32.mrb[180].mxu1  ;;  %v7057_v42 = vsel %vm708_vm7, %v7052_v18, %v7056_v6 }
 0x4f5   : > { %v12353_v59 = vpop.f32.mrb[161].mxu0  ;;  %v6458_v62 = vpop.f32.mrb[181].mxu1  ;;  %v7243_v25 = vsel %vm1034_vm8, %v7240_v2, %v7242_v24 }
 0x4f6   : > { %v9141_v60 = vpop.f32.mrb[162].mxu0  ;;  %v6459_v35 = vpop.f32.mrb[182].mxu1 }
 0x4f7   : > { %v12358_v29 = vpop.f32.mrb[163].mxu0  ;;  %v6460_v26 = vpop.f32.mrb[183].mxu1 }
 0x4f8   : > { %v12392_v26 = vld [vmem:[#allocation2 + $0xe0] sm:$0xff] }
 0x4f9   : > { %7660 = vmatmul.mubr.bf16.gmra.mrb[12].mxu0 %v12309_v37  ;;  %9219 = vmatmul.mubr.bf16.gmra.mrb[32].mxu1 %v7239_v8  ;;  %v12373_v37 = vld [vmem:[#allocation2 + $0xd8] sm:$0xff] }
 0x4fa   : > { %7665 = vmatprep.mubr.bf16.mxu0 %v7049_v48  ;;  %9222 = vmatprep.mubr.bf16.mxu1 %v7241_v39  ;;  %v7062_v20 = vshll.u32 %v12373_v37, 16  ;;  %v7246_v39 = vrot.slane %v12356_v44, 1  ;;  %v7248_v24 = vrot.slane %v12373_v37, 1 }
 0x4fc   : > { %v9144_v1 = vpop.f32.mrb[164].mxu0  ;;  %v6463_v13 = vpop.f32.mrb[184].mxu1 }
 0x4fd   : > { %v12366_v50 = vpop.f32.mrb[165].mxu0  ;;  %v6464_v5 = vadd.f32 %v6463_v13, %v12843_v52  ;;  %v6465_v17 = vpop.f32.mrb[185].mxu1  ;;  %v7064_v1 = vrot.slane %v7062_v20, 1  ;;  %v7247_v13 = vsel %vm1034_vm8, %v7244_v4, %v7246_v39  ;;  %v12845_v4 = vld [vmem:[#allocation16_spill] sm:$0xff] }
 0x4fe   : > { %v9145_v56 = vpop.f32.mrb[166].mxu0  ;;  %v6466_v11 = vpop.f32.mrb[186].mxu1  ;;  %v7249_v17 = vsel %vm1034_vm8, %v7246_v39, %v7248_v24 }
 0x4ff   : > { %v12370_v7 = vpop.f32.mrb[167].mxu0  ;;  %v12380_v19 = vadd.f32 %v12332_v32, %v6464_v5  ;;  %v6467_v15 = vadd.f32 %v6466_v11, %v12844_v30  ;;  %v6468_v60 = vpop.f32.mrb[187].mxu1  ;;  %v7060_v32 = vor.u32 %v7058_v47, %v7056_v6  ;;  %v7070_v56 = vshll.u32 %v12392_v26, 16 }
 0x500   : > { %v12408_v60 = vld [vmem:[#allocation2 + $0xe8] sm:$0xff]  ;;  %v7250_v47 = vrot.slane %v12392_v26, 1 }
 0x501   : > { %7666 = vmatmul.mubr.bf16.gmra.mrb[16].mxu0 %v12324_v12  ;;  %v12387_v12 = vadd.f32 %v12336_v10, %v6467_v15  ;;  %9223 = vmatmul.mubr.bf16.gmra.mrb[36].mxu1 %v7243_v25  ;;  %v7065_v10 = vsel %vm708_vm7, %v7060_v32, %v7064_v1 }
 0x502   : > { %7673 = vmatprep.mubr.bf16.mxu0 %v7057_v42  ;;  %9226 = vmatprep.mubr.bf16.mxu1 %v7245_v55  ;;  %v7066_v42 = vshrl.u32 %v12373_v37, 16 }
 0x504   : > { %v9148_v62 = vpop.f32.mrb[168].mxu0  ;;  %v6471_v2 = vpop.f32.mrb[188].mxu1  ;;  %v7068_v15 = vor.u32 %v7066_v42, %v7064_v1  ;;  %v12846_v1 = vld [vmem:[#allocation17_spill] sm:$0xff] }
 0x505   : > { %v12389_v48 = vpop.f32.mrb[169].mxu0  ;;  %v6472_v23 = vpop.f32.mrb[189].mxu1 }
 0x506   : > { %v9149_v35 = vpop.f32.mrb[170].mxu0  ;;  %v6473_v18 = vpop.f32.mrb[190].mxu1 }
 0x507   : > { %v12394_v8 = vpop.f32.mrb[171].mxu0  ;;  %v6474_v6 = vpop.f32.mrb[191].mxu1  ;;  %v7252_v35 = vrot.slane %v12408_v60, 1  ;;  %v7251_v18 = vsel %vm1034_vm8, %v7248_v24, %v7250_v47 }
 0x509   : > { %7674 = vmatmul.mubr.bf16.gmra.mrb[20].mxu0 %v12339_v33  ;;  %9227 = vmatmul.mubr.bf16.gmra.mrb[40].mxu1 %v7247_v13  ;;  %v7072_v33 = vrot.slane %v7070_v56, 1  ;;  %v7078_v56 = vshll.u32 %v12408_v60, 16 }
 0x50a   : > { %7679 = vmatprep.mubr.bf16.mxu0 %v7065_v10  ;;  %9230 = vmatprep.mubr.bf16.mxu1 %v7249_v17  ;;  %v7074_v10 = vshrl.u32 %v12392_v26, 16 }
 0x50b   : > { %v7073_v55 = vsel %vm708_vm7, %v7068_v15, %v7072_v33  ;;  %v7080_v15 = vrot.slane %v7078_v56, 1 }
 0x50c   : > { %v9152_v52 = vpop.f32.mrb[172].mxu0  ;;  %v6477_v20 = vpop.f32.mrb[192].mxu1  ;;  %v7076_v17 = vor.u32 %v7074_v10, %v7072_v33 }
 0x50d   : > { %v12402_v5 = vpop.f32.mrb[173].mxu0  ;;  %v6478_v25 = vadd.f32 %v6477_v20, %v12845_v4  ;;  %v6479_v62 = vpop.f32.mrb[193].mxu1  ;;  %v12427_v52 = vld [vmem:[#allocation2 + $0xf0] sm:$0xff]  ;;  %v12433_v4 = vld [vmem:[#allocation2 + $0xf8] sm:$0xff] }
 0x50e   : > { %v9153_v11 = vpop.f32.mrb[174].mxu0  ;;  %v6480_v32 = vpop.f32.mrb[194].mxu1  ;;  %v7254_v20 = vrot.slane %v12427_v52, 1  ;;  %v7086_v62 = vshll.u32 %v12427_v52, 16 }
 0x50f   : > { %v12406_v30 = vpop.f32.mrb[175].mxu0  ;;  %v12416_v39 = vadd.f32 %v12353_v59, %v6478_v25  ;;  %v6481_v2 = vadd.f32 %v6480_v32, %v12846_v1  ;;  %v6482_v23 = vpop.f32.mrb[195].mxu1  ;;  %v7253_v59 = vsel %vm1034_vm8, %v7250_v47, %v7252_v35  ;;  %v7081_v25 = vsel %vm708_vm7, %v7076_v17, %v7080_v15 }
 0x510   : > { %v7256_v47 = vrot.slane %v12433_v4, 1  ;;  %v7255_v32 = vsel %vm1034_vm8, %v7252_v35, %v7254_v20  ;;  %v12442_v23 = vld [vmem:[#allocation2 + $0x100] sm:$0xff]  ;;  %v7088_v56 = vrot.slane %v7086_v62, 1  ;;  %v12449_v35 = vld [vmem:[#allocation2 + $0x108] sm:$0xff]  ;;  %v7090_v62 = vshrl.u32 %v12427_v52, 16 }
 0x511   : > { %7680 = vmatmul.mubr.bf16.gmra.mrb[24].mxu0 %v12356_v44  ;;  %v12423_v44 = vadd.f32 %v12358_v29, %v6481_v2  ;;  %9231 = vmatmul.mubr.bf16.gmra.mrb[44].mxu1 %v7251_v18  ;;  %v7258_v17 = vrot.slane %v12442_v23, 1 }
 0x512   : > { %7687 = vmatprep.mubr.bf16.mxu0 %v7073_v55  ;;  %9234 = vmatprep.mubr.bf16.mxu1 %v7253_v59  ;;  %v7257_v10 = vsel %vm1034_vm8, %v7254_v20, %v7256_v47 }
 0x513   : > { %12847 = vst [vmem:[#allocation10_spill] sm:$0xff] %v12423_v44 }
 0x514   : > { %v9156_v6 = vpop.f32.mrb[176].mxu0  ;;  %v6485_v24 = vpop.f32.mrb[196].mxu1 }
 0x515   : > { %v12425_v13 = vpop.f32.mrb[177].mxu0  ;;  %v6486_v29 = vpop.f32.mrb[197].mxu1  ;;  %v12848_v24 = vld [vmem:[#allocation18_spill] sm:$0xff] }
 0x516   : > { %v9157_v42 = vpop.f32.mrb[178].mxu0  ;;  %v6487_v55 = vpop.f32.mrb[198].mxu1 }
 0x517   : > { %v12430_v11 = vpop.f32.mrb[179].mxu0  ;;  %v6488_v33 = vpop.f32.mrb[199].mxu1 }
 0x519   : > { %7688 = vmatmul.mubr.bf16.gmra.mrb[28].mxu0 %v12373_v37  ;;  %9235 = vmatmul.mubr.bf16.gmra.mrb[48].mxu1 %v7255_v32  ;;  %v7082_v37 = vshrl.u32 %v12408_v60, 16 }
 0x51a   : > { %7693 = vmatprep.mubr.bf16.mxu0 %v7081_v25  ;;  %9238 = vmatprep.mubr.bf16.mxu1 %v7257_v10  ;;  %v7260_v10 = vrot.slane %v12449_v35, 1 }
 0x51b   : > { %v7084_v59 = vor.u32 %v7082_v37, %v7080_v15  ;;  %v12850_v15 = vld [vmem:[#allocation19_spill] sm:$0xff]  ;;  %v7094_v37 = vshll.u32 %v12433_v4, 16 }
 0x51c   : > { %v9160_v1 = vpop.f32.mrb[180].mxu0  ;;  %v6491_v42 = vpop.f32.mrb[200].mxu1 }
 0x51d   : > { %v12440_v2 = vpop.f32.mrb[181].mxu0  ;;  %v6492_v29 = vadd.f32 %v6491_v42, %v12848_v24  ;;  %v6493_v25 = vpop.f32.mrb[201].mxu1  ;;  %v7089_v20 = vsel %vm708_vm7, %v7084_v59, %v7088_v56 }
 0x51e   : > { %v9161_v18 = vpop.f32.mrb[182].mxu0  ;;  %v6494_v55 = vpop.f32.mrb[202].mxu1  ;;  %v7092_v25 = vor.u32 %v7090_v62, %v7088_v56 }
 0x51f   : > { %v12446_v6 = vpop.f32.mrb[183].mxu0  ;;  %v12456_v33 = vadd.f32 %v12366_v50, %v6492_v29  ;;  %v6495_v32 = vadd.f32 %v6494_v55, %v12850_v15  ;;  %v6496_v1 = vpop.f32.mrb[203].mxu1  ;;  %v7259_v18 = vsel %vm1034_vm8, %v7256_v47, %v7258_v17  ;;  %v12469_v50 = vld [vmem:[#allocation2 + $0x110] sm:$0xff]  ;;  %v7261_v29 = vsel %vm1034_vm8, %v7258_v17, %v7260_v10  ;;  %v12479_v17 = vld [vmem:[#allocation2 + $0x120] sm:$0xff] }
 0x520   : > { %v7096_v15 = vrot.slane %v7094_v37, 1  ;;  %v7262_v1 = vrot.slane %v12469_v50, 1 }
 0x521   : > { %7694 = vmatmul.mubr.bf16.gmra.mrb[32].mxu0 %v12392_v26  ;;  %12849 = vst [vmem:[#allocation8_spill] sm:$0xff] %v12456_v33  ;;  %v12462_v26 = vld [vmem:[#allocation2 + $0x118] sm:$0xff]  ;;  %v12465_v59 = vadd.f32 %v12370_v7, %v6495_v32  ;;  %9239 = vmatmul.mubr.bf16.gmra.mrb[52].mxu1 %v7259_v18  ;;  %v7102_v18 = vshll.u32 %v12442_v23, 16 }
 0x522   : > { %7701 = vmatprep.mubr.bf16.mxu0 %v7089_v20  ;;  %9242 = vmatprep.mubr.bf16.mxu1 %v7261_v29  ;;  %v7264_v47 = vrot.slane %v12462_v26, 1  ;;  %v7097_v32 = vsel %vm708_vm7, %v7092_v25, %v7096_v15  ;;  %v7263_v37 = vsel %vm1034_vm8, %v7260_v10, %v7262_v1  ;;  %v7266_v25 = vrot.slane %v12479_v17, 1 }
 0x523   : > { %12851 = vst [vmem:[#allocation9_spill] sm:$0xff] %v12465_v59 }
 0x524   : > { %v9164_v42 = vpop.f32.mrb[184].mxu0  ;;  %v7265_v62 = vsel %vm1034_vm8, %v7262_v1, %v7264_v47 }
 0x525   : > { %v12467_v24 = vpop.f32.mrb[185].mxu0  ;;  %v6499_v42 = vpop.f32.mrb[204].mxu1 }
 0x526   : > { %v9165_v20 = vpop.f32.mrb[186].mxu0  ;;  %v6500_v7 = vpop.f32.mrb[205].mxu1  ;;  %v7098_v42 = vshrl.u32 %v12433_v4, 16 }
 0x527   : > { %v12472_v55 = vpop.f32.mrb[187].mxu0  ;;  %v6501_v59 = vpop.f32.mrb[206].mxu1 }
 0x528   : > { %v6502_v56 = vpop.f32.mrb[207].mxu1 }
 0x529   : > { %7702 = vmatmul.mubr.bf16.gmra.mrb[36].mxu0 %v12408_v60  ;;  %9243 = vmatmul.mubr.bf16.gmra.mrb[56].mxu1 %v7263_v37  ;;  %v7104_v60 = vrot.slane %v7102_v18, 1  ;;  %v7267_v37 = vsel %vm1034_vm8, %v7264_v47, %v7266_v25 }
 0x52a   : > { %7707 = vmatprep.mubr.bf16.mxu0 %v7097_v32  ;;  %9246 = vmatprep.mubr.bf16.mxu1 %v7265_v62  ;;  %v7100_v32 = vor.u32 %v7098_v42, %v7096_v15  ;;  %v7106_v15 = vshrl.u32 %v12442_v23, 16  ;;  %v7110_v42 = vshll.u32 %v12449_v35, 16 }
 0x52c   : > { %v9168_v29 = vpop.f32.mrb[188].mxu0  ;;  %v6505_v56 = vpop.f32.mrb[208].mxu1  ;;  %v7105_v10 = vsel %vm708_vm7, %v7100_v32, %v7104_v60 }
 0x52d   : > { %v12483_v20 = vpop.f32.mrb[189].mxu0  ;;  %v6506_v33 = vadd.f32 %v6505_v56, %v12092_v0  ;;  %v6507_v44 = vpop.f32.mrb[209].mxu1  ;;  %v7118_v56 = vshll.u32 %v12469_v50, 16 }
 0x52e   : > { %v9169_v7 = vpop.f32.mrb[190].mxu0  ;;  %v6508_v1 = vpop.f32.mrb[210].mxu1 }
 0x52f   : > { %v12487_v59 = vpop.f32.mrb[191].mxu0  ;;  %v12494_v18 = vadd.f32 %v12389_v48, %v6506_v33  ;;  %v6509_v62 = vadd.f32 %v6508_v1, %v12097_v57  ;;  %v6510_v29 = vpop.f32.mrb[211].mxu1  ;;  %v7108_v7 = vor.u32 %v7106_v15, %v7104_v60  ;;  %v7112_v48 = vrot.slane %v7110_v42, 1 }
 0x530   : > { %v7120_v29 = vrot.slane %v7118_v56, 1  ;;  %v7122_v42 = vshrl.u32 %v12469_v50, 16 }
 0x531   : > { %7708 = vmatmul.mubr.bf16.gmra.mrb[40].mxu0 %v12427_v52  ;;  %v12502_v44 = vadd.f32 %v12394_v8, %v6509_v62  ;;  %9247 = vmatmul.mubr.bf16.gmra.mrb[60].mxu1 %v7267_v37  ;;  %v7113_v57 = vsel %vm708_vm7, %v7108_v7, %v7112_v48  ;;  %v7114_v8 = vshrl.u32 %v12449_v35, 16 }
 0x532   : > { %7715 = vmatprep.mubr.bf16.mxu0 %v7105_v10 }
 0x533   : > { %v7116_v37 = vor.u32 %v7114_v8, %v7112_v48 }
 0x534   : > { %v12499_v0 = vpop.f32.mrb[192].mxu0  ;;  %v6513_v33 = vpop.f32.mrb[212].mxu1 }
 0x535   : > { %v7529_v52 = vpop.f32.mrb[193].mxu0  ;;  %v6514_v25 = vpop.f32.mrb[213].mxu1 }
 0x536   : > { %v12504_v32 = vpop.f32.mrb[194].mxu0  ;;  %v6515_v10 = vpop.f32.mrb[214].mxu1  ;;  %v7121_v25 = vsel %vm708_vm7, %v7116_v37, %v7120_v29 }
 0x537   : > { %v7532_v47 = vpop.f32.mrb[195].mxu0  ;;  %v6516_v1 = vpop.f32.mrb[215].mxu1 }
 0x538   : > { %v7126_v47 = vshll.u32 %v12462_v26, 16  ;;  %v7124_v1 = vor.u32 %v7122_v42, %v7120_v29 }
 0x539   : > { %7716 = vmatmul.mubr.bf16.gmra.mrb[44].mxu0 %v12433_v4 }
 0x53a   : > { %7721 = vmatprep.mubr.bf16.mxu0 %v7113_v57  ;;  %v7128_v8 = vrot.slane %v7126_v47, 1 }
 0x53c   : > { %v7535_v62 = vpop.f32.mrb[196].mxu0  ;;  %v6519_v4 = vpop.f32.mrb[216].mxu1  ;;  %v7129_v37 = vsel %vm708_vm7, %v7124_v1, %v7128_v8 }
 0x53d   : > { %v7536_v60 = vpop.f32.mrb[197].mxu0  ;;  %v6520_v7 = vadd.f32 %v6519_v4, %v12108_v27  ;;  %v6521_v33 = vpop.f32.mrb[217].mxu1 }
 0x53e   : > { %v7537_v15 = vpop.f32.mrb[198].mxu0  ;;  %v6522_v57 = vpop.f32.mrb[218].mxu1 }
 0x53f   : > { %v7538_v52 = vpop.f32.mrb[199].mxu0  ;;  %v12516_v10 = vadd.f32 %v12402_v5, %v6520_v7  ;;  %v6523_v48 = vadd.f32 %v6522_v57, %v12113_v41  ;;  %v6524_v56 = vpop.f32.mrb[219].mxu1  ;;  %v7134_v5 = vshll.u32 %v12479_v17, 16 }
 0x540   : > { %v7130_v52 = vshrl.u32 %v12462_v26, 16 }
 0x541   : > { %7722 = vmatmul.mubr.bf16.gmra.mrb[48].mxu0 %v12442_v23  ;;  %v12522_v60 = vadd.f32 %v12406_v30, %v6523_v48  ;;  %v7136_v30 = vrot.slane %v7134_v5, 1 }
 0x542   : > { %7729 = vmatprep.mubr.bf16.mxu0 %v7121_v25  ;;  %v7132_v47 = vor.u32 %v7130_v52, %v7128_v8 }
 0x544   : > { %v12519_v62 = vpop.f32.mrb[200].mxu0  ;;  %v6527_v4 = vpop.f32.mrb[220].mxu1  ;;  %v7137_v48 = vsel %vm708_vm7, %v7132_v47, %v7136_v30 }
 0x545   : > { %v7543_v27 = vpop.f32.mrb[201].mxu0  ;;  %v6528_v41 = vpop.f32.mrb[221].mxu1 }
 0x546   : > { %v12524_v15 = vpop.f32.mrb[202].mxu0  ;;  %v6529_v29 = vpop.f32.mrb[222].mxu1 }
 0x547   : > { %v7546_v23 = vpop.f32.mrb[203].mxu0  ;;  %v6530_v42 = vpop.f32.mrb[223].mxu1 }
 0x549   : > { %7730 = vmatmul.mubr.bf16.gmra.mrb[52].mxu0 %v12449_v35 }
 0x54a   : > { %7735 = vmatprep.mubr.bf16.mxu0 %v7129_v37 }
 0x54c   : > { %v7549_v7 = vpop.f32.mrb[204].mxu0  ;;  %v6533_v56 = vpop.f32.mrb[224].mxu1 }
 0x54d   : > { %v7550_v33 = vpop.f32.mrb[205].mxu0  ;;  %v6534_v1 = vadd.f32 %v6533_v56, %v12124_v51  ;;  %v6535_v27 = vpop.f32.mrb[225].mxu1 }
 0x54e   : > { %v7551_v25 = vpop.f32.mrb[206].mxu0  ;;  %v6536_v17 = vpop.f32.mrb[226].mxu1 }
 0x54f   : > { %v7552_v57 = vpop.f32.mrb[207].mxu0  ;;  %v12534_v35 = vadd.f32 %v12425_v13, %v6534_v1  ;;  %v6537_v8 = vadd.f32 %v6536_v17, %v12129_v36  ;;  %v6538_v23 = vpop.f32.mrb[227].mxu1 }
 0x551   : > { %7736 = vmatmul.mubr.bf16.gmra.mrb[56].mxu0 %v12469_v50  ;;  %v12540_v52 = vadd.f32 %v12430_v11, %v6537_v8 }
 0x552   : > { %7743 = vmatprep.mubr.bf16.mxu0 %v7137_v48 }
 0x554   : > { %v12537_v37 = vpop.f32.mrb[208].mxu0  ;;  %v6541_v41 = vpop.f32.mrb[228].mxu1 }
 0x555   : > { %v7557_v5 = vpop.f32.mrb[209].mxu0  ;;  %v6542_v29 = vpop.f32.mrb[229].mxu1 }
 0x556   : > { %v12542_v4 = vpop.f32.mrb[210].mxu0  ;;  %v6543_v50 = vpop.f32.mrb[230].mxu1 }
 0x557   : > { %v7560_v51 = vpop.f32.mrb[211].mxu0  ;;  %v6544_v42 = vpop.f32.mrb[231].mxu1 }
 0x559   : > { %7744 = vmatmul.mubr.bf16.gmra.mrb[60].mxu0 %v12462_v26 }
 0x55c   : > { %v7563_v13 = vpop.f32.mrb[212].mxu0  ;;  %v6547_v7 = vpop.f32.mrb[232].mxu1 }
 0x55d   : > { %v7564_v47 = vpop.f32.mrb[213].mxu0  ;;  %v6548_v33 = vadd.f32 %v6547_v7, %v12140_v9  ;;  %v6549_v25 = vpop.f32.mrb[233].mxu1 }
 0x55e   : > { %v7565_v30 = vpop.f32.mrb[214].mxu0  ;;  %v6550_v11 = vpop.f32.mrb[234].mxu1 }
 0x55f   : > { %v7566_v36 = vpop.f32.mrb[215].mxu0  ;;  %v12547_v57 = vadd.f32 %v12440_v2, %v6548_v33  ;;  %v6551_v48 = vadd.f32 %v6550_v11, %v12145_v31  ;;  %v6552_v56 = vpop.f32.mrb[235].mxu1 }
 0x561   : > { %v12553_v26 = vadd.f32 %v12446_v6, %v6551_v48 }
 0x564   : > { %v12550_v1 = vpop.f32.mrb[216].mxu0  ;;  %v6555_v23 = vpop.f32.mrb[236].mxu1 }
 0x565   : > { %v7571_v27 = vpop.f32.mrb[217].mxu0  ;;  %v6556_v5 = vpop.f32.mrb[237].mxu1 }
 0x566   : > { %v12555_v17 = vpop.f32.mrb[218].mxu0  ;;  %v6557_v9 = vpop.f32.mrb[238].mxu1 }
 0x567   : > { %v7574_v8 = vpop.f32.mrb[219].mxu0  ;;  %v6558_v51 = vpop.f32.mrb[239].mxu1 }
 0x56c   : > { %v7577_v41 = vpop.f32.mrb[220].mxu0  ;;  %v6561_v42 = vpop.f32.mrb[240].mxu1 }
 0x56d   : > { %v7578_v29 = vpop.f32.mrb[221].mxu0  ;;  %v6562_v31 = vadd.f32 %v6561_v42, %v12166_v40  ;;  %v6563_v13 = vpop.f32.mrb[241].mxu1 }
 0x56e   : > { %v7579_v2 = vpop.f32.mrb[222].mxu0  ;;  %v6564_v47 = vpop.f32.mrb[242].mxu1 }
 0x56f   : > { %v7580_v50 = vpop.f32.mrb[223].mxu0  ;;  %v12559_v6 = vadd.f32 %v12467_v24, %v6562_v31  ;;  %v6565_v30 = vadd.f32 %v6564_v47, %v12173_v28  ;;  %v6566_v36 = vpop.f32.mrb[243].mxu1 }
 0x571   : > { %v12565_v33 = vadd.f32 %v12472_v55, %v6565_v30 }
 0x574   : > { %v12562_v7 = vpop.f32.mrb[224].mxu0  ;;  %v6569_v56 = vpop.f32.mrb[244].mxu1 }
 0x575   : > { %v7585_v25 = vpop.f32.mrb[225].mxu0  ;;  %v6570_v27 = vpop.f32.mrb[245].mxu1 }
 0x576   : > { %v12567_v11 = vpop.f32.mrb[226].mxu0  ;;  %v6571_v40 = vpop.f32.mrb[246].mxu1 }
 0x577   : > { %v7588_v48 = vpop.f32.mrb[227].mxu0  ;;  %v6572_v8 = vpop.f32.mrb[247].mxu1 }
 0x57c   : > { %v7591_v23 = vpop.f32.mrb[228].mxu0  ;;  %v6575_v51 = vpop.f32.mrb[248].mxu1 }
 0x57d   : > { %v7592_v5 = vpop.f32.mrb[229].mxu0  ;;  %v6576_v28 = vadd.f32 %v6575_v51, %v12197_v54  ;;  %v6577_v41 = vpop.f32.mrb[249].mxu1 }
 0x57e   : > { %v7593_v24 = vpop.f32.mrb[230].mxu0  ;;  %v6578_v29 = vpop.f32.mrb[250].mxu1  ;;  %v12585_v5 = vld [vmem:[%s12790_s4] ss:$0 sm:$0xff] }
 0x57f   : > { %v7594_v9 = vpop.f32.mrb[231].mxu0  ;;  %v12571_v55 = vadd.f32 %v12483_v20, %v6576_v28  ;;  %v6579_v2 = vadd.f32 %v6578_v29, %v12205_v34  ;;  %v6580_v50 = vpop.f32.mrb[251].mxu1  ;;  %v8078_v41 = vld [vmem:[%s9618_s9] sm:$0xff] }
 0x581   : > { %v12577_v31 = vadd.f32 %v12487_v59, %v6579_v2 }
 0x584   : > { %v12574_v42 = vpop.f32.mrb[232].mxu0  ;;  %v6583_v36 = vpop.f32.mrb[252].mxu1 }
 0x585   : > { %v7599_v13 = vpop.f32.mrb[233].mxu0  ;;  %v6584_v25 = vpop.f32.mrb[253].mxu1 }
 0x586   : > { %v12579_v47 = vpop.f32.mrb[234].mxu0  ;;  %v6585_v54 = vpop.f32.mrb[254].mxu1  ;;  %v8079_v13 = vld [vmem:[%s9618_s9 + $0x8] sm:$0xff] }
 0x587   : > { %v7602_v30 = vpop.f32.mrb[235].mxu0  ;;  %v6586_v48 = vpop.f32.mrb[255].mxu1 }
 0x58c   : > { %v7605_v56 = vpop.f32.mrb[236].mxu0  ;;  %v9188_v40 = vpop.f32.mrb[0].mxu1 }
 0x58d   : > { %v7606_v20 = vpop.f32.mrb[237].mxu0  ;;  %v7784_v8 = vpop.f32.mrb[1].mxu1 }
 0x58e   : > { %v7607_v27 = vpop.f32.mrb[238].mxu0  ;;  %v7785_v23 = vadd.f32 %v7784_v8, %v12499_v0  ;;  %v9189_v59 = vpop.f32.mrb[2].mxu1 }
 0x58f   : > { %v7608_v34 = vpop.f32.mrb[239].mxu0  ;;  %v7787_v24 = vpop.f32.mrb[3].mxu1 }
 0x590   : > { %v8007_v9 = vadd.f32 %v7785_v23, %v12229_v63  ;;  %v7788_v51 = vadd.f32 %v7787_v24, %v12504_v32  ;;  %v8080_v23 = vld [vmem:[%s9618_s9 + $0x10] sm:$0xff] }
 0x592   : > { %v8046_v2 = vadd.f32 %v12585_v5, %v8007_v9  ;;  %v8008_v0 = vadd.f32 %v7788_v51, %v12234_v38  ;;  %v8081_v51 = vld [vmem:[%s9618_s9 + $0x18] sm:$0xff] }
 0x594   : > { %v12589_v28 = vpop.f32.mrb[240].mxu0  ;;  %v8110_v36 = vadd.f32 %v8078_v41, %v8046_v2  ;;  %v8047_v25 = vadd.f32 %v12585_v5, %v8008_v0  ;;  %v9192_v54 = vpop.f32.mrb[4].mxu1 }
 0x595   : > { %v7613_v29 = vpop.f32.mrb[241].mxu0  ;;  %v7798_v63 = vpop.f32.mrb[5].mxu1 }
 0x596   : > { %v12594_v50 = vpop.f32.mrb[242].mxu0  ;;  %v8142_v32 = vmax.f32 %v8110_v36, 0.0  ;;  %v8111_v38 = vadd.f32 %v8079_v13, %v8047_v25  ;;  %v7799_v48 = vadd.f32 %v7798_v63, %v12519_v62  ;;  %v9193_v56 = vpop.f32.mrb[6].mxu1 }
 0x597   : > { %v7616_v30 = vpop.f32.mrb[243].mxu0  ;;  %v7801_v20 = vpop.f32.mrb[7].mxu1 }
 0x598   : > { %8174 = vst.msk [vmem:[%s12603_s20] sm:$0xff] %vm416_vm6, %v8142_v32  ;;  %v8143_v27 = vmax.f32 %v8111_v38, 0.0  ;;  %v8009_v34 = vadd.f32 %v7799_v48, %v12245_v3  ;;  %v7802_v40 = vadd.f32 %v7801_v20, %v12524_v15  ;;  %v8082_v38 = vld [vmem:[%s9618_s9 + $0x20] sm:$0xff] }
 0x59a   : > { %8175 = vst.msk [vmem:[%s12603_s20 + $0x8] sm:$0xff] %vm416_vm6, %v8143_v27  ;;  %v8048_v24 = vadd.f32 %v12585_v5, %v8009_v34  ;;  %v8010_v9 = vadd.f32 %v7802_v40, %v12248_v53  ;;  %v8083_v27 = vld [vmem:[%s9618_s9 + $0x28] sm:$0xff] }
 0x59c   : > { %v7619_v8 = vpop.f32.mrb[244].mxu0  ;;  %v8112_v29 = vadd.f32 %v8080_v23, %v8048_v24  ;;  %v8049_v3 = vadd.f32 %v12585_v5, %v8010_v9  ;;  %v9196_v2 = vpop.f32.mrb[8].mxu1 }
 0x59d   : > { %v7620_v59 = vpop.f32.mrb[245].mxu0  ;;  %v7812_v15 = vpop.f32.mrb[9].mxu1 }
 0x59e   : > { %v7621_v62 = vpop.f32.mrb[246].mxu0  ;;  %v8144_v0 = vmax.f32 %v8112_v29, 0.0  ;;  %v8113_v13 = vadd.f32 %v8081_v51, %v8049_v3  ;;  %v7813_v30 = vadd.f32 %v7812_v15, %v12537_v37  ;;  %v9197_v36 = vpop.f32.mrb[10].mxu1  ;;  %v8084_v3 = vld [vmem:[%s9618_s9 + $0x30] sm:$0xff] }
 0x59f   : > { %v7622_v41 = vpop.f32.mrb[247].mxu0  ;;  %v7815_v25 = vpop.f32.mrb[11].mxu1 }
 0x5a0   : > { %8176 = vst.msk [vmem:[%s12603_s20 + $0x10] sm:$0xff] %vm416_vm6, %v8144_v0  ;;  %v8145_v53 = vmax.f32 %v8113_v13, 0.0  ;;  %v8011_v54 = vadd.f32 %v7813_v30, %v12263_v49  ;;  %v7816_v63 = vadd.f32 %v7815_v25, %v12542_v4  ;;  %v8085_v13 = vld [vmem:[%s9618_s9 + $0x38] sm:$0xff] }
 0x5a2   : > { %8177 = vst.msk [vmem:[%s12603_s20 + $0x18] sm:$0xff] %vm416_vm6, %v8145_v53  ;;  %v8050_v56 = vadd.f32 %v12585_v5, %v8011_v54  ;;  %v8012_v37 = vadd.f32 %v7816_v63, %v12268_v43 }
 0x5a4   : > { %v12622_v32 = vpop.f32.mrb[248].mxu0  ;;  %v8114_v40 = vadd.f32 %v8082_v38, %v8050_v56  ;;  %v8051_v49 = vadd.f32 %v12585_v5, %v8012_v37  ;;  %v9200_v4 = vpop.f32.mrb[12].mxu1 }
 0x5a5   : > { %v7627_v48 = vpop.f32.mrb[249].mxu0  ;;  %v7826_v8 = vpop.f32.mrb[13].mxu1 }
 0x5a6   : > { %v12629_v20 = vpop.f32.mrb[250].mxu0  ;;  %v8146_v23 = vmax.f32 %v8114_v40, 0.0  ;;  %v8115_v59 = vadd.f32 %v8083_v27, %v8051_v49  ;;  %v7827_v24 = vadd.f32 %v7826_v8, %v12550_v1  ;;  %v9201_v9 = vpop.f32.mrb[14].mxu1  ;;  %v8087_v8 = vld [vmem:[%s9618_s9 + $0x48] sm:$0xff] }
 0x5a7   : > { %v7630_v34 = vpop.f32.mrb[251].mxu0  ;;  %v7829_v62 = vpop.f32.mrb[15].mxu1 }
 0x5a8   : > { %8178 = vst.msk [vmem:[%s12603_s20 + $0x20] sm:$0xff] %vm416_vm6, %v8146_v23  ;;  %v8147_v43 = vmax.f32 %v8115_v59, 0.0  ;;  %v8013_v51 = vadd.f32 %v7827_v24, %v12278_v16  ;;  %v7830_v41 = vadd.f32 %v7829_v62, %v12555_v17  ;;  %v8086_v34 = vld [vmem:[%s9618_s9 + $0x40] sm:$0xff] }
 0x5aa   : > { %8179 = vst.msk [vmem:[%s12603_s20 + $0x28] sm:$0xff] %vm416_vm6, %v8147_v43  ;;  %v8052_v15 = vadd.f32 %v12585_v5, %v8013_v51  ;;  %v8014_v0 = vadd.f32 %v7830_v41, %v12280_v45 }
 0x5ac   : > { %v7633_v29 = vpop.f32.mrb[252].mxu0  ;;  %v8116_v36 = vadd.f32 %v8084_v3, %v8052_v15  ;;  %v8053_v16 = vadd.f32 %v12585_v5, %v8014_v0  ;;  %v9204_v25 = vpop.f32.mrb[16].mxu1  ;;  %v8088_v15 = vld [vmem:[%s9618_s9 + $0x50] sm:$0xff] }
 0x5ad   : > { %v7634_v2 = vpop.f32.mrb[253].mxu0  ;;  %v7840_v17 = vpop.f32.mrb[17].mxu1 }
 0x5ae   : > { %v7635_v1 = vpop.f32.mrb[254].mxu0  ;;  %v8148_v53 = vmax.f32 %v8116_v36, 0.0  ;;  %v8117_v54 = vadd.f32 %v8085_v13, %v8053_v16  ;;  %v7841_v63 = vadd.f32 %v7840_v17, %v12562_v7  ;;  %v9205_v38 = vpop.f32.mrb[18].mxu1 }
 0x5af   : > { %v7636_v30 = vpop.f32.mrb[255].mxu0  ;;  %v7843_v48 = vpop.f32.mrb[19].mxu1 }
 0x5b0   : > { %8180 = vst.msk [vmem:[%s12603_s20 + $0x30] sm:$0xff] %vm416_vm6, %v8148_v53  ;;  %v8149_v45 = vmax.f32 %v8117_v54, 0.0  ;;  %v8015_v56 = vadd.f32 %v7841_v63, %v12294_v21  ;;  %v7844_v37 = vadd.f32 %v7843_v48, %v12567_v11  ;;  %v8089_v30 = vld [vmem:[%s9618_s9 + $0x58] sm:$0xff] }
 0x5b2   : > { %8181 = vst.msk [vmem:[%s12603_s20 + $0x38] sm:$0xff] %vm416_vm6, %v8149_v45  ;;  %v8054_v49 = vadd.f32 %v12585_v5, %v8015_v56  ;;  %v8016_v7 = vadd.f32 %v7844_v37, %v12299_v14  ;;  %v8090_v37 = vld [vmem:[%s9618_s9 + $0x60] sm:$0xff] }
 0x5b4   : > { %v12650_v27 = vpop.f32.mrb[0].mxu0  ;;  %v8118_v59 = vadd.f32 %v8086_v34, %v8054_v49  ;;  %v8055_v21 = vadd.f32 %v12585_v5, %v8016_v7  ;;  %v9208_v11 = vpop.f32.mrb[20].mxu1  ;;  %v8091_v7 = vld [vmem:[%s9618_s9 + $0x68] sm:$0xff] }
 0x5b5   : > { %v7641_v40 = vpop.f32.mrb[1].mxu0  ;;  %v7854_v24 = vpop.f32.mrb[21].mxu1 }
 0x5b6   : > { %v12657_v4 = vpop.f32.mrb[2].mxu0  ;;  %v8150_v9 = vmax.f32 %v8118_v59, 0.0  ;;  %v8119_v62 = vadd.f32 %v8087_v8, %v8055_v21  ;;  %v7855_v43 = vadd.f32 %v7854_v24, %v12574_v42  ;;  %v9209_v51 = vpop.f32.mrb[22].mxu1 }
 0x5b7   : > { %v7644_v23 = vpop.f32.mrb[3].mxu0  ;;  %v7857_v41 = vpop.f32.mrb[23].mxu1 }
 0x5b8   : > { %8182 = vst.msk [vmem:[%s12603_s20 + $0x40] sm:$0xff] %vm416_vm6, %v8150_v9  ;;  %v8151_v14 = vmax.f32 %v8119_v62, 0.0  ;;  %v8017_v29 = vadd.f32 %v7855_v43, %v12315_v58  ;;  %v7858_v3 = vadd.f32 %v7857_v41, %v12579_v47 }
 0x5ba   : > { %8183 = vst.msk [vmem:[%s12603_s20 + $0x48] sm:$0xff] %vm416_vm6, %v8151_v14  ;;  %v8056_v1 = vadd.f32 %v12585_v5, %v8017_v29  ;;  %v8018_v13 = vadd.f32 %v7858_v3, %v12321_v61  ;;  %v8092_v14 = vld [vmem:[%s9618_s9 + $0x70] sm:$0xff] }
 0x5bc   : > { %v7647_v2 = vpop.f32.mrb[4].mxu0  ;;  %v8120_v16 = vadd.f32 %v8088_v15, %v8056_v1  ;;  %v8057_v58 = vadd.f32 %v12585_v5, %v8018_v13  ;;  %v9212_v25 = vpop.f32.mrb[24].mxu1  ;;  %v8093_v15 = vld [vmem:[%s9618_s9 + $0x78] sm:$0xff] }
 0x5bd   : > { %v7648_v0 = vpop.f32.mrb[5].mxu0  ;;  %v7868_v47 = vpop.f32.mrb[25].mxu1 }
 0x5be   : > { %v7649_v42 = vpop.f32.mrb[6].mxu0  ;;  %v8152_v17 = vmax.f32 %v8120_v16, 0.0  ;;  %v8121_v53 = vadd.f32 %v8089_v30, %v8057_v58  ;;  %v7869_v54 = vadd.f32 %v7868_v47, %v12589_v28  ;;  %v9213_v63 = vpop.f32.mrb[26].mxu1 }
 0x5bf   : > { %v7650_v36 = vpop.f32.mrb[7].mxu0  ;;  %v7871_v38 = vpop.f32.mrb[27].mxu1 }
 0x5c0   : > { %8184 = vst.msk [vmem:[%s12603_s20 + $0x50] sm:$0xff] %vm416_vm6, %v8152_v17  ;;  %v8153_v61 = vmax.f32 %v8121_v53, 0.0  ;;  %v8019_v48 = vadd.f32 %v7869_v54, %v12345_v22  ;;  %v7872_v45 = vadd.f32 %v7871_v38, %v12594_v50  ;;  %v8094_v53 = vld [vmem:[%s9618_s9 + $0x80] sm:$0xff]  ;;  %v12852_v38 = vld [vmem:[#allocation10_spill] sm:$0xff] }
 0x5c2   : > { %8185 = vst.msk [vmem:[%s12603_s20 + $0x58] sm:$0xff] %vm416_vm6, %v8153_v61  ;;  %v8058_v40 = vadd.f32 %v12585_v5, %v8019_v48  ;;  %v8020_v49 = vadd.f32 %v7872_v45, %v12351_v46  ;;  %v8095_v48 = vld [vmem:[%s9618_s9 + $0x88] sm:$0xff] }
 0x5c4   : > { %v7653_v56 = vpop.f32.mrb[8].mxu0  ;;  %v8122_v23 = vadd.f32 %v8090_v37, %v8058_v40  ;;  %v8059_v22 = vadd.f32 %v12585_v5, %v8020_v49  ;;  %v9216_v59 = vpop.f32.mrb[28].mxu1 }
 0x5c5   : > { %v7655_v34 = vpop.f32.mrb[9].mxu0  ;;  %v7882_v50 = vpop.f32.mrb[29].mxu1  ;;  %v12853_v59 = vld [vmem:[#allocation8_spill] sm:$0xff] }
 0x5c6   : > { %v7656_v28 = vpop.f32.mrb[10].mxu0  ;;  %v8154_v21 = vmax.f32 %v8122_v23, 0.0  ;;  %v8123_v11 = vadd.f32 %v8091_v7, %v8059_v22  ;;  %v7883_v24 = vadd.f32 %v7882_v50, %v12622_v32  ;;  %v9217_v9 = vpop.f32.mrb[30].mxu1 }
 0x5c7   : > { %v7658_v8 = vpop.f32.mrb[11].mxu0  ;;  %v7885_v62 = vpop.f32.mrb[31].mxu1 }
 0x5c8   : > { %8186 = vst.msk [vmem:[%s12603_s20 + $0x60] sm:$0xff] %vm416_vm6, %v8154_v21  ;;  %v8155_v46 = vmax.f32 %v8123_v11, 0.0  ;;  %v8021_v43 = vadd.f32 %v7883_v24, %v12380_v19  ;;  %v7886_v51 = vadd.f32 %v7885_v62, %v12629_v20  ;;  %v8096_v24 = vld [vmem:[%s9618_s9 + $0x90] sm:$0xff] }
 0x5ca   : > { %8187 = vst.msk [vmem:[%s12603_s20 + $0x68] sm:$0xff] %vm416_vm6, %v8155_v46  ;;  %v8060_v3 = vadd.f32 %v12585_v5, %v8021_v43  ;;  %v8022_v2 = vadd.f32 %v7886_v51, %v12387_v12  ;;  %v12854_v46 = vld [vmem:[#allocation9_spill] sm:$0xff] }
 0x5cc   : > { %v7661_v41 = vpop.f32.mrb[12].mxu0  ;;  %v8124_v1 = vadd.f32 %v8092_v14, %v8060_v3  ;;  %v8061_v19 = vadd.f32 %v12585_v5, %v8022_v2  ;;  %v9220_v13 = vpop.f32.mrb[32].mxu1 }
 0x5cd   : > { %v7662_v29 = vpop.f32.mrb[13].mxu0  ;;  %v7896_v20 = vpop.f32.mrb[33].mxu1 }
 0x5ce   : > { %v7663_v32 = vpop.f32.mrb[14].mxu0  ;;  %v8156_v42 = vmax.f32 %v8124_v1, 0.0  ;;  %v8125_v30 = vadd.f32 %v8093_v15, %v8061_v19  ;;  %v7897_v36 = vadd.f32 %v7896_v20, %v12650_v27  ;;  %v9221_v16 = vpop.f32.mrb[34].mxu1 }
 0x5cf   : > { %v7664_v0 = vpop.f32.mrb[15].mxu0  ;;  %v7899_v58 = vpop.f32.mrb[35].mxu1 }
 0x5d0   : > { %8188 = vst.msk [vmem:[%s12603_s20 + $0x70] sm:$0xff] %vm416_vm6, %v8156_v42  ;;  %v8157_v12 = vmax.f32 %v8125_v30, 0.0  ;;  %v8023_v25 = vadd.f32 %v7897_v36, %v12416_v39  ;;  %v7900_v47 = vadd.f32 %v7899_v58, %v12657_v4  ;;  %v8098_v30 = vld [vmem:[%s9618_s9 + $0xa0] sm:$0xff] }
 0x5d2   : > { %8189 = vst.msk [vmem:[%s12603_s20 + $0x78] sm:$0xff] %vm416_vm6, %v8157_v12  ;;  %v8062_v63 = vadd.f32 %v12585_v5, %v8023_v25  ;;  %v8024_v61 = vadd.f32 %v7900_v47, %v12852_v38  ;;  %v8099_v25 = vld [vmem:[%s9618_s9 + $0xa8] sm:$0xff] }
 0x5d4   : > { %v7667_v17 = vpop.f32.mrb[16].mxu0  ;;  %v8126_v37 = vadd.f32 %v8094_v53, %v8062_v63  ;;  %v8063_v39 = vadd.f32 %v12585_v5, %v8024_v61  ;;  %v9224_v34 = vpop.f32.mrb[36].mxu1 }
 0x5d5   : > { %v7669_v54 = vpop.f32.mrb[17].mxu0  ;;  %v7910_v4 = vpop.f32.mrb[37].mxu1  ;;  %v8100_v34 = vld [vmem:[%s9618_s9 + $0xb0] sm:$0xff] }
 0x5d6   : > { %v7670_v27 = vpop.f32.mrb[18].mxu0  ;;  %v8158_v40 = vmax.f32 %v8126_v37, 0.0  ;;  %v8127_v49 = vadd.f32 %v8095_v48, %v8063_v39  ;;  %v7911_v7 = vadd.f32 %v7910_v4, %v7653_v56  ;;  %v9225_v8 = vpop.f32.mrb[38].mxu1  ;;  %v8097_v56 = vld [vmem:[%s9618_s9 + $0x98] sm:$0xff] }
 0x5d7   : > { %v7672_v45 = vpop.f32.mrb[19].mxu0  ;;  %v7913_v23 = vpop.f32.mrb[39].mxu1  ;;  %v8101_v8 = vld [vmem:[%s9618_s9 + $0xb8] sm:$0xff] }
 0x5d8   : > { %8190 = vst.msk [vmem:[%s12603_s20 + $0x80] sm:$0xff] %vm416_vm6, %v8158_v40  ;;  %v8159_v22 = vmax.f32 %v8127_v49, 0.0  ;;  %v8025_v50 = vadd.f32 %v7911_v7, %v12853_v59  ;;  %v7914_v21 = vadd.f32 %v7913_v23, %v7656_v28 }
 0x5da   : > { %8191 = vst.msk [vmem:[%s12603_s20 + $0x88] sm:$0xff] %vm416_vm6, %v8159_v22  ;;  %v8064_v62 = vadd.f32 %v12585_v5, %v8025_v50  ;;  %v8026_v43 = vadd.f32 %v7914_v21, %v12854_v46 }
 0x5dc   : > { %v7675_v11 = vpop.f32.mrb[20].mxu0  ;;  %v8128_v14 = vadd.f32 %v8096_v24, %v8064_v62  ;;  %v8065_v29 = vadd.f32 %v12585_v5, %v8026_v43  ;;  %v9228_v3 = vpop.f32.mrb[40].mxu1 }
 0x5dd   : > { %v7676_v9 = vpop.f32.mrb[21].mxu0  ;;  %v7924_v28 = vpop.f32.mrb[41].mxu1 }
 0x5de   : > { %v7677_v51 = vpop.f32.mrb[22].mxu0  ;;  %v8160_v2 = vmax.f32 %v8128_v14, 0.0  ;;  %v8129_v32 = vadd.f32 %v8097_v56, %v8065_v29  ;;  %v7925_v15 = vadd.f32 %v7924_v28, %v7667_v17  ;;  %v9229_v0 = vpop.f32.mrb[42].mxu1  ;;  %v8102_v29 = vld [vmem:[%s9618_s9 + $0xc0] sm:$0xff] }
 0x5df   : > { %v7678_v41 = vpop.f32.mrb[23].mxu0  ;;  %v7927_v1 = vpop.f32.mrb[43].mxu1 }
 0x5e0   : > { %8192 = vst.msk [vmem:[%s12603_s20 + $0x90] sm:$0xff] %vm416_vm6, %v8160_v2  ;;  %v8161_v19 = vmax.f32 %v8129_v32, 0.0  ;;  %v8027_v13 = vadd.f32 %v7925_v15, %v12494_v18  ;;  %v7928_v20 = vadd.f32 %v7927_v1, %v7670_v27  ;;  %v8103_v15 = vld [vmem:[%s9618_s9 + $0xc8] sm:$0xff] }
 0x5e2   : > { %8193 = vst.msk [vmem:[%s12603_s20 + $0x98] sm:$0xff] %vm416_vm6, %v8161_v19  ;;  %v8066_v16 = vadd.f32 %v12585_v5, %v8027_v13  ;;  %v8028_v58 = vadd.f32 %v7928_v20, %v12502_v44 }
 0x5e4   : > { %v7681_v42 = vpop.f32.mrb[24].mxu0  ;;  %v8130_v17 = vadd.f32 %v8098_v30, %v8066_v16  ;;  %v8067_v53 = vadd.f32 %v12585_v5, %v8028_v58  ;;  %v9232_v18 = vpop.f32.mrb[44].mxu1 }
 0x5e5   : > { %v7683_v36 = vpop.f32.mrb[25].mxu0  ;;  %v7938_v54 = vpop.f32.mrb[45].mxu1 }
 0x5e6   : > { %v7684_v12 = vpop.f32.mrb[26].mxu0  ;;  %v8162_v63 = vmax.f32 %v8130_v17, 0.0  ;;  %v8131_v38 = vadd.f32 %v8099_v25, %v8067_v53  ;;  %v7939_v61 = vadd.f32 %v7938_v54, %v7681_v42  ;;  %v9233_v27 = vpop.f32.mrb[46].mxu1 }
 0x5e7   : > { %v7686_v47 = vpop.f32.mrb[27].mxu0  ;;  %v7941_v48 = vpop.f32.mrb[47].mxu1  ;;  %v8104_v27 = vld [vmem:[%s9618_s9 + $0xd0] sm:$0xff] }
 0x5e8   : > { %8194 = vst.msk [vmem:[%s12603_s20 + $0xa0] sm:$0xff] %vm416_vm6, %v8162_v63  ;;  %v8163_v45 = vmax.f32 %v8131_v38, 0.0  ;;  %v8029_v44 = vadd.f32 %v7939_v61, %v12516_v10  ;;  %v7942_v37 = vadd.f32 %v7941_v48, %v7684_v12 }
 0x5ea   : > { %8195 = vst.msk [vmem:[%s12603_s20 + $0xa8] sm:$0xff] %vm416_vm6, %v8163_v45  ;;  %v8068_v40 = vadd.f32 %v12585_v5, %v8029_v44  ;;  %v8030_v49 = vadd.f32 %v7942_v37, %v12522_v60 }
 0x5ec   : > { %v7689_v39 = vpop.f32.mrb[28].mxu0  ;;  %v8132_v22 = vadd.f32 %v8100_v34, %v8068_v40  ;;  %v8069_v59 = vadd.f32 %v12585_v5, %v8030_v49  ;;  %v9236_v50 = vpop.f32.mrb[48].mxu1 }
 0x5ed   : > { %v7690_v4 = vpop.f32.mrb[29].mxu0  ;;  %v7952_v10 = vpop.f32.mrb[49].mxu1  ;;  %v8105_v39 = vld [vmem:[%s9618_s9 + $0xd8] sm:$0xff] }
 0x5ee   : > { %v7691_v7 = vpop.f32.mrb[30].mxu0  ;;  %v8164_v21 = vmax.f32 %v8132_v22, 0.0  ;;  %v8133_v11 = vadd.f32 %v8101_v8, %v8069_v59  ;;  %v9237_v24 = vpop.f32.mrb[50].mxu1 }
 0x5ef   : > { %v7692_v23 = vpop.f32.mrb[31].mxu0  ;;  %v7955_v9 = vpop.f32.mrb[51].mxu1 }
 0x5f0   : > { %8196 = vst.msk [vmem:[%s12603_s20 + $0xb0] sm:$0xff] %vm416_vm6, %v8164_v21  ;;  %v8165_v62 = vmax.f32 %v8133_v11, 0.0 }
 0x5f2   : > { %8197 = vst.msk [vmem:[%s12603_s20 + $0xb8] sm:$0xff] %vm416_vm6, %v8165_v62 }
 0x5f4   : > { %v7695_v46 = vpop.f32.mrb[32].mxu0  ;;  %v9240_v3 = vpop.f32.mrb[52].mxu1 }
 0x5f5   : > { %v7953_v60 = vadd.f32 %v7952_v10, %v7695_v46  ;;  %v7697_v43 = vpop.f32.mrb[33].mxu0  ;;  %v7966_v32 = vpop.f32.mrb[53].mxu1  ;;  %v8106_v46 = vld [vmem:[%s9618_s9 + $0xe0] sm:$0xff] }
 0x5f6   : > { %v7698_v51 = vpop.f32.mrb[34].mxu0  ;;  %v9241_v0 = vpop.f32.mrb[54].mxu1 }
 0x5f7   : > { %v8031_v56 = vadd.f32 %v7953_v60, %v12534_v35  ;;  %v7956_v41 = vadd.f32 %v7955_v9, %v7698_v51  ;;  %v7700_v14 = vpop.f32.mrb[35].mxu0  ;;  %v7969_v13 = vpop.f32.mrb[55].mxu1  ;;  %v8107_v51 = vld [vmem:[%s9618_s9 + $0xe8] sm:$0xff] }
 0x5f9   : > { %v8070_v28 = vadd.f32 %v12585_v5, %v8031_v56  ;;  %v8032_v2 = vadd.f32 %v7956_v41, %v12540_v52 }
 0x5fb   : > { %v8134_v1 = vadd.f32 %v8102_v29, %v8070_v28  ;;  %v8071_v19 = vadd.f32 %v12585_v5, %v8032_v2 }
 0x5fc   : > { %v7703_v20 = vpop.f32.mrb[36].mxu0  ;;  %v9244_v12 = vpop.f32.mrb[56].mxu1 }
 0x5fd   : > { %v8166_v42 = vmax.f32 %v8134_v1, 0.0  ;;  %v8135_v35 = vadd.f32 %v8103_v15, %v8071_v19  ;;  %v7704_v30 = vpop.f32.mrb[37].mxu0  ;;  %v7980_v52 = vpop.f32.mrb[57].mxu1 }
 0x5fe   : > { %v7705_v36 = vpop.f32.mrb[38].mxu0  ;;  %v9245_v25 = vpop.f32.mrb[58].mxu1 }
 0x5ff   : > { %8198 = vst.msk [vmem:[%s12603_s20 + $0xc0] sm:$0xff] %vm416_vm6, %v8166_v42  ;;  %v8167_v16 = vmax.f32 %v8135_v35, 0.0  ;;  %v7706_v58 = vpop.f32.mrb[39].mxu0  ;;  %v7983_v47 = vpop.f32.mrb[59].mxu1  ;;  %v8108_v42 = vld [vmem:[%s9618_s9 + $0xf0] sm:$0xff]  ;;  %v8109_v36 = vld [vmem:[%s9618_s9 + $0xf8] sm:$0xff] }
 0x601   : > { %8199 = vst.msk [vmem:[%s12603_s20 + $0xc8] sm:$0xff] %vm416_vm6, %v8167_v16 }
 0x604   : > { %v7709_v17 = vpop.f32.mrb[40].mxu0  ;;  %v9248_v48 = vpop.f32.mrb[60].mxu1 }
 0x605   : > { %v7967_v53 = vadd.f32 %v7966_v32, %v7709_v17  ;;  %v7711_v18 = vpop.f32.mrb[41].mxu0  ;;  %v7994_v37 = vpop.f32.mrb[61].mxu1 }
 0x606   : > { %v7712_v54 = vpop.f32.mrb[42].mxu0  ;;  %v9249_v34 = vpop.f32.mrb[62].mxu1 }
 0x607   : > { %v8033_v63 = vadd.f32 %v7967_v53, %v12547_v57  ;;  %v7970_v38 = vadd.f32 %v7969_v13, %v7712_v54  ;;  %v7714_v61 = vpop.f32.mrb[43].mxu0  ;;  %v7997_v49 = vpop.f32.mrb[63].mxu1 }
 0x609   : > { %v8072_v45 = vadd.f32 %v12585_v5, %v8033_v63  ;;  %v8034_v44 = vadd.f32 %v7970_v38, %v12553_v26 }
 0x60b   : > { %v8136_v4 = vadd.f32 %v8104_v27, %v8072_v45  ;;  %v8073_v40 = vadd.f32 %v12585_v5, %v8034_v44 }
 0x60c   : > { %v7717_v7 = vpop.f32.mrb[44].mxu0 }
 0x60d   : > { %v8168_v57 = vmax.f32 %v8136_v4, 0.0  ;;  %v8137_v8 = vadd.f32 %v8105_v39, %v8073_v40  ;;  %v7718_v23 = vpop.f32.mrb[45].mxu0 }
 0x60e   : > { %v7719_v22 = vpop.f32.mrb[46].mxu0 }
 0x60f   : > { %8200 = vst.msk [vmem:[%s12603_s20 + $0xd0] sm:$0xff] %vm416_vm6, %v8168_v57  ;;  %v8169_v59 = vmax.f32 %v8137_v8, 0.0  ;;  %v7720_v50 = vpop.f32.mrb[47].mxu0 }
 0x611   : > { %8201 = vst.msk [vmem:[%s12603_s20 + $0xd8] sm:$0xff] %vm416_vm6, %v8169_v59 }
 0x614   : > { %v7723_v26 = vpop.f32.mrb[48].mxu0 }
 0x615   : > { %v7981_v10 = vadd.f32 %v7980_v52, %v7723_v26  ;;  %v7725_v21 = vpop.f32.mrb[49].mxu0 }
 0x616   : > { %v7726_v11 = vpop.f32.mrb[50].mxu0 }
 0x617   : > { %v8035_v24 = vadd.f32 %v7981_v10, %v12559_v6  ;;  %v7984_v9 = vadd.f32 %v7983_v47, %v7726_v11  ;;  %v7728_v62 = vpop.f32.mrb[51].mxu0 }
 0x619   : > { %v8074_v60 = vadd.f32 %v12585_v5, %v8035_v24  ;;  %v8036_v43 = vadd.f32 %v7984_v9, %v12565_v33 }
 0x61b   : > { %v8138_v56 = vadd.f32 %v8106_v46, %v8074_v60  ;;  %v8075_v41 = vadd.f32 %v12585_v5, %v8036_v43 }
 0x61c   : > { %v7731_v14 = vpop.f32.mrb[52].mxu0 }
 0x61d   : > { %v8170_v29 = vmax.f32 %v8138_v56, 0.0  ;;  %v8139_v3 = vadd.f32 %v8107_v51, %v8075_v41  ;;  %v7732_v28 = vpop.f32.mrb[53].mxu0 }
 0x61e   : > { %v7733_v2 = vpop.f32.mrb[54].mxu0 }
 0x61f   : > { %8202 = vst.msk [vmem:[%s12603_s20 + $0xe0] sm:$0xff] %vm416_vm6, %v8170_v29  ;;  %v8171_v6 = vmax.f32 %v8139_v3, 0.0  ;;  %v7734_v32 = vpop.f32.mrb[55].mxu0 }
 0x621   : > { %8203 = vst.msk [vmem:[%s12603_s20 + $0xe8] sm:$0xff] %vm416_vm6, %v8171_v6 }
 0x624   : > { %v7737_v15 = vpop.f32.mrb[56].mxu0 }
 0x625   : > { %v7995_v0 = vadd.f32 %v7994_v37, %v7737_v15  ;;  %v7739_v33 = vpop.f32.mrb[57].mxu0 }
 0x626   : > { %v7740_v1 = vpop.f32.mrb[58].mxu0 }
 0x627   : > { %v8037_v19 = vadd.f32 %v7995_v0, %v12571_v55  ;;  %v7998_v13 = vadd.f32 %v7997_v49, %v7740_v1  ;;  %v7742_v20 = vpop.f32.mrb[59].mxu0 }
 0x629   : > { %v8076_v35 = vadd.f32 %v12585_v5, %v8037_v19  ;;  %v8038_v30 = vadd.f32 %v7998_v13, %v12577_v31 }
 0x62b   : > { %v8140_v16 = vadd.f32 %v8108_v42, %v8076_v35  ;;  %v8077_v58 = vadd.f32 %v12585_v5, %v8038_v30 }
 0x62c   : > { %v7745_v12 = vpop.f32.mrb[60].mxu0 }
 0x62d   : > { %v8172_v52 = vmax.f32 %v8140_v16, 0.0  ;;  %v8141_v25 = vadd.f32 %v8109_v36, %v8077_v58  ;;  %v7746_v47 = vpop.f32.mrb[61].mxu0 }
 0x62e   : > { %v7747_v17 = vpop.f32.mrb[62].mxu0 }
 0x62f   : > { %8204 = vst.msk [vmem:[%s12603_s20 + $0xf0] sm:$0xff] %vm416_vm6, %v8172_v52  ;;  %v8173_v55 = vmax.f32 %v8141_v25, 0.0  ;;  %v7748_v53 = vpop.f32.mrb[63].mxu0 }
 0x631   : > { %8205 = vst.msk [vmem:[%s12603_s20 + $0xf8] sm:$0xff] %vm416_vm6, %v8173_v55 }
 0x632 PF: > { %s16_s18 = sadd.s32 1, %s9485_s18  }
 0x633   : > { %p13_p3 = scmp.ge.s32.totalorder %s16_s18, 4  }
 0x635   :  { %15 = sbr.rel (!%p13_p3) target bundleno = 1 (0x1), region = 82 }
 0x63c   :  { %8227 = vsyncpa [#allocation4], 1 }
 0x63d   :  { %8229 = vsyncpa [#allocation4 + $0x1], 1 }

</bundles_post_ra>
